<compile_context>
chip_gen: v6e
topology: v6e:2x2x1
jax: 0.10.0
libtpu: 0.0.40
codegen_flags: <defaults>
</compile_context>

<pallas_src>
import functools

import jax
import jax.numpy as jnp
import numpy as np
from jax.experimental import pallas as pl
from jax.experimental.pallas import tpu as pltpu


# ----------------------------------------------------------------------------
# Fused kernel: 10 x (Linear -> BN(batch stats) -> ReLU)  +  final Linear
# ----------------------------------------------------------------------------
def _fused_net_kernel(*refs, eps, n_hidden):
    """refs = (x, [w, b, gamma, beta] * n_hidden, w_last, b_last, out)."""
    x_ref = refs[0]
    o_ref = refs[-1]
    p = refs[1:-1]

    h = x_ref[...]                                   # f32 (M, K0)
    for i in range(n_hidden):                        # static unroll (traced once)
        w = p[4 * i][...]                            # bf16 (K_pad, N_pad)
        b = p[4 * i + 1][...]                        # f32  (1, N_pad)
        gamma = p[4 * i + 2][...]                    # f32  (1, N_pad)
        beta = p[4 * i + 3][...]                     # f32  (1, N_pad)

        # bf16 operands -> MXU, f32 accumulate.
        z = jnp.dot(h.astype(jnp.bfloat16), w,
                    preferred_element_type=jnp.float32) + b

        # Training-mode BN (biased variance) as a single FMA, all in f32.
        mean = jnp.mean(z, axis=0, keepdims=True)             # (1, N)
        centered = z - mean
        var = jnp.mean(centered * centered, axis=0, keepdims=True)
        scale = gamma * jax.lax.rsqrt(var + eps)
        h = jnp.maximum(centered * scale + beta, 0.0)         # ReLU

    w_last = p[4 * n_hidden][...]                    # bf16 (K_pad, 20)
    b_last = p[4 * n_hidden + 1][...]                # f32  (1, 20)
    o_ref[...] = (
        jnp.dot(h.astype(jnp.bfloat16), w_last, preferred_element_type=jnp.float32)
        + b_last
    )


# ----------------------------------------------------------------------------
# Wrapper
# ----------------------------------------------------------------------------
_VMEM = pl.BlockSpec(memory_space=pltpu.MemorySpace.VMEM)


def net_forward(x, prepped_params, n_columns, eps=1e-5):
    x = x.reshape(-1, n_columns).astype(jnp.float32)          # x.view(-1, unit)
    n_hidden = len(prepped_params) - 1

    flat_inputs = [x]
    for (w, b, gamma, beta) in prepped_params[:-1]:
        flat_inputs += [w, b, gamma, beta]
    w_last, b_last = prepped_params[-1]
    flat_inputs += [w_last, b_last]

    m = x.shape[0]
    n_out = w_last.shape[1]
    return pl.pallas_call(
        functools.partial(_fused_net_kernel, eps=eps, n_hidden=n_hidden),
        out_shape=jax.ShapeDtypeStruct((m, n_out), jnp.float32),
        in_specs=[_VMEM] * len(flat_inputs),
        out_specs=_VMEM,
        compiler_params=pltpu.CompilerParams(
            # ~4.3 MB of bf16 weights + small f32 activations; plenty of headroom.
            vmem_limit_bytes=32 * 1024 * 1024,
        ),
    )(*flat_inputs)


# ----------------------------------------------------------------------------
# Parameter construction (PyTorch-faithful shapes / init) and kernel prep
# ----------------------------------------------------------------------------
def init_params(n_columns, key):
    u = n_columns
    dims = [u, u * 400, u * 200, u * 100, u * 50, u * 25,
            u * 12, u * 6, u * 4, u * 3, u * 2, 20]
    params = []
    for i in range(len(dims) - 1):
        fan_in, fan_out = dims[i], dims[i + 1]
        key, kw, kb = jax.random.split(key, 3)
        bound = 1.0 / np.sqrt(fan_in)               # PyTorch nn.Linear init bound
        w = jax.random.uniform(kw, (fan_in, fan_out), jnp.float32, -bound, bound)
        b = jax.random.uniform(kb, (1, fan_out), jnp.float32, -bound, bound)
        if i < len(dims) - 2:
            gamma = jnp.ones((1, fan_out), jnp.float32)    # BN weight init
            beta = jnp.zeros((1, fan_out), jnp.float32)    # BN bias init
            params.append((w, b, gamma, beta))
        else:
            params.append((w, b))
    return params


def _round_up(n, m):
    return ((n + m - 1) // m) * m


def prep_params(params, lane=128):
    """Zero-pad feature widths to lane multiples; cast weights to bf16.

    Padded output columns get bias = gamma = beta = 0, so they are exactly 0
    after BN + ReLU; padded weight rows are 0, so padded inputs never
    contribute to the next layer.
    """
    prepped = []
    prev_width = params[0][0].shape[0]              # input feature dim (unit)
    for (w, b, gamma, beta) in params[:-1]:
        in_dim, out_dim = w.shape
        out_pad = _round_up(out_dim, lane)
        w_p = jnp.zeros((prev_width, out_pad), jnp.float32)
        w_p = w_p.at[:in_dim, :out_dim].set(w)
        b_p = jnp.zeros((1, out_pad), jnp.float32).at[:, :out_dim].set(b)
        gamma_p = jnp.zeros((1, out_pad), jnp.float32).at[:, :out_dim].set(gamma)
        beta_p = jnp.zeros((1, out_pad), jnp.float32).at[:, :out_dim].set(beta)
        prepped.append((w_p.astype(jnp.bfloat16), b_p, gamma_p, beta_p))
        prev_width = out_pad
    w_last, b_last = params[-1]
    in_dim, out_dim = w_last.shape
    w_p = jnp.zeros((prev_width, out_dim), jnp.float32).at[:in_dim, :].set(w_last)
    prepped.append((w_p.astype(jnp.bfloat16), b_last))
    return prepped


# ----------------------------------------------------------------------------
# Pure-JAX reference (same numerics: bf16 matmul operands, f32 accumulate,
# training-mode BatchNorm with batch statistics), on the unpadded params.
# ----------------------------------------------------------------------------
def net_forward_ref(x, params, n_columns, eps=1e-5):
    x = x.reshape(-1, n_columns).astype(jnp.float32)
    for w, b, gamma, beta in params[:-1]:
        z = jnp.dot(x.astype(jnp.bfloat16), w.astype(jnp.bfloat16),
                    preferred_element_type=jnp.float32) + b
        mean = jnp.mean(z, axis=0, keepdims=True)
        var = jnp.mean((z - mean) ** 2, axis=0, keepdims=True)
        x = jnp.maximum(gamma * (z - mean) * jax.lax.rsqrt(var + eps) + beta, 0.0)
    w, b = params[-1]
    return jnp.dot(x.astype(jnp.bfloat16), w.astype(jnp.bfloat16),
                   preferred_element_type=jnp.float32) + b


# ----------------------------------------------------------------------------
# Main
# ----------------------------------------------------------------------------
if __name__ == "__main__":
    n_columns = 4       # "unit" in the PyTorch module
    batch = 32          # >1 required for batch-stat BatchNorm; multiple of 8 sublanes

    key = jax.random.PRNGKey(0)
    key, kx = jax.random.split(key)
    x = jax.random.normal(kx, (batch, n_columns), jnp.float32)

    params = init_params(n_columns, key)          # PyTorch-faithful f32 params
    prepped = prep_params(params)                 # padded / bf16 kernel params

    out = jax.block_until_ready(net_forward(x, prepped, n_columns))
    ref = jax.block_until_ready(net_forward_ref(x, params, n_columns))

    assert out.shape == (batch, 20), out.shape
    # Both paths use bf16 matmuls; tiny f32 reduce-order differences between
    # Mosaic and XLA can flip an occasional bf16 rounding across 10 layers,
    # hence the modest tolerance.
    np.testing.assert_allclose(np.asarray(out), np.asarray(ref), rtol=5e-3, atol=5e-3)

    print("KERNEL_OK")
</pallas_src>

<mosaic_0001>
module attributes {stable_mosaic.version = 11 : i64} {
  func.func @_fused_net_kernel(%arg0: memref<32x4xf32, #tpu.memory_space<vmem>>, %arg1: memref<4x1664xbf16, #tpu.memory_space<vmem>>, %arg2: memref<1x1664xf32, #tpu.memory_space<vmem>>, %arg3: memref<1x1664xf32, #tpu.memory_space<vmem>>, %arg4: memref<1x1664xf32, #tpu.memory_space<vmem>>, %arg5: memref<1664x896xbf16, #tpu.memory_space<vmem>>, %arg6: memref<1x896xf32, #tpu.memory_space<vmem>>, %arg7: memref<1x896xf32, #tpu.memory_space<vmem>>, %arg8: memref<1x896xf32, #tpu.memory_space<vmem>>, %arg9: memref<896x512xbf16, #tpu.memory_space<vmem>>, %arg10: memref<1x512xf32, #tpu.memory_space<vmem>>, %arg11: memref<1x512xf32, #tpu.memory_space<vmem>>, %arg12: memref<1x512xf32, #tpu.memory_space<vmem>>, %arg13: memref<512x256xbf16, #tpu.memory_space<vmem>>, %arg14: memref<1x256xf32, #tpu.memory_space<vmem>>, %arg15: memref<1x256xf32, #tpu.memory_space<vmem>>, %arg16: memref<1x256xf32, #tpu.memory_space<vmem>>, %arg17: memref<256x128xbf16, #tpu.memory_space<vmem>>, %arg18: memref<1x128xf32, #tpu.memory_space<vmem>>, %arg19: memref<1x128xf32, #tpu.memory_space<vmem>>, %arg20: memref<1x128xf32, #tpu.memory_space<vmem>>, %arg21: memref<128x128xbf16, #tpu.memory_space<vmem>>, %arg22: memref<1x128xf32, #tpu.memory_space<vmem>>, %arg23: memref<1x128xf32, #tpu.memory_space<vmem>>, %arg24: memref<1x128xf32, #tpu.memory_space<vmem>>, %arg25: memref<128x128xbf16, #tpu.memory_space<vmem>>, %arg26: memref<1x128xf32, #tpu.memory_space<vmem>>, %arg27: memref<1x128xf32, #tpu.memory_space<vmem>>, %arg28: memref<1x128xf32, #tpu.memory_space<vmem>>, %arg29: memref<128x128xbf16, #tpu.memory_space<vmem>>, %arg30: memref<1x128xf32, #tpu.memory_space<vmem>>, %arg31: memref<1x128xf32, #tpu.memory_space<vmem>>, %arg32: memref<1x128xf32, #tpu.memory_space<vmem>>, %arg33: memref<128x128xbf16, #tpu.memory_space<vmem>>, %arg34: memref<1x128xf32, #tpu.memory_space<vmem>>, %arg35: memref<1x128xf32, #tpu.memory_space<vmem>>, %arg36: memref<1x128xf32, #tpu.memory_space<vmem>>, %arg37: memref<128x128xbf16, #tpu.memory_space<vmem>>, %arg38: memref<1x128xf32, #tpu.memory_space<vmem>>, %arg39: memref<1x128xf32, #tpu.memory_space<vmem>>, %arg40: memref<1x128xf32, #tpu.memory_space<vmem>>, %arg41: memref<128x20xbf16, #tpu.memory_space<vmem>>, %arg42: memref<1x20xf32, #tpu.memory_space<vmem>>, %arg43: memref<32x20xf32, #tpu.memory_space<vmem>>) attributes {dimension_semantics = [], scalar_prefetch = 0 : i64, scratch_operands = 0 : i64, tpu.core_type = #tpu.core_type<tc>} {
    %c0 = arith.constant 0 : index
    %c0_0 = arith.constant 0 : index
    %0 = vector.load %arg0[%c0, %c0_0] : memref<32x4xf32, #tpu.memory_space<vmem>>, vector<32x4xf32>
    %c0_1 = arith.constant 0 : index
    %c0_2 = arith.constant 0 : index
    %1 = vector.load %arg1[%c0_1, %c0_2] : memref<4x1664xbf16, #tpu.memory_space<vmem>>, vector<4x1664xbf16>
    %c0_3 = arith.constant 0 : index
    %c0_4 = arith.constant 0 : index
    %2 = vector.load %arg2[%c0_3, %c0_4] : memref<1x1664xf32, #tpu.memory_space<vmem>>, vector<1x1664xf32>
    %c0_5 = arith.constant 0 : index
    %c0_6 = arith.constant 0 : index
    %3 = vector.load %arg3[%c0_5, %c0_6] : memref<1x1664xf32, #tpu.memory_space<vmem>>, vector<1x1664xf32>
    %c0_7 = arith.constant 0 : index
    %c0_8 = arith.constant 0 : index
    %4 = vector.load %arg4[%c0_7, %c0_8] : memref<1x1664xf32, #tpu.memory_space<vmem>>, vector<1x1664xf32>
    %5 = arith.truncf %0 : vector<32x4xf32> to vector<32x4xbf16>
    %cst = arith.constant dense<0.000000e+00> : vector<32x1664xf32>
    %6 = tpu.matmul %5, %1, %cst {dimension_numbers = #tpu.dot_dimension_numbers<[1], [0], [0], [1], [0, 0, 1, 1], [], []>} : vector<32x4xbf16>, vector<4x1664xbf16>, vector<32x1664xf32> -> vector<32x1664xf32>
    %7 = vector.broadcast %2 : vector<1x1664xf32> to vector<32x1664xf32>
    %8 = arith.addf %6, %7 : vector<32x1664xf32>
    %cst_9 = arith.constant dense<0.000000e+00> : vector<1664xf32>
    %9 = vector.multi_reduction <add>, %8, %cst_9 [0] : vector<32x1664xf32> to vector<1664xf32>
    %10 = vector.shape_cast %9 : vector<1664xf32> to vector<1x1664xf32>
    %cst_10 = arith.constant 3.200000e+01 : f32
    %11 = vector.broadcast %cst_10 : f32 to vector<1x1664xf32>
    %12 = arith.divf %10, %11 : vector<1x1664xf32>
    %13 = vector.broadcast %12 : vector<1x1664xf32> to vector<32x1664xf32>
    %14 = arith.subf %8, %13 : vector<32x1664xf32>
    %15 = arith.mulf %14, %14 : vector<32x1664xf32>
    %cst_11 = arith.constant dense<0.000000e+00> : vector<1664xf32>
    %16 = vector.multi_reduction <add>, %15, %cst_11 [0] : vector<32x1664xf32> to vector<1664xf32>
    %17 = vector.shape_cast %16 : vector<1664xf32> to vector<1x1664xf32>
    %cst_12 = arith.constant 3.200000e+01 : f32
    %18 = vector.broadcast %cst_12 : f32 to vector<1x1664xf32>
    %19 = arith.divf %17, %18 : vector<1x1664xf32>
    %cst_13 = arith.constant 9.99999974E-6 : f32
    %20 = vector.broadcast %cst_13 : f32 to vector<1x1664xf32>
    %21 = arith.addf %19, %20 : vector<1x1664xf32>
    %22 = math.rsqrt %21 : vector<1x1664xf32>
    %23 = arith.mulf %3, %22 : vector<1x1664xf32>
    %24 = vector.broadcast %23 : vector<1x1664xf32> to vector<32x1664xf32>
    %25 = arith.mulf %14, %24 : vector<32x1664xf32>
    %26 = vector.broadcast %4 : vector<1x1664xf32> to vector<32x1664xf32>
    %27 = arith.addf %25, %26 : vector<32x1664xf32>
    %cst_14 = arith.constant 0.000000e+00 : f32
    %28 = vector.broadcast %cst_14 : f32 to vector<32x1664xf32>
    %29 = arith.maximumf %27, %28 : vector<32x1664xf32>
    %c0_15 = arith.constant 0 : index
    %c0_16 = arith.constant 0 : index
    %30 = vector.load %arg5[%c0_15, %c0_16] : memref<1664x896xbf16, #tpu.memory_space<vmem>>, vector<1664x896xbf16>
    %c0_17 = arith.constant 0 : index
    %c0_18 = arith.constant 0 : index
    %31 = vector.load %arg6[%c0_17, %c0_18] : memref<1x896xf32, #tpu.memory_space<vmem>>, vector<1x896xf32>
    %c0_19 = arith.constant 0 : index
    %c0_20 = arith.constant 0 : index
    %32 = vector.load %arg7[%c0_19, %c0_20] : memref<1x896xf32, #tpu.memory_space<vmem>>, vector<1x896xf32>
    %c0_21 = arith.constant 0 : index
    %c0_22 = arith.constant 0 : index
    %33 = vector.load %arg8[%c0_21, %c0_22] : memref<1x896xf32, #tpu.memory_space<vmem>>, vector<1x896xf32>
    %34 = arith.truncf %29 : vector<32x1664xf32> to vector<32x1664xbf16>
    %cst_23 = arith.constant dense<0.000000e+00> : vector<32x896xf32>
    %35 = tpu.matmul %34, %30, %cst_23 {dimension_numbers = #tpu.dot_dimension_numbers<[1], [0], [0], [1], [0, 0, 1, 1], [], []>} : vector<32x1664xbf16>, vector<1664x896xbf16>, vector<32x896xf32> -> vector<32x896xf32>
    %36 = vector.broadcast %31 : vector<1x896xf32> to vector<32x896xf32>
    %37 = arith.addf %35, %36 : vector<32x896xf32>
    %cst_24 = arith.constant dense<0.000000e+00> : vector<896xf32>
    %38 = vector.multi_reduction <add>, %37, %cst_24 [0] : vector<32x896xf32> to vector<896xf32>
    %39 = vector.shape_cast %38 : vector<896xf32> to vector<1x896xf32>
    %cst_25 = arith.constant 3.200000e+01 : f32
    %40 = vector.broadcast %cst_25 : f32 to vector<1x896xf32>
    %41 = arith.divf %39, %40 : vector<1x896xf32>
    %42 = vector.broadcast %41 : vector<1x896xf32> to vector<32x896xf32>
    %43 = arith.subf %37, %42 : vector<32x896xf32>
    %44 = arith.mulf %43, %43 : vector<32x896xf32>
    %cst_26 = arith.constant dense<0.000000e+00> : vector<896xf32>
    %45 = vector.multi_reduction <add>, %44, %cst_26 [0] : vector<32x896xf32> to vector<896xf32>
    %46 = vector.shape_cast %45 : vector<896xf32> to vector<1x896xf32>
    %cst_27 = arith.constant 3.200000e+01 : f32
    %47 = vector.broadcast %cst_27 : f32 to vector<1x896xf32>
    %48 = arith.divf %46, %47 : vector<1x896xf32>
    %cst_28 = arith.constant 9.99999974E-6 : f32
    %49 = vector.broadcast %cst_28 : f32 to vector<1x896xf32>
    %50 = arith.addf %48, %49 : vector<1x896xf32>
    %51 = math.rsqrt %50 : vector<1x896xf32>
    %52 = arith.mulf %32, %51 : vector<1x896xf32>
    %53 = vector.broadcast %52 : vector<1x896xf32> to vector<32x896xf32>
    %54 = arith.mulf %43, %53 : vector<32x896xf32>
    %55 = vector.broadcast %33 : vector<1x896xf32> to vector<32x896xf32>
    %56 = arith.addf %54, %55 : vector<32x896xf32>
    %cst_29 = arith.constant 0.000000e+00 : f32
    %57 = vector.broadcast %cst_29 : f32 to vector<32x896xf32>
    %58 = arith.maximumf %56, %57 : vector<32x896xf32>
    %c0_30 = arith.constant 0 : index
    %c0_31 = arith.constant 0 : index
    %59 = vector.load %arg9[%c0_30, %c0_31] : memref<896x512xbf16, #tpu.memory_space<vmem>>, vector<896x512xbf16>
    %c0_32 = arith.constant 0 : index
    %c0_33 = arith.constant 0 : index
    %60 = vector.load %arg10[%c0_32, %c0_33] : memref<1x512xf32, #tpu.memory_space<vmem>>, vector<1x512xf32>
    %c0_34 = arith.constant 0 : index
    %c0_35 = arith.constant 0 : index
    %61 = vector.load %arg11[%c0_34, %c0_35] : memref<1x512xf32, #tpu.memory_space<vmem>>, vector<1x512xf32>
    %c0_36 = arith.constant 0 : index
    %c0_37 = arith.constant 0 : index
    %62 = vector.load %arg12[%c0_36, %c0_37] : memref<1x512xf32, #tpu.memory_space<vmem>>, vector<1x512xf32>
    %63 = arith.truncf %58 : vector<32x896xf32> to vector<32x896xbf16>
    %cst_38 = arith.constant dense<0.000000e+00> : vector<32x512xf32>
    %64 = tpu.matmul %63, %59, %cst_38 {dimension_numbers = #tpu.dot_dimension_numbers<[1], [0], [0], [1], [0, 0, 1, 1], [], []>} : vector<32x896xbf16>, vector<896x512xbf16>, vector<32x512xf32> -> vector<32x512xf32>
    %65 = vector.broadcast %60 : vector<1x512xf32> to vector<32x512xf32>
    %66 = arith.addf %64, %65 : vector<32x512xf32>
    %cst_39 = arith.constant dense<0.000000e+00> : vector<512xf32>
    %67 = vector.multi_reduction <add>, %66, %cst_39 [0] : vector<32x512xf32> to vector<512xf32>
    %68 = vector.shape_cast %67 : vector<512xf32> to vector<1x512xf32>
    %cst_40 = arith.constant 3.200000e+01 : f32
    %69 = vector.broadcast %cst_40 : f32 to vector<1x512xf32>
    %70 = arith.divf %68, %69 : vector<1x512xf32>
    %71 = vector.broadcast %70 : vector<1x512xf32> to vector<32x512xf32>
    %72 = arith.subf %66, %71 : vector<32x512xf32>
    %73 = arith.mulf %72, %72 : vector<32x512xf32>
    %cst_41 = arith.constant dense<0.000000e+00> : vector<512xf32>
    %74 = vector.multi_reduction <add>, %73, %cst_41 [0] : vector<32x512xf32> to vector<512xf32>
    %75 = vector.shape_cast %74 : vector<512xf32> to vector<1x512xf32>
    %cst_42 = arith.constant 3.200000e+01 : f32
    %76 = vector.broadcast %cst_42 : f32 to vector<1x512xf32>
    %77 = arith.divf %75, %76 : vector<1x512xf32>
    %cst_43 = arith.constant 9.99999974E-6 : f32
    %78 = vector.broadcast %cst_43 : f32 to vector<1x512xf32>
    %79 = arith.addf %77, %78 : vector<1x512xf32>
    %80 = math.rsqrt %79 : vector<1x512xf32>
    %81 = arith.mulf %61, %80 : vector<1x512xf32>
    %82 = vector.broadcast %81 : vector<1x512xf32> to vector<32x512xf32>
    %83 = arith.mulf %72, %82 : vector<32x512xf32>
    %84 = vector.broadcast %62 : vector<1x512xf32> to vector<32x512xf32>
    %85 = arith.addf %83, %84 : vector<32x512xf32>
    %cst_44 = arith.constant 0.000000e+00 : f32
    %86 = vector.broadcast %cst_44 : f32 to vector<32x512xf32>
    %87 = arith.maximumf %85, %86 : vector<32x512xf32>
    %c0_45 = arith.constant 0 : index
    %c0_46 = arith.constant 0 : index
    %88 = vector.load %arg13[%c0_45, %c0_46] : memref<512x256xbf16, #tpu.memory_space<vmem>>, vector<512x256xbf16>
    %c0_47 = arith.constant 0 : index
    %c0_48 = arith.constant 0 : index
    %89 = vector.load %arg14[%c0_47, %c0_48] : memref<1x256xf32, #tpu.memory_space<vmem>>, vector<1x256xf32>
    %c0_49 = arith.constant 0 : index
    %c0_50 = arith.constant 0 : index
    %90 = vector.load %arg15[%c0_49, %c0_50] : memref<1x256xf32, #tpu.memory_space<vmem>>, vector<1x256xf32>
    %c0_51 = arith.constant 0 : index
    %c0_52 = arith.constant 0 : index
    %91 = vector.load %arg16[%c0_51, %c0_52] : memref<1x256xf32, #tpu.memory_space<vmem>>, vector<1x256xf32>
    %92 = arith.truncf %87 : vector<32x512xf32> to vector<32x512xbf16>
    %cst_53 = arith.constant dense<0.000000e+00> : vector<32x256xf32>
    %93 = tpu.matmul %92, %88, %cst_53 {dimension_numbers = #tpu.dot_dimension_numbers<[1], [0], [0], [1], [0, 0, 1, 1], [], []>} : vector<32x512xbf16>, vector<512x256xbf16>, vector<32x256xf32> -> vector<32x256xf32>
    %94 = vector.broadcast %89 : vector<1x256xf32> to vector<32x256xf32>
    %95 = arith.addf %93, %94 : vector<32x256xf32>
    %cst_54 = arith.constant dense<0.000000e+00> : vector<256xf32>
    %96 = vector.multi_reduction <add>, %95, %cst_54 [0] : vector<32x256xf32> to vector<256xf32>
    %97 = vector.shape_cast %96 : vector<256xf32> to vector<1x256xf32>
    %cst_55 = arith.constant 3.200000e+01 : f32
    %98 = vector.broadcast %cst_55 : f32 to vector<1x256xf32>
    %99 = arith.divf %97, %98 : vector<1x256xf32>
    %100 = vector.broadcast %99 : vector<1x256xf32> to vector<32x256xf32>
    %101 = arith.subf %95, %100 : vector<32x256xf32>
    %102 = arith.mulf %101, %101 : vector<32x256xf32>
    %cst_56 = arith.constant dense<0.000000e+00> : vector<256xf32>
    %103 = vector.multi_reduction <add>, %102, %cst_56 [0] : vector<32x256xf32> to vector<256xf32>
    %104 = vector.shape_cast %103 : vector<256xf32> to vector<1x256xf32>
    %cst_57 = arith.constant 3.200000e+01 : f32
    %105 = vector.broadcast %cst_57 : f32 to vector<1x256xf32>
    %106 = arith.divf %104, %105 : vector<1x256xf32>
    %cst_58 = arith.constant 9.99999974E-6 : f32
    %107 = vector.broadcast %cst_58 : f32 to vector<1x256xf32>
    %108 = arith.addf %106, %107 : vector<1x256xf32>
    %109 = math.rsqrt %108 : vector<1x256xf32>
    %110 = arith.mulf %90, %109 : vector<1x256xf32>
    %111 = vector.broadcast %110 : vector<1x256xf32> to vector<32x256xf32>
    %112 = arith.mulf %101, %111 : vector<32x256xf32>
    %113 = vector.broadcast %91 : vector<1x256xf32> to vector<32x256xf32>
    %114 = arith.addf %112, %113 : vector<32x256xf32>
    %cst_59 = arith.constant 0.000000e+00 : f32
    %115 = vector.broadcast %cst_59 : f32 to vector<32x256xf32>
    %116 = arith.maximumf %114, %115 : vector<32x256xf32>
    %c0_60 = arith.constant 0 : index
    %c0_61 = arith.constant 0 : index
    %117 = vector.load %arg17[%c0_60, %c0_61] : memref<256x128xbf16, #tpu.memory_space<vmem>>, vector<256x128xbf16>
    %c0_62 = arith.constant 0 : index
    %c0_63 = arith.constant 0 : index
    %118 = vector.load %arg18[%c0_62, %c0_63] : memref<1x128xf32, #tpu.memory_space<vmem>>, vector<1x128xf32>
    %c0_64 = arith.constant 0 : index
    %c0_65 = arith.constant 0 : index
    %119 = vector.load %arg19[%c0_64, %c0_65] : memref<1x128xf32, #tpu.memory_space<vmem>>, vector<1x128xf32>
    %c0_66 = arith.constant 0 : index
    %c0_67 = arith.constant 0 : index
    %120 = vector.load %arg20[%c0_66, %c0_67] : memref<1x128xf32, #tpu.memory_space<vmem>>, vector<1x128xf32>
    %121 = arith.truncf %116 : vector<32x256xf32> to vector<32x256xbf16>
    %cst_68 = arith.constant dense<0.000000e+00> : vector<32x128xf32>
    %122 = tpu.matmul %121, %117, %cst_68 {dimension_numbers = #tpu.dot_dimension_numbers<[1], [0], [0], [1], [0, 0, 1, 1], [], []>} : vector<32x256xbf16>, vector<256x128xbf16>, vector<32x128xf32> -> vector<32x128xf32>
    %123 = vector.broadcast %118 : vector<1x128xf32> to vector<32x128xf32>
    %124 = arith.addf %122, %123 : vector<32x128xf32>
    %cst_69 = arith.constant dense<0.000000e+00> : vector<128xf32>
    %125 = vector.multi_reduction <add>, %124, %cst_69 [0] : vector<32x128xf32> to vector<128xf32>
    %126 = vector.shape_cast %125 : vector<128xf32> to vector<1x128xf32>
    %cst_70 = arith.constant 3.200000e+01 : f32
    %127 = vector.broadcast %cst_70 : f32 to vector<1x128xf32>
    %128 = arith.divf %126, %127 : vector<1x128xf32>
    %129 = vector.broadcast %128 : vector<1x128xf32> to vector<32x128xf32>
    %130 = arith.subf %124, %129 : vector<32x128xf32>
    %131 = arith.mulf %130, %130 : vector<32x128xf32>
    %cst_71 = arith.constant dense<0.000000e+00> : vector<128xf32>
    %132 = vector.multi_reduction <add>, %131, %cst_71 [0] : vector<32x128xf32> to vector<128xf32>
    %133 = vector.shape_cast %132 : vector<128xf32> to vector<1x128xf32>
    %cst_72 = arith.constant 3.200000e+01 : f32
    %134 = vector.broadcast %cst_72 : f32 to vector<1x128xf32>
    %135 = arith.divf %133, %134 : vector<1x128xf32>
    %cst_73 = arith.constant 9.99999974E-6 : f32
    %136 = vector.broadcast %cst_73 : f32 to vector<1x128xf32>
    %137 = arith.addf %135, %136 : vector<1x128xf32>
    %138 = math.rsqrt %137 : vector<1x128xf32>
    %139 = arith.mulf %119, %138 : vector<1x128xf32>
    %140 = vector.broadcast %139 : vector<1x128xf32> to vector<32x128xf32>
    %141 = arith.mulf %130, %140 : vector<32x128xf32>
    %142 = vector.broadcast %120 : vector<1x128xf32> to vector<32x128xf32>
    %143 = arith.addf %141, %142 : vector<32x128xf32>
    %cst_74 = arith.constant 0.000000e+00 : f32
    %144 = vector.broadcast %cst_74 : f32 to vector<32x128xf32>
    %145 = arith.maximumf %143, %144 : vector<32x128xf32>
    %c0_75 = arith.constant 0 : index
    %c0_76 = arith.constant 0 : index
    %146 = vector.load %arg21[%c0_75, %c0_76] : memref<128x128xbf16, #tpu.memory_space<vmem>>, vector<128x128xbf16>
    %c0_77 = arith.constant 0 : index
    %c0_78 = arith.constant 0 : index
    %147 = vector.load %arg22[%c0_77, %c0_78] : memref<1x128xf32, #tpu.memory_space<vmem>>, vector<1x128xf32>
    %c0_79 = arith.constant 0 : index
    %c0_80 = arith.constant 0 : index
    %148 = vector.load %arg23[%c0_79, %c0_80] : memref<1x128xf32, #tpu.memory_space<vmem>>, vector<1x128xf32>
    %c0_81 = arith.constant 0 : index
    %c0_82 = arith.constant 0 : index
    %149 = vector.load %arg24[%c0_81, %c0_82] : memref<1x128xf32, #tpu.memory_space<vmem>>, vector<1x128xf32>
    %150 = arith.truncf %145 : vector<32x128xf32> to vector<32x128xbf16>
    %cst_83 = arith.constant dense<0.000000e+00> : vector<32x128xf32>
    %151 = tpu.matmul %150, %146, %cst_83 {dimension_numbers = #tpu.dot_dimension_numbers<[1], [0], [0], [1], [0, 0, 1, 1], [], []>} : vector<32x128xbf16>, vector<128x128xbf16>, vector<32x128xf32> -> vector<32x128xf32>
    %152 = vector.broadcast %147 : vector<1x128xf32> to vector<32x128xf32>
    %153 = arith.addf %151, %152 : vector<32x128xf32>
    %cst_84 = arith.constant dense<0.000000e+00> : vector<128xf32>
    %154 = vector.multi_reduction <add>, %153, %cst_84 [0] : vector<32x128xf32> to vector<128xf32>
    %155 = vector.shape_cast %154 : vector<128xf32> to vector<1x128xf32>
    %cst_85 = arith.constant 3.200000e+01 : f32
    %156 = vector.broadcast %cst_85 : f32 to vector<1x128xf32>
    %157 = arith.divf %155, %156 : vector<1x128xf32>
    %158 = vector.broadcast %157 : vector<1x128xf32> to vector<32x128xf32>
    %159 = arith.subf %153, %158 : vector<32x128xf32>
    %160 = arith.mulf %159, %159 : vector<32x128xf32>
    %cst_86 = arith.constant dense<0.000000e+00> : vector<128xf32>
    %161 = vector.multi_reduction <add>, %160, %cst_86 [0] : vector<32x128xf32> to vector<128xf32>
    %162 = vector.shape_cast %161 : vector<128xf32> to vector<1x128xf32>
    %cst_87 = arith.constant 3.200000e+01 : f32
    %163 = vector.broadcast %cst_87 : f32 to vector<1x128xf32>
    %164 = arith.divf %162, %163 : vector<1x128xf32>
    %cst_88 = arith.constant 9.99999974E-6 : f32
    %165 = vector.broadcast %cst_88 : f32 to vector<1x128xf32>
    %166 = arith.addf %164, %165 : vector<1x128xf32>
    %167 = math.rsqrt %166 : vector<1x128xf32>
    %168 = arith.mulf %148, %167 : vector<1x128xf32>
    %169 = vector.broadcast %168 : vector<1x128xf32> to vector<32x128xf32>
    %170 = arith.mulf %159, %169 : vector<32x128xf32>
    %171 = vector.broadcast %149 : vector<1x128xf32> to vector<32x128xf32>
    %172 = arith.addf %170, %171 : vector<32x128xf32>
    %cst_89 = arith.constant 0.000000e+00 : f32
    %173 = vector.broadcast %cst_89 : f32 to vector<32x128xf32>
    %174 = arith.maximumf %172, %173 : vector<32x128xf32>
    %c0_90 = arith.constant 0 : index
    %c0_91 = arith.constant 0 : index
    %175 = vector.load %arg25[%c0_90, %c0_91] : memref<128x128xbf16, #tpu.memory_space<vmem>>, vector<128x128xbf16>
    %c0_92 = arith.constant 0 : index
    %c0_93 = arith.constant 0 : index
    %176 = vector.load %arg26[%c0_92, %c0_93] : memref<1x128xf32, #tpu.memory_space<vmem>>, vector<1x128xf32>
    %c0_94 = arith.constant 0 : index
    %c0_95 = arith.constant 0 : index
    %177 = vector.load %arg27[%c0_94, %c0_95] : memref<1x128xf32, #tpu.memory_space<vmem>>, vector<1x128xf32>
    %c0_96 = arith.constant 0 : index
    %c0_97 = arith.constant 0 : index
    %178 = vector.load %arg28[%c0_96, %c0_97] : memref<1x128xf32, #tpu.memory_space<vmem>>, vector<1x128xf32>
    %179 = arith.truncf %174 : vector<32x128xf32> to vector<32x128xbf16>
    %cst_98 = arith.constant dense<0.000000e+00> : vector<32x128xf32>
    %180 = tpu.matmul %179, %175, %cst_98 {dimension_numbers = #tpu.dot_dimension_numbers<[1], [0], [0], [1], [0, 0, 1, 1], [], []>} : vector<32x128xbf16>, vector<128x128xbf16>, vector<32x128xf32> -> vector<32x128xf32>
    %181 = vector.broadcast %176 : vector<1x128xf32> to vector<32x128xf32>
    %182 = arith.addf %180, %181 : vector<32x128xf32>
    %cst_99 = arith.constant dense<0.000000e+00> : vector<128xf32>
    %183 = vector.multi_reduction <add>, %182, %cst_99 [0] : vector<32x128xf32> to vector<128xf32>
    %184 = vector.shape_cast %183 : vector<128xf32> to vector<1x128xf32>
    %cst_100 = arith.constant 3.200000e+01 : f32
    %185 = vector.broadcast %cst_100 : f32 to vector<1x128xf32>
    %186 = arith.divf %184, %185 : vector<1x128xf32>
    %187 = vector.broadcast %186 : vector<1x128xf32> to vector<32x128xf32>
    %188 = arith.subf %182, %187 : vector<32x128xf32>
    %189 = arith.mulf %188, %188 : vector<32x128xf32>
    %cst_101 = arith.constant dense<0.000000e+00> : vector<128xf32>
    %190 = vector.multi_reduction <add>, %189, %cst_101 [0] : vector<32x128xf32> to vector<128xf32>
    %191 = vector.shape_cast %190 : vector<128xf32> to vector<1x128xf32>
    %cst_102 = arith.constant 3.200000e+01 : f32
    %192 = vector.broadcast %cst_102 : f32 to vector<1x128xf32>
    %193 = arith.divf %191, %192 : vector<1x128xf32>
    %cst_103 = arith.constant 9.99999974E-6 : f32
    %194 = vector.broadcast %cst_103 : f32 to vector<1x128xf32>
    %195 = arith.addf %193, %194 : vector<1x128xf32>
    %196 = math.rsqrt %195 : vector<1x128xf32>
    %197 = arith.mulf %177, %196 : vector<1x128xf32>
    %198 = vector.broadcast %197 : vector<1x128xf32> to vector<32x128xf32>
    %199 = arith.mulf %188, %198 : vector<32x128xf32>
    %200 = vector.broadcast %178 : vector<1x128xf32> to vector<32x128xf32>
    %201 = arith.addf %199, %200 : vector<32x128xf32>
    %cst_104 = arith.constant 0.000000e+00 : f32
    %202 = vector.broadcast %cst_104 : f32 to vector<32x128xf32>
    %203 = arith.maximumf %201, %202 : vector<32x128xf32>
    %c0_105 = arith.constant 0 : index
    %c0_106 = arith.constant 0 : index
    %204 = vector.load %arg29[%c0_105, %c0_106] : memref<128x128xbf16, #tpu.memory_space<vmem>>, vector<128x128xbf16>
    %c0_107 = arith.constant 0 : index
    %c0_108 = arith.constant 0 : index
    %205 = vector.load %arg30[%c0_107, %c0_108] : memref<1x128xf32, #tpu.memory_space<vmem>>, vector<1x128xf32>
    %c0_109 = arith.constant 0 : index
    %c0_110 = arith.constant 0 : index
    %206 = vector.load %arg31[%c0_109, %c0_110] : memref<1x128xf32, #tpu.memory_space<vmem>>, vector<1x128xf32>
    %c0_111 = arith.constant 0 : index
    %c0_112 = arith.constant 0 : index
    %207 = vector.load %arg32[%c0_111, %c0_112] : memref<1x128xf32, #tpu.memory_space<vmem>>, vector<1x128xf32>
    %208 = arith.truncf %203 : vector<32x128xf32> to vector<32x128xbf16>
    %cst_113 = arith.constant dense<0.000000e+00> : vector<32x128xf32>
    %209 = tpu.matmul %208, %204, %cst_113 {dimension_numbers = #tpu.dot_dimension_numbers<[1], [0], [0], [1], [0, 0, 1, 1], [], []>} : vector<32x128xbf16>, vector<128x128xbf16>, vector<32x128xf32> -> vector<32x128xf32>
    %210 = vector.broadcast %205 : vector<1x128xf32> to vector<32x128xf32>
    %211 = arith.addf %209, %210 : vector<32x128xf32>
    %cst_114 = arith.constant dense<0.000000e+00> : vector<128xf32>
    %212 = vector.multi_reduction <add>, %211, %cst_114 [0] : vector<32x128xf32> to vector<128xf32>
    %213 = vector.shape_cast %212 : vector<128xf32> to vector<1x128xf32>
    %cst_115 = arith.constant 3.200000e+01 : f32
    %214 = vector.broadcast %cst_115 : f32 to vector<1x128xf32>
    %215 = arith.divf %213, %214 : vector<1x128xf32>
    %216 = vector.broadcast %215 : vector<1x128xf32> to vector<32x128xf32>
    %217 = arith.subf %211, %216 : vector<32x128xf32>
    %218 = arith.mulf %217, %217 : vector<32x128xf32>
    %cst_116 = arith.constant dense<0.000000e+00> : vector<128xf32>
    %219 = vector.multi_reduction <add>, %218, %cst_116 [0] : vector<32x128xf32> to vector<128xf32>
    %220 = vector.shape_cast %219 : vector<128xf32> to vector<1x128xf32>
    %cst_117 = arith.constant 3.200000e+01 : f32
    %221 = vector.broadcast %cst_117 : f32 to vector<1x128xf32>
    %222 = arith.divf %220, %221 : vector<1x128xf32>
    %cst_118 = arith.constant 9.99999974E-6 : f32
    %223 = vector.broadcast %cst_118 : f32 to vector<1x128xf32>
    %224 = arith.addf %222, %223 : vector<1x128xf32>
    %225 = math.rsqrt %224 : vector<1x128xf32>
    %226 = arith.mulf %206, %225 : vector<1x128xf32>
    %227 = vector.broadcast %226 : vector<1x128xf32> to vector<32x128xf32>
    %228 = arith.mulf %217, %227 : vector<32x128xf32>
    %229 = vector.broadcast %207 : vector<1x128xf32> to vector<32x128xf32>
    %230 = arith.addf %228, %229 : vector<32x128xf32>
    %cst_119 = arith.constant 0.000000e+00 : f32
    %231 = vector.broadcast %cst_119 : f32 to vector<32x128xf32>
    %232 = arith.maximumf %230, %231 : vector<32x128xf32>
    %c0_120 = arith.constant 0 : index
    %c0_121 = arith.constant 0 : index
    %233 = vector.load %arg33[%c0_120, %c0_121] : memref<128x128xbf16, #tpu.memory_space<vmem>>, vector<128x128xbf16>
    %c0_122 = arith.constant 0 : index
    %c0_123 = arith.constant 0 : index
    %234 = vector.load %arg34[%c0_122, %c0_123] : memref<1x128xf32, #tpu.memory_space<vmem>>, vector<1x128xf32>
    %c0_124 = arith.constant 0 : index
    %c0_125 = arith.constant 0 : index
    %235 = vector.load %arg35[%c0_124, %c0_125] : memref<1x128xf32, #tpu.memory_space<vmem>>, vector<1x128xf32>
    %c0_126 = arith.constant 0 : index
    %c0_127 = arith.constant 0 : index
    %236 = vector.load %arg36[%c0_126, %c0_127] : memref<1x128xf32, #tpu.memory_space<vmem>>, vector<1x128xf32>
    %237 = arith.truncf %232 : vector<32x128xf32> to vector<32x128xbf16>
    %cst_128 = arith.constant dense<0.000000e+00> : vector<32x128xf32>
    %238 = tpu.matmul %237, %233, %cst_128 {dimension_numbers = #tpu.dot_dimension_numbers<[1], [0], [0], [1], [0, 0, 1, 1], [], []>} : vector<32x128xbf16>, vector<128x128xbf16>, vector<32x128xf32> -> vector<32x128xf32>
    %239 = vector.broadcast %234 : vector<1x128xf32> to vector<32x128xf32>
    %240 = arith.addf %238, %239 : vector<32x128xf32>
    %cst_129 = arith.constant dense<0.000000e+00> : vector<128xf32>
    %241 = vector.multi_reduction <add>, %240, %cst_129 [0] : vector<32x128xf32> to vector<128xf32>
    %242 = vector.shape_cast %241 : vector<128xf32> to vector<1x128xf32>
    %cst_130 = arith.constant 3.200000e+01 : f32
    %243 = vector.broadcast %cst_130 : f32 to vector<1x128xf32>
    %244 = arith.divf %242, %243 : vector<1x128xf32>
    %245 = vector.broadcast %244 : vector<1x128xf32> to vector<32x128xf32>
    %246 = arith.subf %240, %245 : vector<32x128xf32>
    %247 = arith.mulf %246, %246 : vector<32x128xf32>
    %cst_131 = arith.constant dense<0.000000e+00> : vector<128xf32>
    %248 = vector.multi_reduction <add>, %247, %cst_131 [0] : vector<32x128xf32> to vector<128xf32>
    %249 = vector.shape_cast %248 : vector<128xf32> to vector<1x128xf32>
    %cst_132 = arith.constant 3.200000e+01 : f32
    %250 = vector.broadcast %cst_132 : f32 to vector<1x128xf32>
    %251 = arith.divf %249, %250 : vector<1x128xf32>
    %cst_133 = arith.constant 9.99999974E-6 : f32
    %252 = vector.broadcast %cst_133 : f32 to vector<1x128xf32>
    %253 = arith.addf %251, %252 : vector<1x128xf32>
    %254 = math.rsqrt %253 : vector<1x128xf32>
    %255 = arith.mulf %235, %254 : vector<1x128xf32>
    %256 = vector.broadcast %255 : vector<1x128xf32> to vector<32x128xf32>
    %257 = arith.mulf %246, %256 : vector<32x128xf32>
    %258 = vector.broadcast %236 : vector<1x128xf32> to vector<32x128xf32>
    %259 = arith.addf %257, %258 : vector<32x128xf32>
    %cst_134 = arith.constant 0.000000e+00 : f32
    %260 = vector.broadcast %cst_134 : f32 to vector<32x128xf32>
    %261 = arith.maximumf %259, %260 : vector<32x128xf32>
    %c0_135 = arith.constant 0 : index
    %c0_136 = arith.constant 0 : index
    %262 = vector.load %arg37[%c0_135, %c0_136] : memref<128x128xbf16, #tpu.memory_space<vmem>>, vector<128x128xbf16>
    %c0_137 = arith.constant 0 : index
    %c0_138 = arith.constant 0 : index
    %263 = vector.load %arg38[%c0_137, %c0_138] : memref<1x128xf32, #tpu.memory_space<vmem>>, vector<1x128xf32>
    %c0_139 = arith.constant 0 : index
    %c0_140 = arith.constant 0 : index
    %264 = vector.load %arg39[%c0_139, %c0_140] : memref<1x128xf32, #tpu.memory_space<vmem>>, vector<1x128xf32>
    %c0_141 = arith.constant 0 : index
    %c0_142 = arith.constant 0 : index
    %265 = vector.load %arg40[%c0_141, %c0_142] : memref<1x128xf32, #tpu.memory_space<vmem>>, vector<1x128xf32>
    %266 = arith.truncf %261 : vector<32x128xf32> to vector<32x128xbf16>
    %cst_143 = arith.constant dense<0.000000e+00> : vector<32x128xf32>
    %267 = tpu.matmul %266, %262, %cst_143 {dimension_numbers = #tpu.dot_dimension_numbers<[1], [0], [0], [1], [0, 0, 1, 1], [], []>} : vector<32x128xbf16>, vector<128x128xbf16>, vector<32x128xf32> -> vector<32x128xf32>
    %268 = vector.broadcast %263 : vector<1x128xf32> to vector<32x128xf32>
    %269 = arith.addf %267, %268 : vector<32x128xf32>
    %cst_144 = arith.constant dense<0.000000e+00> : vector<128xf32>
    %270 = vector.multi_reduction <add>, %269, %cst_144 [0] : vector<32x128xf32> to vector<128xf32>
    %271 = vector.shape_cast %270 : vector<128xf32> to vector<1x128xf32>
    %cst_145 = arith.constant 3.200000e+01 : f32
    %272 = vector.broadcast %cst_145 : f32 to vector<1x128xf32>
    %273 = arith.divf %271, %272 : vector<1x128xf32>
    %274 = vector.broadcast %273 : vector<1x128xf32> to vector<32x128xf32>
    %275 = arith.subf %269, %274 : vector<32x128xf32>
    %276 = arith.mulf %275, %275 : vector<32x128xf32>
    %cst_146 = arith.constant dense<0.000000e+00> : vector<128xf32>
    %277 = vector.multi_reduction <add>, %276, %cst_146 [0] : vector<32x128xf32> to vector<128xf32>
    %278 = vector.shape_cast %277 : vector<128xf32> to vector<1x128xf32>
    %cst_147 = arith.constant 3.200000e+01 : f32
    %279 = vector.broadcast %cst_147 : f32 to vector<1x128xf32>
    %280 = arith.divf %278, %279 : vector<1x128xf32>
    %cst_148 = arith.constant 9.99999974E-6 : f32
    %281 = vector.broadcast %cst_148 : f32 to vector<1x128xf32>
    %282 = arith.addf %280, %281 : vector<1x128xf32>
    %283 = math.rsqrt %282 : vector<1x128xf32>
    %284 = arith.mulf %264, %283 : vector<1x128xf32>
    %285 = vector.broadcast %284 : vector<1x128xf32> to vector<32x128xf32>
    %286 = arith.mulf %275, %285 : vector<32x128xf32>
    %287 = vector.broadcast %265 : vector<1x128xf32> to vector<32x128xf32>
    %288 = arith.addf %286, %287 : vector<32x128xf32>
    %cst_149 = arith.constant 0.000000e+00 : f32
    %289 = vector.broadcast %cst_149 : f32 to vector<32x128xf32>
    %290 = arith.maximumf %288, %289 : vector<32x128xf32>
    %c0_150 = arith.constant 0 : index
    %c0_151 = arith.constant 0 : index
    %291 = vector.load %arg41[%c0_150, %c0_151] : memref<128x20xbf16, #tpu.memory_space<vmem>>, vector<128x20xbf16>
    %c0_152 = arith.constant 0 : index
    %c0_153 = arith.constant 0 : index
    %292 = vector.load %arg42[%c0_152, %c0_153] : memref<1x20xf32, #tpu.memory_space<vmem>>, vector<1x20xf32>
    %293 = arith.truncf %290 : vector<32x128xf32> to vector<32x128xbf16>
    %cst_154 = arith.constant dense<0.000000e+00> : vector<32x20xf32>
    %294 = tpu.matmul %293, %291, %cst_154 {dimension_numbers = #tpu.dot_dimension_numbers<[1], [0], [0], [1], [0, 0, 1, 1], [], []>} : vector<32x128xbf16>, vector<128x20xbf16>, vector<32x20xf32> -> vector<32x20xf32>
    %295 = vector.broadcast %292 : vector<1x20xf32> to vector<32x20xf32>
    %296 = arith.addf %294, %295 : vector<32x20xf32>
    %c0_155 = arith.constant 0 : index
    %c0_156 = arith.constant 0 : index
    %297 = vector.load %arg43[%c0_155, %c0_156] : memref<32x20xf32, #tpu.memory_space<vmem>>, vector<32x20xf32>
    tpu.vector_store %arg43[%c0_155, %c0_156], %296 {strides = array<i32>} : memref<32x20xf32, #tpu.memory_space<vmem>>, vector<32x20xf32>,
    return
  }
}

</mosaic_0001>

<bundles_post_ra>
// kernel: tpu_custom_call.1
= control target key start
LH: loop header
LB: loop body
LE: loop exit
PB: predicated region body
PF: predicated region fallthrough
CT: control target
= control target key end

     0   :  { %s16646_s6 = smov 1   ;;  %s16647_s10 = smov 2   ;;  %s18960_s0 = inlined_call_operand.smem [shape: u32[44], index: -1, kind: input, shape index: {}] }
   0x1   :  { %s16749_s5 = sld [smem:[%s18960_s0]]   ;;  %s16648_s14 = smov 3  }
   0x2   :  { %s16754_s9 = sld [smem:[%s18960_s0 + %s16646_s6]]   ;;  %s16649_s18 = smov 4  }
   0x3   :  { %s16759_s13 = sld [smem:[%s18960_s0 + %s16647_s10]]   ;;  %s16650_s22 = smov 5  }
   0x4   :  { %s16764_s17 = sld [smem:[%s18960_s0 + %s16648_s14]]   ;;  %s16651_s26 = smov 6  }
   0x5   :  { %s16769_s21 = sld [smem:[%s18960_s0 + %s16649_s18]]   ;;  %s16652_s30 = smov 7  }
   0x6   :  { %s16774_s25 = sld [smem:[%s18960_s0 + %s16650_s22]]   ;;  %s16653_s4 = smov 8  }
   0x7   :  { %19030 = sst [smem:[#allocation85_spill]] %s16749_s5  ;;  %s16654_s10 = smov 9  }
   0x8   :  { %19031 = sst [smem:[#allocation86_spill]] %s16754_s9  ;;  %s16655_s15 = smov 10  }
   0x9   :  { %s16779_s29 = sld [smem:[%s18960_s0 + %s16651_s26]]   ;;  %s16656_s20 = smov 11  }
   0xa   :  { %19032 = sst [smem:[#allocation87_spill]] %s16764_s17  ;;  %s16657_s26 = smov 12  }
   0xb   :  { %s16784_s3 = sld [smem:[%s18960_s0 + %s16652_s30]]   ;;  %s16658_s1 = smov 13  }
   0xc   :  { %19033 = sst [smem:[#allocation88_spill]] %s16774_s25  ;;  %s16659_s7 = smov 14  }
   0xd   :  { %s16789_s8 = sld [smem:[%s18960_s0 + %s16653_s4]]   ;;  %s16661_s22 = smov 16  }
   0xe   :  { %s16794_s14 = sld [smem:[%s18960_s0 + %s16654_s10]]   ;;  %s16662_s28 = smov 17  }
   0xf   :  { %s16799_s19 = sld [smem:[%s18960_s0 + %s16655_s15]]   ;;  %s16660_s15 = smov 15  }
  0x10   :  { %s16804_s24 = sld [smem:[%s18960_s0 + %s16656_s20]]  }
  0x11   :  { %19034 = sst [smem:[#allocation89_spill]] %s16784_s3 }
  0x12   :  { %s16809_s30 = sld [smem:[%s18960_s0 + %s16657_s26]]  }
  0x13   :  { %s16814_s6 = sld [smem:[%s18960_s0 + %s16658_s1]]  }
  0x14   :  { %19035 = sst [smem:[#allocation90_spill]] %s16794_s14 }
  0x15   :  { %s16819_s12 = sld [smem:[%s18960_s0 + %s16659_s7]]   ;;  %s16663_s7 = smov 18  }
  0x16   :  { %19036 = sst [smem:[#allocation91_spill]] %s16804_s24 }
  0x17   :  { %s16824_s20 = sld [smem:[%s18960_s0 + %s16660_s15]]   ;;  %s16664_s15 = smov 19  }
  0x18   :  { %s16829_s27 = sld [smem:[%s18960_s0 + %s16661_s22]]   ;;  %s16665_s22 = smov 20  }
  0x19   :  { %19037 = sst [smem:[#allocation92_spill]] %s16814_s6 }
  0x1a   :  { %s16834_s4 = sld [smem:[%s18960_s0 + %s16662_s28]]   ;;  %s16666_s28 = smov 21  }
  0x1b   :  { %s16839_s5 = sld [smem:[%s18960_s0 + %s16663_s7]]   ;;  %s16667_s7 = smov 22  }
  0x1c   :  { %s16849_s6 = sld [smem:[%s18960_s0 + %s16665_s22]]   ;;  %s16669_s22 = smov 24  }
  0x1d   :  { %19038 = sst [smem:[#allocation93_spill]] %s16824_s20 }
  0x1e   :  { %s16844_s20 = sld [smem:[%s18960_s0 + %s16664_s15]]   ;;  %s16668_s15 = smov 23  }
  0x1f   :  { %s16859_s24 = sld [smem:[%s18960_s0 + %s16667_s7]]   ;;  %s16671_s7 = smov 26  }
  0x20   :  { %19039 = sst [smem:[#allocation94_spill]] %s16834_s4 }
  0x21   :  { %s16854_s4 = sld [smem:[%s18960_s0 + %s16666_s28]]   ;;  %s16670_s28 = smov 25  }
  0x22   :  { %s16869_s14 = sld [smem:[%s18960_s0 + %s16669_s22]]   ;;  %s16673_s22 = smov 28  }
  0x23   :  { %s16879_s3 = sld [smem:[%s18960_s0 + %s16671_s7]]   ;;  %s16675_s7 = smov 30  }
  0x24   :  { %19040 = sst [smem:[#allocation95_spill]] %s16844_s20 }
  0x25   :  { %s16864_s20 = sld [smem:[%s18960_s0 + %s16668_s15]]   ;;  %s16672_s15 = smov 27  }
  0x26   :  { %s16889_s25 = sld [smem:[%s18960_s0 + %s16673_s22]]   ;;  %s16677_s22 = smov 32  }
  0x27   :  { %19041 = sst [smem:[#allocation96_spill]] %s16854_s4 }
  0x28   :  { %s16874_s4 = sld [smem:[%s18960_s0 + %s16670_s28]]   ;;  %s16674_s28 = smov 29  }
  0x29   :  { %s16899_s17 = sld [smem:[%s18960_s0 + %s16675_s7]]   ;;  %s16679_s7 = smov 34  }
  0x2a   :  { %s16909_s9 = sld [smem:[%s18960_s0 + %s16677_s22]]   ;;  %s16681_s22 = smov 36  }
  0x2b   :  { %19042 = sst [smem:[#allocation97_spill]] %s16864_s20 }
  0x2c   :  { %s16884_s20 = sld [smem:[%s18960_s0 + %s16672_s15]]   ;;  %s16676_s15 = smov 31  }
  0x2e   :  { %19043 = sst [smem:[#allocation98_spill]] %s16874_s4 }
  0x2f   :  { %s16894_s4 = sld [smem:[%s18960_s0 + %s16674_s28]]   ;;  %s16678_s28 = smov 33  }
  0x30   :  { %19046 = sst [smem:[#allocation101_spill]] %s16899_s17 }
  0x31   :  { %19048 = sst [smem:[#allocation103_spill]] %s16909_s9 }
  0x32   :  { %19044 = sst [smem:[#allocation99_spill]] %s16884_s20 }
  0x33   :  { %s16904_s20 = sld [smem:[%s18960_s0 + %s16676_s15]]   ;;  %s16680_s15 = smov 35  }
  0x34   :  { %s16919_s17 = sld [smem:[%s18960_s0 + %s16679_s7]]   ;;  %s16683_s7 = smov 38  }
  0x35   :  { %19045 = sst [smem:[#allocation100_spill]] %s16894_s4 }
  0x36   :  { %s16914_s4 = sld [smem:[%s18960_s0 + %s16678_s28]]   ;;  %s16682_s28 = smov 37  }
  0x37   :  { %s16929_s9 = sld [smem:[%s18960_s0 + %s16681_s22]]   ;;  %s16685_s22 = smov 40  }
  0x39   :  { %19047 = sst [smem:[#allocation102_spill]] %s16904_s20 }
  0x3a   :  { %19050 = sst [smem:[#allocation105_spill]] %s16919_s17 }
  0x3b   :  { %s16924_s20 = sld [smem:[%s18960_s0 + %s16680_s15]]   ;;  %s16684_s15 = smov 39  }
  0x3c   :  { %19049 = sst [smem:[#allocation104_spill]] %s16914_s4 }
  0x3d   :  { %19052 = sst [smem:[#allocation107_spill]] %s16929_s9 }
  0x3e   :  { %s16934_s4 = sld [smem:[%s18960_s0 + %s16682_s28]]   ;;  %s16686_s28 = smov 41  }
  0x3f   :  { %s16939_s17 = sld [smem:[%s18960_s0 + %s16683_s7]]   ;;  %s16687_s7 = smov 42  }
  0x40   :  { %s16949_s9 = sld [smem:[%s18960_s0 + %s16685_s22]]  }
  0x41   :  { %19051 = sst [smem:[#allocation106_spill]] %s16924_s20 }
  0x42   :  { %s16944_s20 = sld [smem:[%s18960_s0 + %s16684_s15]]   ;;  %s16688_s15 = smov 43  }
  0x44   :  { %19053 = sst [smem:[#allocation108_spill]] %s16934_s4 }
  0x45   :  { %19054 = sst [smem:[#allocation109_spill]] %s16939_s17 }
  0x46   :  { %s16954_s4 = sld [smem:[%s18960_s0 + %s16686_s28]]  }
  0x47   :  { %s16959_s17 = sld [smem:[%s18960_s0 + %s16687_s7]]  }
  0x48   :  { %19055 = sst [smem:[#allocation110_spill]] %s16944_s20 }
  0x49   :  { %s16964_s20 = sld [smem:[%s18960_s0 + %s16688_s15]]  }
  0x4a   :  { %92 = vsyncpa [#allocation3], 0 }
  0x4b   :  { %93 = vsyncpa [#allocation5], 0 }
  0x4c   :  { %94 = vsyncpa [#allocation8], 0 }
  0x4d   :  { %95 = vsyncpa [#allocation11], 0 }
  0x4e   :  { %96 = vsyncpa [#allocation14], 0 }
  0x4f   :  { %97 = vsyncpa [#allocation17], 0 }
  0x50   :  { %98 = vsyncpa [#allocation20], 0 }
  0x51   :  { %99 = vsyncpa [#allocation23], 0 }
  0x52   :  { %100 = vsyncpa [#allocation26], 0 }
  0x53   :  { %101 = vsyncpa [#allocation29], 0 }
  0x54   :  { %102 = vsyncpa [#allocation32], 0 }
  0x55   :  { %103 = vsyncpa [#allocation35], 0 }
  0x56   :  { %104 = vsyncpa [#allocation38], 0 }
  0x57   :  { %105 = vsyncpa [#allocation41], 0 }
  0x58   :  { %106 = vsyncpa [#allocation44], 0 }
  0x59   :  { %107 = vsyncpa [#allocation47], 0 }
  0x5a   :  { %108 = vsyncpa [#allocation50], 0 }
  0x5b   :  { %109 = vsyncpa [#allocation53], 0 }
  0x5c   :  { %110 = vsyncpa [#allocation56], 0 }
  0x5d   :  { %111 = vsyncpa [#allocation59], 0 }
  0x5e   :  { %112 = vsyncpa [#allocation62], 0  ;;  %s16689_s0 = smov [#allocation4]   ;;  %s16690_s23 = smov [#allocation7]  }
  0x5f   :  { %s131_s22 = sshll.u32 %s16689_s0, 4  ;;  %s151_s26 = sshll.u32 %s16690_s23, 4  ;;  %s132_s22 = int_to_ptr.vmem [resolvable:$true] %s131_s22  ;;  %s152_s26 = int_to_ptr.vmem [resolvable:$true] %s151_s26 }
  0x60   :  { %s15792_s28 = scalar_lea.vmem %s132_s22, 208  ;;  %s15796_s1 = scalar_lea.vmem %s132_s22, 224 }
  0x61   :  { %p15793_p0 = scmp.ne.s32.totalorder %s132_s22, %s15792_s28  ;;  %p15797_p1 = scmp.lt.s32.totalorder %s132_s22, %s132_s22 }
  0x62   :  { %p15798_p2 = scmp.lt.s32.totalorder %s15796_s1, %s15792_s28 }
  0x64   :  { %p15799_p3 = por %p15798_p2, %p15797_p1 }
  0x66   :  { %p15800_p4 = pnand %p15799_p3, %p15793_p0 }
  0x68   :  { %15803 = shalt.err (!%p15800_p4)
}
  0x69   :  { %134 = dma.hbm_to_vmem [thread:$0]  %s16759_s13, 208, %s132_s22, [#allocation5]  }
  0x6a   :  { %s15812_s2 = scalar_lea.vmem %s152_s26, 208  ;;  %s15816_s7 = scalar_lea.vmem %s152_s26, 224 }
  0x6b   :  { %p15813_p5 = scmp.ne.s32.totalorder %s152_s26, %s15812_s2  ;;  %p15817_p6 = scmp.lt.s32.totalorder %s152_s26, %s152_s26 }
  0x6c   :  { %p15818_p7 = scmp.lt.s32.totalorder %s15816_s7, %s15812_s2 }
  0x6e   :  { %p15819_p8 = por %p15818_p7, %p15817_p6 }
  0x70   :  { %p15820_p9 = pnand %p15819_p8, %p15813_p5 }
  0x72   :  { %15823 = shalt.err (!%p15820_p9)
}
  0x73   :  { %154 = dma.hbm_to_vmem [thread:$0]  %s16769_s21, 208, %s152_s26, [#allocation8]  }
  0x74   :  { %s16691_s10 = smov [#allocation10]   ;;  %s16692_s15 = smov [#allocation13]  }
  0x75   :  { %s173_s11 = sshll.u32 %s16691_s10, 4  ;;  %s193_s16 = sshll.u32 %s16692_s15, 4  ;;  %s174_s11 = int_to_ptr.vmem [resolvable:$true] %s173_s11  ;;  %s194_s16 = int_to_ptr.vmem [resolvable:$true] %s193_s16 }
  0x76   :  { %s15832_s18 = scalar_lea.vmem %s174_s11, 112  ;;  %s15836_s0 = scalar_lea.vmem %s174_s11, 128 }
  0x77   :  { %p15833_p10 = scmp.ne.s32.totalorder %s174_s11, %s15832_s18  ;;  %p15837_p11 = scmp.lt.s32.totalorder %s174_s11, %s174_s11 }
  0x78   :  { %p15838_p12 = scmp.lt.s32.totalorder %s15836_s0, %s15832_s18 }
  0x7a   :  { %p15839_p13 = por %p15838_p12, %p15837_p11 }
  0x7c   :  { %p15840_p0 = pnand %p15839_p13, %p15833_p10 }
  0x7e   :  { %15843 = shalt.err (!%p15840_p0)
}
  0x7f   :  { %176 = dma.hbm_to_vmem [thread:$0]  %s16779_s29, 112, %s174_s11, [#allocation11]  }
  0x80   :  { %s15852_s13 = scalar_lea.vmem %s194_s16, 112  ;;  %s15856_s22 = scalar_lea.vmem %s194_s16, 128 }
  0x81   :  { %p15853_p1 = scmp.ne.s32.totalorder %s194_s16, %s15852_s13  ;;  %p15857_p2 = scmp.lt.s32.totalorder %s194_s16, %s194_s16 }
  0x82   :  { %p15858_p3 = scmp.lt.s32.totalorder %s15856_s22, %s15852_s13 }
  0x84   :  { %p15859_p4 = por %p15858_p3, %p15857_p2 }
  0x86   :  { %p15860_p5 = pnand %p15859_p4, %p15853_p1 }
  0x88   :  { %15863 = shalt.err (!%p15860_p5)
}
  0x89   :  { %196 = dma.hbm_to_vmem [thread:$0]  %s16789_s8, 112, %s194_s16, [#allocation14]  }
  0x8a   :  { %s16693_s21 = smov [#allocation16]   ;;  %s16694_s26 = smov [#allocation19]  }
  0x8b   :  { %s215_s23 = sshll.u32 %s16693_s21, 4  ;;  %s235_s28 = sshll.u32 %s16694_s26, 4  ;;  %s216_s23 = int_to_ptr.vmem [resolvable:$true] %s215_s23  ;;  %s236_s28 = int_to_ptr.vmem [resolvable:$true] %s235_s28 }
  0x8c   :  { %s15872_s1 = scalar_lea.vmem %s216_s23, 64  ;;  %p15877_p7 = scmp.lt.s32.totalorder %s216_s23, %s216_s23 }
  0x8d   :  { %p15873_p6 = scmp.ne.s32.totalorder %s216_s23, %s15872_s1  ;;  %p15878_p8 = scmp.lt.s32.totalorder %s15872_s1, %s15872_s1 }
  0x8f   :  { %p15879_p9 = por %p15878_p8, %p15877_p7 }
  0x91   :  { %p15880_p10 = pnand %p15879_p9, %p15873_p6 }
  0x93   :  { %15883 = shalt.err (!%p15880_p10)
}
  0x94   :  { %218 = dma.hbm_to_vmem [thread:$0]  %s16799_s19, 64, %s216_s23, [#allocation17]  }
  0x95   :  { %s15892_s29 = scalar_lea.vmem %s236_s28, 64  ;;  %p15897_p12 = scmp.lt.s32.totalorder %s236_s28, %s236_s28 }
  0x96   :  { %p15893_p11 = scmp.ne.s32.totalorder %s236_s28, %s15892_s29  ;;  %p15898_p13 = scmp.lt.s32.totalorder %s15892_s29, %s15892_s29 }
  0x98   :  { %p15899_p0 = por %p15898_p13, %p15897_p12 }
  0x9a   :  { %p15900_p1 = pnand %p15899_p0, %p15893_p11 }
  0x9c   :  { %15903 = shalt.err (!%p15900_p1)
}
  0x9d   :  { %238 = dma.hbm_to_vmem [thread:$0]  %s16809_s30, 64, %s236_s28, [#allocation20]  }
  0x9e   :  { %s16695_s8 = smov [#allocation22]   ;;  %s16696_s7 = smov [#allocation25]  }
  0x9f   :  { %s257_s2 = sshll.u32 %s16695_s8, 4  ;;  %s277_s10 = sshll.u32 %s16696_s7, 4  ;;  %s258_s2 = int_to_ptr.vmem [resolvable:$true] %s257_s2  ;;  %s278_s10 = int_to_ptr.vmem [resolvable:$true] %s277_s10 }
  0xa0   :  { %s15912_s11 = scalar_lea.vmem %s258_s2, 32  ;;  %p15917_p3 = scmp.lt.s32.totalorder %s258_s2, %s258_s2 }
  0xa1   :  { %p15913_p2 = scmp.ne.s32.totalorder %s258_s2, %s15912_s11  ;;  %p15918_p4 = scmp.lt.s32.totalorder %s15912_s11, %s15912_s11 }
  0xa3   :  { %p15919_p5 = por %p15918_p4, %p15917_p3 }
  0xa5   :  { %p15920_p6 = pnand %p15919_p5, %p15913_p2 }
  0xa7   :  { %15923 = shalt.err (!%p15920_p6)
}
  0xa8   :  { %260 = dma.hbm_to_vmem [thread:$0]  %s16819_s12, 32, %s258_s2, [#allocation23]  }
  0xa9   :  { %s15932_s19 = scalar_lea.vmem %s278_s10, 32  ;;  %p15937_p8 = scmp.lt.s32.totalorder %s278_s10, %s278_s10 }
  0xaa   :  { %p15933_p7 = scmp.ne.s32.totalorder %s278_s10, %s15932_s19  ;;  %p15938_p9 = scmp.lt.s32.totalorder %s15932_s19, %s15932_s19 }
  0xac   :  { %p15939_p10 = por %p15938_p9, %p15937_p8 }
  0xae   :  { %p15940_p11 = pnand %p15939_p10, %p15933_p7 }
  0xb0   :  { %15943 = shalt.err (!%p15940_p11)
}
  0xb1   :  { %280 = dma.hbm_to_vmem [thread:$0]  %s16829_s27, 32, %s278_s10, [#allocation26]  }
  0xb2   :  { %s16697_s30 = smov [#allocation28]   ;;  %s16698_s16 = smov [#allocation31]  }
  0xb3   :  { %s299_s15 = sshll.u32 %s16697_s30, 4  ;;  %s319_s18 = sshll.u32 %s16698_s16, 4  ;;  %s300_s15 = int_to_ptr.vmem [resolvable:$true] %s299_s15  ;;  %s320_s18 = int_to_ptr.vmem [resolvable:$true] %s319_s18 }
  0xb4   :  { %s15952_s0 = scalar_lea.vmem %s300_s15, 16  ;;  %s15956_s13 = scalar_lea.vmem %s300_s15, 32 }
  0xb5   :  { %p15953_p12 = scmp.ne.s32.totalorder %s300_s15, %s15952_s0  ;;  %p15957_p13 = scmp.lt.s32.totalorder %s300_s15, %s300_s15 }
  0xb6   :  { %p15958_p0 = scmp.lt.s32.totalorder %s15956_s13, %s15952_s0 }
  0xb8   :  { %p15959_p1 = por %p15958_p0, %p15957_p13 }
  0xba   :  { %p15960_p2 = pnand %p15959_p1, %p15953_p12 }
  0xbc   :  { %15963 = shalt.err (!%p15960_p2)
}
  0xbd   :  { %302 = dma.hbm_to_vmem [thread:$0]  %s16839_s5, 16, %s300_s15, [#allocation29]  }
  0xbe   :  { %s15972_s12 = scalar_lea.vmem %s320_s18, 16  ;;  %s15976_s22 = scalar_lea.vmem %s320_s18, 32 }
  0xbf   :  { %p15973_p3 = scmp.ne.s32.totalorder %s320_s18, %s15972_s12  ;;  %p15977_p4 = scmp.lt.s32.totalorder %s320_s18, %s320_s18 }
  0xc0   :  { %p15978_p5 = scmp.lt.s32.totalorder %s15976_s22, %s15972_s12 }
  0xc2   :  { %p15979_p6 = por %p15978_p5, %p15977_p4 }
  0xc4   :  { %p15980_p7 = pnand %p15979_p6, %p15973_p3 }
  0xc6   :  { %15983 = shalt.err (!%p15980_p7)
}
  0xc7   :  { %322 = dma.hbm_to_vmem [thread:$0]  %s16849_s6, 16, %s320_s18, [#allocation32]  }
  0xc8   :  { %s16699_s27 = smov [#allocation34]   ;;  %s16700_s23 = smov [#allocation37]  }
  0xc9   :  { %s341_s21 = sshll.u32 %s16699_s27, 4  ;;  %s361_s26 = sshll.u32 %s16700_s23, 4  ;;  %s342_s21 = int_to_ptr.vmem [resolvable:$true] %s341_s21  ;;  %s362_s26 = int_to_ptr.vmem [resolvable:$true] %s361_s26 }
  0xca   :  { %s15992_s28 = scalar_lea.vmem %s342_s21, 16  ;;  %s15996_s1 = scalar_lea.vmem %s342_s21, 32 }
  0xcb   :  { %p15993_p8 = scmp.ne.s32.totalorder %s342_s21, %s15992_s28  ;;  %p15997_p9 = scmp.lt.s32.totalorder %s342_s21, %s342_s21 }
  0xcc   :  { %p15998_p10 = scmp.lt.s32.totalorder %s15996_s1, %s15992_s28 }
  0xce   :  { %p15999_p11 = por %p15998_p10, %p15997_p9 }
  0xd0   :  { %p16000_p12 = pnand %p15999_p11, %p15993_p8 }
  0xd2   :  { %16003 = shalt.err (!%p16000_p12)
}
  0xd3   :  { %344 = dma.hbm_to_vmem [thread:$0]  %s16859_s24, 16, %s342_s21, [#allocation35]  }
  0xd4   :  { %s16012_s5 = scalar_lea.vmem %s362_s26, 16  ;;  %s16016_s29 = scalar_lea.vmem %s362_s26, 32 }
  0xd5   :  { %p16013_p13 = scmp.ne.s32.totalorder %s362_s26, %s16012_s5  ;;  %p16017_p0 = scmp.lt.s32.totalorder %s362_s26, %s362_s26 }
  0xd6   :  { %p16018_p1 = scmp.lt.s32.totalorder %s16016_s29, %s16012_s5 }
  0xd8   :  { %p16019_p2 = por %p16018_p1, %p16017_p0 }
  0xda   :  { %p16020_p3 = pnand %p16019_p2, %p16013_p13 }
  0xdc   :  { %16023 = shalt.err (!%p16020_p3)
}
  0xdd   :  { %364 = dma.hbm_to_vmem [thread:$0]  %s16869_s14, 16, %s362_s26, [#allocation38]  }
  0xde   :  { %s16701_s6 = smov [#allocation40]   ;;  %s16702_s2 = smov [#allocation43]  }
  0xdf   :  { %s383_s8 = sshll.u32 %s16701_s6, 4  ;;  %s403_s7 = sshll.u32 %s16702_s2, 4  ;;  %s384_s8 = int_to_ptr.vmem [resolvable:$true] %s383_s8  ;;  %s404_s7 = int_to_ptr.vmem [resolvable:$true] %s403_s7 }
  0xe0   :  { %s16032_s10 = scalar_lea.vmem %s384_s8, 16  ;;  %s16036_s11 = scalar_lea.vmem %s384_s8, 32 }
  0xe1   :  { %p16033_p4 = scmp.ne.s32.totalorder %s384_s8, %s16032_s10  ;;  %p16037_p5 = scmp.lt.s32.totalorder %s384_s8, %s384_s8 }
  0xe2   :  { %p16038_p6 = scmp.lt.s32.totalorder %s16036_s11, %s16032_s10 }
  0xe4   :  { %p16039_p7 = por %p16038_p6, %p16037_p5 }
  0xe6   :  { %p16040_p8 = pnand %p16039_p7, %p16033_p4 }
  0xe8   :  { %16043 = shalt.err (!%p16040_p8)
}
  0xe9   :  { %386 = dma.hbm_to_vmem [thread:$0]  %s16879_s3, 16, %s384_s8, [#allocation41]  }
  0xea   :  { %s16052_s24 = scalar_lea.vmem %s404_s7, 16  ;;  %s16056_s19 = scalar_lea.vmem %s404_s7, 32 }
  0xeb   :  { %p16053_p9 = scmp.ne.s32.totalorder %s404_s7, %s16052_s24  ;;  %p16057_p10 = scmp.lt.s32.totalorder %s404_s7, %s404_s7 }
  0xec   :  { %p16058_p11 = scmp.lt.s32.totalorder %s16056_s19, %s16052_s24 }
  0xee   :  { %p16059_p12 = por %p16058_p11, %p16057_p10 }
  0xf0   :  { %p16060_p13 = pnand %p16059_p12, %p16053_p9 }
  0xf2   :  { %16063 = shalt.err (!%p16060_p13)
}
  0xf3   :  { %406 = dma.hbm_to_vmem [thread:$0]  %s16889_s25, 16, %s404_s7, [#allocation44]  }
  0xf4   :  { %s16703_s14 = smov [#allocation46]   ;;  %s16704_s15 = smov [#allocation49]  }
  0xf5   :  { %s425_s30 = sshll.u32 %s16703_s14, 4  ;;  %s445_s16 = sshll.u32 %s16704_s15, 4  ;;  %s426_s30 = int_to_ptr.vmem [resolvable:$true] %s425_s30  ;;  %s446_s16 = int_to_ptr.vmem [resolvable:$true] %s445_s16 }
  0xf6   :  { %s16072_s18 = scalar_lea.vmem %s426_s30, 16  ;;  %s16076_s0 = scalar_lea.vmem %s426_s30, 32 }
  0xf7   :  { %p16073_p0 = scmp.ne.s32.totalorder %s426_s30, %s16072_s18  ;;  %p16077_p1 = scmp.lt.s32.totalorder %s426_s30, %s426_s30 }
  0xf8   :  { %p16078_p2 = scmp.lt.s32.totalorder %s16076_s0, %s16072_s18 }
  0xfa   :  { %p16079_p3 = por %p16078_p2, %p16077_p1 }
  0xfc   :  { %p16080_p4 = pnand %p16079_p3, %p16073_p0 }
  0xfe   :  { %16083 = shalt.err (!%p16080_p4)
}
  0xff   :  { %s19056_s3 = sld [smem:[#allocation101_spill]]  ;;  %s16092_s13 = scalar_lea.vmem %s446_s16, 16 }
 0x100   :  { %p16093_p5 = scmp.ne.s32.totalorder %s446_s16, %s16092_s13  ;;  %s16096_s12 = scalar_lea.vmem %s446_s16, 32 }
 0x101   :  { %p16097_p6 = scmp.lt.s32.totalorder %s446_s16, %s446_s16  ;;  %p16098_p7 = scmp.lt.s32.totalorder %s16096_s12, %s16092_s13 }
 0x103   :  { %p16099_p8 = por %p16098_p7, %p16097_p6 }
 0x105   :  { %428 = dma.hbm_to_vmem [thread:$0]  %s19056_s3, 16, %s426_s30, [#allocation47]  }
 0x106   :  { %p16100_p9 = pnand %p16099_p8, %p16093_p5 }
 0x108   :  { %16103 = shalt.err (!%p16100_p9)
}
 0x109   :  { %s19057_s25 = sld [smem:[#allocation103_spill]]  ;;  %s16705_s22 = smov [#allocation52]  }
 0x10a   :  { %s467_s27 = sshll.u32 %s16705_s22, 4  ;;  %s16706_s21 = smov [#allocation55]   ;;  %s468_s27 = int_to_ptr.vmem [resolvable:$true] %s467_s27 }
 0x10b   :  { %s487_s23 = sshll.u32 %s16706_s21, 4  ;;  %s16112_s26 = scalar_lea.vmem %s468_s27, 16  ;;  %s488_s23 = int_to_ptr.vmem [resolvable:$true] %s487_s23 }
 0x10c   :  { %p16113_p10 = scmp.ne.s32.totalorder %s468_s27, %s16112_s26  ;;  %s16116_s28 = scalar_lea.vmem %s468_s27, 32 }
 0x10d   :  { %p16117_p11 = scmp.lt.s32.totalorder %s468_s27, %s468_s27  ;;  %p16118_p12 = scmp.lt.s32.totalorder %s16116_s28, %s16112_s26 }
 0x10f   :  { %448 = dma.hbm_to_vmem [thread:$0]  %s19057_s25, 16, %s446_s16, [#allocation50]  }
 0x110   :  { %p16119_p13 = por %p16118_p12, %p16117_p11 }
 0x112   :  { %p16120_p0 = pnand %p16119_p13, %p16113_p10 }
 0x114   :  { %16123 = shalt.err (!%p16120_p0)
}
 0x115   :  { %s19058_s1 = sld [smem:[#allocation105_spill]]  ;;  %s16132_s5 = scalar_lea.vmem %s488_s23, 16 }
 0x116   :  { %p16133_p1 = scmp.ne.s32.totalorder %s488_s23, %s16132_s5  ;;  %s16136_s29 = scalar_lea.vmem %s488_s23, 32 }
 0x117   :  { %p16137_p2 = scmp.lt.s32.totalorder %s488_s23, %s488_s23  ;;  %p16138_p3 = scmp.lt.s32.totalorder %s16136_s29, %s16132_s5 }
 0x119   :  { %p16139_p4 = por %p16138_p3, %p16137_p2 }
 0x11b   :  { %470 = dma.hbm_to_vmem [thread:$0]  %s19058_s1, 16, %s468_s27, [#allocation53]  }
 0x11c   :  { %p16140_p5 = pnand %p16139_p4, %p16133_p1 }
 0x11e   :  { %16143 = shalt.err (!%p16140_p5)
}
 0x11f   :  { %s19059_s6 = sld [smem:[#allocation107_spill]]  ;;  %s16707_s8 = smov [#allocation58]  }
 0x120   :  { %s509_s2 = sshll.u32 %s16707_s8, 4  ;;  %s16708_s7 = smov [#allocation61]   ;;  %s510_s2 = int_to_ptr.vmem [resolvable:$true] %s509_s2 }
 0x121   :  { %s529_s10 = sshll.u32 %s16708_s7, 4  ;;  %s16152_s11 = scalar_lea.vmem %s510_s2, 16  ;;  %s530_s10 = int_to_ptr.vmem [resolvable:$true] %s529_s10 }
 0x122   :  { %p16153_p6 = scmp.ne.s32.totalorder %s510_s2, %s16152_s11  ;;  %s16156_s24 = scalar_lea.vmem %s510_s2, 32 }
 0x123   :  { %p16157_p7 = scmp.lt.s32.totalorder %s510_s2, %s510_s2  ;;  %p16158_p8 = scmp.lt.s32.totalorder %s16156_s24, %s16152_s11 }
 0x125   :  { %490 = dma.hbm_to_vmem [thread:$0]  %s19059_s6, 16, %s488_s23, [#allocation56]  }
 0x126   :  { %p16159_p9 = por %p16158_p8, %p16157_p7 }
 0x128   :  { %p16160_p10 = pnand %p16159_p9, %p16153_p6 }
 0x12a   :  { %16163 = shalt.err (!%p16160_p10)
}
 0x12b   :  { %s19060_s19 = sld [smem:[#allocation109_spill]]  ;;  %s16172_s14 = scalar_lea.vmem %s530_s10, 16 }
 0x12c   :  { %p16173_p11 = scmp.ne.s32.totalorder %s530_s10, %s16172_s14  ;;  %s16176_s30 = scalar_lea.vmem %s530_s10, 32 }
 0x12d   :  { %p16177_p12 = scmp.lt.s32.totalorder %s530_s10, %s530_s10  ;;  %p16178_p13 = scmp.lt.s32.totalorder %s16176_s30, %s16172_s14 }
 0x12f   :  { %p16179_p0 = por %p16178_p13, %p16177_p12 }
 0x131   :  { %512 = dma.hbm_to_vmem [thread:$0]  %s19060_s19, 16, %s510_s2, [#allocation59]  }
 0x132   :  { %p16180_p1 = pnand %p16179_p0, %p16173_p11 }
 0x134   :  { %16183 = shalt.err (!%p16180_p1)
}
 0x135   :  { %532 = dma.hbm_to_vmem [thread:$0]  %s16949_s9, 16, %s530_s10, [#allocation62]  }
 0x136   :  { %s16709_s15 = smov [#allocation2]   ;;  %s16710_s18 = smov [#allocation6]  }
 0x137   :  { %s121_s16 = sshll.u32 %s16709_s15, 4  ;;  %s141_s0 = sshll.u32 %s16710_s18, 4  ;;  %s122_s16 = int_to_ptr.vmem [resolvable:$true] %s121_s16  ;;  %s142_s0 = int_to_ptr.vmem [resolvable:$true] %s141_s0 }
 0x138   :  { %s16192_s3 = scalar_lea.vmem %s122_s16, 416  ;;  %p16197_p3 = scmp.lt.s32.totalorder %s122_s16, %s122_s16 }
 0x139   :  { %p16193_p2 = scmp.ne.s32.totalorder %s122_s16, %s16192_s3  ;;  %p16198_p4 = scmp.lt.s32.totalorder %s16192_s3, %s16192_s3 }
 0x13b   :  { %p16199_p5 = por %p16198_p4, %p16197_p3 }
 0x13d   :  { %p16200_p6 = pnand %p16199_p5, %p16193_p2 }
 0x13f   :  { %16203 = shalt.err (!%p16200_p6)
}
 0x140   :  { %s19061_s13 = sld [smem:[#allocation86_spill]]  ;;  %s16212_s12 = scalar_lea.vmem %s142_s0, 208 }
 0x141   :  { %p16213_p7 = scmp.ne.s32.totalorder %s142_s0, %s16212_s12  ;;  %s16216_s25 = scalar_lea.vmem %s142_s0, 224 }
 0x142   :  { %p16217_p8 = scmp.lt.s32.totalorder %s142_s0, %s142_s0  ;;  %p16218_p9 = scmp.lt.s32.totalorder %s16216_s25, %s16212_s12 }
 0x144   :  { %p16219_p10 = por %p16218_p9, %p16217_p8 }
 0x146   :  { %124 = dma.hbm_to_vmem [thread:$0]  %s19061_s13, 416, %s122_s16, [#allocation3]  }
 0x147   :  { %p16220_p11 = pnand %p16219_p10, %p16213_p7 }
 0x149   :  { %16223 = shalt.err (!%p16220_p11)
}
 0x14a   :  { %s19062_s9 = sld [smem:[#allocation87_spill]]  ;;  %s16711_s22 = smov [#allocation9]  }
 0x14b   :  { %s160_s27 = sshll.u32 %s16711_s22, 4  ;;  %s161_s27 = int_to_ptr.vmem [resolvable:$true] %s160_s27 }
 0x14c   :  { %s16232_s21 = scalar_lea.vmem %s161_s27, 93184  ;;  %p16237_p13 = scmp.lt.s32.totalorder %s161_s27, %s161_s27 }
 0x14d   :  { %p16233_p12 = scmp.ne.s32.totalorder %s161_s27, %s16232_s21  ;;  %p16238_p0 = scmp.lt.s32.totalorder %s16232_s21, %s16232_s21 }
 0x14f   :  { %p16239_p1 = por %p16238_p0, %p16237_p13 }
 0x150   :  { %144 = dma.hbm_to_vmem [thread:$0]  %s19062_s9, 208, %s142_s0, [#allocation5]  }
 0x151   :  { %p16240_p2 = pnand %p16239_p1, %p16233_p12 }
 0x153   :  { %16243 = shalt.err (!%p16240_p2)
}
 0x154   :  { %s16712_s23 = smov 448   ;;  %s19063_s26 = sld [smem:[#allocation88_spill]] }
 0x155   :  { %s16713_s28 = smov 28   ;;  %s16714_s1 = smov [#allocation12]  }
 0x156   :  { %s183_s5 = sshll.u32 %s16714_s1, 4  ;;  %s16715_s29 = smov [#allocation15]   ;;  %s184_s5 = int_to_ptr.vmem [resolvable:$true] %s183_s5 }
 0x157   :  { %s202_s6 = sshll.u32 %s16715_s29, 4  ;;  %s16252_s8 = scalar_lea.vmem %s184_s5, 112  ;;  %s203_s6 = int_to_ptr.vmem [resolvable:$true] %s202_s6 }
 0x158   :  { %p16253_p3 = scmp.ne.s32.totalorder %s184_s5, %s16252_s8  ;;  %s16256_s2 = scalar_lea.vmem %s184_s5, 128 }
 0x159   :  { %p16257_p4 = scmp.lt.s32.totalorder %s184_s5, %s184_s5  ;;  %p16258_p5 = scmp.lt.s32.totalorder %s16256_s2, %s16252_s8 }
 0x15a   :  { %166 = dma.hbm_to_vmem [thread:$0]  %s19063_s26, 93184, %s161_s27, [#allocation8], %s16712_s23, %s16712_s23, %s16713_s28  }
 0x15b   :  { %p16259_p6 = por %p16258_p5, %p16257_p4 }
 0x15d   :  { %p16260_p7 = pnand %p16259_p6, %p16253_p3 }
 0x15f   :  { %16263 = shalt.err (!%p16260_p7)
}
 0x160   :  { %s19064_s7 = sld [smem:[#allocation89_spill]]  ;;  %s16272_s10 = scalar_lea.vmem %s203_s6, 28672 }
 0x161   :  { %p16273_p8 = scmp.ne.s32.totalorder %s203_s6, %s16272_s10  ;;  %p16277_p9 = scmp.lt.s32.totalorder %s203_s6, %s203_s6 }
 0x162   :  { %p16278_p10 = scmp.lt.s32.totalorder %s16272_s10, %s16272_s10 }
 0x164   :  { %p16279_p11 = por %p16278_p10, %p16277_p9 }
 0x166   :  { %186 = dma.hbm_to_vmem [thread:$0]  %s19064_s7, 112, %s184_s5, [#allocation11]  }
 0x167   :  { %p16280_p12 = pnand %p16279_p11, %p16273_p8 }
 0x169   :  { %16283 = shalt.err (!%p16280_p12)
}
 0x16a   :  { %s16716_s11 = smov 256   ;;  %s19065_s24 = sld [smem:[#allocation90_spill]] }
 0x16b   :  { %s16717_s19 = smov 16   ;;  %s16718_s14 = smov [#allocation18]  }
 0x16c   :  { %s225_s30 = sshll.u32 %s16718_s14, 4  ;;  %s16719_s15 = smov [#allocation21]   ;;  %s226_s30 = int_to_ptr.vmem [resolvable:$true] %s225_s30 }
 0x16d   :  { %s244_s16 = sshll.u32 %s16719_s15, 4  ;;  %s16292_s18 = scalar_lea.vmem %s226_s30, 64  ;;  %s245_s16 = int_to_ptr.vmem [resolvable:$true] %s244_s16 }
 0x16e   :  { %p16293_p13 = scmp.ne.s32.totalorder %s226_s30, %s16292_s18  ;;  %p16297_p0 = scmp.lt.s32.totalorder %s226_s30, %s226_s30 }
 0x16f   :  { %p16298_p1 = scmp.lt.s32.totalorder %s16292_s18, %s16292_s18 }
 0x170   :  { %208 = dma.hbm_to_vmem [thread:$0]  %s19065_s24, 28672, %s203_s6, [#allocation14], %s16716_s11, %s16716_s11, %s16717_s19  }
 0x171   :  { %p16299_p2 = por %p16298_p1, %p16297_p0 }
 0x173   :  { %p16300_p3 = pnand %p16299_p2, %p16293_p13 }
 0x175   :  { %16303 = shalt.err (!%p16300_p3)
}
 0x176   :  { %s19066_s0 = sld [smem:[#allocation91_spill]]  ;;  %s16312_s3 = scalar_lea.vmem %s245_s16, 8192 }
 0x177   :  { %p16313_p4 = scmp.ne.s32.totalorder %s245_s16, %s16312_s3  ;;  %p16317_p5 = scmp.lt.s32.totalorder %s245_s16, %s245_s16 }
 0x178   :  { %p16318_p6 = scmp.lt.s32.totalorder %s16312_s3, %s16312_s3 }
 0x17a   :  { %p16319_p7 = por %p16318_p6, %p16317_p5 }
 0x17c   :  { %228 = dma.hbm_to_vmem [thread:$0]  %s19066_s0, 64, %s226_s30, [#allocation17]  }
 0x17d   :  { %p16320_p8 = pnand %p16319_p7, %p16313_p4 }
 0x17f   :  { %16323 = shalt.err (!%p16320_p8)
}
 0x180   :  { %s16720_s13 = smov 128   ;;  %s19067_s12 = sld [smem:[#allocation92_spill]] }
 0x181   :  { %s16721_s25 = smov 8   ;;  %s16722_s9 = smov [#allocation24]  }
 0x182   :  { %s267_s22 = sshll.u32 %s16722_s9, 4  ;;  %s16723_s27 = smov [#allocation27]   ;;  %s268_s22 = int_to_ptr.vmem [resolvable:$true] %s267_s22 }
 0x183   :  { %s286_s21 = sshll.u32 %s16723_s27, 4  ;;  %s16332_s23 = scalar_lea.vmem %s268_s22, 32  ;;  %s287_s21 = int_to_ptr.vmem [resolvable:$true] %s286_s21 }
 0x184   :  { %p16333_p9 = scmp.ne.s32.totalorder %s268_s22, %s16332_s23  ;;  %p16337_p10 = scmp.lt.s32.totalorder %s268_s22, %s268_s22 }
 0x185   :  { %p16338_p11 = scmp.lt.s32.totalorder %s16332_s23, %s16332_s23 }
 0x186   :  { %250 = dma.hbm_to_vmem [thread:$0]  %s19067_s12, 8192, %s245_s16, [#allocation20], %s16720_s13, %s16720_s13, %s16721_s25  }
 0x187   :  { %p16339_p12 = por %p16338_p11, %p16337_p10 }
 0x189   :  { %p16340_p13 = pnand %p16339_p12, %p16333_p9 }
 0x18b   :  { %16343 = shalt.err (!%p16340_p13)
}
 0x18c   :  { %s19068_s26 = sld [smem:[#allocation93_spill]]  ;;  %s16352_s28 = scalar_lea.vmem %s287_s21, 2048 }
 0x18d   :  { %p16353_p0 = scmp.ne.s32.totalorder %s287_s21, %s16352_s28  ;;  %p16357_p1 = scmp.lt.s32.totalorder %s287_s21, %s287_s21 }
 0x18e   :  { %p16358_p2 = scmp.lt.s32.totalorder %s16352_s28, %s16352_s28 }
 0x190   :  { %p16359_p3 = por %p16358_p2, %p16357_p1 }
 0x192   :  { %270 = dma.hbm_to_vmem [thread:$0]  %s19068_s26, 32, %s268_s22, [#allocation23]  }
 0x193   :  { %p16360_p4 = pnand %p16359_p3, %p16353_p0 }
 0x195   :  { %16363 = shalt.err (!%p16360_p4)
}
 0x196   :  { %s16724_s1 = smov 64   ;;  %s19069_s5 = sld [smem:[#allocation94_spill]] }
 0x197   :  { %s16725_s29 = smov 4   ;;  %s16726_s6 = smov [#allocation30]  }
 0x198   :  { %s309_s8 = sshll.u32 %s16726_s6, 4  ;;  %s16727_s2 = smov [#allocation33]   ;;  %s310_s8 = int_to_ptr.vmem [resolvable:$true] %s309_s8 }
 0x199   :  { %s328_s7 = sshll.u32 %s16727_s2, 4  ;;  %s16372_s10 = scalar_lea.vmem %s310_s8, 16  ;;  %s329_s7 = int_to_ptr.vmem [resolvable:$true] %s328_s7 }
 0x19a   :  { %p16373_p5 = scmp.ne.s32.totalorder %s310_s8, %s16372_s10  ;;  %s16376_s11 = scalar_lea.vmem %s310_s8, 32 }
 0x19b   :  { %p16377_p6 = scmp.lt.s32.totalorder %s310_s8, %s310_s8  ;;  %p16378_p7 = scmp.lt.s32.totalorder %s16376_s11, %s16372_s10 }
 0x19c   :  { %292 = dma.hbm_to_vmem [thread:$0]  %s19069_s5, 2048, %s287_s21, [#allocation26], %s16724_s1, %s16724_s1, %s16725_s29  }
 0x19d   :  { %p16379_p8 = por %p16378_p7, %p16377_p6 }
 0x19f   :  { %p16380_p9 = pnand %p16379_p8, %p16373_p5 }
 0x1a1   :  { %16383 = shalt.err (!%p16380_p9)
}
 0x1a2   :  { %s19070_s24 = sld [smem:[#allocation95_spill]]  ;;  %s16392_s19 = scalar_lea.vmem %s329_s7, 1024 }
 0x1a3   :  { %p16393_p10 = scmp.ne.s32.totalorder %s329_s7, %s16392_s19  ;;  %p16397_p11 = scmp.lt.s32.totalorder %s329_s7, %s329_s7 }
 0x1a4   :  { %p16398_p12 = scmp.lt.s32.totalorder %s16392_s19, %s16392_s19 }
 0x1a6   :  { %p16399_p13 = por %p16398_p12, %p16397_p11 }
 0x1a8   :  { %312 = dma.hbm_to_vmem [thread:$0]  %s19070_s24, 16, %s310_s8, [#allocation29]  }
 0x1a9   :  { %p16400_p0 = pnand %p16399_p13, %p16393_p10 }
 0x1ab   :  { %16403 = shalt.err (!%p16400_p0)
}
 0x1ac   :  { %s19071_s14 = sld [smem:[#allocation96_spill]]  ;;  %s16728_s30 = smov [#allocation36]  }
 0x1ad   :  { %s351_s15 = sshll.u32 %s16728_s30, 4  ;;  %s16729_s16 = smov [#allocation39]   ;;  %s352_s15 = int_to_ptr.vmem [resolvable:$true] %s351_s15 }
 0x1ae   :  { %s370_s18 = sshll.u32 %s16729_s16, 4  ;;  %s16412_s0 = scalar_lea.vmem %s352_s15, 16  ;;  %s371_s18 = int_to_ptr.vmem [resolvable:$true] %s370_s18 }
 0x1af   :  { %p16413_p1 = scmp.ne.s32.totalorder %s352_s15, %s16412_s0  ;;  %s16416_s3 = scalar_lea.vmem %s352_s15, 32 }
 0x1b0   :  { %p16417_p2 = scmp.lt.s32.totalorder %s352_s15, %s352_s15  ;;  %p16418_p3 = scmp.lt.s32.totalorder %s16416_s3, %s16412_s0 }
 0x1b2   :  { %334 = dma.hbm_to_vmem [thread:$0]  %s19071_s14, 1024, %s329_s7, [#allocation32], %s16724_s1, %s16724_s1, %s16725_s29  }
 0x1b3   :  { %p16419_p4 = por %p16418_p3, %p16417_p2 }
 0x1b5   :  { %p16420_p5 = pnand %p16419_p4, %p16413_p1 }
 0x1b7   :  { %16423 = shalt.err (!%p16420_p5)
}
 0x1b8   :  { %s19072_s13 = sld [smem:[#allocation97_spill]]  ;;  %s16432_s12 = scalar_lea.vmem %s371_s18, 1024 }
 0x1b9   :  { %p16433_p6 = scmp.ne.s32.totalorder %s371_s18, %s16432_s12  ;;  %p16437_p7 = scmp.lt.s32.totalorder %s371_s18, %s371_s18 }
 0x1ba   :  { %p16438_p8 = scmp.lt.s32.totalorder %s16432_s12, %s16432_s12 }
 0x1bc   :  { %p16439_p9 = por %p16438_p8, %p16437_p7 }
 0x1be   :  { %354 = dma.hbm_to_vmem [thread:$0]  %s19072_s13, 16, %s352_s15, [#allocation35]  }
 0x1bf   :  { %p16440_p10 = pnand %p16439_p9, %p16433_p6 }
 0x1c1   :  { %16443 = shalt.err (!%p16440_p10)
}
 0x1c2   :  { %s19073_s25 = sld [smem:[#allocation98_spill]]  ;;  %s16730_s9 = smov [#allocation42]  }
 0x1c3   :  { %s393_s22 = sshll.u32 %s16730_s9, 4  ;;  %s16731_s27 = smov [#allocation45]   ;;  %s394_s22 = int_to_ptr.vmem [resolvable:$true] %s393_s22 }
 0x1c4   :  { %s412_s21 = sshll.u32 %s16731_s27, 4  ;;  %s16452_s23 = scalar_lea.vmem %s394_s22, 16  ;;  %s413_s21 = int_to_ptr.vmem [resolvable:$true] %s412_s21 }
 0x1c5   :  { %p16453_p11 = scmp.ne.s32.totalorder %s394_s22, %s16452_s23  ;;  %s16456_s26 = scalar_lea.vmem %s394_s22, 32 }
 0x1c6   :  { %p16457_p12 = scmp.lt.s32.totalorder %s394_s22, %s394_s22  ;;  %p16458_p13 = scmp.lt.s32.totalorder %s16456_s26, %s16452_s23 }
 0x1c8   :  { %376 = dma.hbm_to_vmem [thread:$0]  %s19073_s25, 1024, %s371_s18, [#allocation38], %s16724_s1, %s16724_s1, %s16725_s29  }
 0x1c9   :  { %p16459_p0 = por %p16458_p13, %p16457_p12 }
 0x1cb   :  { %p16460_p1 = pnand %p16459_p0, %p16453_p11 }
 0x1cd   :  { %16463 = shalt.err (!%p16460_p1)
}
 0x1ce   :  { %s19074_s28 = sld [smem:[#allocation99_spill]]  ;;  %s16472_s5 = scalar_lea.vmem %s413_s21, 1024 }
 0x1cf   :  { %p16473_p2 = scmp.ne.s32.totalorder %s413_s21, %s16472_s5  ;;  %p16477_p3 = scmp.lt.s32.totalorder %s413_s21, %s413_s21 }
 0x1d0   :  { %p16478_p4 = scmp.lt.s32.totalorder %s16472_s5, %s16472_s5 }
 0x1d2   :  { %p16479_p5 = por %p16478_p4, %p16477_p3 }
 0x1d4   :  { %396 = dma.hbm_to_vmem [thread:$0]  %s19074_s28, 16, %s394_s22, [#allocation41]  }
 0x1d5   :  { %p16480_p6 = pnand %p16479_p5, %p16473_p2 }
 0x1d7   :  { %16483 = shalt.err (!%p16480_p6)
}
 0x1d8   :  { %s19075_s6 = sld [smem:[#allocation100_spill]]  ;;  %s16732_s8 = smov [#allocation48]  }
 0x1d9   :  { %s435_s2 = sshll.u32 %s16732_s8, 4  ;;  %s16733_s7 = smov [#allocation51]   ;;  %s436_s2 = int_to_ptr.vmem [resolvable:$true] %s435_s2 }
 0x1da   :  { %s454_s10 = sshll.u32 %s16733_s7, 4  ;;  %s16492_s11 = scalar_lea.vmem %s436_s2, 16  ;;  %s455_s10 = int_to_ptr.vmem [resolvable:$true] %s454_s10 }
 0x1db   :  { %p16493_p7 = scmp.ne.s32.totalorder %s436_s2, %s16492_s11  ;;  %s16496_s24 = scalar_lea.vmem %s436_s2, 32 }
 0x1dc   :  { %p16497_p8 = scmp.lt.s32.totalorder %s436_s2, %s436_s2  ;;  %p16498_p9 = scmp.lt.s32.totalorder %s16496_s24, %s16492_s11 }
 0x1de   :  { %418 = dma.hbm_to_vmem [thread:$0]  %s19075_s6, 1024, %s413_s21, [#allocation44], %s16724_s1, %s16724_s1, %s16725_s29  }
 0x1df   :  { %p16499_p10 = por %p16498_p9, %p16497_p8 }
 0x1e1   :  { %p16500_p11 = pnand %p16499_p10, %p16493_p7 }
 0x1e3   :  { %16503 = shalt.err (!%p16500_p11)
}
 0x1e4   :  { %s19076_s19 = sld [smem:[#allocation102_spill]]  ;;  %s16512_s14 = scalar_lea.vmem %s455_s10, 1024 }
 0x1e5   :  { %p16513_p12 = scmp.ne.s32.totalorder %s455_s10, %s16512_s14  ;;  %p16517_p13 = scmp.lt.s32.totalorder %s455_s10, %s455_s10 }
 0x1e6   :  { %p16518_p0 = scmp.lt.s32.totalorder %s16512_s14, %s16512_s14 }
 0x1e8   :  { %p16519_p1 = por %p16518_p0, %p16517_p13 }
 0x1ea   :  { %438 = dma.hbm_to_vmem [thread:$0]  %s19076_s19, 16, %s436_s2, [#allocation47]  }
 0x1eb   :  { %p16520_p2 = pnand %p16519_p1, %p16513_p12 }
 0x1ed   :  { %16523 = shalt.err (!%p16520_p2)
}
 0x1ee   :  { %s19077_s30 = sld [smem:[#allocation104_spill]]  ;;  %s16734_s15 = smov [#allocation54]  }
 0x1ef   :  { %s477_s16 = sshll.u32 %s16734_s15, 4  ;;  %s16735_s18 = smov [#allocation57]   ;;  %s478_s16 = int_to_ptr.vmem [resolvable:$true] %s477_s16 }
 0x1f0   :  { %s496_s0 = sshll.u32 %s16735_s18, 4  ;;  %s16532_s3 = scalar_lea.vmem %s478_s16, 16  ;;  %s497_s0 = int_to_ptr.vmem [resolvable:$true] %s496_s0 }
 0x1f1   :  { %p16533_p3 = scmp.ne.s32.totalorder %s478_s16, %s16532_s3  ;;  %s16536_s13 = scalar_lea.vmem %s478_s16, 32 }
 0x1f2   :  { %p16537_p4 = scmp.lt.s32.totalorder %s478_s16, %s478_s16  ;;  %p16538_p5 = scmp.lt.s32.totalorder %s16536_s13, %s16532_s3 }
 0x1f4   :  { %460 = dma.hbm_to_vmem [thread:$0]  %s19077_s30, 1024, %s455_s10, [#allocation50], %s16724_s1, %s16724_s1, %s16725_s29  }
 0x1f5   :  { %p16539_p6 = por %p16538_p5, %p16537_p4 }
 0x1f7   :  { %p16540_p7 = pnand %p16539_p6, %p16533_p3 }
 0x1f9   :  { %16543 = shalt.err (!%p16540_p7)
}
 0x1fa   :  { %s19078_s12 = sld [smem:[#allocation106_spill]]  ;;  %s16552_s25 = scalar_lea.vmem %s497_s0, 1024 }
 0x1fb   :  { %p16553_p8 = scmp.ne.s32.totalorder %s497_s0, %s16552_s25  ;;  %p16557_p9 = scmp.lt.s32.totalorder %s497_s0, %s497_s0 }
 0x1fc   :  { %p16558_p10 = scmp.lt.s32.totalorder %s16552_s25, %s16552_s25 }
 0x1fe   :  { %p16559_p11 = por %p16558_p10, %p16557_p9 }
 0x200   :  { %480 = dma.hbm_to_vmem [thread:$0]  %s19078_s12, 16, %s478_s16, [#allocation53]  }
 0x201   :  { %p16560_p12 = pnand %p16559_p11, %p16553_p8 }
 0x203   :  { %16563 = shalt.err (!%p16560_p12)
}
 0x204   :  { %s19079_s9 = sld [smem:[#allocation108_spill]]  ;;  %s16736_s22 = smov [#allocation60]  }
 0x205   :  { %s519_s27 = sshll.u32 %s16736_s22, 4  ;;  %s16737_s21 = smov [#allocation63]   ;;  %s520_s27 = int_to_ptr.vmem [resolvable:$true] %s519_s27 }
 0x206   :  { %s541_s23 = sshll.u32 %s16737_s21, 4  ;;  %s16572_s26 = scalar_lea.vmem %s520_s27, 16  ;;  %s542_s23 = int_to_ptr.vmem [resolvable:$true] %s541_s23 }
 0x207   :  { %p16573_p13 = scmp.ne.s32.totalorder %s520_s27, %s16572_s26  ;;  %s16576_s28 = scalar_lea.vmem %s520_s27, 32 }
 0x208   :  { %p16577_p0 = scmp.lt.s32.totalorder %s520_s27, %s520_s27  ;;  %p16578_p1 = scmp.lt.s32.totalorder %s16576_s28, %s16572_s26 }
 0x20a   :  { %502 = dma.hbm_to_vmem [thread:$0]  %s19079_s9, 1024, %s497_s0, [#allocation56], %s16724_s1, %s16724_s1, %s16725_s29  }
 0x20b   :  { %p16579_p2 = por %p16578_p1, %p16577_p0 }
 0x20d   :  { %p16580_p3 = pnand %p16579_p2, %p16573_p13 }
 0x20f   :  { %16583 = shalt.err (!%p16580_p3)
}
 0x210   :  { %s19080_s5 = sld [smem:[#allocation110_spill]]  ;;  %s16592_s6 = scalar_lea.vmem %s542_s23, 16 }
 0x211   :  { %p16593_p4 = scmp.ne.s32.totalorder %s542_s23, %s16592_s6  ;;  %s16596_s8 = scalar_lea.vmem %s542_s23, 32 }
 0x212   :  { %p16597_p5 = scmp.lt.s32.totalorder %s542_s23, %s542_s23  ;;  %p16598_p6 = scmp.lt.s32.totalorder %s16596_s8, %s16592_s6 }
 0x214   :  { %p16599_p7 = por %p16598_p6, %p16597_p5 }
 0x216   :  { %522 = dma.hbm_to_vmem [thread:$0]  %s19080_s5, 16, %s520_s27, [#allocation59]  }
 0x217   :  { %p16600_p8 = pnand %p16599_p7, %p16593_p4 }
 0x219   :  { %16603 = shalt.err (!%p16600_p8)
}
 0x21a   :  { %544 = dma.hbm_to_vmem [thread:$0]  %s16959_s17, 16, %s542_s23, [#allocation62]  }
 0x21b   :  { %16604 = dma.done.wait [#allocation3], 416  }
 0x21c   :  { %16605 = vsyncadd [#allocation3], 4294966880 }
 0x21d   :  { %16606 = dma.done.wait [#allocation5], 416  }
 0x21e   :  { %16607 = vsyncadd [#allocation5], 4294966880 }
 0x21f   :  { %16608 = dma.done.wait [#allocation8], 93392  }
 0x220   :  { %16609 = vsyncadd [#allocation8], 4294873904 }
 0x221   :  { %16610 = dma.done.wait [#allocation11], 224  }
 0x222   :  { %16611 = vsyncadd [#allocation11], 4294967072 }
 0x223   :  { %16612 = dma.done.wait [#allocation14], 28784  }
 0x224   :  { %16613 = vsyncadd [#allocation14], 4294938512 }
 0x225   :  { %16614 = dma.done.wait [#allocation17], 128  }
 0x226   :  { %16615 = vsyncadd [#allocation17], 4294967168 }
 0x227   :  { %16616 = dma.done.wait [#allocation20], 8256  }
 0x228   :  { %16617 = vsyncadd [#allocation20], 4294959040 }
 0x229   :  { %16618 = dma.done.wait [#allocation23], 64  }
 0x22a   :  { %16619 = vsyncadd [#allocation23], 4294967232 }
 0x22b   :  { %16620 = dma.done.wait [#allocation26], 2080  }
 0x22c   :  { %16621 = vsyncadd [#allocation26], 4294965216 }
 0x22d   :  { %16622 = dma.done.wait [#allocation29], 32  }
 0x22e   :  { %16623 = vsyncadd [#allocation29], 4294967264 }
 0x22f   :  { %16624 = dma.done.wait [#allocation32], 1040  }
 0x230   :  { %16625 = vsyncadd [#allocation32], 4294966256 }
 0x231   :  { %16626 = dma.done.wait [#allocation35], 32  }
 0x232   :  { %16627 = vsyncadd [#allocation35], 4294967264 }
 0x233   :  { %16628 = dma.done.wait [#allocation38], 1040  }
 0x234   :  { %16629 = vsyncadd [#allocation38], 4294966256 }
 0x235   :  { %16630 = dma.done.wait [#allocation41], 32  }
 0x236   :  { %16631 = vsyncadd [#allocation41], 4294967264 }
 0x237   :  { %16632 = dma.done.wait [#allocation44], 1040  }
 0x238   :  { %16633 = vsyncadd [#allocation44], 4294966256 }
 0x239   :  { %16634 = dma.done.wait [#allocation47], 32  }
 0x23a   :  { %16635 = vsyncadd [#allocation47], 4294967264 }
 0x23b   :  { %16636 = dma.done.wait [#allocation50], 1040  }
 0x23c   :  { %16637 = vsyncadd [#allocation50], 4294966256 }
 0x23d   :  { %16638 = dma.done.wait [#allocation53], 32  }
 0x23e   :  { %16639 = vsyncadd [#allocation53], 4294967264 }
 0x23f   :  { %16640 = dma.done.wait [#allocation56], 1040  }
 0x240   :  { %16641 = vsyncadd [#allocation56], 4294966256 }
 0x241   :  { %16642 = dma.done.wait [#allocation59], 32  }
 0x242   :  { %16643 = vsyncadd [#allocation59], 4294967264 }
 0x243   :  { %16644 = dma.done.wait [#allocation62], 32  }
 0x244   :  { %16645 = vsyncadd [#allocation62], 4294967264  ;;  %s19081_s17 = sld [smem:[#allocation85_spill]]  ;;  %v687_v0 = vlaneseq  ;;  %v16738_v1 = vmov 1983009808   ;;  %v18962_v3 = vmov 0  }
 0x245   :  { %v758_v2 = vunpack.c.l.s4 %v16738_v1  ;;  %893 = vmatprep.mubr.bf16.mxu0 %v18962_v3  ;;  %956 = vmatprep.mubr.bf16.mxu1 %v18962_v3  ;;  %v673_v7 = vld [vmem:[#allocation2] sm:$0xff]  ;;  %vm821_vm0 = vcmask 1041408   ;;  %v674_v12 = vld [vmem:[#allocation2 + $0x8] sm:$0xff]  ;;  %v675_v16 = vld [vmem:[#allocation2 + $0x10] sm:$0xff]  ;;  %vm814_vm1 = vcmask 31744   ;;  %vm12479_vm2 = vcmask 162816  }
 0x246   :  { %v17027_v4 = vshrl.u32 %v687_v0, 7  ;;  %v756_v9 = vcombine.high %v673_v7, %v673_v7  ;;  %v773_v15 = vcombine.high %v674_v12, %v674_v12  ;;  %v790_v22 = vcombine.high %v675_v16, %v675_v16  ;;  %v12552_v36 = vld.sshfl [vmem:[#allocation2 + $0x18] sm:$0x3 pattern:$0x76325410] }
 0x247   :  { %v759_v5 = vunpack.c.0.s8 %v758_v2  ;;  %v859_v38 = vsel %vm821_vm0, %v12552_v36, 0  ;;  %v14184_v39 = vld [vmem:[#allocation9 + $0x18c] ss:$28 sps:$4 sm:$0xff]   ;;  %v14190_v43 = vld [vmem:[#allocation9 + $0x154] ss:$28 sps:$4 sm:$0xff]  }
 0x248   :  { %v14187_v40 = vld [vmem:[#allocation9 + $0x50c] ss:$28 sps:$4 sm:$0xff]   ;;  %v14193_v44 = vld [vmem:[#allocation9 + $0x4d4] ss:$28 sps:$4 sm:$0xff]   ;;  %v14196_v47 = vld [vmem:[#allocation9 + $0x11c] ss:$28 sps:$4 sm:$0xff]  }
 0x249   :  { %v762_v6 = vsub.s32 %v759_v5, %v17027_v4  ;;  %v14182_v41 = vld [vmem:[#allocation9 + $0x188] ss:$28 sps:$4 sm:$0xff]   ;;  %v14188_v45 = vld [vmem:[#allocation9 + $0x150] ss:$28 sps:$4 sm:$0xff]   ;;  %v14199_v48 = vld [vmem:[#allocation9 + $0x49c] ss:$28 sps:$4 sm:$0xff]  }
 0x24a   :  { %v669_v10 = vld [vmem:[%s19081_s17] sm:$0xff]  ;;  %v670_v11 = vld [vmem:[%s19081_s17 + $0x8] sm:$0xff]  ;;  %v671_v13 = vld [vmem:[%s19081_s17 + $0x10] sm:$0xff] }
 0x24b   :  { %v763_v8 = vrot.slane %v673_v7, %v762_v6  ;;  %v672_v14 = vld [vmem:[%s19081_s17 + $0x18] sm:$0xff]  ;;  %v770_v19 = vrot.slane %v756_v9, %v762_v6  ;;  %v780_v20 = vrot.slane %v674_v12, %v762_v6  ;;  %v787_v21 = vrot.slane %v773_v15, %v762_v6  ;;  %v14185_v42 = vld [vmem:[#allocation9 + $0x508] ss:$28 sps:$4 sm:$0xff]   ;;  %v14191_v46 = vld [vmem:[#allocation9 + $0x4d0] ss:$28 sps:$4 sm:$0xff]  }
 0x24c   :  { %v683_v25 = vpack.c.bf16 %v670_v11, %v669_v10  ;;  %v804_v27 = vrot.slane %v790_v22, %v762_v6  ;;  %v684_v28 = vpack.c.bf16 %v672_v14, %v671_v13  ;;  %v797_v33 = vrot.slane %v675_v16, %v762_v6  ;;  %v14194_v49 = vld [vmem:[#allocation9 + $0x118] ss:$28 sps:$4 sm:$0xff]   ;;  %v14202_v51 = vld [vmem:[#allocation9 + $0xe4] ss:$28 sps:$4 sm:$0xff]   ;;  %v14208_v55 = vld [vmem:[#allocation9 + $0xac] ss:$28 sps:$4 sm:$0xff]  }
 0x24d   :  { %v771_v17 = vcombine.high %v763_v8, %v763_v8  ;;  %v823_v18 = vsel %vm821_vm0, %v763_v8, 0  ;;  %v772_v23 = vcombine.high %v770_v19, %v770_v19  ;;  %v829_v24 = vsel %vm821_vm0, %v770_v19, 0  ;;  %v14197_v50 = vld [vmem:[#allocation9 + $0x498] ss:$28 sps:$4 sm:$0xff]   ;;  %v14205_v52 = vld [vmem:[#allocation9 + $0x464] ss:$28 sps:$4 sm:$0xff]  }
 0x24e   :  { %v789_v26 = vcombine.high %v787_v21, %v787_v21  ;;  %v788_v29 = vcombine.high %v780_v20, %v780_v20  ;;  %v841_v30 = vsel %vm821_vm0, %v787_v21, 0  ;;  %v806_v31 = vcombine.high %v804_v27, %v804_v27  ;;  %v14200_v53 = vld [vmem:[#allocation9 + $0xe0] ss:$28 sps:$4 sm:$0xff]   ;;  %v14211_v56 = vld [vmem:[#allocation9 + $0x42c] ss:$28 sps:$4 sm:$0xff]  }
 0x24f   :  { %12553 = vmatprep.subr.msk.bf16.mxu0 %vm821_vm0, %v771_v17  ;;  %14081 = vmatprep.subr.msk.bf16.mxu1 %vm821_vm0, %v772_v23  ;;  %v853_v32 = vsel %vm821_vm0, %v804_v27, 0  ;;  %v835_v34 = vsel %vm821_vm0, %v780_v20, 0  ;;  %v805_v35 = vcombine.high %v797_v33, %v797_v33  ;;  %v847_v37 = vsel %vm821_vm0, %v797_v33, 0  ;;  %v14203_v54 = vld [vmem:[#allocation9 + $0x460] ss:$28 sps:$4 sm:$0xff]  }
 0x250   :  { %876 = vmatpush1.bf16.msra.mxu0 %v823_v18  ;;  %14082 = vmatpush1.bf16.msra.mxu1 %v829_v24  ;;  %v14206_v57 = vld [vmem:[#allocation9 + $0xa8] ss:$28 sps:$4 sm:$0xff]   ;;  %v14214_v59 = vld [vmem:[#allocation9 + $0x74] ss:$28 sps:$4 sm:$0xff]   ;;  %v14220_v63 = vld [vmem:[#allocation9 + $0x3c] ss:$28 sps:$4 sm:$0xff]  }
 0x251   :  { %12556 = vmatprep.subr.msk.bf16.mxu0 %vm821_vm0, %v772_v23  ;;  %12562 = vmatprep.subr.msk.bf16.mxu1 %vm821_vm0, %v789_v26  ;;  %v14209_v58 = vld [vmem:[#allocation9 + $0x428] ss:$28 sps:$4 sm:$0xff]   ;;  %v14217_v60 = vld [vmem:[#allocation9 + $0x3f4] ss:$28 sps:$4 sm:$0xff]   ;;  %v14223_v0 = vld [vmem:[#allocation9 + $0x3bc] ss:$28 sps:$4 sm:$0xff]  }
 0x252   :  { %v14212_v61 = vld [vmem:[#allocation9 + $0x70] ss:$28 sps:$4 sm:$0xff]   ;;  %v14218_v1 = vld [vmem:[#allocation9 + $0x38] ss:$28 sps:$4 sm:$0xff]   ;;  %v14226_v5 = vld [vmem:[#allocation9 + $0x4] ss:$28 sps:$4 sm:$0xff]  }
 0x253   :  { %12554 = vmatmul.mubr.msk.bf16.vlgmr.msra.gmra.mxu0 %vm814_vm1, %v683_v25  ;;  %12558 = vmatmul.mubr.msk.bf16.vlgmr.msra.gmra.mxu1 %vm814_vm1, %v684_v28  ;;  %v14215_v62 = vld [vmem:[#allocation9 + $0x3f0] ss:$28 sps:$4 sm:$0xff]   ;;  %v14221_v2 = vld [vmem:[#allocation9 + $0x3b8] ss:$28 sps:$4 sm:$0xff]   ;;  %v14229_v6 = vld [vmem:[#allocation9 + $0x384] ss:$28 sps:$4 sm:$0xff]  }
 0x254   :  { %929 = vmatpush1.bf16.msra.mxu0 %v829_v24  ;;  %903 = vmatprep.mubr.bf16.mxu0 %v18962_v3  ;;  %v14224_v7 = vld [vmem:[#allocation9] ss:$28 sps:$4 sm:$0xff]   ;;  %v14232_v9 = vld [vmem:[#allocation9 + $0x34c] ss:$28 sps:$4 sm:$0xff]   ;;  %v14238_v13 = vld [vmem:[#allocation9 + $0x314] ss:$28 sps:$4 sm:$0xff]  }
 0x255   :  { %12559 = vmatprep.subr.msk.bf16.mxu0 %vm821_vm0, %v788_v29  ;;  %1035 = vmatpush1.bf16.msra.mxu1 %v841_v30  ;;  %v14227_v8 = vld [vmem:[#allocation9 + $0x380] ss:$28 sps:$4 sm:$0xff]   ;;  %v14235_v10 = vld [vmem:[#allocation9 + $0x6cc] ss:$28 sps:$4 sm:$0xff]   ;;  %v14241_v14 = vld [vmem:[#allocation9 + $0x694] ss:$28 sps:$4 sm:$0xff]  }
 0x256   :  { %1052 = vmatprep.mubr.bf16.mxu1 %v18962_v3  ;;  %12568 = vmatprep.subr.msk.bf16.mxu1 %vm821_vm0, %v806_v31  ;;  %v14230_v11 = vld [vmem:[#allocation9 + $0x348] ss:$28 sps:$4 sm:$0xff]   ;;  %v14236_v15 = vld [vmem:[#allocation9 + $0x310] ss:$28 sps:$4 sm:$0xff]   ;;  %v14244_v17 = vld [vmem:[#allocation9 + $0x2dc] ss:$28 sps:$4 sm:$0xff]  }
 0x257   :  { %v14233_v12 = vld [vmem:[#allocation9 + $0x6c8] ss:$28 sps:$4 sm:$0xff]   ;;  %v14239_v16 = vld [vmem:[#allocation9 + $0x690] ss:$28 sps:$4 sm:$0xff]   ;;  %v14247_v18 = vld [vmem:[#allocation9 + $0x65c] ss:$28 sps:$4 sm:$0xff]  }
 0x258   :  { %v14242_v19 = vld [vmem:[#allocation9 + $0x2d8] ss:$28 sps:$4 sm:$0xff]   ;;  %v14250_v21 = vld [vmem:[#allocation9 + $0x2a4] ss:$28 sps:$4 sm:$0xff]   ;;  %v14259_v26 = vld [vmem:[#allocation9 + $0x5ec] ss:$28 sps:$4 sm:$0xff]  }
 0x259   :  { %v14245_v20 = vld [vmem:[#allocation9 + $0x658] ss:$28 sps:$4 sm:$0xff]   ;;  %v14253_v22 = vld [vmem:[#allocation9 + $0x624] ss:$28 sps:$4 sm:$0xff]   ;;  %v14260_v33 = vld [vmem:[#allocation9 + $0x230] ss:$28 sps:$4 sm:$0xff]  }
 0x25a   :  { %v14248_v23 = vld [vmem:[#allocation9 + $0x2a0] ss:$28 sps:$4 sm:$0xff]   ;;  %v14254_v27 = vld [vmem:[#allocation9 + $0x268] ss:$28 sps:$4 sm:$0xff]   ;;  %v14262_v29 = vld [vmem:[#allocation9 + $0x234] ss:$28 sps:$4 sm:$0xff]  }
 0x25b   :  { %12555 = vmatmul.mubr.msk.bf16.gmra.mxu0 %vm814_vm1, %v684_v28  ;;  %12563 = vmatmul.mubr.msk.bf16.vlgmr.msra.gmra.mxu1 %vm814_vm1, %v683_v25  ;;  %v14251_v24 = vld [vmem:[#allocation9 + $0x620] ss:$28 sps:$4 sm:$0xff]   ;;  %v14265_v30 = vld [vmem:[#allocation9 + $0x5b4] ss:$28 sps:$4 sm:$0xff]  }
 0x25c   :  { %946 = vmatprep.mubr.bf16.mxu0 %v18962_v3  ;;  %1062 = vmatprep.mubr.bf16.mxu1 %v18962_v3  ;;  %v17073_v31 = vld [vmem:[#allocation4] sm:$0xff] }
 0x25d   :  { %1141 = vmatpush1.bf16.msra.mxu1 %v853_v32 }
 0x25e   :  { %6655 = vmatprep.subr.bf16.mxu1 %v14184_v39  ;;  %v14268_v39 = vld [vmem:[#allocation9 + $0x1fc] ss:$28 sps:$4 sm:$0xff]  }
 0x263   :  { %12557 = vmatmul.mubr.msk.bf16.vlgmr.msra.gmra.mxu0 %vm814_vm1, %v683_v25  ;;  %12564 = vmatmul.mubr.msk.bf16.gmra.mxu1 %vm814_vm1, %v684_v28 }
 0x264   :  { %982 = vmatpush1.bf16.msra.mxu0 %v835_v34  ;;  %999 = vmatprep.mubr.bf16.mxu0 %v18962_v3  ;;  %v14263_v34 = vld [vmem:[#allocation9 + $0x5b0] ss:$28 sps:$4 sm:$0xff]  }
 0x265   :  { %12565 = vmatprep.subr.msk.bf16.mxu0 %vm821_vm0, %v805_v35  ;;  %1158 = vmatprep.mubr.bf16.mxu1 %v18962_v3  ;;  %v17076_v35 = vsub.s32 0, %v17027_v4 }
 0x26b   :  { %12560 = vmatmul.mubr.msk.bf16.vlgmr.msra.gmra.mxu0 %vm814_vm1, %v683_v25  ;;  %12569 = vmatmul.mubr.msk.bf16.vlgmr.msra.gmra.mxu1 %vm814_vm1, %v683_v25 }
 0x26c   :  { %1009 = vmatprep.mubr.bf16.mxu0 %v18962_v3  ;;  %1088 = vmatpush1.bf16.msra.mxu0 %v847_v37 }
 0x26d   :  { %14083 = vmatprep.subr.msk.bf16.mxu0 %vm821_vm0, %v12552_v36  ;;  %1168 = vmatprep.mubr.bf16.mxu1 %v18962_v3 }
 0x26e   :  { %6656 = vmatpush1.bf16.msra.mxu1 %v14182_v41 }
 0x26f   :  { %6657 = vmatprep.subr.bf16.mxu1 %v14190_v43  ;;  %v14266_v43 = vld [vmem:[#allocation9 + $0x1f8] ss:$28 sps:$4 sm:$0xff]  }
 0x272   :  { %6658 = vmatpush1.bf16.msra.mxu1 %v14188_v45  ;;  %v690_v45 = vrot.slane %v17073_v31, %v17076_v35 }
 0x273   :  { %12561 = vmatmul.mubr.msk.bf16.gmra.mxu0 %vm814_vm1, %v684_v28  ;;  %12570 = vmatmul.mubr.msk.bf16.gmra.mxu1 %vm814_vm1, %v684_v28 }
 0x274   :  { %1105 = vmatprep.mubr.bf16.mxu0 %v18962_v3  ;;  %6659 = vmatprep.subr.bf16.mxu1 %v14196_v47 }
 0x276   :  { %6660 = vmatpush1.bf16.msra.mxu1 %v14194_v49 }
 0x277   :  { %6661 = vmatprep.subr.bf16.mxu1 %v14202_v51  ;;  %v14274_v51 = vld [vmem:[#allocation9 + $0x1c4] ss:$28 sps:$4 sm:$0xff]  }
 0x27a   :  { %6662 = vmatpush1.bf16.msra.mxu1 %v14200_v53 }
 0x27b   :  { %12566 = vmatmul.mubr.msk.bf16.vlgmr.msra.gmra.mxu0 %vm814_vm1, %v683_v25  ;;  %6663 = vmatprep.subr.bf16.mxu1 %v14208_v55  ;;  %v17099_v55 = vsub.s32 7, %v17027_v4 }
 0x27c   :  { %1115 = vmatprep.mubr.bf16.mxu0 %v18962_v3  ;;  %13936 = vmatpush3.bf16.msra.mxu0 %v859_v38  ;;  %v17081_v38 = vsub.s32 1, %v17027_v4 }
 0x27d   :  { %6708 = vmatprep.subr.bf16.mxu0 %v14187_v40  ;;  %v14271_v40 = vld [vmem:[#allocation9 + $0x57c] ss:$28 sps:$4 sm:$0xff]  }
 0x27e   :  { %6664 = vmatpush1.bf16.msra.mxu1 %v14206_v57  ;;  %v694_v49 = vrot.slane %v17073_v31, %v17081_v38  ;;  %v14275_v57 = vld [vmem:[#allocation9 + $0x540] ss:$28 sps:$4 sm:$0xff]  }
 0x27f   :  { %6665 = vmatprep.subr.bf16.mxu1 %v14214_v59 }
 0x282   :  { %6666 = vmatpush1.bf16.msra.mxu1 %v14212_v61 }
 0x283   :  { %12567 = vmatmul.mubr.msk.bf16.gmra.mxu0 %vm814_vm1, %v684_v28  ;;  %6667 = vmatprep.subr.bf16.mxu1 %v14220_v63 }
 0x284   :  { %13937 = vmatprep.mubr.msk.bf16.mxu0 %vm814_vm1, %v683_v25  ;;  %v14256_v25 = vld [vmem:[#allocation9 + $0x26c] ss:$28 sps:$4 sm:$0xff]  }
 0x286   :  { %6668 = vmatpush1.bf16.msra.mxu1 %v14218_v1 }
 0x287   :  { %6669 = vmatprep.subr.bf16.mxu1 %v14226_v5  ;;  %v14280_v5 = vld [vmem:[#allocation9 + $0x88c] ss:$28 sps:$4 sm:$0xff]  }
 0x28a   :  { %6670 = vmatpush1.bf16.msra.mxu1 %v14224_v7 }
 0x28b   :  { %13938 = vmatmul.mubr.msk.bf16.vlgmr.msra.gmra.mxu0 %vm814_vm1, %v684_v28  ;;  %6671 = vmatprep.subr.bf16.mxu1 %v14232_v9  ;;  %v14257_v28 = vld [vmem:[#allocation9 + $0x5e8] ss:$28 sps:$4 sm:$0xff]  }
 0x28c   :  { %6709 = vmatpush1.bf16.msra.mxu0 %v14185_v42 }
 0x28d   :  { %6710 = vmatprep.subr.bf16.mxu0 %v14193_v44  ;;  %v14269_v44 = vld [vmem:[#allocation9 + $0x578] ss:$28 sps:$4 sm:$0xff]  }
 0x28e   :  { %6672 = vmatpush2.bf16.msra.mxu1 %v14230_v11 }
 0x28f   :  { %6673 = vmatprep.subr.bf16.mxu1 %v14238_v13 }
 0x290   :  { %6711 = vmatpush1.bf16.msra.mxu0 %v14191_v46 }
 0x291   :  { %6712 = vmatprep.subr.bf16.mxu0 %v14199_v48  ;;  %v17090_v48 = vsub.s32 6, %v17027_v4 }
 0x292   :  { %6674 = vmatpush2.bf16.msra.mxu1 %v14236_v15 }
 0x293   :  { %6675 = vmatprep.subr.bf16.mxu1 %v14244_v17  ;;  %19082 = vst [vmem:[#allocation111_spill] sm:$0xff] %v17090_v48 }
 0x294   :  { %6713 = vmatpush1.bf16.msra.mxu0 %v14197_v50 }
 0x295   :  { %6714 = vmatprep.subr.bf16.mxu0 %v14205_v52  ;;  %v14277_v52 = vld [vmem:[#allocation9 + $0x544] ss:$28 sps:$4 sm:$0xff]  }
 0x296   :  { %6676 = vmatpush2.bf16.msra.mxu1 %v14242_v19 }
 0x297   :  { %6677 = vmatprep.subr.bf16.mxu1 %v14250_v21  ;;  %v17134_v21 = vsub.s32 3, %v17027_v4 }
 0x298   :  { %6715 = vmatpush1.bf16.msra.mxu0 %v14203_v54 }
 0x299   :  { %6716 = vmatprep.subr.bf16.mxu0 %v14211_v56  ;;  %v14272_v56 = vld [vmem:[#allocation9 + $0x1c0] ss:$28 sps:$4 sm:$0xff]   ;;  %19084 = vst [vmem:[#allocation113_spill] sm:$0xff] %v17134_v21 }
 0x29a   :  { %6678 = vmatpush2.bf16.msra.mxu1 %v14248_v23 }
 0x29b   :  { %6679 = vmatprep.subr.bf16.mxu1 %v14256_v25 }
 0x29c   :  { %6717 = vmatpush1.bf16.msra.mxu0 %v14209_v58 }
 0x29d   :  { %6718 = vmatprep.subr.bf16.mxu0 %v14217_v60 }
 0x29e   :  { %6680 = vmatpush2.bf16.msra.mxu1 %v14254_v27 }
 0x29f   :  { %6681 = vmatprep.subr.bf16.mxu1 %v14262_v29 }
 0x2a0   :  { %6719 = vmatpush1.bf16.msra.mxu0 %v14215_v62  ;;  %v714_v62 = vrot.slane %v17073_v31, %v17090_v48 }
 0x2a1   :  { %6720 = vmatprep.subr.bf16.mxu0 %v14223_v0 }
 0x2a2   :  { %6682 = vmatpush2.bf16.msra.mxu1 %v14260_v33 }
 0x2a3   :  { %6683 = vmatprep.subr.bf16.mxu1 %v14268_v39  ;;  %v702_v39 = vrot.slane %v17073_v31, %v17134_v21 }
 0x2a4   :  { %6721 = vmatpush1.bf16.msra.mxu0 %v14221_v2 }
 0x2a5   :  { %6722 = vmatprep.subr.bf16.mxu0 %v14229_v6  ;;  %v14283_v6 = vld [vmem:[#allocation9 + $0xc0c] ss:$28 sps:$4 sm:$0xff]  }
 0x2a6   :  { %6684 = vmatpush2.bf16.msra.mxu1 %v14266_v43 }
 0x2a7   :  { %6685 = vmatprep.subr.bf16.mxu1 %v14274_v51 }
 0x2a8   :  { %6723 = vmatpush1.bf16.msra.mxu0 %v14227_v8  ;;  %v718_v8 = vrot.slane %v17073_v31, %v17099_v55 }
 0x2a9   :  { %6724 = vmatprep.subr.bf16.mxu0 %v14235_v10  ;;  %v17118_v10 = vsub.s32 2, %v17027_v4 }
 0x2aa   :  { %6686 = vmatpush2.bf16.msra.mxu1 %v14272_v56 }
 0x2ab   :  { %19083 = vst [vmem:[#allocation112_spill] sm:$0xff] %v17118_v10  ;;  %6761 = vmatprep.subr.bf16.mxu1 %v14280_v5  ;;  %v698_v25 = vrot.slane %v17073_v31, %v17118_v10 }
 0x2ac   :  { %6725 = vmatpush2.bf16.msra.mxu0 %v14233_v12 }
 0x2ad   :  { %6726 = vmatprep.subr.bf16.mxu0 %v14241_v14 }
 0x2b0   :  { %6727 = vmatpush2.bf16.msra.mxu0 %v14239_v16 }
 0x2b1   :  { %6728 = vmatprep.subr.bf16.mxu0 %v14247_v18 }
 0x2b4   :  { %6729 = vmatpush2.bf16.msra.mxu0 %v14245_v20 }
 0x2b5   :  { %6730 = vmatprep.subr.bf16.mxu0 %v14253_v22 }
 0x2b8   :  { %6731 = vmatpush2.bf16.msra.mxu0 %v14251_v24 }
 0x2b9   :  { %6732 = vmatprep.subr.bf16.mxu0 %v14259_v26 }
 0x2bc   :  { %6733 = vmatpush2.bf16.msra.mxu0 %v14257_v28 }
 0x2bd   :  { %6734 = vmatprep.subr.bf16.mxu0 %v14265_v30 }
 0x2c0   :  { %6735 = vmatpush2.bf16.msra.mxu0 %v14263_v34 }
 0x2c1   :  { %6736 = vmatprep.subr.bf16.mxu0 %v14271_v40 }
 0x2c4   :  { %6737 = vmatpush2.bf16.msra.mxu0 %v14269_v44  ;;  %v17152_v44 = vsub.s32 4, %v17027_v4 }
 0x2c5   :  { %6738 = vmatprep.subr.bf16.mxu0 %v14277_v52 }
 0x2c6   :  { %19085 = vst [vmem:[#allocation114_spill] sm:$0xff] %v17152_v44 }
 0x2c8   :  { %6739 = vmatpush2.bf16.msra.mxu0 %v14275_v57 }
 0x2c9   :  { %6814 = vmatprep.subr.bf16.mxu0 %v14283_v6 }
 0x313   :  { %v895_v32 = vpop.f32.mrf.mxu0  ;;  %v17078_v37 = vpop.f32.mrf.mxu1 }
 0x314   :  { %v17101_v58 = vadd.f32 %v895_v32, %v690_v45 }
 0x315   :  { %v897_v36 = vpop.f32.mrf.mxu0  ;;  %v17083_v42 = vpop.f32.mrf.mxu1 }
 0x316   :  { %v17109_v0 = vadd.f32 %v897_v36, %v694_v49 }
 0x317   :  { %v899_v41 = vpop.f32.mrf.mxu0  ;;  %v17087_v47 = vpop.f32.mrf.mxu1 }
 0x318   :  { %v17094_v50 = vadd.f32 %v899_v41, %v690_v45 }
 0x319   :  { %v901_v46 = vpop.f32.mrf.mxu0  ;;  %v17096_v54 = vpop.f32.mrf.mxu1 }
 0x31a   :  { %v17103_v59 = vadd.f32 %v901_v46, %v694_v49  ;;  %v1228_v1 = vadd.f32 %v17094_v50, %v17101_v58 }
 0x31b   :  { %v905_v53 = vpop.f32.mrf.mxu0  ;;  %v1054_v63 = vpop.f32.mrf.mxu1 }
 0x31c   :  { %v17105_v60 = vadd.f32 %v905_v53, %v690_v45  ;;  %v1237_v11 = vadd.f32 %v17103_v59, %v17109_v0  ;;  %v17125_v14 = vadd.f32 %v1054_v63, %v714_v62  ;;  %v17162_v53 = vadd.f32 %v17078_v37, %v698_v25 }
 0x31d   :  { %v907_v61 = vpop.f32.mrf.mxu0  ;;  %v1056_v9 = vpop.f32.mrf.mxu1  ;;  %v17177_v37 = vadd.f32 %v17087_v47, %v698_v25  ;;  %v17191_v47 = vrot.slane %v17073_v31, %v17152_v44 }
 0x31e   :  { %v17113_v2 = vadd.f32 %v907_v61, %v694_v49  ;;  %v1229_v12 = vadd.f32 %v1228_v1, %v17105_v60  ;;  %v17136_v22 = vadd.f32 %v1056_v9, %v718_v8 }
 0x31f   :  { %v909_v7 = vpop.f32.mrf.mxu0  ;;  %v1058_v16 = vpop.f32.mrf.mxu1 }
 0x320   :  { %v17123_v13 = vadd.f32 %v909_v7, %v690_v45  ;;  %v1238_v17 = vadd.f32 %v1237_v11, %v17113_v2  ;;  %v17131_v20 = vadd.f32 %v1058_v16, %v714_v62  ;;  %v17155_v45 = vsub.s32 5, %v17027_v4 }
 0x321   :  { %v911_v15 = vpop.f32.mrf.mxu0  ;;  %v1060_v24 = vpop.f32.mrf.mxu1  ;;  %v17174_v11 = vadd.f32 %v17083_v42, %v702_v39 }
 0x322   :  { %v1230_v18 = vadd.f32 %v1229_v12, %v17123_v13  ;;  %v17129_v19 = vadd.f32 %v911_v15, %v694_v49  ;;  %v1282_v28 = vadd.f32 %v17131_v20, %v17125_v14  ;;  %v17143_v29 = vadd.f32 %v1060_v24, %v718_v8  ;;  %19086 = vst [vmem:[#allocation115_spill] sm:$0xff] %v17155_v45 }
 0x323   :  { %v948_v23 = vpop.f32.mrf.mxu0  ;;  %v1064_v32 = vpop.f32.mrf.mxu1 }
 0x324   :  { %v1231_v26 = vrot.slane %v1230_v18, 4  ;;  %v1239_v27 = vadd.f32 %v1238_v17, %v17129_v19  ;;  %v17145_v36 = vadd.f32 %v1064_v32, %v714_v62  ;;  %v1291_v40 = vadd.f32 %v17143_v29, %v17136_v22 }
 0x325   :  { %v950_v30 = vpop.f32.mrf.mxu0  ;;  %v1066_v43 = vpop.f32.mrf.mxu1  ;;  %v17157_v51 = vadd.f32 %v948_v23, %v698_v25 }
 0x326   :  { %v1232_v33 = vadd.f32 %v1231_v26, %v1230_v18  ;;  %v1240_v34 = vrot.slane %v1239_v27, 4  ;;  %v17164_v56 = vadd.f32 %v950_v30, %v702_v39  ;;  %v1283_v57 = vadd.f32 %v1282_v28, %v17145_v36 }
 0x327   :  { %v952_v41 = vpop.f32.mrf.mxu0  ;;  %v17167_v61 = vadd.f32 %v1066_v43, %v718_v8  ;;  %v1068_v1 = vpop.f32.mrf.mxu1  ;;  %v17204_v43 = vrot.slane %v17073_v31, %v17155_v45 }
 0x328   :  { %v1233_v46 = vrot.slane %v1232_v33, 2  ;;  %v1241_v49 = vadd.f32 %v1240_v34, %v1239_v27  ;;  %v17159_v52 = vadd.f32 %v952_v41, %v698_v25  ;;  %v17180_v15 = vadd.f32 %v1068_v1, %v714_v62  ;;  %v17197_v34 = vld [vmem:[#allocation4 + $0x8] sm:$0x1f] }
 0x329   :  { %v954_v63 = vpop.f32.mrf.mxu0  ;;  %v1292_v12 = vadd.f32 %v1291_v40, %v17167_v61  ;;  %v1070_v17 = vpop.f32.mrf.mxu1  ;;  %v17186_v27 = vadd.f32 %v17096_v54, %v702_v39  ;;  %v16740_v40 = vmov 1966171168  }
 0x32a   :  { %v1234_v5 = vadd.f32 %v1233_v46, %v1232_v33  ;;  %v1242_v6 = vrot.slane %v1241_v49, 2  ;;  %v1246_v7 = vadd.f32 %v17159_v52, %v17157_v51  ;;  %v17171_v9 = vadd.f32 %v954_v63, %v702_v39 }
 0x32b   :  { %v1001_v16 = vpop.f32.mrf.mxu0  ;;  %v1284_v42 = vadd.f32 %v1283_v57, %v17180_v15  ;;  %v17193_v62 = vadd.f32 %v1070_v17, %v718_v8  ;;  %v17199_v54 = vunpack.c.l.s4 %v16740_v40  ;;  %v17212_v17 = vrot.slane %v17197_v34, %v17076_v35 }
 0x32c   :  { %v1235_v18 = vrot.slane %v1234_v5, 1  ;;  %v1243_v23 = vadd.f32 %v1242_v6, %v1241_v49  ;;  %v1247_v24 = vadd.f32 %v1246_v7, %v17162_v53  ;;  %v1255_v26 = vadd.f32 %v17171_v9, %v17164_v56 }
 0x32d   :  { %v1003_v25 = vpop.f32.mrf.mxu0  ;;  %v1285_v39 = vrot.slane %v1284_v42, 4  ;;  %v1293_v41 = vadd.f32 %v1292_v12, %v17193_v62 }
 0x32e   :  { %v1236_v28 = vadd.f32 %v1235_v18, %v1234_v5  ;;  %v1244_v30 = vrot.slane %v1243_v23, 1  ;;  %v1248_v32 = vadd.f32 %v1247_v24, %v17177_v37  ;;  %v1256_v33 = vadd.f32 %v1255_v26, %v17174_v11 }
 0x32f   :  { %v1005_v8 = vpop.f32.mrf.mxu0  ;;  %v1286_v1 = vadd.f32 %v1285_v39, %v1284_v42  ;;  %v17208_v5 = vadd.f32 %v1001_v16, %v17191_v47  ;;  %v1294_v6 = vrot.slane %v1293_v41, 4 }
 0x330   :  { %v1346_v46 = vmul.f32 0.03125, %v1236_v28  ;;  %v1245_v49 = vadd.f32 %v1244_v30, %v1243_v23  ;;  %v1249_v57 = vrot.slane %v1248_v32, 4  ;;  %v1257_v63 = vadd.f32 %v1256_v33, %v17186_v27 }
 0x331   :  { %v1007_v7 = vpop.f32.mrf.mxu0  ;;  %v1287_v42 = vrot.slane %v1286_v1, 2 }
 0x332   :  { %v17215_v12 = vsub.f32 %v17101_v58, %v1346_v46  ;;  %v17218_v31 = vsub.f32 %v17094_v50, %v1346_v46  ;;  %v17221_v18 = vsub.f32 %v17105_v60, %v1346_v46  ;;  %v17224_v23 = vsub.f32 %v17123_v13, %v1346_v46 }
 0x333   :  { %v1347_v16 = vmul.f32 0.03125, %v1245_v49  ;;  %v1250_v24 = vadd.f32 %v1249_v57, %v1248_v32  ;;  %v1258_v26 = vrot.slane %v1257_v63, 4  ;;  %v1011_v28 = vpop.f32.mrf.mxu0  ;;  %v17231_v50 = vadd.f32 %v1003_v25, %v17204_v43 }
 0x334   :  { %19087 = vst [vmem:[#allocation116_spill] sm:$0xff] %v17215_v12  ;;  %19088 = vst [vmem:[#allocation117_spill] sm:$0xff] %v17218_v31  ;;  %v1411_v30 = vmul.f32 %v17215_v12, %v17215_v12  ;;  %v1424_v58 = vmul.f32 %v17218_v31, %v17218_v31  ;;  %v17234_v60 = vadd.f32 %v1005_v8, %v17191_v47 }
 0x335   :  { %19089 = vst [vmem:[#allocation118_spill] sm:$0xff] %v17221_v18  ;;  %19090 = vst [vmem:[#allocation119_spill] sm:$0xff] %v17224_v23  ;;  %v1437_v13 = vmul.f32 %v17221_v18, %v17221_v18  ;;  %v17239_v32 = vsub.f32 %v17109_v0, %v1347_v16  ;;  %v17242_v33 = vsub.f32 %v17103_v59, %v1347_v16  ;;  %v17247_v39 = vpop.f32.mrf.mxu0  ;;  %v1251_v25 = vrot.slane %v1250_v24, 2 }
 0x336   :  { %v17245_v40 = vsub.f32 %v17113_v2, %v1347_v16  ;;  %v1463_v46 = vadd.f32 %v1424_v58, %v1411_v30  ;;  %v1259_v49 = vadd.f32 %v1258_v26, %v1257_v63  ;;  %v1288_v57 = vadd.f32 %v1287_v42, %v1286_v1 }
 0x337   :  { %19091 = vst [vmem:[#allocation120_spill] sm:$0xff] %v17242_v33  ;;  %v1450_v8 = vmul.f32 %v17224_v23, %v17224_v23  ;;  %v17252_v3 = vsub.f32 %v17129_v19, %v1347_v16  ;;  %v1412_v0 = vmul.f32 %v17239_v32, %v17239_v32  ;;  %v1425_v59 = vmul.f32 %v17242_v33, %v17242_v33  ;;  %v17258_v2 = vpop.f32.mrf.mxu0 }
 0x338   :  { %v1464_v48 = vadd.f32 %v1463_v46, %v1437_v13  ;;  %v1252_v18 = vadd.f32 %v1251_v25, %v1250_v24  ;;  %v1260_v30 = vrot.slane %v1259_v49, 2  ;;  %v1289_v58 = vrot.slane %v1288_v57, 1 }
 0x339   :  { %v1438_v63 = vmul.f32 %v17245_v40, %v17245_v40  ;;  %v1472_v1 = vadd.f32 %v1425_v59, %v1412_v0  ;;  %v1295_v26 = vadd.f32 %v1294_v6, %v1293_v41  ;;  %v17263_v19 = vadd.f32 %v1007_v7, %v17204_v43  ;;  %v17270_v46 = vpop.f32.mrf.mxu0 }
 0x33a   :  { %v1465_v16 = vadd.f32 %v1464_v48, %v1450_v8  ;;  %v1253_v42 = vrot.slane %v1252_v18, 1  ;;  %v1261_v23 = vadd.f32 %v1260_v30, %v1259_v49  ;;  %v1290_v31 = vadd.f32 %v1289_v58, %v1288_v57 }
 0x33b   :  { %v1451_v12 = vmul.f32 %v17252_v3, %v17252_v3  ;;  %v1473_v33 = vadd.f32 %v1472_v1, %v1438_v63  ;;  %v1296_v13 = vrot.slane %v1295_v26, 2  ;;  %v17268_v24 = vadd.f32 %v1011_v28, %v17191_v47  ;;  %v17276_v57 = vpop.f32.mrf.mxu0 }
 0x33c   :  { %v1466_v25 = vrot.slane %v1465_v16, 4  ;;  %v1254_v0 = vadd.f32 %v1253_v42, %v1252_v18  ;;  %v1262_v41 = vrot.slane %v1261_v23, 1  ;;  %v1352_v6 = vmul.f32 0.03125, %v1290_v31 }
 0x33d   :  { %v1474_v7 = vadd.f32 %v1473_v33, %v1451_v12  ;;  %v1297_v59 = vadd.f32 %v1296_v13, %v1295_v26  ;;  %v1264_v48 = vadd.f32 %v17234_v60, %v17208_v5  ;;  %v1273_v49 = vadd.f32 %v17263_v19, %v17231_v50  ;;  %v17303_v42 = vpop.f32.mrf.mxu0 }
 0x33e   :  { %v1467_v8 = vadd.f32 %v1466_v25, %v1465_v16  ;;  %v1348_v30 = vmul.f32 0.03125, %v1254_v0  ;;  %v1263_v28 = vadd.f32 %v1262_v41, %v1261_v23  ;;  %v17279_v58 = vsub.f32 %v17125_v14, %v1352_v6 }
 0x33f   :  { %v1475_v63 = vrot.slane %v1474_v7, 4  ;;  %v17282_v18 = vsub.f32 %v17131_v20, %v1352_v6  ;;  %v17285_v12 = vsub.f32 %v17145_v36, %v1352_v6  ;;  %v1265_v31 = vadd.f32 %v1264_v48, %v17268_v24 }
 0x340   :  { %19092 = vst [vmem:[#allocation121_spill] sm:$0xff] %v17279_v58  ;;  %v1468_v33 = vrot.slane %v1467_v8, 2  ;;  %v17289_v1 = vsub.f32 %v17157_v51, %v1348_v30  ;;  %v17292_v26 = vsub.f32 %v17159_v52, %v1348_v30  ;;  %v17295_v23 = vsub.f32 %v17162_v53, %v1348_v30 }
 0x341   :  { %19093 = vst [vmem:[#allocation122_spill] sm:$0xff] %v17282_v18  ;;  %19094 = vst [vmem:[#allocation123_spill] sm:$0xff] %v17285_v12  ;;  %v1476_v14 = vadd.f32 %v1475_v63, %v1474_v7  ;;  %v17298_v16 = vsub.f32 %v17177_v37, %v1348_v30  ;;  %v1349_v20 = vmul.f32 0.03125, %v1263_v28  ;;  %v17301_v36 = vsub.f32 %v17180_v15, %v1352_v6 }
 0x342   :  { %19095 = vst [vmem:[#allocation124_spill] sm:$0xff] %v17295_v23  ;;  %v1469_v13 = vadd.f32 %v1468_v33, %v1467_v8  ;;  %v1413_v51 = vmul.f32 %v17289_v1, %v17289_v1  ;;  %v1426_v52 = vmul.f32 %v17292_v26, %v17292_v26  ;;  %v1417_v53 = vmul.f32 %v17279_v58, %v17279_v58 }
 0x343   :  { %19096 = vst [vmem:[#allocation125_spill] sm:$0xff] %v17298_v16  ;;  %19097 = vst [vmem:[#allocation126_spill] sm:$0xff] %v17301_v36  ;;  %v1477_v25 = vrot.slane %v1476_v14, 2  ;;  %v1439_v37 = vmul.f32 %v17295_v23, %v17295_v23  ;;  %v17314_v0 = vsub.f32 %v17164_v56, %v1349_v20  ;;  %v17317_v15 = vsub.f32 %v17171_v9, %v1349_v20  ;;  %v17331_v9 = vpop.f32.mrf.mxu0 }
 0x344   :  { %v1470_v41 = vrot.slane %v1469_v13, 1  ;;  %v1481_v6 = vadd.f32 %v1426_v52, %v1413_v51  ;;  %v17320_v7 = vsub.f32 %v17174_v11, %v1349_v20  ;;  %v17323_v48 = vsub.f32 %v17186_v27, %v1349_v20 }
 0x345   :  { %v1478_v8 = vadd.f32 %v1477_v25, %v1476_v14  ;;  %v1414_v30 = vmul.f32 %v17314_v0, %v17314_v0  ;;  %v1427_v28 = vmul.f32 %v17317_v15, %v17317_v15  ;;  %v1430_v56 = vmul.f32 %v17282_v18, %v17282_v18 }
 0x346   :  { %19098 = vst [vmem:[#allocation127_spill] sm:$0xff] %v17323_v48  ;;  %v1471_v63 = vadd.f32 %v1470_v41, %v1469_v13  ;;  %v1452_v11 = vmul.f32 %v17298_v16, %v17298_v16  ;;  %v1482_v33 = vadd.f32 %v1481_v6, %v1439_v37  ;;  %v17337_v27 = vadd.f32 %v17247_v39, %v17204_v43  ;;  %v17351_v16 = vpop.f32.mrf.mxu0 }
 0x347   :  { %v1479_v14 = vrot.slane %v1478_v8, 1  ;;  %v1440_v20 = vmul.f32 %v17320_v7, %v17320_v7  ;;  %v1453_v51 = vmul.f32 %v17323_v48, %v17323_v48  ;;  %v1490_v52 = vadd.f32 %v1427_v28, %v1414_v30 }
 0x348   :  { %v1483_v25 = vadd.f32 %v1482_v33, %v1452_v11  ;;  %v1443_v13 = vmul.f32 %v17285_v12, %v17285_v12  ;;  %v1517_v41 = vadd.f32 %v1430_v56, %v1417_v53  ;;  %v1298_v18 = vrot.slane %v1297_v59, 1 }
 0x349   :  { %v1580_v58 = vmul.f32 0.03125, %v1471_v63  ;;  %v1491_v37 = vadd.f32 %v1490_v52, %v1440_v20  ;;  %v1456_v39 = vmul.f32 %v17301_v36, %v17301_v36  ;;  %v17349_v6 = vadd.f32 %v17258_v2, %v17191_v47 }
 0x34a   :  { %v1480_v23 = vadd.f32 %v1479_v14, %v1478_v8  ;;  %v1484_v48 = vrot.slane %v1483_v25, 4  ;;  %v1518_v30 = vadd.f32 %v1517_v41, %v1443_v13  ;;  %v1299_v28 = vadd.f32 %v1298_v18, %v1297_v59  ;;  %v1117_v18 = vpop.f32.mrf.mxu0 }
 0x34b   :  { %v1492_v11 = vadd.f32 %v1491_v37, %v1453_v51  ;;  %v1274_v33 = vadd.f32 %v1273_v49, %v17337_v27  ;;  %v1266_v53 = vadd.f32 %v1265_v31, %v17349_v6  ;;  %v17357_v56 = vadd.f32 %v17270_v46, %v17204_v43  ;;  %v1160_v49 = vpop.f32.mrf.mxu1 }
 0x34c   :  { %v1485_v63 = vadd.f32 %v1484_v48, %v1483_v25  ;;  %v1519_v20 = vadd.f32 %v1518_v30, %v1456_v39  ;;  %v1353_v52 = vmul.f32 0.03125, %v1299_v28  ;;  %v17361_v47 = vrot.slane %v17197_v34, %v17081_v38  ;;  %v1119_v28 = vpop.f32.mrf.mxu0 }
 0x34d   :  { %v1593_v2 = vadd.f32 1e-05, %v1580_v58  ;;  %v1493_v8 = vrot.slane %v1492_v11, 4  ;;  %v1267_v14 = vrot.slane %v1266_v53, 4  ;;  %v1275_v59 = vadd.f32 %v1274_v33, %v17357_v56 }
 0x34e   :  { %v1486_v51 = vrot.slane %v1485_v63, 2  ;;  %v1520_v31 = vrot.slane %v1519_v20, 4  ;;  %v17365_v13 = vsub.f32 %v17136_v22, %v1353_v52  ;;  %v17368_v43 = vsub.f32 %v17143_v29, %v1353_v52 }
 0x34f   :  { %v1581_v46 = vmul.f32 0.03125, %v1480_v23  ;;  %v1494_v48 = vadd.f32 %v1493_v8, %v1492_v11  ;;  %v17371_v25 = vsub.f32 %v17167_v61, %v1353_v52  ;;  %v17374_v58 = vsub.f32 %v17193_v62, %v1353_v52  ;;  %v1162_v62 = vpop.f32.mrf.mxu1 }
 0x350   :  { %19099 = vst [vmem:[#allocation128_spill] sm:$0xff] %v17365_v13  ;;  %19100 = vst [vmem:[#allocation129_spill] sm:$0xff] %v17368_v43  ;;  %v1487_v41 = vadd.f32 %v1486_v51, %v1485_v63  ;;  %v1521_v37 = vadd.f32 %v1520_v31, %v1519_v20  ;;  %v1418_v39 = vmul.f32 %v17365_v13, %v17365_v13  ;;  %v1276_v20 = vrot.slane %v1275_v59, 4 }
 0x351   :  { %19101 = vst [vmem:[#allocation130_spill] sm:$0xff] %v17371_v25  ;;  %19102 = vst [vmem:[#allocation131_spill] sm:$0xff] %v17374_v58  ;;  %v1431_v22 = vmul.f32 %v17368_v43, %v17368_v43  ;;  %v1495_v30 = vrot.slane %v1494_v48, 2  ;;  %v1444_v29 = vmul.f32 %v17371_v25, %v17371_v25  ;;  %v1268_v23 = vadd.f32 %v1267_v14, %v1266_v53 }
 0x352   :  { %v17384_v61 = vrot.slane %v17197_v34, %v17118_v10  ;;  %v1488_v11 = vrot.slane %v1487_v41, 1  ;;  %v1522_v33 = vrot.slane %v1521_v37, 2  ;;  %v1457_v8 = vmul.f32 %v17374_v58, %v17374_v58 }
 0x353   :  { %v1526_v63 = vadd.f32 %v1431_v22, %v1418_v39  ;;  %v1496_v52 = vadd.f32 %v1495_v30, %v1494_v48  ;;  %v1269_v51 = vrot.slane %v1268_v23, 2  ;;  %v17390_v31 = vadd.f32 %v17276_v57, %v17212_v17  ;;  %v1121_v39 = vpop.f32.mrf.mxu0  ;;  %v1164_v22 = vpop.f32.mrf.mxu1 }
 0x354   :  { %v1489_v53 = vadd.f32 %v1488_v11, %v1487_v41  ;;  %v1523_v14 = vadd.f32 %v1522_v33, %v1521_v37  ;;  %v1277_v12 = vadd.f32 %v1276_v20, %v1275_v59  ;;  %v17394_v13 = vadd.f32 %v17331_v9, %v17212_v17 }
 0x355   :  { %v1527_v36 = vadd.f32 %v1526_v63, %v1444_v29  ;;  %v1497_v25 = vrot.slane %v1496_v52, 1  ;;  %v1270_v43 = vadd.f32 %v1269_v51, %v1268_v23  ;;  %v17398_v48 = vrot.slane %v17197_v34, %v17134_v21  ;;  %v1166_v51 = vpop.f32.mrf.mxu1 }
 0x356   :  { %v1582_v30 = vmul.f32 0.03125, %v1489_v53  ;;  %v1278_v57 = vrot.slane %v1277_v12, 2  ;;  %v17402_v41 = vrot.slane %v17197_v34, %v17152_v44  ;;  %v1594_v59 = vadd.f32 1e-05, %v1581_v46 }
 0x357   :  { %v1528_v58 = vadd.f32 %v1527_v36, %v1457_v8  ;;  %v1524_v37 = vrot.slane %v1523_v14, 1  ;;  %v1271_v29 = vrot.slane %v1270_v43, 1  ;;  %v17406_v9 = vadd.f32 %v17303_v42, %v17361_v47  ;;  %v1123_v8 = vpop.f32.mrf.mxu0 }
 0x358   :  { %v1279_v11 = vadd.f32 %v1278_v57, %v1277_v12  ;;  %v1300_v33 = vadd.f32 %v17394_v13, %v17390_v31  ;;  %v17412_v36 = vadd.f32 %v17351_v16, %v17361_v47  ;;  %v1595_v63 = vadd.f32 1e-05, %v1582_v30 }
 0x359   :  { %v1529_v23 = vrot.slane %v1528_v58, 4  ;;  %v1498_v20 = vadd.f32 %v1497_v25, %v1496_v52  ;;  %v1272_v34 = vadd.f32 %v1271_v29, %v1270_v43  ;;  %v17415_v46 = vadd.f32 %v1117_v18, %v17212_v17 }
 0x35a   :  { %15718 = vrsqrt.f32 %v1593_v2  ;;  %v1280_v53 = vrot.slane %v1279_v11, 1  ;;  %v17418_v12 = vadd.f32 %v1160_v49, %v17384_v61  ;;  %v1525_v57 = vadd.f32 %v1524_v37, %v1523_v14  ;;  %v1170_v14 = vpop.f32.mrf.mxu1 }
 0x35b   :  { %v1530_v42 = vadd.f32 %v1529_v23, %v1528_v58  ;;  %15720 = vrsqrt.f32 %v1594_v59  ;;  %v1350_v44 = vmul.f32 0.03125, %v1272_v34  ;;  %v17421_v16 = vadd.f32 %v1162_v62, %v17398_v48  ;;  %v17435_v62 = vpop.f32.mrf.mxu0 }
 0x35c   :  { %v1281_v25 = vadd.f32 %v1280_v53, %v1279_v11  ;;  %v1301_v43 = vadd.f32 %v1300_v33, %v17415_v46  ;;  %v17425_v18 = vadd.f32 %v1121_v39, %v17212_v17  ;;  %v1583_v52 = vmul.f32 0.03125, %v1498_v20  ;;  %v1172_v20 = vpop.f32.mrf.mxu1 }
 0x35d   :  { %v1531_v30 = vrot.slane %v1530_v42, 2  ;;  %v17428_v2 = vsub.f32 %v17208_v5, %v1350_v44  ;;  %v17431_v49 = vsub.f32 %v17234_v60, %v1350_v44  ;;  %v1309_v58 = vadd.f32 %v17412_v36, %v17406_v9  ;;  %v1213_v34 = vpop.f32.mrf.mxu0 }
 0x35e   :  { %15722 = vrsqrt.f32 %v1595_v63  ;;  %v17438_v37 = vsub.f32 %v17268_v24, %v1350_v44  ;;  %v17441_v17 = vadd.f32 %v1119_v28, %v17361_v47  ;;  %v17444_v5 = vsub.f32 %v17349_v6, %v1350_v44 }
 0x35f   :  { %19103 = vst [vmem:[#allocation132_spill] sm:$0xff] %v17428_v2  ;;  %19104 = vst [vmem:[#allocation133_spill] sm:$0xff] %v17431_v49  ;;  %v1532_v59 = vadd.f32 %v1531_v30, %v1530_v42  ;;  %v1415_v60 = vmul.f32 %v17428_v2, %v17428_v2  ;;  %v1428_v39 = vmul.f32 %v17431_v49, %v17431_v49  ;;  %v1351_v29 = vmul.f32 0.03125, %v1281_v25 }
 0x360   :  { %19105 = vst [vmem:[#allocation134_spill] sm:$0xff] %v17438_v37  ;;  %19106 = vst [vmem:[#allocation135_spill] sm:$0xff] %v17444_v5  ;;  %v1586_v23 = vmul.f32 0.03125, %v1525_v57  ;;  %v1441_v33 = vmul.f32 %v17438_v37, %v17438_v37  ;;  %v1302_v24 = vadd.f32 %v1301_v43, %v17425_v18  ;;  %v1310_v53 = vadd.f32 %v1309_v58, %v17441_v17 }
 0x361   :  { %v1533_v11 = vrot.slane %v1532_v59, 1  ;;  %v1499_v63 = vadd.f32 %v1428_v39, %v1415_v60  ;;  %v17454_v28 = vsub.f32 %v17231_v50, %v1351_v29  ;;  %v17457_v44 = vsub.f32 %v17263_v19, %v1351_v29 }
 0x362   :  { %v17460_v6 = vsub.f32 %v17337_v27, %v1351_v29  ;;  %v17463_v42 = vsub.f32 %v17357_v56, %v1351_v29  ;;  %v1303_v57 = vrot.slane %v1302_v24, 4  ;;  %v17467_v30 = vadd.f32 %v1164_v22, %v17384_v61 }
 0x363   :  { %19107 = vst [vmem:[#allocation136_spill] sm:$0xff] %v17454_v28  ;;  %19108 = vst [vmem:[#allocation137_spill] sm:$0xff] %v17457_v44  ;;  %v1454_v50 = vmul.f32 %v17444_v5, %v17444_v5  ;;  %v1500_v25 = vadd.f32 %v1499_v63, %v1441_v33  ;;  %v1416_v19 = vmul.f32 %v17454_v28, %v17454_v28  ;;  %v1174_v63 = vpop.f32.mrf.mxu1  ;;  %v13940_v5 = vpop.f32.mrf.mxu0  ;;  %v1596_v37 = vadd.f32 1e-05, %v1583_v52 }
 0x364   :  { %19109 = vst [vmem:[#allocation138_spill] sm:$0xff] %v17460_v6  ;;  %19110 = vst [vmem:[#allocation139_spill] sm:$0xff] %v17463_v42  ;;  %v1429_v27 = vmul.f32 %v17457_v44, %v17457_v44  ;;  %v1534_v43 = vadd.f32 %v1533_v11, %v1532_v59  ;;  %v1442_v56 = vmul.f32 %v17460_v6, %v17460_v6 }
 0x365   :  { %v1304_v60 = vadd.f32 %v1303_v57, %v1302_v24  ;;  %v1318_v58 = vadd.f32 %v17467_v30, %v17418_v12  ;;  %v1501_v22 = vadd.f32 %v1500_v25, %v1454_v50  ;;  %v17480_v29 = vadd.f32 %v1123_v8, %v17361_v47  ;;  %v1176_v44 = vpop.f32.mrf.mxu1 }
 0x366   :  { %v1508_v39 = vadd.f32 %v1429_v27, %v1416_v19  ;;  %v17483_v33 = vadd.f32 %v1166_v51, %v17398_v48  ;;  %v1455_v59 = vmul.f32 %v17463_v42, %v17463_v42  ;;  %v17488_v24 = vadd.f32 %v1170_v14, %v17384_v61 }
 0x367   :  { %v1305_v11 = vrot.slane %v1304_v60, 2  ;;  %v17490_v57 = vpop.eup %15718  ;;  %v1502_v50 = vrot.slane %v1501_v22, 4  ;;  %v1311_v47 = vadd.f32 %v1310_v53, %v17480_v29  ;;  %v1599_v19 = vadd.f32 1e-05, %v1586_v23 }
 0x368   :  { %v1509_v25 = vadd.f32 %v1508_v39, %v1442_v56  ;;  %v1327_v8 = vadd.f32 %v17483_v33, %v17421_v16  ;;  %v17495_v51 = vpop.eup %15720  ;;  %v1319_v27 = vadd.f32 %v1318_v58, %v17488_v24  ;;  %v17499_v6 = vadd.f32 %v1172_v20, %v17398_v48  ;;  %v1216_v56 = vpop.f32.mrf.mxu0 }
 0x369   :  { %v1306_v52 = vadd.f32 %v1305_v11, %v1304_v60  ;;  %v1587_v14 = vmul.f32 0.03125, %v1534_v43  ;;  %v1503_v42 = vadd.f32 %v1502_v50, %v1501_v22  ;;  %v1312_v2 = vrot.slane %v1311_v47, 4 }
 0x36a   :  { %v1510_v49 = vadd.f32 %v1509_v25, %v1455_v59  ;;  %15724 = vrsqrt.f32 %v1596_v37  ;;  %v1328_v39 = vadd.f32 %v1327_v8, %v17499_v6  ;;  %v17503_v28 = vadd.f32 %v1174_v63, %v17384_v61 }
 0x36b   :  { %v1307_v53 = vrot.slane %v1306_v52, 1  ;;  %v17505_v23 = vpop.eup %15722  ;;  %v1504_v60 = vrot.slane %v1503_v42, 2  ;;  %v1313_v11 = vadd.f32 %v1312_v2, %v1311_v47  ;;  %v17508_v20 = vadd.f32 %v1213_v34, %v17402_v41 }
 0x36c   :  { %v1511_v58 = vrot.slane %v1510_v49, 4  ;;  %v1320_v22 = vadd.f32 %v1319_v27, %v17503_v28  ;;  %v17512_v59 = vadd.f32 %v1176_v44, %v17398_v48  ;;  %v17515_v37 = vadd.f32 %v1216_v56, %v17402_v41 }
 0x36d   :  { %v1308_v43 = vadd.f32 %v1307_v53, %v1306_v52  ;;  %15726 = vrsqrt.f32 %v1599_v19  ;;  %v1505_v61 = vadd.f32 %v1504_v60, %v1503_v42  ;;  %v1314_v50 = vrot.slane %v1313_v11, 2 }
 0x36e   :  { %v1512_v63 = vadd.f32 %v1511_v58, %v1510_v49  ;;  %v17519_v2 = vadd.f32 %v17435_v62, %v17402_v41  ;;  %v1321_v34 = vrot.slane %v1320_v22, 4  ;;  %v1329_v47 = vadd.f32 %v1328_v39, %v17512_v59 }
 0x36f   :  { %v1354_v25 = vmul.f32 0.03125, %v1308_v43  ;;  %v1506_v8 = vrot.slane %v1505_v61, 1  ;;  %v1315_v27 = vadd.f32 %v1314_v50, %v1313_v11  ;;  %v1336_v48 = vadd.f32 %v17515_v37, %v17508_v20 }
 0x370   :  { %v1513_v52 = vrot.slane %v1512_v63, 2  ;;  %v1600_v19 = vadd.f32 1e-05, %v1587_v14  ;;  %v17543_v58 = vadd.f32 %v13940_v5, %v17402_v41  ;;  %v1322_v43 = vadd.f32 %v1321_v34, %v1320_v22 }
 0x371   :  { %v17525_v44 = vsub.f32 %v17390_v31, %v1354_v25  ;;  %v17528_v49 = vsub.f32 %v17394_v13, %v1354_v25  ;;  %v17531_v42 = vsub.f32 %v17415_v46, %v1354_v25  ;;  %v17534_v62 = vsub.f32 %v17425_v18, %v1354_v25 }
 0x372   :  { %v1507_v56 = vadd.f32 %v1506_v8, %v1505_v61  ;;  %v1514_v53 = vadd.f32 %v1513_v52, %v1512_v63  ;;  %v1316_v39 = vrot.slane %v1315_v27, 1  ;;  %v1330_v63 = vrot.slane %v1329_v47, 4 }
 0x373   :  { %19111 = vst [vmem:[#allocation140_spill] sm:$0xff] %v17525_v44  ;;  %19112 = vst [vmem:[#allocation141_spill] sm:$0xff] %v17528_v49  ;;  %v1419_v60 = vmul.f32 %v17525_v44, %v17525_v44  ;;  %v1432_v31 = vmul.f32 %v17528_v49, %v17528_v49  ;;  %v1445_v13 = vmul.f32 %v17531_v42, %v17531_v42  ;;  %v1323_v49 = vrot.slane %v1322_v43, 2 }
 0x374   :  { %19113 = vst [vmem:[#allocation142_spill] sm:$0xff] %v17531_v42  ;;  %v1584_v46 = vmul.f32 0.03125, %v1507_v56  ;;  %v1515_v11 = vrot.slane %v1514_v53, 1  ;;  %v1317_v18 = vadd.f32 %v1316_v39, %v1315_v27  ;;  %v1458_v14 = vmul.f32 %v17534_v62, %v17534_v62 }
 0x375   :  { %v1535_v61 = vadd.f32 %v1432_v31, %v1419_v60  ;;  %v1337_v50 = vadd.f32 %v1336_v48, %v17519_v2  ;;  %v1638_v42 = vunpack.c.0.s8 %v17199_v54  ;;  %15728 = vrsqrt.f32 %v1600_v19 }
 0x376   :  { %v1597_v25 = vadd.f32 1e-05, %v1584_v46  ;;  %v1516_v8 = vadd.f32 %v1515_v11, %v1514_v53  ;;  %v1355_v52 = vmul.f32 0.03125, %v1317_v18  ;;  %v1331_v5 = vadd.f32 %v1330_v63, %v1329_v47 }
 0x377   :  { %v1536_v41 = vadd.f32 %v1535_v61, %v1445_v13  ;;  %v15725_v56 = vpop.eup %15724  ;;  %v1338_v27 = vadd.f32 %v1337_v50, %v17543_v58  ;;  %v1324_v39 = vadd.f32 %v1323_v49, %v1322_v43  ;;  %v17574_v63 = vsub.s32 %v1638_v42, %v17027_v4 }
 0x378   :  { %v1585_v44 = vmul.f32 0.03125, %v1516_v8  ;;  %v17550_v22 = vsub.f32 %v17406_v9, %v1355_v52  ;;  %v17553_v34 = vsub.f32 %v17412_v36, %v1355_v52  ;;  %15730 = vrsqrt.f32 %v1597_v25 }
 0x379   :  { %v1537_v48 = vadd.f32 %v1536_v41, %v1458_v14  ;;  %v17557_v53 = vsub.f32 %v17441_v17, %v1355_v52  ;;  %v17560_v54 = vsub.f32 %v17480_v29, %v1355_v52  ;;  %v1332_v13 = vrot.slane %v1331_v5, 2  ;;  %19114 = vst [vmem:[#allocation143_spill] sm:$0xff] %v17574_v63 }
 0x37a   :  { %v1598_v19 = vadd.f32 1e-05, %v1585_v44  ;;  %v1420_v47 = vmul.f32 %v17550_v22, %v17550_v22  ;;  %v1433_v9 = vmul.f32 %v17553_v34, %v17553_v34  ;;  %v17566_v36 = vpop.eup %15726  ;;  %v1325_v44 = vrot.slane %v1324_v39, 1 }
 0x37b   :  { %v1538_v60 = vrot.slane %v1537_v48, 4  ;;  %v1446_v31 = vmul.f32 %v17557_v53, %v17557_v53  ;;  %v1459_v17 = vmul.f32 %v17560_v54, %v17560_v54  ;;  %v1339_v46 = vrot.slane %v1338_v27, 4 }
 0x37c   :  { %15732 = vrsqrt.f32 %v1598_v19  ;;  %v1544_v29 = vadd.f32 %v1433_v9, %v1420_v47  ;;  %v1633_v11 = vcombine.low %v17505_v23, %v15725_v56  ;;  %v1333_v14 = vadd.f32 %v1332_v13, %v1331_v5 }
 0x37d   :  { %v1539_v18 = vadd.f32 %v1538_v60, %v1537_v48  ;;  %v1326_v49 = vadd.f32 %v1325_v44, %v1324_v39  ;;  %v1340_v43 = vadd.f32 %v1339_v46, %v1338_v27  ;;  %v1632_v19 = vcombine.low %v17490_v57, %v17495_v51 }
 0x37e   :  { %v1545_v61 = vadd.f32 %v1544_v29, %v1446_v31  ;;  %v1334_v25 = vrot.slane %v1333_v14, 1  ;;  %v1649_v47 = vrot.slane %v1633_v11, %v17574_v63 }
 0x37f   :  { %v1540_v50 = vrot.slane %v1539_v18, 2  ;;  %v1356_v52 = vmul.f32 0.03125, %v1326_v49  ;;  %v1341_v41 = vrot.slane %v1340_v43, 2 }
 0x380   :  { %v1546_v8 = vadd.f32 %v1545_v61, %v1459_v17  ;;  %v1335_v23 = vadd.f32 %v1334_v25, %v1333_v14 }
 0x381   :  { %v1541_v9 = vadd.f32 %v1540_v50, %v1539_v18  ;;  %v17580_v5 = vsub.f32 %v17418_v12, %v1356_v52  ;;  %v17583_v27 = vsub.f32 %v17467_v30, %v1356_v52  ;;  %v17586_v4 = vsub.f32 %v17488_v24, %v1356_v52 }
 0x382   :  { %v1547_v56 = vrot.slane %v1546_v8, 4  ;;  %v17589_v48 = vsub.f32 %v17503_v28, %v1356_v52  ;;  %v1357_v39 = vmul.f32 0.03125, %v1335_v23  ;;  %v1342_v57 = vadd.f32 %v1341_v41, %v1340_v43  ;;  %v15729_v51 = vpop.eup %15728 }
 0x383   :  { %v1542_v42 = vrot.slane %v1541_v9, 1  ;;  %v1421_v31 = vmul.f32 %v17580_v5, %v17580_v5  ;;  %v1434_v12 = vmul.f32 %v17583_v27, %v17583_v27  ;;  %v1447_v30 = vmul.f32 %v17586_v4, %v17586_v4 }
 0x384   :  { %v1548_v60 = vadd.f32 %v1547_v56, %v1546_v8  ;;  %v1460_v24 = vmul.f32 %v17589_v48, %v17589_v48  ;;  %v17600_v28 = vsub.f32 %v17421_v16, %v1357_v39  ;;  %v17603_v13 = vsub.f32 %v17483_v33, %v1357_v39 }
 0x385   :  { %v1543_v17 = vadd.f32 %v1542_v42, %v1541_v9  ;;  %v15731_v29 = vpop.eup %15730  ;;  %v1553_v46 = vadd.f32 %v1434_v12, %v1421_v31  ;;  %v17606_v11 = vsub.f32 %v17499_v6, %v1357_v39  ;;  %v17609_v18 = vsub.f32 %v17512_v59, %v1357_v39 }
 0x386   :  { %v1549_v44 = vrot.slane %v1548_v60, 2  ;;  %v1422_v61 = vmul.f32 %v17600_v28, %v17600_v28  ;;  %v1435_v16 = vmul.f32 %v17603_v13, %v17603_v13  ;;  %v1343_v49 = vrot.slane %v1342_v57, 1 }
 0x387   :  { %v1588_v14 = vmul.f32 0.03125, %v1543_v17  ;;  %v1635_v33 = vcombine.low %v17566_v36, %v15729_v51  ;;  %v1554_v50 = vadd.f32 %v1553_v46, %v1447_v30  ;;  %v1448_v25 = vmul.f32 %v17606_v11, %v17606_v11 }
 0x388   :  { %v1550_v43 = vadd.f32 %v1549_v44, %v1548_v60  ;;  %v1642_v8 = vrot.slane %v1632_v19, %v17574_v63  ;;  %v1461_v59 = vmul.f32 %v17609_v18, %v17609_v18  ;;  %v1562_v52 = vadd.f32 %v1435_v16, %v1422_v61 }
 0x389   :  { %v15733_v6 = vpop.eup %15732  ;;  %v1344_v41 = vadd.f32 %v1343_v49, %v1342_v57  ;;  %v1601_v23 = vadd.f32 1e-05, %v1588_v14  ;;  %v1555_v42 = vadd.f32 %v1554_v50, %v1460_v24  ;;  %v1663_v51 = vrot.slane %v1635_v33, %v17574_v63 }
 0x38a   :  { %v1634_v9 = vcombine.low %v15731_v29, %v15733_v6  ;;  %v1551_v56 = vrot.slane %v1550_v43, 1  ;;  %v1664_v39 = vcombine.low %v1642_v8, %v1649_v47  ;;  %v1563_v31 = vadd.f32 %v1562_v52, %v1448_v25  ;;  %v17645_v6 = vld [vmem:[#allocation7] sm:$0xff] }
 0x38b   :  { %v1358_v36 = vmul.f32 0.03125, %v1344_v41  ;;  %v1556_v30 = vrot.slane %v1555_v42, 4  ;;  %15734 = vrsqrt.f32 %v1601_v23  ;;  %v17655_v23 = vrot.slane %v17645_v6, %v17155_v45 }
 0x38c   :  { %v1656_v60 = vrot.slane %v1634_v9, %v17574_v63  ;;  %v1552_v12 = vadd.f32 %v1551_v56, %v1550_v43  ;;  %v1564_v17 = vadd.f32 %v1563_v31, %v1461_v59  ;;  %v1672_v16 = vrot.slane %v1664_v39, %v17574_v63  ;;  %v679_v43 = vld [vmem:[#allocation6] sm:$0xff] }
 0x38d   :  { %v17624_v19 = vsub.f32 %v17508_v20, %v1358_v36  ;;  %v17627_v44 = vsub.f32 %v17515_v37, %v1358_v36  ;;  %v17630_v57 = vsub.f32 %v17519_v2, %v1358_v36  ;;  %v1557_v29 = vadd.f32 %v1556_v30, %v1555_v42 }
 0x38e   :  { %v1665_v24 = vcombine.low %v1656_v60, %v1663_v51  ;;  %v1589_v47 = vmul.f32 0.03125, %v1552_v12  ;;  %v17633_v46 = vsub.f32 %v17543_v58, %v1358_v36  ;;  %v1565_v14 = vrot.slane %v1564_v17, 4 }
 0x38f   :  { %v1423_v61 = vmul.f32 %v17624_v19, %v17624_v19  ;;  %v1436_v20 = vmul.f32 %v17627_v44, %v17627_v44  ;;  %v1449_v37 = vmul.f32 %v17630_v57, %v17630_v57  ;;  %v1558_v33 = vrot.slane %v1557_v29, 2 }
 0x390   :  { %v1679_v2 = vrot.slane %v1665_v24, %v17574_v63  ;;  %v1602_v49 = vadd.f32 1e-05, %v1589_v47  ;;  %v1566_v58 = vadd.f32 %v1565_v14, %v1564_v17  ;;  %v1462_v50 = vmul.f32 %v17633_v46, %v17633_v46 }
 0x391   :  { %v1571_v25 = vadd.f32 %v1436_v20, %v1423_v61  ;;  %v1559_v59 = vadd.f32 %v1558_v33, %v1557_v29  ;;  %v17651_v42 = vrot.slane %v17645_v6, %v17099_v55  ;;  %v1852_v60 = vrot.slane %v17645_v6, %v17081_v38  ;;  %v19115_v61 = vld [vmem:[#allocation120_spill] sm:$0xff] }
 0x392   :  { %v1680_v8 = vcombine.low %v1672_v16, %v1679_v2  ;;  %15736 = vrsqrt.f32 %v1602_v49  ;;  %v1567_v52 = vrot.slane %v1566_v58, 2  ;;  %v17667_v24 = vrot.slane %v17645_v6, %v17134_v21 }
 0x393   :  { %v1572_v41 = vadd.f32 %v1571_v25, %v1449_v37  ;;  %v1560_v56 = vrot.slane %v1559_v59, 1  ;;  %v17671_v47 = vrot.slane %v17645_v6, %v17076_v35 }
 0x394   :  { %v17647_v9 = vmul.f32 %v1680_v8, %v679_v43  ;;  %v1568_v39 = vadd.f32 %v1567_v52, %v1566_v58 }
 0x395   :  { %v1573_v31 = vadd.f32 %v1572_v41, %v1462_v50  ;;  %v1561_v36 = vadd.f32 %v1560_v56, %v1559_v59 }
 0x396   :  { %v1733_v51 = vrot.slane %v17647_v9, %v17081_v38  ;;  %v17663_v12 = vrot.slane %v17647_v9, %v17134_v21  ;;  %v1569_v30 = vrot.slane %v1568_v39, 1  ;;  %v17677_v37 = vrot.slane %v17647_v9, %v17076_v35 }
 0x397   :  { %v1574_v17 = vrot.slane %v1573_v31, 4  ;;  %v1590_v29 = vmul.f32 0.03125, %v1561_v36 }
 0x398   :  { %v1792_v14 = vmul.f32 %v1733_v51, %v17239_v32  ;;  %v1805_v20 = vmul.f32 %v1733_v51, %v19115_v61  ;;  %v1570_v16 = vadd.f32 %v1569_v30, %v1568_v39  ;;  %v1794_v49 = vmul.f32 %v17663_v12, %v17314_v0  ;;  %v17693_v30 = vpop.eup %15734  ;;  %v19117_v61 = vld [vmem:[#allocation117_spill] sm:$0xff] }
 0x399   :  { %v1575_v2 = vadd.f32 %v1574_v17, %v1573_v31  ;;  %v1807_v33 = vmul.f32 %v17663_v12, %v17317_v15  ;;  %v1603_v43 = vadd.f32 1e-05, %v1590_v29  ;;  %v17685_v32 = vrot.slane %v17647_v9, %v17118_v10  ;;  %v19116_v29 = vld [vmem:[#allocation116_spill] sm:$0xff] }
 0x39a   :  { %v1911_v58 = vadd.f32 %v1852_v60, %v1792_v14  ;;  %v1924_v50 = vadd.f32 %v1852_v60, %v1805_v20  ;;  %v1591_v25 = vmul.f32 0.03125, %v1570_v16  ;;  %v1913_v59 = vadd.f32 %v17667_v24, %v1794_v49 }
 0x39b   :  { %v1576_v8 = vrot.slane %v1575_v2, 2  ;;  %v1926_v52 = vadd.f32 %v17667_v24, %v1807_v33  ;;  %15738 = vrsqrt.f32 %v1603_v43  ;;  %v17691_v0 = vrot.slane %v17645_v6, %v17118_v10 }
 0x39c   :  { %v1963_v41 = vmax.f32 %v1911_v58, 0.0  ;;  %v1976_v56 = vmax.f32 %v1924_v50, 0.0  ;;  %v1604_v15 = vadd.f32 1e-05, %v1591_v25  ;;  %v1965_v31 = vmax.f32 %v1913_v59, 0.0 }
 0x39d   :  { %v1577_v39 = vadd.f32 %v1576_v8, %v1575_v2  ;;  %v1978_v36 = vmax.f32 %v1926_v52, 0.0  ;;  %v1791_v14 = vmul.f32 %v17677_v37, %v19116_v29  ;;  %v1804_v20 = vmul.f32 %v17677_v37, %v19117_v61  ;;  %v14278_v59 = vld [vmem:[#allocation9 + $0x888] ss:$28 sps:$4 sm:$0xff]  }
 0x39e   :  { %v17695_v17 = vpack.c.bf16 %v1976_v56, %v1963_v41  ;;  %v1793_v16 = vmul.f32 %v17685_v32, %v17289_v1  ;;  %15740 = vrsqrt.f32 %v1604_v15  ;;  %v1806_v43 = vmul.f32 %v17685_v32, %v17292_v26  ;;  %v14281_v15 = vld [vmem:[#allocation9 + $0xc08] ss:$28 sps:$4 sm:$0xff]  }
 0x39f   :  { %v17703_v49 = vpop.eup %15736  ;;  %v1578_v33 = vrot.slane %v1577_v39, 1  ;;  %v17705_v2 = vpack.c.bf16 %v1978_v36, %v1965_v31  ;;  %v17711_v58 = vrot.slane %v17647_v9, %v17155_v45  ;;  %v1910_v50 = vadd.f32 %v17671_v47, %v1791_v14  ;;  %v14286_v14 = vld [vmem:[#allocation9 + $0x854] ss:$28 sps:$4 sm:$0xff]  }
 0x3a0   :  { %6687 = vmatprep.mubr.bf16.mxu1 %v17695_v17  ;;  %v1923_v25 = vadd.f32 %v17671_v47, %v1804_v20  ;;  %v1912_v1 = vadd.f32 %v17691_v0, %v1793_v16  ;;  %v1925_v52 = vadd.f32 %v17691_v0, %v1806_v43  ;;  %v1818_v26 = vmul.f32 %v1733_v51, %v17245_v40  ;;  %v19118_v43 = vld [vmem:[#allocation127_spill] sm:$0xff] }
 0x3a1   :  { %v1579_v8 = vadd.f32 %v1578_v33, %v1577_v39  ;;  %6740 = vmatprep.mubr.bf16.mxu0 %v17705_v2  ;;  %v1831_v41 = vmul.f32 %v1733_v51, %v17252_v3  ;;  %v1681_v56 = vcombine.low %v17693_v30, %v17703_v49  ;;  %v1962_v31 = vmax.f32 %v1910_v50, 0.0  ;;  %v14289_v33 = vld [vmem:[#allocation9 + $0xbd4] ss:$28 sps:$4 sm:$0xff]   ;;  %v19119_v51 = vld [vmem:[#allocation118_spill] sm:$0xff] }
 0x3a2   :  { %v1975_v36 = vmax.f32 %v1923_v25, 0.0  ;;  %v1964_v29 = vmax.f32 %v1912_v1, 0.0  ;;  %v1977_v20 = vmax.f32 %v1925_v52, 0.0  ;;  %v1937_v39 = vadd.f32 %v1852_v60, %v1818_v26  ;;  %v19120_v26 = vld [vmem:[#allocation119_spill] sm:$0xff] }
 0x3a3   :  { %v1592_v61 = vmul.f32 0.03125, %v1579_v8  ;;  %v1950_v16 = vadd.f32 %v1852_v60, %v1831_v41  ;;  %v1820_v40 = vmul.f32 %v17663_v12, %v17320_v7  ;;  %v1833_v3 = vmul.f32 %v17663_v12, %v19118_v43  ;;  %v14284_v8 = vld [vmem:[#allocation9 + $0x850] ss:$28 sps:$4 sm:$0xff]   ;;  %v14295_v43 = vld [vmem:[#allocation9 + $0xb9c] ss:$28 sps:$4 sm:$0xff]  }
 0x3a4   :  { %v17723_v45 = vpack.c.bf16 %v1975_v36, %v1962_v31  ;;  %v1817_v30 = vmul.f32 %v17677_v37, %v19119_v51  ;;  %v17731_v50 = vpack.c.bf16 %v1977_v20, %v1964_v29  ;;  %v1989_v25 = vmax.f32 %v1937_v39, 0.0  ;;  %v19121_v31 = vld [vmem:[#allocation124_spill] sm:$0xff]  ;;  %v19122_v29 = vld [vmem:[#allocation125_spill] sm:$0xff]  ;;  %v14287_v39 = vld [vmem:[#allocation9 + $0xbd0] ss:$28 sps:$4 sm:$0xff]  }
 0x3a5   :  { %v1605_v49 = vadd.f32 1e-05, %v1592_v61  ;;  %v2002_v1 = vmax.f32 %v1950_v16, 0.0  ;;  %v1939_v60 = vadd.f32 %v17667_v24, %v1820_v40  ;;  %v1952_v52 = vadd.f32 %v17667_v24, %v1833_v3 }
 0x3a6   :  { %6688 = vmatmul.mubr.bf16.vlgmr.msra.gmra.mxu1 %v17723_v45  ;;  %v1830_v7 = vmul.f32 %v17677_v37, %v19120_v26  ;;  %v1936_v12 = vadd.f32 %v17671_v47, %v1817_v30  ;;  %6741 = vmatmul.mubr.bf16.vlgmr.msra.gmra.mxu0 %v17731_v50  ;;  %v1819_v36 = vmul.f32 %v17685_v32, %v19121_v31  ;;  %v19123_v30 = vld [vmem:[#allocation136_spill] sm:$0xff] }
 0x3a7   :  { %15742 = vrsqrt.f32 %v1605_v49  ;;  %6762 = vmatpush1.bf16.msra.mxu1 %v14278_v59  ;;  %v17740_v41 = vpack.c.bf16 %v2002_v1, %v1989_v25  ;;  %v1832_v61 = vmul.f32 %v17685_v32, %v19122_v29  ;;  %6815 = vmatpush1.bf16.msra.mxu0 %v14281_v15  ;;  %v1991_v20 = vmax.f32 %v1939_v60, 0.0  ;;  %v14292_v59 = vld [vmem:[#allocation9 + $0x81c] ss:$28 sps:$4 sm:$0xff]  }
 0x3a8   :  { %v2004_v24 = vmax.f32 %v1952_v52, 0.0  ;;  %6763 = vmatprep.subr.bf16.mxu1 %v14286_v14  ;;  %v1949_v37 = vadd.f32 %v17671_v47, %v1830_v7  ;;  %v1988_v16 = vmax.f32 %v1936_v12, 0.0  ;;  %v15739_v40 = vpop.eup %15738  ;;  %6816 = vmatprep.subr.bf16.mxu0 %v14289_v33  ;;  %v1938_v3 = vadd.f32 %v17691_v0, %v1819_v36  ;;  %v14290_v14 = vld [vmem:[#allocation9 + $0x818] ss:$28 sps:$4 sm:$0xff]   ;;  %v19125_v47 = vld [vmem:[#allocation137_spill] sm:$0xff] }
 0x3a9   :  { %6697 = vmatprep.mubr.bf16.mxu1 %v17740_v41  ;;  %v1951_v51 = vadd.f32 %v17691_v0, %v1832_v61  ;;  %v1796_v32 = vmul.f32 %v17711_v58, %v19123_v30  ;;  %v14293_v49 = vld [vmem:[#allocation9 + $0xb98] ss:$28 sps:$4 sm:$0xff]   ;;  %v1809_v1 = vmul.f32 %v17711_v58, %v19125_v47  ;;  %v17758_v33 = vrot.slane %v17647_v9, %v17099_v55  ;;  %v14298_v7 = vld [vmem:[#allocation9 + $0x7e4] ss:$28 sps:$4 sm:$0xff]  }
 0x3aa   :  { %v17752_v15 = vpack.c.bf16 %v2004_v24, %v1991_v20  ;;  %v2001_v25 = vmax.f32 %v1949_v37, 0.0  ;;  %v1689_v60 = vrot.slane %v1681_v56, %v17574_v63  ;;  %v1990_v52 = vmax.f32 %v1938_v3, 0.0  ;;  %v14301_v12 = vld [vmem:[#allocation9 + $0xb64] ss:$28 sps:$4 sm:$0xff]   ;;  %v19126_v61 = vld [vmem:[#allocation128_spill] sm:$0xff] }
 0x3ab   :  { %6764 = vmatpush1.bf16.msra.mxu1 %v14284_v8  ;;  %v2003_v0 = vmax.f32 %v1951_v51, 0.0  ;;  %v1915_v26 = vadd.f32 %v17655_v23, %v1796_v32  ;;  %v15741_v31 = vpop.eup %15740  ;;  %6817 = vmatpush1.bf16.msra.mxu0 %v14287_v39  ;;  %v1928_v29 = vadd.f32 %v17655_v23, %v1809_v1  ;;  %v1798_v55 = vmul.f32 %v17758_v33, %v19126_v61  ;;  %v19128_v24 = vld [vmem:[#allocation129_spill] sm:$0xff]  ;;  %v14304_v32 = vld [vmem:[#allocation9 + $0x7ac] ss:$28 sps:$4 sm:$0xff]  }
 0x3ac   :  { %19124 = vst [vmem:[#allocation120_spill] sm:$0xff] %v17752_v15  ;;  %6750 = vmatprep.mubr.bf16.mxu0 %v17752_v15  ;;  %v17763_v36 = vpack.c.bf16 %v2001_v25, %v1988_v16  ;;  %v1682_v20 = vcombine.low %v15739_v40, %v15741_v31  ;;  %6765 = vmatprep.subr.bf16.mxu1 %v14292_v59  ;;  %v14296_v3 = vld [vmem:[#allocation9 + $0x7e0] ss:$28 sps:$4 sm:$0xff]   ;;  %v14307_v1 = vld [vmem:[#allocation9 + $0xb2c] ss:$28 sps:$4 sm:$0xff]  }
 0x3ad   :  { %6818 = vmatprep.subr.bf16.mxu0 %v14295_v43  ;;  %v17768_v56 = vpack.c.bf16 %v2003_v0, %v1990_v52  ;;  %v1967_v8 = vmax.f32 %v1915_v26, 0.0  ;;  %v1811_v37 = vmul.f32 %v17758_v33, %v19128_v24  ;;  %v1980_v39 = vmax.f32 %v1928_v29, 0.0  ;;  %v14299_v30 = vld [vmem:[#allocation9 + $0xb60] ss:$28 sps:$4 sm:$0xff]   ;;  %v14302_v52 = vld [vmem:[#allocation9 + $0x7a8] ss:$28 sps:$4 sm:$0xff]  }
 0x3ae   :  { %6698 = vmatmul.mubr.bf16.gmra.mxu1 %v17763_v36  ;;  %v1917_v16 = vadd.f32 %v17651_v42, %v1798_v55  ;;  %v1696_v51 = vrot.slane %v1682_v20, %v17574_v63  ;;  %v14310_v26 = vld [vmem:[#allocation9 + $0x774] ss:$28 sps:$4 sm:$0xff]   ;;  %v14316_v20 = vld [vmem:[#allocation9 + $0x73c] ss:$28 sps:$4 sm:$0xff]  }
 0x3af   :  { %19127 = vst [vmem:[#allocation116_spill] sm:$0xff] %v17768_v56  ;;  %6751 = vmatmul.mubr.bf16.gmra.mxu0 %v17768_v56  ;;  %6766 = vmatpush1.bf16.msra.mxu1 %v14290_v14  ;;  %v1930_v40 = vadd.f32 %v17651_v42, %v1811_v37  ;;  %v17777_v59 = vpack.c.bf16 %v1980_v39, %v1967_v8  ;;  %v14305_v14 = vld [vmem:[#allocation9 + $0xb28] ss:$28 sps:$4 sm:$0xff]   ;;  %v14308_v29 = vld [vmem:[#allocation9 + $0x770] ss:$28 sps:$4 sm:$0xff]  }
 0x3b0   :  { %6819 = vmatpush1.bf16.msra.mxu0 %v14293_v49  ;;  %v1969_v43 = vmax.f32 %v1917_v16, 0.0  ;;  %6767 = vmatprep.subr.bf16.mxu1 %v14298_v7  ;;  %v1704_v25 = vcombine.low %v1689_v60, %v1696_v51  ;;  %v14313_v60 = vld [vmem:[#allocation9 + $0xaf4] ss:$28 sps:$4 sm:$0xff]   ;;  %v14319_v8 = vld [vmem:[#allocation9 + $0xabc] ss:$28 sps:$4 sm:$0xff]   ;;  %v19143_v56 = vld [vmem:[#allocation126_spill] sm:$0xff] }
 0x3b1   :  { %v1982_v47 = vmax.f32 %v1930_v40, 0.0  ;;  %6820 = vmatprep.subr.bf16.mxu0 %v14301_v12  ;;  %6793 = vmatprep.mubr.bf16.mxu1 %v17777_v59  ;;  %v680_v12 = vld [vmem:[#allocation6 + $0x8] sm:$0x1f]  ;;  %v17786_v37 = vld [vmem:[#allocation7 + $0x8] sm:$0x1f] }
 0x3b2   :  { %v1711_v7 = vrot.slane %v1704_v25, %v17574_v63  ;;  %v14311_v61 = vld [vmem:[#allocation9 + $0xaf0] ss:$28 sps:$4 sm:$0xff]   ;;  %v14317_v39 = vld [vmem:[#allocation9 + $0xab8] ss:$28 sps:$4 sm:$0xff]   ;;  %v14322_v51 = vld [vmem:[#allocation9 + $0x704] ss:$28 sps:$4 sm:$0xff]  }
 0x3b3   :  { %v17780_v0 = vpack.c.bf16 %v1982_v47, %v1969_v43  ;;  %6768 = vmatpush1.bf16.msra.mxu1 %v14296_v3  ;;  %v14314_v3 = vld [vmem:[#allocation9 + $0x738] ss:$28 sps:$4 sm:$0xff]   ;;  %v14325_v40 = vld [vmem:[#allocation9 + $0xa84] ss:$28 sps:$4 sm:$0xff]   ;;  %v19130_v43 = vld [vmem:[#allocation114_spill] sm:$0xff] }
 0x3b4   :  { %v15743_v31 = vpop.eup %15742  ;;  %6821 = vmatpush1.bf16.msra.mxu0 %v14299_v30  ;;  %6769 = vmatprep.subr.bf16.mxu1 %v14304_v32  ;;  %v1896_v32 = vrot.slane %v17786_v37, %v19130_v43  ;;  %v14320_v25 = vld [vmem:[#allocation9 + $0x700] ss:$28 sps:$4 sm:$0xff]  }
 0x3b5   :  { %19129 = vst [vmem:[#allocation117_spill] sm:$0xff] %v17780_v0  ;;  %v1703_v49 = vrot.slane %v15743_v31, %v17574_v63  ;;  %6846 = vmatprep.mubr.bf16.mxu0 %v17780_v0  ;;  %6822 = vmatprep.subr.bf16.mxu0 %v14307_v1  ;;  %v14323_v47 = vld [vmem:[#allocation9 + $0xa80] ss:$28 sps:$4 sm:$0xff]   ;;  %v14328_v1 = vld [vmem:[#allocation9 + $0xa4c] ss:$28 sps:$4 sm:$0xff]   ;;  %v19141_v0 = vld [vmem:[#allocation135_spill] sm:$0xff] }
 0x3b7   :  { %v1718_v55 = vrot.slane %v1703_v49, %v17574_v63  ;;  %6770 = vmatpush1.bf16.msra.mxu1 %v14302_v52  ;;  %v19139_v63 = vld [vmem:[#allocation131_spill] sm:$0xff] }
 0x3b8   :  { %6823 = vmatpush1.bf16.msra.mxu0 %v14305_v14  ;;  %6771 = vmatprep.subr.bf16.mxu1 %v14310_v26  ;;  %v14331_v26 = vld [vmem:[#allocation9 + $0xdcc] ss:$28 sps:$4 sm:$0xff]  }
 0x3b9   :  { %v1719_v24 = vcombine.low %v1711_v7, %v1718_v55  ;;  %6824 = vmatprep.subr.bf16.mxu0 %v14313_v60  ;;  %v14326_v7 = vld [vmem:[#allocation9 + $0xa48] ss:$28 sps:$4 sm:$0xff]   ;;  %v14337_v55 = vld [vmem:[#allocation9 + $0xd94] ss:$28 sps:$4 sm:$0xff]  }
 0x3ba   :  { %v14329_v60 = vld [vmem:[#allocation9 + $0xdc8] ss:$28 sps:$4 sm:$0xff]  }
 0x3bb   :  { %v17788_v16 = vmul.f32 %v1719_v24, %v680_v12  ;;  %6772 = vmatpush1.bf16.msra.mxu1 %v14308_v29 }
 0x3bc   :  { %6825 = vmatpush1.bf16.msra.mxu0 %v14311_v61  ;;  %6773 = vmatprep.subr.bf16.mxu1 %v14316_v20  ;;  %v14334_v61 = vld [vmem:[#allocation9 + $0xa14] ss:$28 sps:$4 sm:$0xff]  }
 0x3bd   :  { %v1777_v30 = vrot.slane %v17788_v16, %v19130_v43  ;;  %6826 = vmatprep.subr.bf16.mxu0 %v14319_v8  ;;  %v17804_v8 = vrot.slane %v17786_v37, %v17134_v21 }
 0x3bf   :  { %v1803_v52 = vmul.f32 %v1777_v30, %v17624_v19  ;;  %v1816_v14 = vmul.f32 %v1777_v30, %v17627_v44  ;;  %6774 = vmatpush1.bf16.msra.mxu1 %v14314_v3  ;;  %v14332_v19 = vld [vmem:[#allocation9 + $0xa10] ss:$28 sps:$4 sm:$0xff]   ;;  %v17800_v44 = vrot.slane %v17788_v16, %v17134_v21 }
 0x3c0   :  { %6827 = vmatpush1.bf16.msra.mxu0 %v14317_v39  ;;  %6775 = vmatprep.subr.bf16.mxu1 %v14322_v51  ;;  %v14335_v3 = vld [vmem:[#allocation9 + $0xd90] ss:$28 sps:$4 sm:$0xff]   ;;  %v14340_v39 = vld [vmem:[#allocation9 + $0x9dc] ss:$28 sps:$4 sm:$0xff]  }
 0x3c1   :  { %v1922_v31 = vadd.f32 %v1896_v32, %v1803_v52  ;;  %v1935_v49 = vadd.f32 %v1896_v32, %v1816_v14  ;;  %6828 = vmatprep.subr.bf16.mxu0 %v14325_v40  ;;  %v1828_v24 = vmul.f32 %v17800_v44, %v17606_v11  ;;  %v1841_v51 = vmul.f32 %v17800_v44, %v17609_v18  ;;  %v14343_v40 = vld [vmem:[#allocation9 + $0xd5c] ss:$28 sps:$4 sm:$0xff]   ;;  %v14346_v14 = vld [vmem:[#allocation9 + $0x9a4] ss:$28 sps:$4 sm:$0xff]  }
 0x3c2   :  { %v1842_v18 = vmul.f32 %v1777_v30, %v17633_v46  ;;  %v1745_v46 = vrot.slane %v17647_v9, %v19130_v43 }
 0x3c3   :  { %v1974_v12 = vmax.f32 %v1922_v31, 0.0  ;;  %v1987_v29 = vmax.f32 %v1935_v49, 0.0  ;;  %6776 = vmatpush1.bf16.msra.mxu1 %v14320_v25  ;;  %v1947_v25 = vadd.f32 %v17804_v8, %v1828_v24  ;;  %v1960_v52 = vadd.f32 %v17804_v8, %v1841_v51  ;;  %v14353_v51 = vld [vmem:[#allocation9 + $0xce8] ss:$28 sps:$4 sm:$0xff]  }
 0x3c4   :  { %6829 = vmatpush1.bf16.msra.mxu0 %v14323_v47  ;;  %6777 = vmatprep.subr.bf16.mxu1 %v14328_v1  ;;  %v14338_v47 = vld [vmem:[#allocation9 + $0x9d8] ss:$28 sps:$4 sm:$0xff]   ;;  %v1829_v49 = vmul.f32 %v1777_v30, %v17630_v57 }
 0x3c5   :  { %v17796_v20 = vpack.c.bf16 %v1987_v29, %v1974_v12  ;;  %6830 = vmatprep.subr.bf16.mxu0 %v14331_v26  ;;  %v14341_v1 = vld [vmem:[#allocation9 + $0xd58] ss:$28 sps:$4 sm:$0xff]   ;;  %v14349_v26 = vld [vmem:[#allocation9 + $0xd24] ss:$28 sps:$4 sm:$0xff]   ;;  %v1999_v31 = vmax.f32 %v1947_v25, 0.0  ;;  %v2012_v11 = vmax.f32 %v1960_v52, 0.0  ;;  %v1961_v29 = vadd.f32 %v1896_v32, %v1842_v18 }
 0x3c6   :  { %v1948_v12 = vadd.f32 %v1896_v32, %v1829_v49  ;;  %v14358_v57 = vld [vmem:[#allocation9 + $0x934] ss:$28 sps:$4 sm:$0xff]   ;;  %v17824_v52 = vrot.slane %v17645_v6, %v19130_v43  ;;  %v19133_v49 = vld [vmem:[#allocation133_spill] sm:$0xff] }
 0x3c7   :  { %6778 = vmatpush2.bf16.msra.mxu1 %v14326_v7  ;;  %v14344_v7 = vld [vmem:[#allocation9 + $0x9a0] ss:$28 sps:$4 sm:$0xff]   ;;  %v19131_v30 = vld [vmem:[#allocation111_spill] sm:$0xff]  ;;  %v1808_v18 = vmul.f32 %v1745_v46, %v19133_v49  ;;  %v1837_v49 = vmul.f32 %v17758_v33, %v19139_v63  ;;  %v17850_v63 = vrot.slane %v17788_v16, %v17081_v38 }
 0x3c8   :  { %6831 = vmatpush2.bf16.msra.mxu0 %v14329_v60  ;;  %6779 = vmatprep.subr.bf16.mxu1 %v14334_v61  ;;  %v17814_v60 = vpack.c.bf16 %v2012_v11, %v1999_v31  ;;  %v14347_v61 = vld [vmem:[#allocation9 + $0xd20] ss:$28 sps:$4 sm:$0xff]   ;;  %v2000_v24 = vmax.f32 %v1948_v12, 0.0  ;;  %v1753_v25 = vrot.slane %v17647_v9, %v19131_v30 }
 0x3c9   :  { %6832 = vmatprep.subr.bf16.mxu0 %v14337_v55  ;;  %v14352_v55 = vld [vmem:[#allocation9 + $0x96c] ss:$28 sps:$4 sm:$0xff]   ;;  %v14367_v31 = vld [vmem:[#allocation9 + $0xc7c] ss:$28 sps:$4 sm:$0xff]  }
 0x3ca   :  { %v19132_v11 = vld [vmem:[#allocation132_spill] sm:$0xff]  ;;  %v1836_v15 = vmul.f32 %v1753_v25, %v19143_v56  ;;  %v14377_v56 = vld [vmem:[#allocation9 + $0x1308] ss:$28 sps:$4 sm:$0xff]  }
 0x3cb   :  { %6780 = vmatpush2.bf16.msra.mxu1 %v14332_v19  ;;  %v14355_v19 = vld [vmem:[#allocation9 + $0xcec] ss:$28 sps:$4 sm:$0xff]   ;;  %v1795_v9 = vmul.f32 %v1745_v46, %v19132_v11 }
 0x3cc   :  { %6833 = vmatpush2.bf16.msra.mxu0 %v14335_v3  ;;  %6781 = vmatprep.subr.bf16.mxu1 %v14340_v39  ;;  %v2013_v3 = vmax.f32 %v1961_v29, 0.0  ;;  %v14350_v39 = vld [vmem:[#allocation9 + $0x968] ss:$28 sps:$4 sm:$0xff]  }
 0x3cd   :  { %6834 = vmatprep.subr.bf16.mxu0 %v14343_v40  ;;  %v14361_v40 = vld [vmem:[#allocation9 + $0xcb4] ss:$28 sps:$4 sm:$0xff]   ;;  %v19135_v29 = vld [vmem:[#allocation122_spill] sm:$0xff]  ;;  %v1914_v43 = vadd.f32 %v17824_v52, %v1795_v9 }
 0x3ce   :  { %v17820_v32 = vpack.c.bf16 %v2013_v3, %v2000_v24  ;;  %v19137_v24 = vld [vmem:[#allocation138_spill] sm:$0xff]  ;;  %v14362_v3 = vld [vmem:[#allocation9 + $0x8f8] ss:$28 sps:$4 sm:$0xff]  }
 0x3cf   :  { %6782 = vmatpush2.bf16.msra.mxu1 %v14338_v47  ;;  %v14356_v47 = vld [vmem:[#allocation9 + $0x930] ss:$28 sps:$4 sm:$0xff]  }
 0x3d0   :  { %6835 = vmatpush2.bf16.msra.mxu0 %v14341_v1  ;;  %6783 = vmatprep.subr.bf16.mxu1 %v14346_v14  ;;  %v14359_v1 = vld [vmem:[#allocation9 + $0xcb0] ss:$28 sps:$4 sm:$0xff]   ;;  %v17828_v14 = vrot.slane %v17645_v6, %v19131_v30  ;;  %v1822_v6 = vmul.f32 %v17711_v58, %v19137_v24 }
 0x3d1   :  { %6836 = vmatprep.subr.bf16.mxu0 %v14349_v26  ;;  %v14364_v26 = vld [vmem:[#allocation9 + $0x8fc] ss:$28 sps:$4 sm:$0xff]   ;;  %v19138_v30 = vld [vmem:[#allocation130_spill] sm:$0xff] }
 0x3d2   :  { %v1824_v11 = vmul.f32 %v17758_v33, %v19138_v30  ;;  %v1941_v30 = vadd.f32 %v17655_v23, %v1822_v6  ;;  %v14371_v33 = vld [vmem:[#allocation9 + $0xc40] ss:$28 sps:$4 sm:$0xff]   ;;  %v19140_v6 = vld [vmem:[#allocation134_spill] sm:$0xff] }
 0x3d3   :  { %6784 = vmatpush2.bf16.msra.mxu1 %v14344_v7  ;;  %v19134_v7 = vld [vmem:[#allocation121_spill] sm:$0xff]  ;;  %v1821_v21 = vmul.f32 %v1745_v46, %v19140_v6 }
 0x3d4   :  { %6837 = vmatpush2.bf16.msra.mxu0 %v14347_v61  ;;  %6785 = vmatprep.subr.bf16.mxu1 %v14352_v55  ;;  %v1797_v12 = vmul.f32 %v1753_v25, %v19134_v7  ;;  %v1810_v61 = vmul.f32 %v1753_v25, %v19135_v29  ;;  %v19136_v55 = vld [vmem:[#allocation139_spill] sm:$0xff]  ;;  %v14370_v7 = vld [vmem:[#allocation9 + $0x8c4] ss:$28 sps:$4 sm:$0xff]   ;;  %v1943_v9 = vadd.f32 %v17651_v42, %v1824_v11  ;;  %v1993_v24 = vmax.f32 %v1941_v30, 0.0 }
 0x3d5   :  { %6838 = vmatprep.subr.bf16.mxu0 %v14355_v19  ;;  %v1835_v19 = vmul.f32 %v17711_v58, %v19136_v55  ;;  %v14373_v29 = vld [vmem:[#allocation9 + $0xc44] ss:$28 sps:$4 sm:$0xff]   ;;  %v1834_v11 = vmul.f32 %v1745_v46, %v19141_v0  ;;  %v1815_v0 = vmul.f32 %v17800_v44, %v17603_v13  ;;  %v1955_v13 = vadd.f32 %v17828_v14, %v1836_v15 }
 0x3d6   :  { %v1929_v58 = vadd.f32 %v17828_v14, %v1810_v61  ;;  %v14368_v55 = vld [vmem:[#allocation9 + $0x8c0] ss:$28 sps:$4 sm:$0xff]   ;;  %v14379_v61 = vld [vmem:[#allocation9 + $0x130c] ss:$28 sps:$4 sm:$0xff]  }
 0x3d7   :  { %6786 = vmatpush2.bf16.msra.mxu1 %v14350_v39  ;;  %v14365_v39 = vld [vmem:[#allocation9 + $0xc78] ss:$28 sps:$4 sm:$0xff]   ;;  %v14394_v6 = vld [vmem:[#allocation9 + $0xee4] ss:$28 sps:$4 sm:$0xff]  }
 0x3d8   :  { %6839 = vmatpush2.bf16.msra.mxu0 %v14353_v51  ;;  %6787 = vmatprep.subr.bf16.mxu1 %v14358_v57  ;;  %v1927_v51 = vadd.f32 %v17824_v52, %v1808_v18  ;;  %v1916_v57 = vadd.f32 %v17828_v14, %v1797_v12  ;;  %v1956_v18 = vadd.f32 %v17651_v42, %v1837_v49  ;;  %v19142_v42 = vld [vmem:[#allocation123_spill] sm:$0xff] }
 0x3d9   :  { %6840 = vmatprep.subr.bf16.mxu0 %v14361_v40  ;;  %v1954_v40 = vadd.f32 %v17655_v23, %v1835_v19  ;;  %v17856_v12 = vrot.slane %v17786_v37, %v17081_v38  ;;  %v1823_v49 = vmul.f32 %v1753_v25, %v19142_v42  ;;  %v14382_v25 = vld [vmem:[#allocation9 + $0xf54] ss:$28 sps:$4 sm:$0xff]   ;;  %v14397_v42 = vld [vmem:[#allocation9 + $0x1264] ss:$28 sps:$4 sm:$0xff]  }
 0x3da   :  { %v1968_v23 = vmax.f32 %v1916_v57, 0.0  ;;  %v1995_v57 = vmax.f32 %v1943_v9, 0.0 }
 0x3db   :  { %6788 = vmatpush2.bf16.msra.mxu1 %v14356_v47  ;;  %v14376_v47 = vld [vmem:[#allocation9 + $0xf8c] ss:$28 sps:$4 sm:$0xff]   ;;  %v2006_v19 = vmax.f32 %v1954_v40, 0.0  ;;  %v1953_v40 = vadd.f32 %v17824_v52, %v1834_v11 }
 0x3dc   :  { %6841 = vmatpush2.bf16.msra.mxu0 %v14359_v1  ;;  %6789 = vmatprep.subr.bf16.mxu1 %v14364_v26  ;;  %v1966_v1 = vmax.f32 %v1914_v43, 0.0  ;;  %v1979_v26 = vmax.f32 %v1927_v51, 0.0  ;;  %v1800_v43 = vmul.f32 %v17850_v63, %v17550_v22  ;;  %v14374_v51 = vld [vmem:[#allocation9 + $0xf88] ss:$28 sps:$4 sm:$0xff]  }
 0x3dd   :  { %6842 = vmatprep.subr.bf16.mxu0 %v14367_v31  ;;  %v1981_v31 = vmax.f32 %v1929_v58, 0.0  ;;  %v17874_v22 = vpack.c.bf16 %v2006_v19, %v1993_v24  ;;  %v1940_v58 = vadd.f32 %v17824_v52, %v1821_v21  ;;  %v1934_v21 = vadd.f32 %v17804_v8, %v1815_v0  ;;  %v14383_v52 = vld [vmem:[#allocation9 + $0x12d0] ss:$28 sps:$4 sm:$0xff]   ;;  %v14386_v19 = vld [vmem:[#allocation9 + $0xf18] ss:$28 sps:$4 sm:$0xff]  }
 0x3de   :  { %v17870_v46 = vpack.c.bf16 %v1979_v26, %v1966_v1  ;;  %v14388_v1 = vld [vmem:[#allocation9 + $0xf1c] ss:$28 sps:$4 sm:$0xff]   ;;  %v14398_v0 = vld [vmem:[#allocation9 + $0xea8] ss:$28 sps:$4 sm:$0xff]  }
 0x3df   :  { %6790 = vmatpush2.bf16.msra.mxu1 %v14362_v3  ;;  %v1813_v3 = vmul.f32 %v17850_v63, %v17553_v34  ;;  %v14385_v34 = vld [vmem:[#allocation9 + $0x12d4] ss:$28 sps:$4 sm:$0xff]   ;;  %v1992_v15 = vmax.f32 %v1940_v58, 0.0 }
 0x3e0   :  { %6843 = vmatpush2.bf16.msra.mxu0 %v14365_v39  ;;  %6791 = vmatprep.subr.bf16.mxu1 %v14370_v7  ;;  %v2008_v39 = vmax.f32 %v1956_v18, 0.0  ;;  %v1802_v7 = vmul.f32 %v17800_v44, %v17600_v28  ;;  %v1942_v28 = vadd.f32 %v17828_v14, %v1823_v49  ;;  %v1919_v44 = vadd.f32 %v17856_v12, %v1800_v43  ;;  %v14389_v24 = vld [vmem:[#allocation9 + $0x1298] ss:$28 sps:$4 sm:$0xff]   ;;  %v14404_v58 = vld [vmem:[#allocation9 + $0xe70] ss:$28 sps:$4 sm:$0xff]  }
 0x3e1   :  { %6844 = vmatprep.subr.bf16.mxu0 %v14373_v29  ;;  %v17872_v29 = vpack.c.bf16 %v1981_v31, %v1968_v23  ;;  %v1932_v30 = vadd.f32 %v17856_v12, %v1813_v3  ;;  %v2005_v14 = vmax.f32 %v1953_v40, 0.0  ;;  %v2007_v18 = vmax.f32 %v1955_v13, 0.0  ;;  %v14391_v31 = vld [vmem:[#allocation9 + $0x129c] ss:$28 sps:$4 sm:$0xff]   ;;  %v14407_v40 = vld [vmem:[#allocation9 + $0x11f0] ss:$28 sps:$4 sm:$0xff]  }
 0x3e2   :  { %v1994_v9 = vmax.f32 %v1942_v28, 0.0  ;;  %v1971_v26 = vmax.f32 %v1919_v44, 0.0  ;;  %v14412_v28 = vld [vmem:[#allocation9 + $0xe3c] ss:$28 sps:$4 sm:$0xff]  }
 0x3e3   :  { %6792 = vmatpush2.bf16.msra.mxu1 %v14368_v55  ;;  %v17883_v55 = vpack.c.bf16 %v2008_v39, %v1995_v57  ;;  %v1984_v23 = vmax.f32 %v1932_v30, 0.0  ;;  %v17890_v11 = vpack.c.bf16 %v2005_v14, %v1992_v15  ;;  %v14395_v57 = vld [vmem:[#allocation9 + $0x1260] ss:$28 sps:$4 sm:$0xff]   ;;  %v14400_v39 = vld [vmem:[#allocation9 + $0xeac] ss:$28 sps:$4 sm:$0xff]  }
 0x3e4   :  { %6845 = vmatpush2.bf16.msra.mxu0 %v14371_v33  ;;  %6867 = vmatprep.subr.bf16.mxu1 %v14376_v47  ;;  %v14380_v33 = vld [vmem:[#allocation9 + $0xf50] ss:$28 sps:$4 sm:$0xff]   ;;  %v1921_v47 = vadd.f32 %v17804_v8, %v1802_v7  ;;  %v17892_v49 = vpack.c.bf16 %v2007_v18, %v1994_v9  ;;  %v14410_v13 = vld [vmem:[#allocation9 + $0xe38] ss:$28 sps:$4 sm:$0xff]   ;;  %v14422_v14 = vld [vmem:[#allocation9 + $0x1148] ss:$28 sps:$4 sm:$0xff]  }
 0x3e5   :  { %6920 = vmatprep.subr.bf16.mxu0 %v14379_v61  ;;  %v1986_v61 = vmax.f32 %v1934_v21, 0.0  ;;  %v17894_v43 = vpack.c.bf16 %v1984_v23, %v1971_v26  ;;  %v14403_v7 = vld [vmem:[#allocation9 + $0x122c] ss:$28 sps:$4 sm:$0xff]   ;;  %v14415_v44 = vld [vmem:[#allocation9 + $0x11bc] ss:$28 sps:$4 sm:$0xff]  }
 0x3e6   :  { %6794 = vmatmul.mubr.bf16.vlgmr.msra.gmra.mxu1 %v17870_v46  ;;  %v1973_v8 = vmax.f32 %v1921_v47, 0.0  ;;  %v14413_v30 = vld [vmem:[#allocation9 + $0x11b8] ss:$28 sps:$4 sm:$0xff]   ;;  %v14416_v47 = vld [vmem:[#allocation9 + $0xe00] ss:$28 sps:$4 sm:$0xff]  }
 0x3e7   :  { %6847 = vmatmul.mubr.bf16.vlgmr.msra.gmra.mxu0 %v17872_v29  ;;  %6803 = vmatprep.mubr.bf16.mxu1 %v17874_v22  ;;  %v14421_v21 = vld [vmem:[#allocation9 + $0x1184] ss:$28 sps:$4 sm:$0xff]   ;;  %v14424_v15 = vld [vmem:[#allocation9 + $0x114c] ss:$28 sps:$4 sm:$0xff]   ;;  %v14433_v26 = vld [vmem:[#allocation9 + $0x1494] ss:$28 sps:$4 sm:$0xff]  }
 0x3e8   :  { %6856 = vmatprep.mubr.bf16.mxu0 %v17883_v55  ;;  %6868 = vmatpush1.bf16.msra.mxu1 %v14374_v51  ;;  %v17897_v3 = vpack.c.bf16 %v1986_v61, %v1973_v8  ;;  %v14392_v51 = vld [vmem:[#allocation9 + $0xee0] ss:$28 sps:$4 sm:$0xff]   ;;  %v14427_v9 = vld [vmem:[#allocation9 + $0x14cc] ss:$28 sps:$4 sm:$0xff]   ;;  %v14434_v61 = vld [vmem:[#allocation9 + $0x10d8] ss:$28 sps:$4 sm:$0xff]  }
 0x3e9   :  { %6921 = vmatpush1.bf16.msra.mxu0 %v14377_v56  ;;  %6869 = vmatprep.subr.bf16.mxu1 %v14382_v25  ;;  %v14401_v56 = vld [vmem:[#allocation9 + $0x1228] ss:$28 sps:$4 sm:$0xff]   ;;  %v14406_v25 = vld [vmem:[#allocation9 + $0xe74] ss:$28 sps:$4 sm:$0xff]   ;;  %v14436_v8 = vld [vmem:[#allocation9 + $0x10dc] ss:$28 sps:$4 sm:$0xff]  }
 0x3ea   :  { %6922 = vmatprep.subr.bf16.mxu0 %v14385_v34  ;;  %v14409_v34 = vld [vmem:[#allocation9 + $0x11f4] ss:$28 sps:$4 sm:$0xff]   ;;  %v14425_v18 = vld [vmem:[#allocation9 + $0x14c8] ss:$28 sps:$4 sm:$0xff]  }
 0x3eb   :  { %v14428_v23 = vld [vmem:[#allocation9 + $0x1110] ss:$28 sps:$4 sm:$0xff]  }
 0x3ec   :  { %6870 = vmatpush1.bf16.msra.mxu1 %v14380_v33  ;;  %v14418_v33 = vld [vmem:[#allocation9 + $0xe04] ss:$28 sps:$4 sm:$0xff]  }
 0x3ed   :  { %6923 = vmatpush1.bf16.msra.mxu0 %v14383_v52  ;;  %6871 = vmatprep.subr.bf16.mxu1 %v14388_v1  ;;  %v14419_v52 = vld [vmem:[#allocation9 + $0x1180] ss:$28 sps:$4 sm:$0xff]   ;;  %v14430_v1 = vld [vmem:[#allocation9 + $0x1114] ss:$28 sps:$4 sm:$0xff]  }
 0x3ee   :  { %6804 = vmatmul.mubr.bf16.gmra.mxu1 %v17890_v11  ;;  %6924 = vmatprep.subr.bf16.mxu0 %v14391_v31  ;;  %v14431_v31 = vld [vmem:[#allocation9 + $0x1490] ss:$28 sps:$4 sm:$0xff]  }
 0x3ef   :  { %6857 = vmatmul.mubr.bf16.gmra.mxu0 %v17892_v49  ;;  %6899 = vmatprep.mubr.bf16.mxu1 %v17894_v43 }
 0x3f0   :  { %6872 = vmatpush1.bf16.msra.mxu1 %v14386_v19  ;;  %6952 = vmatprep.mubr.bf16.mxu0 %v17897_v3  ;;  %v14439_v19 = vld [vmem:[#allocation9 + $0x145c] ss:$28 sps:$4 sm:$0xff]  }
 0x3f1   :  { %6925 = vmatpush1.bf16.msra.mxu0 %v14389_v24  ;;  %6873 = vmatprep.subr.bf16.mxu1 %v14394_v6  ;;  %v14437_v24 = vld [vmem:[#allocation9 + $0x1458] ss:$28 sps:$4 sm:$0xff]   ;;  %v14442_v6 = vld [vmem:[#allocation9 + $0x10a4] ss:$28 sps:$4 sm:$0xff]  }
 0x3f2   :  { %6926 = vmatprep.subr.bf16.mxu0 %v14397_v42  ;;  %v14445_v42 = vld [vmem:[#allocation9 + $0x1424] ss:$28 sps:$4 sm:$0xff]  }
 0x3f4   :  { %6874 = vmatpush1.bf16.msra.mxu1 %v14392_v51  ;;  %v14440_v51 = vld [vmem:[#allocation9 + $0x10a0] ss:$28 sps:$4 sm:$0xff]  }
 0x3f5   :  { %6927 = vmatpush1.bf16.msra.mxu0 %v14395_v57  ;;  %6875 = vmatprep.subr.bf16.mxu1 %v14400_v39  ;;  %v14443_v57 = vld [vmem:[#allocation9 + $0x1420] ss:$28 sps:$4 sm:$0xff]   ;;  %v14448_v39 = vld [vmem:[#allocation9 + $0x106c] ss:$28 sps:$4 sm:$0xff]  }
 0x3f6   :  { %6928 = vmatprep.subr.bf16.mxu0 %v14403_v7  ;;  %v14446_v7 = vld [vmem:[#allocation9 + $0x1068] ss:$28 sps:$4 sm:$0xff]  }
 0x3f8   :  { %6876 = vmatpush1.bf16.msra.mxu1 %v14398_v0  ;;  %v14451_v0 = vld [vmem:[#allocation9 + $0x13ec] ss:$28 sps:$4 sm:$0xff]  }
 0x3f9   :  { %6929 = vmatpush1.bf16.msra.mxu0 %v14401_v56  ;;  %6877 = vmatprep.subr.bf16.mxu1 %v14406_v25  ;;  %v14449_v56 = vld [vmem:[#allocation9 + $0x13e8] ss:$28 sps:$4 sm:$0xff]   ;;  %v14454_v25 = vld [vmem:[#allocation9 + $0x1034] ss:$28 sps:$4 sm:$0xff]  }
 0x3fa   :  { %6930 = vmatprep.subr.bf16.mxu0 %v14409_v34  ;;  %v1761_v34 = vrot.slane %v17788_v16, %v17076_v35 }
 0x3fc   :  { %6878 = vmatpush1.bf16.msra.mxu1 %v14404_v58  ;;  %v1769_v58 = vrot.slane %v17788_v16, %v17118_v10  ;;  %v1888_v16 = vrot.slane %v17786_v37, %v17118_v10 }
 0x3fd   :  { %6931 = vmatpush1.bf16.msra.mxu0 %v14407_v40  ;;  %6879 = vmatprep.subr.bf16.mxu1 %v14412_v28  ;;  %v14452_v40 = vld [vmem:[#allocation9 + $0x1030] ss:$28 sps:$4 sm:$0xff]  }
 0x3fe   :  { %6932 = vmatprep.subr.bf16.mxu0 %v14415_v44  ;;  %v14457_v28 = vld [vmem:[#allocation9 + $0x13b4] ss:$28 sps:$4 sm:$0xff]   ;;  %v14460_v44 = vld [vmem:[#allocation9 + $0xffc] ss:$28 sps:$4 sm:$0xff]  }
 0x400   :  { %6880 = vmatpush1.bf16.msra.mxu1 %v14410_v13  ;;  %v14455_v13 = vld [vmem:[#allocation9 + $0x13b0] ss:$28 sps:$4 sm:$0xff]  }
 0x401   :  { %6933 = vmatpush1.bf16.msra.mxu0 %v14413_v30  ;;  %6881 = vmatprep.subr.bf16.mxu1 %v14418_v33  ;;  %v19144_v30 = vld [vmem:[#allocation140_spill] sm:$0xff] }
 0x402   :  { %6934 = vmatprep.subr.bf16.mxu0 %v14421_v21  ;;  %v1799_v33 = vmul.f32 %v1761_v34, %v19144_v30  ;;  %v14478_v30 = vld [vmem:[#allocation9 + $0x1654] ss:$28 sps:$4 sm:$0xff]  }
 0x404   :  { %6882 = vmatpush1.bf16.msra.mxu1 %v14416_v47  ;;  %v19145_v47 = vld [vmem:[#allocation141_spill] sm:$0xff] }
 0x405   :  { %6935 = vmatpush1.bf16.msra.mxu0 %v14419_v52  ;;  %6883 = vmatprep.subr.bf16.mxu1 %v14424_v15  ;;  %v1812_v21 = vmul.f32 %v1761_v34, %v19145_v47  ;;  %v1880_v52 = vrot.slane %v17786_v37, %v17076_v35  ;;  %v1801_v15 = vmul.f32 %v1769_v58, %v17580_v5  ;;  %v14464_v37 = vld [vmem:[#allocation9 + $0xfc0] ss:$28 sps:$4 sm:$0xff]  }
 0x406   :  { %6936 = vmatprep.subr.bf16.mxu0 %v14427_v9  ;;  %v14458_v9 = vld [vmem:[#allocation9 + $0xff8] ss:$28 sps:$4 sm:$0xff]  }
 0x407   :  { %v1920_v5 = vadd.f32 %v1888_v16, %v1801_v15  ;;  %v14481_v47 = vld [vmem:[#allocation9 + $0x15c] ss:$28 sps:$4 sm:$0xff]  }
 0x408   :  { %6884 = vmatpush2.bf16.msra.mxu1 %v14422_v14  ;;  %v1814_v14 = vmul.f32 %v1769_v58, %v17583_v27 }
 0x409   :  { %6937 = vmatpush2.bf16.msra.mxu0 %v14425_v18  ;;  %6885 = vmatprep.subr.bf16.mxu1 %v14430_v1  ;;  %v14463_v18 = vld [vmem:[#allocation9 + $0x137c] ss:$28 sps:$4 sm:$0xff]   ;;  %v1826_v1 = vmul.f32 %v17850_v63, %v17557_v53 }
 0x40a   :  { %6938 = vmatprep.subr.bf16.mxu0 %v14433_v26  ;;  %v1839_v26 = vmul.f32 %v17850_v63, %v17560_v54  ;;  %v1933_v27 = vadd.f32 %v1888_v16, %v1814_v14  ;;  %v14467_v53 = vld [vmem:[#allocation9 + $0x1340] ss:$28 sps:$4 sm:$0xff]  }
 0x40c   :  { %6886 = vmatpush2.bf16.msra.mxu1 %v14428_v23  ;;  %v14461_v23 = vld [vmem:[#allocation9 + $0x1378] ss:$28 sps:$4 sm:$0xff]  }
 0x40d   :  { %6939 = vmatpush2.bf16.msra.mxu0 %v14431_v31  ;;  %6887 = vmatprep.subr.bf16.mxu1 %v14436_v8  ;;  %v14466_v31 = vld [vmem:[#allocation9 + $0xfc4] ss:$28 sps:$4 sm:$0xff]   ;;  %v1918_v8 = vadd.f32 %v1880_v52, %v1799_v33 }
 0x40e   :  { %6940 = vmatprep.subr.bf16.mxu0 %v14439_v19  ;;  %v14469_v19 = vld [vmem:[#allocation9 + $0x1344] ss:$28 sps:$4 sm:$0xff]  }
 0x40f   :  { %v1970_v54 = vmax.f32 %v1918_v8, 0.0  ;;  %v14485_v8 = vld [vmem:[#allocation9 + $0x120] ss:$28 sps:$4 sm:$0xff]  }
 0x410   :  { %6888 = vmatpush2.bf16.msra.mxu1 %v14434_v61  ;;  %v1931_v61 = vadd.f32 %v1880_v52, %v1812_v21 }
 0x411   :  { %6941 = vmatpush2.bf16.msra.mxu0 %v14437_v24  ;;  %6889 = vmatprep.subr.bf16.mxu1 %v14442_v6  ;;  %v1945_v24 = vadd.f32 %v17856_v12, %v1826_v1  ;;  %v1958_v6 = vadd.f32 %v17856_v12, %v1839_v26  ;;  %v1840_v12 = vmul.f32 %v1769_v58, %v17589_v48  ;;  %v14476_v48 = vld [vmem:[#allocation9 + $0x1650] ss:$28 sps:$4 sm:$0xff]  }
 0x412   :  { %6942 = vmatprep.subr.bf16.mxu0 %v14445_v42  ;;  %v14472_v42 = vld [vmem:[#allocation9 + $0x168c] ss:$28 sps:$4 sm:$0xff]   ;;  %v1983_v63 = vmax.f32 %v1931_v61, 0.0  ;;  %v14490_v61 = vld [vmem:[#allocation9 + $0x15e4] ss:$28 sps:$4 sm:$0xff]  }
 0x414   :  { %6890 = vmatpush2.bf16.msra.mxu1 %v14440_v51  ;;  %v1972_v51 = vmax.f32 %v1920_v5, 0.0  ;;  %v17924_v33 = vpack.c.bf16 %v1983_v63, %v1970_v54  ;;  %v14497_v54 = vld [vmem:[#allocation9 + $0xb0] ss:$28 sps:$4 sm:$0xff]  }
 0x415   :  { %6943 = vmatpush2.bf16.msra.mxu0 %v14443_v57  ;;  %6891 = vmatprep.subr.bf16.mxu1 %v14448_v39  ;;  %v1985_v57 = vmax.f32 %v1933_v27, 0.0  ;;  %v19146_v39 = vld [vmem:[#allocation142_spill] sm:$0xff]  ;;  %v14502_v63 = vld [vmem:[#allocation9 + $0x1574] ss:$28 sps:$4 sm:$0xff]  }
 0x416   :  { %6944 = vmatprep.subr.bf16.mxu0 %v14451_v0  ;;  %v1838_v0 = vmul.f32 %v1761_v34, %v17534_v62  ;;  %v14493_v27 = vld [vmem:[#allocation9 + $0xec] ss:$28 sps:$4 sm:$0xff]  }
 0x417   :  { %v17926_v62 = vpack.c.bf16 %v1985_v57, %v1972_v51  ;;  %v14505_v51 = vld [vmem:[#allocation9 + $0x7c] ss:$28 sps:$4 sm:$0xff]   ;;  %v14500_v57 = vld [vmem:[#allocation9 + $0x1570] ss:$28 sps:$4 sm:$0xff]  }
 0x418   :  { %6892 = vmatpush2.bf16.msra.mxu1 %v14446_v7  ;;  %v1825_v7 = vmul.f32 %v1761_v34, %v19146_v39  ;;  %v1957_v15 = vadd.f32 %v1880_v52, %v1838_v0  ;;  %v14503_v39 = vld [vmem:[#allocation9 + $0x78] ss:$28 sps:$4 sm:$0xff]  }
 0x419   :  { %6945 = vmatpush2.bf16.msra.mxu0 %v14449_v56  ;;  %6893 = vmatprep.subr.bf16.mxu1 %v14454_v25  ;;  %v14475_v56 = vld [vmem:[#allocation9 + $0x194] ss:$28 sps:$4 sm:$0xff]   ;;  %v1997_v25 = vmax.f32 %v1945_v24, 0.0  ;;  %v14491_v24 = vld [vmem:[#allocation9 + $0xe8] ss:$28 sps:$4 sm:$0xff]  }
 0x41a   :  { %6946 = vmatprep.subr.bf16.mxu0 %v14457_v28  ;;  %v1827_v28 = vmul.f32 %v1769_v58, %v17586_v4  ;;  %v1944_v21 = vadd.f32 %v1880_v52, %v1825_v7  ;;  %v1959_v4 = vadd.f32 %v1888_v16, %v1840_v12  ;;  %v14479_v58 = vld [vmem:[#allocation9 + $0x158] ss:$28 sps:$4 sm:$0xff]   ;;  %v2009_v52 = vmax.f32 %v1957_v15, 0.0  ;;  %v14517_v12 = vld [vmem:[#allocation9 + $0xc] ss:$28 sps:$4 sm:$0xff]  }
 0x41b   :  { %v14508_v7 = vld [vmem:[#allocation9 + $0x153c] ss:$28 sps:$4 sm:$0xff]  }
 0x41c   :  { %6894 = vmatpush2.bf16.msra.mxu1 %v14452_v40  ;;  %v2010_v40 = vmax.f32 %v1958_v6, 0.0  ;;  %v1946_v14 = vadd.f32 %v1888_v16, %v1827_v28  ;;  %v2011_v26 = vmax.f32 %v1959_v4, 0.0  ;;  %v14496_v6 = vld [vmem:[#allocation9 + $0x15ac] ss:$28 sps:$4 sm:$0xff]   ;;  %v14506_v0 = vld [vmem:[#allocation9 + $0x1538] ss:$28 sps:$4 sm:$0xff]  }
 0x41d   :  { %6947 = vmatpush2.bf16.msra.mxu0 %v14455_v13  ;;  %6895 = vmatprep.subr.bf16.mxu1 %v14460_v44  ;;  %v14470_v13 = vld [vmem:[#allocation9 + $0x1688] ss:$28 sps:$4 sm:$0xff]   ;;  %v14473_v44 = vld [vmem:[#allocation9 + $0x190] ss:$28 sps:$4 sm:$0xff]   ;;  %v14512_v28 = vld [vmem:[#allocation9 + $0x1500] ss:$28 sps:$4 sm:$0xff]  }
 0x41e   :  { %6948 = vmatprep.subr.bf16.mxu0 %v14463_v18  ;;  %v17928_v34 = vpack.c.bf16 %v2010_v40, %v1997_v25  ;;  %v14484_v18 = vld [vmem:[#allocation9 + $0x161c] ss:$28 sps:$4 sm:$0xff]   ;;  %v1998_v1 = vmax.f32 %v1946_v14, 0.0  ;;  %v14514_v40 = vld [vmem:[#allocation9 + $0x1504] ss:$28 sps:$4 sm:$0xff]  }
 0x41f   :  { %v14509_v25 = vld [vmem:[#allocation9 + $0x40] ss:$28 sps:$4 sm:$0xff]   ;;  %v14527_v4 = vld [vmem:[#allocation9 + $0x4d8] ss:$28 sps:$4 sm:$0xff]  }
 0x420   :  { %6896 = vmatpush2.bf16.msra.mxu1 %v14458_v9  ;;  %v1996_v9 = vmax.f32 %v1944_v21, 0.0  ;;  %v17936_v5 = vpack.c.bf16 %v2011_v26, %v1998_v1  ;;  %v14518_v21 = vld [vmem:[#allocation9 + $0x350] ss:$28 sps:$4 sm:$0xff]   ;;  %v14529_v15 = vld [vmem:[#allocation9 + $0x4dc] ss:$28 sps:$4 sm:$0xff]  }
 0x421   :  { %6949 = vmatpush2.bf16.msra.mxu0 %v14461_v23  ;;  %6897 = vmatprep.subr.bf16.mxu1 %v14466_v31  ;;  %v14487_v23 = vld [vmem:[#allocation9 + $0x124] ss:$28 sps:$4 sm:$0xff]   ;;  %v14482_v31 = vld [vmem:[#allocation9 + $0x1618] ss:$28 sps:$4 sm:$0xff]   ;;  %v14541_v1 = vld [vmem:[#allocation9 + $0x46c] ss:$28 sps:$4 sm:$0xff]  }
 0x422   :  { %6950 = vmatprep.subr.bf16.mxu0 %v14469_v19  ;;  %v17934_v16 = vpack.c.bf16 %v2009_v52, %v1996_v9  ;;  %v14488_v19 = vld [vmem:[#allocation9 + $0x15e0] ss:$28 sps:$4 sm:$0xff]   ;;  %v14538_v26 = vld [vmem:[#allocation9 + $0x2ac] ss:$28 sps:$4 sm:$0xff]  }
 0x423   :  { %v14526_v14 = vld [vmem:[#allocation9 + $0x31c] ss:$28 sps:$4 sm:$0xff]   ;;  %v14532_v9 = vld [vmem:[#allocation9 + $0x2e4] ss:$28 sps:$4 sm:$0xff]  }
 0x424   :  { %6898 = vmatpush2.bf16.msra.mxu1 %v14464_v37  ;;  %v19147_v37 = vmov 0   ;;  %v14533_v52 = vld [vmem:[#allocation9 + $0x4a0] ss:$28 sps:$4 sm:$0xff]  }
 0x425   :  { %6951 = vmatpush2.bf16.msra.mxu0 %v14467_v53  ;;  %6973 = vmatprep.subr.bf16.mxu1 %v14472_v42  ;;  %v14499_v53 = vld [vmem:[#allocation9 + $0xb4] ss:$28 sps:$4 sm:$0xff]   ;;  %v14494_v42 = vld [vmem:[#allocation9 + $0x15a8] ss:$28 sps:$4 sm:$0xff]  }
 0x426   :  { %7026 = vmatprep.subr.bf16.mxu0 %v14475_v56  ;;  %v14511_v56 = vld [vmem:[#allocation9 + $0x44] ss:$28 sps:$4 sm:$0xff]  }
 0x427   :  { %6900 = vmatmul.mubr.bf16.vlgmr.msra.gmra.mxu1 %v17924_v33 }
 0x428   :  { %6953 = vmatmul.mubr.bf16.vlgmr.msra.gmra.mxu0 %v17926_v62  ;;  %6909 = vmatprep.mubr.bf16.mxu1 %v17928_v34 }
 0x429   :  { %6962 = vmatprep.mubr.bf16.mxu0 %v17814_v60  ;;  %6974 = vmatpush1.bf16.msra.mxu1 %v14470_v13  ;;  %v14515_v13 = vld [vmem:[#allocation9 + $0x8] ss:$28 sps:$4 sm:$0xff]  }
 0x42a   :  { %7027 = vmatpush1.bf16.msra.mxu0 %v14473_v44  ;;  %6975 = vmatprep.subr.bf16.mxu1 %v14478_v30  ;;  %v14520_v44 = vld [vmem:[#allocation9 + $0x354] ss:$28 sps:$4 sm:$0xff]  }
 0x42b   :  { %7028 = vmatprep.subr.bf16.mxu0 %v14481_v47  ;;  %v14523_v30 = vld [vmem:[#allocation9 + $0x514] ss:$28 sps:$4 sm:$0xff]  }
 0x42c   :  { %v14521_v47 = vld [vmem:[#allocation9 + $0x510] ss:$28 sps:$4 sm:$0xff]  }
 0x42d   :  { %6976 = vmatpush1.bf16.msra.mxu1 %v14476_v48  ;;  %v14524_v48 = vld [vmem:[#allocation9 + $0x318] ss:$28 sps:$4 sm:$0xff]  }
 0x42e   :  { %7029 = vmatpush1.bf16.msra.mxu0 %v14479_v58  ;;  %6977 = vmatprep.subr.bf16.mxu1 %v14484_v18  ;;  %v14535_v58 = vld [vmem:[#allocation9 + $0x4a4] ss:$28 sps:$4 sm:$0xff]  }
 0x42f   :  { %6910 = vmatmul.mubr.bf16.gmra.mxu1 %v17934_v16  ;;  %7030 = vmatprep.subr.bf16.mxu0 %v14487_v23  ;;  %v14530_v18 = vld [vmem:[#allocation9 + $0x2e0] ss:$28 sps:$4 sm:$0xff]   ;;  %v14539_v23 = vld [vmem:[#allocation9 + $0x468] ss:$28 sps:$4 sm:$0xff]  }
 0x430   :  { %6963 = vmatmul.mubr.bf16.gmra.mxu0 %v17936_v5  ;;  %7005 = vmatprep.mubr.bf16.mxu1 %v19147_v37 }
 0x431   :  { %6978 = vmatpush1.bf16.msra.mxu1 %v14482_v31  ;;  %7058 = vmatprep.mubr.bf16.mxu0 %v17695_v17  ;;  %v14536_v31 = vld [vmem:[#allocation9 + $0x2a8] ss:$28 sps:$4 sm:$0xff]  }
 0x432   :  { %7031 = vmatpush1.bf16.msra.mxu0 %v14485_v8  ;;  %6979 = vmatprep.subr.bf16.mxu1 %v14490_v61  ;;  %v14547_v8 = vld [vmem:[#allocation9 + $0x434] ss:$28 sps:$4 sm:$0xff]  }
 0x433   :  { %7032 = vmatprep.subr.bf16.mxu0 %v14493_v27  ;;  %v14544_v61 = vld [vmem:[#allocation9 + $0x274] ss:$28 sps:$4 sm:$0xff]  }
 0x434   :  { %v14545_v27 = vld [vmem:[#allocation9 + $0x430] ss:$28 sps:$4 sm:$0xff]  }
 0x435   :  { %6980 = vmatpush1.bf16.msra.mxu1 %v14488_v19  ;;  %v14542_v19 = vld [vmem:[#allocation9 + $0x270] ss:$28 sps:$4 sm:$0xff]  }
 0x436   :  { %7033 = vmatpush1.bf16.msra.mxu0 %v14491_v24  ;;  %6981 = vmatprep.subr.bf16.mxu1 %v14496_v6  ;;  %v14553_v24 = vld [vmem:[#allocation9 + $0x3fc] ss:$28 sps:$4 sm:$0xff]  }
 0x437   :  { %7034 = vmatprep.subr.bf16.mxu0 %v14499_v53  ;;  %v14550_v6 = vld [vmem:[#allocation9 + $0x23c] ss:$28 sps:$4 sm:$0xff]  }
 0x438   :  { %v14551_v53 = vld [vmem:[#allocation9 + $0x3f8] ss:$28 sps:$4 sm:$0xff]  }
 0x439   :  { %6982 = vmatpush1.bf16.msra.mxu1 %v14494_v42  ;;  %v14548_v42 = vld [vmem:[#allocation9 + $0x238] ss:$28 sps:$4 sm:$0xff]  }
 0x43a   :  { %7035 = vmatpush1.bf16.msra.mxu0 %v14497_v54  ;;  %6983 = vmatprep.subr.bf16.mxu1 %v14502_v63  ;;  %v14559_v54 = vld [vmem:[#allocation9 + $0x3c4] ss:$28 sps:$4 sm:$0xff]  }
 0x43b   :  { %7036 = vmatprep.subr.bf16.mxu0 %v14505_v51  ;;  %v14556_v63 = vld [vmem:[#allocation9 + $0x204] ss:$28 sps:$4 sm:$0xff]  }
 0x43c   :  { %v14557_v51 = vld [vmem:[#allocation9 + $0x3c0] ss:$28 sps:$4 sm:$0xff]  }
 0x43d   :  { %6984 = vmatpush1.bf16.msra.mxu1 %v14500_v57  ;;  %v14554_v57 = vld [vmem:[#allocation9 + $0x200] ss:$28 sps:$4 sm:$0xff]  }
 0x43e   :  { %7037 = vmatpush1.bf16.msra.mxu0 %v14503_v39  ;;  %6985 = vmatprep.subr.bf16.mxu1 %v14508_v7  ;;  %v14562_v39 = vld [vmem:[#allocation9 + $0x1cc] ss:$28 sps:$4 sm:$0xff]  }
 0x43f   :  { %7038 = vmatprep.subr.bf16.mxu0 %v14511_v56  ;;  %v14565_v7 = vld [vmem:[#allocation9 + $0x38c] ss:$28 sps:$4 sm:$0xff]   ;;  %v2846_v56 = vld [vmem:[#allocation10] sm:$0xff] }
 0x441   :  { %6986 = vmatpush1.bf16.msra.mxu1 %v14506_v0  ;;  %v14563_v0 = vld [vmem:[#allocation9 + $0x388] ss:$28 sps:$4 sm:$0xff]  }
 0x442   :  { %7039 = vmatpush1.bf16.msra.mxu0 %v14509_v25  ;;  %6987 = vmatprep.subr.bf16.mxu1 %v14514_v40  ;;  %v14560_v25 = vld [vmem:[#allocation9 + $0x1c8] ss:$28 sps:$4 sm:$0xff]   ;;  %v14568_v40 = vld [vmem:[#allocation9 + $0x6d4] ss:$28 sps:$4 sm:$0xff]  }
 0x443   :  { %7040 = vmatprep.subr.bf16.mxu0 %v14517_v12  ;;  %v14571_v12 = vld [vmem:[#allocation9 + $0x894] ss:$28 sps:$4 sm:$0xff]  }
 0x445   :  { %6988 = vmatpush1.bf16.msra.mxu1 %v14512_v28  ;;  %v14566_v28 = vld [vmem:[#allocation9 + $0x6d0] ss:$28 sps:$4 sm:$0xff]  }
 0x446   :  { %7041 = vmatpush1.bf16.msra.mxu0 %v14515_v13  ;;  %7079 = vmatprep.subr.bf16.mxu1 %v14523_v30  ;;  %v2879_v13 = vrot.slane %v2846_v56, %v17076_v35  ;;  %v17948_v30 = vrot.slane %v2846_v56, %v17081_v38 }
 0x447   :  { %7042 = vmatprep.subr.bf16.mxu0 %v14520_v44  ;;  %v14569_v44 = vld [vmem:[#allocation9 + $0x890] ss:$28 sps:$4 sm:$0xff]  }
 0x448   :  { %7006 = vmatmul.mubr.bf16.vlgmr.msra.gmra.mxu1 %v17796_v20 }
 0x449   :  { %7080 = vmatpush1.bf16.msra.mxu1 %v14521_v47  ;;  %7015 = vmatprep.mubr.bf16.mxu1 %v19147_v37  ;;  %v14574_v47 = vld [vmem:[#allocation9 + $0x69c] ss:$28 sps:$4 sm:$0xff]  }
 0x44a   :  { %7043 = vmatpush2.bf16.msra.mxu0 %v14518_v21  ;;  %7081 = vmatprep.subr.bf16.mxu1 %v14529_v15  ;;  %v14577_v21 = vld [vmem:[#allocation9 + $0x85c] ss:$28 sps:$4 sm:$0xff]  }
 0x44b   :  { %7044 = vmatprep.subr.bf16.mxu0 %v14526_v14 }
 0x44d   :  { %7082 = vmatpush1.bf16.msra.mxu1 %v14527_v4 }
 0x44e   :  { %7045 = vmatpush2.bf16.msra.mxu0 %v14524_v48  ;;  %7083 = vmatprep.subr.bf16.mxu1 %v14535_v58  ;;  %v14572_v48 = vld [vmem:[#allocation9 + $0x698] ss:$28 sps:$4 sm:$0xff]  }
 0x44f   :  { %7046 = vmatprep.subr.bf16.mxu0 %v14532_v9 }
 0x450   :  { %7016 = vmatmul.mubr.bf16.gmra.mxu1 %v17820_v32 }
 0x451   :  { %7084 = vmatpush1.bf16.msra.mxu1 %v14533_v52  ;;  %7111 = vmatprep.mubr.bf16.mxu1 %v17705_v2 }
 0x452   :  { %7047 = vmatpush2.bf16.msra.mxu0 %v14530_v18  ;;  %7085 = vmatprep.subr.bf16.mxu1 %v14541_v1  ;;  %v14575_v1 = vld [vmem:[#allocation9 + $0x858] ss:$28 sps:$4 sm:$0xff]  }
 0x453   :  { %7048 = vmatprep.subr.bf16.mxu0 %v14538_v26 }
 0x455   :  { %7086 = vmatpush1.bf16.msra.mxu1 %v14539_v23  ;;  %v14580_v23 = vld [vmem:[#allocation9 + $0x664] ss:$28 sps:$4 sm:$0xff]  }
 0x456   :  { %7049 = vmatpush2.bf16.msra.mxu0 %v14536_v31  ;;  %7087 = vmatprep.subr.bf16.mxu1 %v14547_v8 }
 0x457   :  { %7050 = vmatprep.subr.bf16.mxu0 %v14544_v61 }
 0x459   :  { %7088 = vmatpush1.bf16.msra.mxu1 %v14545_v27  ;;  %v14578_v27 = vld [vmem:[#allocation9 + $0x660] ss:$28 sps:$4 sm:$0xff]  }
 0x45a   :  { %7051 = vmatpush2.bf16.msra.mxu0 %v14542_v19  ;;  %7089 = vmatprep.subr.bf16.mxu1 %v14553_v24  ;;  %v14583_v19 = vld [vmem:[#allocation9 + $0x824] ss:$28 sps:$4 sm:$0xff]  }
 0x45b   :  { %7052 = vmatprep.subr.bf16.mxu0 %v14550_v6 }
 0x45d   :  { %7090 = vmatpush1.bf16.msra.mxu1 %v14551_v53 }
 0x45e   :  { %7053 = vmatpush2.bf16.msra.mxu0 %v14548_v42  ;;  %7091 = vmatprep.subr.bf16.mxu1 %v14559_v54  ;;  %v14581_v42 = vld [vmem:[#allocation9 + $0x820] ss:$28 sps:$4 sm:$0xff]  }
 0x45f   :  { %7054 = vmatprep.subr.bf16.mxu0 %v14556_v63  ;;  %v14586_v63 = vld [vmem:[#allocation9 + $0x62c] ss:$28 sps:$4 sm:$0xff]  }
 0x461   :  { %7092 = vmatpush1.bf16.msra.mxu1 %v14557_v51 }
 0x462   :  { %7055 = vmatpush2.bf16.msra.mxu0 %v14554_v57  ;;  %7093 = vmatprep.subr.bf16.mxu1 %v14565_v7  ;;  %v14589_v7 = vld [vmem:[#allocation9 + $0x7ec] ss:$28 sps:$4 sm:$0xff]  }
 0x463   :  { %7056 = vmatprep.subr.bf16.mxu0 %v14562_v39  ;;  %v14584_v39 = vld [vmem:[#allocation9 + $0x628] ss:$28 sps:$4 sm:$0xff]  }
 0x465   :  { %7094 = vmatpush1.bf16.msra.mxu1 %v14563_v0 }
 0x466   :  { %7057 = vmatpush2.bf16.msra.mxu0 %v14560_v25  ;;  %7095 = vmatprep.subr.bf16.mxu1 %v14568_v40  ;;  %v6689_v15 = vpop.f32.mrf.mxu1  ;;  %v6742_v4 = vpop.f32.mrf.mxu0 }
 0x467   :  { %7132 = vmatprep.subr.bf16.mxu0 %v14571_v12  ;;  %v6690_v14 = vadd.f32 %v6689_v15, %v2879_v13  ;;  %v14590_v15 = vld [vmem:[#allocation9 + $0x5f0] ss:$28 sps:$4 sm:$0xff]  }
 0x468   :  { %v6691_v58 = vpop.f32.mrf.mxu1  ;;  %v6744_v18 = vpop.f32.mrf.mxu0 }
 0x469   :  { %7059 = vmatmul.mubr.bf16.vlgmr.msra.gmra.mxu0 %v17723_v45  ;;  %v17951_v9 = vadd.f32 %v6742_v4, %v6690_v14  ;;  %7096 = vmatpush2.bf16.msra.mxu1 %v14566_v28  ;;  %v6692_v52 = vadd.f32 %v6691_v58, %v17948_v30  ;;  %v14587_v28 = vld [vmem:[#allocation9 + $0x7e8] ss:$28 sps:$4 sm:$0xff]   ;;  %v14595_v14 = vld [vmem:[#allocation9 + $0x7b4] ss:$28 sps:$4 sm:$0xff]  }
 0x46a   :  { %7068 = vmatprep.mubr.bf16.mxu0 %v17740_v41  ;;  %7133 = vmatpush1.bf16.msra.mxu0 %v14569_v44  ;;  %v6693_v26 = vpop.f32.mrf.mxu1  ;;  %v6746_v61 = vpop.f32.mrf.mxu0  ;;  %v14592_v44 = vld [vmem:[#allocation9 + $0x5f4] ss:$28 sps:$4 sm:$0xff]  }
 0x46b   :  { %v17955_v31 = vadd.f32 %v6744_v18, %v6692_v52  ;;  %7097 = vmatprep.subr.bf16.mxu1 %v14574_v47  ;;  %7134 = vmatprep.subr.bf16.mxu0 %v14577_v21  ;;  %v6694_v8 = vadd.f32 %v6693_v26, %v2879_v13  ;;  %v14593_v58 = vld [vmem:[#allocation9 + $0x7b0] ss:$28 sps:$4 sm:$0xff]   ;;  %v14598_v52 = vld [vmem:[#allocation9 + $0x5bc] ss:$28 sps:$4 sm:$0xff]  }
 0x46c   :  { %v17957_v24 = vpop.f32.mrf.mxu1  ;;  %v17961_v53 = vpop.f32.mrf.mxu0  ;;  %v14601_v18 = vld [vmem:[#allocation9 + $0x77c] ss:$28 sps:$4 sm:$0xff]  }
 0x46d   :  { %v17959_v6 = vadd.f32 %v6746_v61, %v6694_v8  ;;  %7098 = vmatpush2.bf16.msra.mxu1 %v14572_v48  ;;  %v14599_v26 = vld [vmem:[#allocation9 + $0x778] ss:$28 sps:$4 sm:$0xff]   ;;  %v14607_v8 = vld [vmem:[#allocation9 + $0x744] ss:$28 sps:$4 sm:$0xff]  }
 0x46e   :  { %7135 = vmatpush1.bf16.msra.mxu0 %v14575_v1  ;;  %7099 = vmatprep.subr.bf16.mxu1 %v14580_v23  ;;  %v6699_v54 = vpop.f32.mrf.mxu1  ;;  %v14596_v1 = vld [vmem:[#allocation9 + $0x5b8] ss:$28 sps:$4 sm:$0xff]   ;;  %v14604_v23 = vld [vmem:[#allocation9 + $0x584] ss:$28 sps:$4 sm:$0xff]  }
 0x46f   :  { %7136 = vmatprep.subr.bf16.mxu0 %v14583_v19  ;;  %v6700_v51 = vadd.f32 %v6699_v54, %v2879_v13  ;;  %v6752_v57 = vpop.f32.mrf.mxu0  ;;  %v14605_v61 = vld [vmem:[#allocation9 + $0x740] ss:$28 sps:$4 sm:$0xff]   ;;  %v14608_v19 = vld [vmem:[#allocation9 + $0x548] ss:$28 sps:$4 sm:$0xff]  }
 0x470   :  { %v6701_v0 = vpop.f32.mrf.mxu1  ;;  %v14611_v54 = vld [vmem:[#allocation9 + $0x708] ss:$28 sps:$4 sm:$0xff]  }
 0x471   :  { %7069 = vmatmul.mubr.bf16.gmra.mxu0 %v17763_v36  ;;  %v17964_v56 = vadd.f32 %v6752_v57, %v6700_v51  ;;  %7100 = vmatpush2.bf16.msra.mxu1 %v14578_v27  ;;  %v6702_v25 = vadd.f32 %v6701_v0, %v17948_v30  ;;  %v6754_v40 = vpop.f32.mrf.mxu0  ;;  %v14610_v27 = vld [vmem:[#allocation9 + $0x54c] ss:$28 sps:$4 sm:$0xff]   ;;  %v14619_v51 = vld [vmem:[#allocation9 + $0xc14] ss:$28 sps:$4 sm:$0xff]   ;;  %v14622_v0 = vld [vmem:[#allocation9 + $0xa1c] ss:$28 sps:$4 sm:$0xff]  }
 0x472   :  { %7137 = vmatpush1.bf16.msra.mxu0 %v14581_v42  ;;  %7164 = vmatprep.mubr.bf16.mxu0 %v17777_v59  ;;  %v6703_v12 = vpop.f32.mrf.mxu1  ;;  %v14613_v42 = vld [vmem:[#allocation9 + $0x70c] ss:$28 sps:$4 sm:$0xff]  }
 0x473   :  { %v17968_v47 = vadd.f32 %v6754_v40, %v6702_v25  ;;  %7101 = vmatprep.subr.bf16.mxu1 %v14586_v63  ;;  %7138 = vmatprep.subr.bf16.mxu0 %v14589_v7  ;;  %v6704_v21 = vadd.f32 %v6703_v12, %v2879_v13  ;;  %v6756_v4 = vpop.f32.mrf.mxu0  ;;  %v14602_v13 = vld [vmem:[#allocation9 + $0x580] ss:$28 sps:$4 sm:$0xff]   ;;  %v14616_v63 = vld [vmem:[#allocation9 + $0xa54] ss:$28 sps:$4 sm:$0xff]  }
 0x474   :  { %v14617_v57 = vld [vmem:[#allocation9 + $0xc10] ss:$28 sps:$4 sm:$0xff]   ;;  %v14625_v7 = vld [vmem:[#allocation9 + $0xbdc] ss:$28 sps:$4 sm:$0xff]   ;;  %v14628_v12 = vld [vmem:[#allocation9 + $0x9e4] ss:$28 sps:$4 sm:$0xff]  }
 0x475   :  { %v17970_v48 = vadd.f32 %v6756_v4, %v6704_v21  ;;  %7102 = vmatpush2.bf16.msra.mxu1 %v14584_v39  ;;  %v14614_v39 = vld [vmem:[#allocation9 + $0xa50] ss:$28 sps:$4 sm:$0xff]   ;;  %v19148_v25 = vld [vmem:[#allocation120_spill] sm:$0xff] }
 0x476   :  { %7139 = vmatpush1.bf16.msra.mxu0 %v14587_v28  ;;  %7103 = vmatprep.subr.bf16.mxu1 %v14592_v44  ;;  %v14620_v40 = vld [vmem:[#allocation9 + $0xa18] ss:$28 sps:$4 sm:$0xff]   ;;  %v14631_v44 = vld [vmem:[#allocation9 + $0xba4] ss:$28 sps:$4 sm:$0xff]   ;;  %v14634_v4 = vld [vmem:[#allocation9 + $0x9ac] ss:$28 sps:$4 sm:$0xff]  }
 0x477   :  { %7140 = vmatprep.subr.bf16.mxu0 %v14595_v14  ;;  %v14623_v28 = vld [vmem:[#allocation9 + $0xbd8] ss:$28 sps:$4 sm:$0xff]   ;;  %v14629_v21 = vld [vmem:[#allocation9 + $0xba0] ss:$28 sps:$4 sm:$0xff]   ;;  %v14637_v14 = vld [vmem:[#allocation9 + $0xb6c] ss:$28 sps:$4 sm:$0xff]  }
 0x479   :  { %7104 = vmatpush2.bf16.msra.mxu1 %v14590_v15  ;;  %v14626_v15 = vld [vmem:[#allocation9 + $0x9e0] ss:$28 sps:$4 sm:$0xff]  }
 0x47a   :  { %7141 = vmatpush1.bf16.msra.mxu0 %v14593_v58  ;;  %7105 = vmatprep.subr.bf16.mxu1 %v14598_v52  ;;  %v19149_v58 = vld [vmem:[#allocation116_spill] sm:$0xff]  ;;  %v19150_v52 = vld [vmem:[#allocation117_spill] sm:$0xff] }
 0x47b   :  { %7142 = vmatprep.subr.bf16.mxu0 %v14601_v18  ;;  %v14635_v18 = vld [vmem:[#allocation9 + $0xb68] ss:$28 sps:$4 sm:$0xff]  }
 0x47d   :  { %7106 = vmatpush2.bf16.msra.mxu1 %v14596_v1  ;;  %v14632_v1 = vld [vmem:[#allocation9 + $0x9a8] ss:$28 sps:$4 sm:$0xff]  }
 0x47e   :  { %7143 = vmatpush1.bf16.msra.mxu0 %v14599_v26  ;;  %7107 = vmatprep.subr.bf16.mxu1 %v14604_v23  ;;  %v14643_v26 = vld [vmem:[#allocation9 + $0xb34] ss:$28 sps:$4 sm:$0xff]  }
 0x47f   :  { %7144 = vmatprep.subr.bf16.mxu0 %v14607_v8  ;;  %v14640_v23 = vld [vmem:[#allocation9 + $0x974] ss:$28 sps:$4 sm:$0xff]  }
 0x480   :  { %v14638_v8 = vld [vmem:[#allocation9 + $0x970] ss:$28 sps:$4 sm:$0xff]  }
 0x481   :  { %7108 = vmatpush2.bf16.msra.mxu1 %v14602_v13  ;;  %v14641_v13 = vld [vmem:[#allocation9 + $0xb30] ss:$28 sps:$4 sm:$0xff]  }
 0x482   :  { %7145 = vmatpush1.bf16.msra.mxu0 %v14605_v61  ;;  %7109 = vmatprep.subr.bf16.mxu1 %v14610_v27  ;;  %v14649_v61 = vld [vmem:[#allocation9 + $0xafc] ss:$28 sps:$4 sm:$0xff]  }
 0x483   :  { %7146 = vmatprep.subr.bf16.mxu0 %v14613_v42  ;;  %v14646_v27 = vld [vmem:[#allocation9 + $0x93c] ss:$28 sps:$4 sm:$0xff]  }
 0x484   :  { %v14644_v42 = vld [vmem:[#allocation9 + $0x938] ss:$28 sps:$4 sm:$0xff]  }
 0x485   :  { %7110 = vmatpush2.bf16.msra.mxu1 %v14608_v19  ;;  %v14647_v19 = vld [vmem:[#allocation9 + $0xaf8] ss:$28 sps:$4 sm:$0xff]  }
 0x486   :  { %7147 = vmatpush1.bf16.msra.mxu0 %v14611_v54  ;;  %7185 = vmatprep.subr.bf16.mxu1 %v14619_v51  ;;  %v14655_v54 = vld [vmem:[#allocation9 + $0xac4] ss:$28 sps:$4 sm:$0xff]  }
 0x487   :  { %7148 = vmatprep.subr.bf16.mxu0 %v14616_v63  ;;  %v14652_v63 = vld [vmem:[#allocation9 + $0x904] ss:$28 sps:$4 sm:$0xff]  }
 0x488   :  { %7112 = vmatmul.mubr.bf16.vlgmr.msra.gmra.mxu1 %v17731_v50  ;;  %v14653_v51 = vld [vmem:[#allocation9 + $0xac0] ss:$28 sps:$4 sm:$0xff]  }
 0x489   :  { %7121 = vmatprep.mubr.bf16.mxu1 %v19148_v25  ;;  %7186 = vmatpush1.bf16.msra.mxu1 %v14617_v57  ;;  %v14650_v57 = vld [vmem:[#allocation9 + $0x900] ss:$28 sps:$4 sm:$0xff]  }
 0x48a   :  { %7149 = vmatpush2.bf16.msra.mxu0 %v14614_v39  ;;  %7187 = vmatprep.subr.bf16.mxu1 %v14625_v7  ;;  %v14661_v39 = vld [vmem:[#allocation9 + $0xa8c] ss:$28 sps:$4 sm:$0xff]  }
 0x48b   :  { %7150 = vmatprep.subr.bf16.mxu0 %v14622_v0  ;;  %v14658_v7 = vld [vmem:[#allocation9 + $0x8cc] ss:$28 sps:$4 sm:$0xff]  }
 0x48c   :  { %v14659_v0 = vld [vmem:[#allocation9 + $0xa88] ss:$28 sps:$4 sm:$0xff]  }
 0x48d   :  { %7188 = vmatpush1.bf16.msra.mxu1 %v14623_v28  ;;  %v14664_v28 = vld [vmem:[#allocation9 + $0xdd4] ss:$28 sps:$4 sm:$0xff]  }
 0x48e   :  { %7151 = vmatpush2.bf16.msra.mxu0 %v14620_v40  ;;  %7189 = vmatprep.subr.bf16.mxu1 %v14631_v44  ;;  %v14656_v40 = vld [vmem:[#allocation9 + $0x8c8] ss:$28 sps:$4 sm:$0xff]   ;;  %v17976_v44 = vpop.f32.mrf.mxu1 }
 0x48f   :  { %7152 = vmatprep.subr.bf16.mxu0 %v14628_v12  ;;  %v14667_v12 = vld [vmem:[#allocation9 + $0xf94] ss:$28 sps:$4 sm:$0xff]  }
 0x490   :  { %7122 = vmatmul.mubr.bf16.gmra.mxu1 %v19149_v58 }
 0x491   :  { %7190 = vmatpush1.bf16.msra.mxu1 %v14629_v21  ;;  %7217 = vmatprep.mubr.bf16.mxu1 %v19150_v52  ;;  %v17978_v21 = vpop.f32.mrf.mxu0 }
 0x492   :  { %7153 = vmatpush2.bf16.msra.mxu0 %v14626_v15  ;;  %7191 = vmatprep.subr.bf16.mxu1 %v14637_v14  ;;  %v14662_v15 = vld [vmem:[#allocation9 + $0xdd0] ss:$28 sps:$4 sm:$0xff]  }
 0x493   :  { %7154 = vmatprep.subr.bf16.mxu0 %v14634_v4  ;;  %v14665_v4 = vld [vmem:[#allocation9 + $0xf90] ss:$28 sps:$4 sm:$0xff]  }
 0x495   :  { %7192 = vmatpush1.bf16.msra.mxu1 %v14635_v18 }
 0x496   :  { %7155 = vmatpush2.bf16.msra.mxu0 %v14632_v1  ;;  %7193 = vmatprep.subr.bf16.mxu1 %v14643_v26  ;;  %v14670_v26 = vld [vmem:[#allocation9 + $0xd9c] ss:$28 sps:$4 sm:$0xff]  }
 0x497   :  { %7156 = vmatprep.subr.bf16.mxu0 %v14640_v23  ;;  %v14673_v23 = vld [vmem:[#allocation9 + $0xf5c] ss:$28 sps:$4 sm:$0xff]  }
 0x499   :  { %7194 = vmatpush1.bf16.msra.mxu1 %v14641_v13 }
 0x49a   :  { %7157 = vmatpush2.bf16.msra.mxu0 %v14638_v8  ;;  %7195 = vmatprep.subr.bf16.mxu1 %v14649_v61 }
 0x49b   :  { %7158 = vmatprep.subr.bf16.mxu0 %v14646_v27 }
 0x49d   :  { %7196 = vmatpush1.bf16.msra.mxu1 %v14647_v19  ;;  %v14668_v19 = vld [vmem:[#allocation9 + $0xd98] ss:$28 sps:$4 sm:$0xff]  }
 0x49e   :  { %7159 = vmatpush2.bf16.msra.mxu0 %v14644_v42  ;;  %7197 = vmatprep.subr.bf16.mxu1 %v14655_v54  ;;  %v14671_v54 = vld [vmem:[#allocation9 + $0xf58] ss:$28 sps:$4 sm:$0xff]  }
 0x49f   :  { %7160 = vmatprep.subr.bf16.mxu0 %v14652_v63 }
 0x4a1   :  { %7198 = vmatpush1.bf16.msra.mxu1 %v14653_v51 }
 0x4a2   :  { %7161 = vmatpush2.bf16.msra.mxu0 %v14650_v57  ;;  %7199 = vmatprep.subr.bf16.mxu1 %v14661_v39  ;;  %v14679_v39 = vld [vmem:[#allocation9 + $0xf24] ss:$28 sps:$4 sm:$0xff]  }
 0x4a3   :  { %7162 = vmatprep.subr.bf16.mxu0 %v14658_v7 }
 0x4a5   :  { %7200 = vmatpush1.bf16.msra.mxu1 %v14659_v0 }
 0x4a6   :  { %7163 = vmatpush2.bf16.msra.mxu0 %v14656_v40  ;;  %v6795_v14 = vpop.f32.mrf.mxu1  ;;  %7201 = vmatprep.subr.bf16.mxu1 %v14664_v28  ;;  %v14674_v40 = vld [vmem:[#allocation9 + $0xd60] ss:$28 sps:$4 sm:$0xff]  }
 0x4a7   :  { %v6796_v18 = vadd.f32 %v6795_v14, %v17951_v9  ;;  %v6848_v1 = vpop.f32.mrf.mxu0  ;;  %7238 = vmatprep.subr.bf16.mxu0 %v14667_v12  ;;  %v14676_v9 = vld [vmem:[#allocation9 + $0xd64] ss:$28 sps:$4 sm:$0xff]  }
 0x4a8   :  { %v6797_v13 = vpop.f32.mrf.mxu1  ;;  %v14677_v12 = vld [vmem:[#allocation9 + $0xf20] ss:$28 sps:$4 sm:$0xff]  }
 0x4a9   :  { %v17981_v8 = vadd.f32 %v6848_v1, %v6796_v18  ;;  %7165 = vmatmul.mubr.bf16.vlgmr.msra.gmra.mxu0 %v17870_v46  ;;  %7202 = vmatpush2.bf16.msra.mxu1 %v14662_v15  ;;  %v6798_v61 = vadd.f32 %v6797_v13, %v17955_v31  ;;  %v6850_v27 = vpop.f32.mrf.mxu0  ;;  %v14680_v13 = vld [vmem:[#allocation9 + $0xd28] ss:$28 sps:$4 sm:$0xff]  }
 0x4aa   :  { %7174 = vmatprep.mubr.bf16.mxu0 %v17874_v22  ;;  %7239 = vmatpush1.bf16.msra.mxu0 %v14665_v4  ;;  %v6799_v42 = vpop.f32.mrf.mxu1  ;;  %v14685_v4 = vld [vmem:[#allocation9 + $0xeec] ss:$28 sps:$4 sm:$0xff]  }
 0x4ab   :  { %v17986_v63 = vadd.f32 %v6850_v27, %v6798_v61  ;;  %v6800_v51 = vadd.f32 %v6799_v42, %v17959_v6  ;;  %v6852_v57 = vpop.f32.mrf.mxu0  ;;  %7203 = vmatprep.subr.bf16.mxu1 %v14670_v26  ;;  %7240 = vmatprep.subr.bf16.mxu0 %v14673_v23  ;;  %v14682_v6 = vld [vmem:[#allocation9 + $0xd2c] ss:$28 sps:$4 sm:$0xff]  }
 0x4ac   :  { %v17989_v7 = vpop.f32.mrf.mxu1  ;;  %v14683_v27 = vld [vmem:[#allocation9 + $0xee8] ss:$28 sps:$4 sm:$0xff]  }
 0x4ad   :  { %v17991_v0 = vadd.f32 %v6852_v57, %v6800_v51  ;;  %7204 = vmatpush2.bf16.msra.mxu1 %v14668_v19  ;;  %v17993_v31 = vpop.f32.mrf.mxu0  ;;  %v14689_v57 = vld [vmem:[#allocation9 + $0xeb0] ss:$28 sps:$4 sm:$0xff]  }
 0x4ae   :  { %7241 = vmatpush1.bf16.msra.mxu0 %v14671_v54  ;;  %v6805_v28 = vpop.f32.mrf.mxu1  ;;  %7205 = vmatprep.subr.bf16.mxu1 %v14676_v9  ;;  %v14691_v54 = vld [vmem:[#allocation9 + $0xeb4] ss:$28 sps:$4 sm:$0xff]  }
 0x4af   :  { %v6806_v15 = vadd.f32 %v6805_v28, %v17964_v56  ;;  %v6858_v14 = vpop.f32.mrf.mxu0  ;;  %7242 = vmatprep.subr.bf16.mxu0 %v14679_v39  ;;  %v14688_v56 = vld [vmem:[#allocation9 + $0xcf4] ss:$28 sps:$4 sm:$0xff]   ;;  %v14694_v39 = vld [vmem:[#allocation9 + $0xcbc] ss:$28 sps:$4 sm:$0xff]  }
 0x4b0   :  { %v6807_v18 = vpop.f32.mrf.mxu1  ;;  %v14692_v28 = vld [vmem:[#allocation9 + $0xcb8] ss:$28 sps:$4 sm:$0xff]  }
 0x4b1   :  { %v17996_v1 = vadd.f32 %v6858_v14, %v6806_v15  ;;  %7175 = vmatmul.mubr.bf16.gmra.mxu0 %v17890_v11  ;;  %7206 = vmatpush2.bf16.msra.mxu1 %v14674_v40  ;;  %v6808_v26 = vadd.f32 %v6807_v18, %v17968_v47  ;;  %v6860_v23 = vpop.f32.mrf.mxu0  ;;  %v14686_v47 = vld [vmem:[#allocation9 + $0xcf0] ss:$28 sps:$4 sm:$0xff]   ;;  %v14697_v40 = vld [vmem:[#allocation9 + $0xe7c] ss:$28 sps:$4 sm:$0xff]   ;;  %v14703_v15 = vld [vmem:[#allocation9 + $0xe44] ss:$28 sps:$4 sm:$0xff]  }
 0x4b2   :  { %7243 = vmatpush1.bf16.msra.mxu0 %v14677_v12  ;;  %7270 = vmatprep.mubr.bf16.mxu0 %v17894_v43  ;;  %v6809_v61 = vpop.f32.mrf.mxu1  ;;  %v14695_v12 = vld [vmem:[#allocation9 + $0xe78] ss:$28 sps:$4 sm:$0xff]   ;;  %v14698_v14 = vld [vmem:[#allocation9 + $0xc80] ss:$28 sps:$4 sm:$0xff]   ;;  %v14709_v18 = vld [vmem:[#allocation9 + $0xe0c] ss:$28 sps:$4 sm:$0xff]  }
 0x4b3   :  { %v18001_v19 = vadd.f32 %v6860_v23, %v6808_v26  ;;  %v6810_v42 = vadd.f32 %v6809_v61, %v17970_v48  ;;  %7207 = vmatprep.subr.bf16.mxu1 %v14682_v6  ;;  %7244 = vmatprep.subr.bf16.mxu0 %v14685_v4  ;;  %v6862_v9 = vpop.f32.mrf.mxu0  ;;  %v14700_v48 = vld [vmem:[#allocation9 + $0xc84] ss:$28 sps:$4 sm:$0xff]   ;;  %v14706_v4 = vld [vmem:[#allocation9 + $0xc4c] ss:$28 sps:$4 sm:$0xff]   ;;  %v14712_v61 = vld [vmem:[#allocation9 + $0x1154] ss:$28 sps:$4 sm:$0xff]  }
 0x4b4   :  { %v14701_v6 = vld [vmem:[#allocation9 + $0xe40] ss:$28 sps:$4 sm:$0xff]   ;;  %v14704_v26 = vld [vmem:[#allocation9 + $0xc48] ss:$28 sps:$4 sm:$0xff]  }
 0x4b5   :  { %v18004_v51 = vadd.f32 %v6862_v9, %v6810_v42  ;;  %7208 = vmatpush2.bf16.msra.mxu1 %v14680_v13  ;;  %v14707_v23 = vld [vmem:[#allocation9 + $0xe08] ss:$28 sps:$4 sm:$0xff]   ;;  %v14715_v13 = vld [vmem:[#allocation9 + $0x1314] ss:$28 sps:$4 sm:$0xff]   ;;  %v14721_v42 = vld [vmem:[#allocation9 + $0x12dc] ss:$28 sps:$4 sm:$0xff]  }
 0x4b6   :  { %7245 = vmatpush1.bf16.msra.mxu0 %v14683_v27  ;;  %7209 = vmatprep.subr.bf16.mxu1 %v14688_v56  ;;  %v14713_v27 = vld [vmem:[#allocation9 + $0x1310] ss:$28 sps:$4 sm:$0xff]   ;;  %v14719_v9 = vld [vmem:[#allocation9 + $0x12d8] ss:$28 sps:$4 sm:$0xff]  }
 0x4b7   :  { %7246 = vmatprep.subr.bf16.mxu0 %v14691_v54  ;;  %v14710_v56 = vld [vmem:[#allocation9 + $0x1150] ss:$28 sps:$4 sm:$0xff]   ;;  %v14718_v54 = vld [vmem:[#allocation9 + $0x111c] ss:$28 sps:$4 sm:$0xff]  }
 0x4b9   :  { %7210 = vmatpush2.bf16.msra.mxu1 %v14686_v47  ;;  %v14716_v47 = vld [vmem:[#allocation9 + $0x1118] ss:$28 sps:$4 sm:$0xff]  }
 0x4ba   :  { %7247 = vmatpush1.bf16.msra.mxu0 %v14689_v57  ;;  %7211 = vmatprep.subr.bf16.mxu1 %v14694_v39  ;;  %v14727_v57 = vld [vmem:[#allocation9 + $0x12a4] ss:$28 sps:$4 sm:$0xff]  }
 0x4bb   :  { %7248 = vmatprep.subr.bf16.mxu0 %v14697_v40  ;;  %v14724_v39 = vld [vmem:[#allocation9 + $0x10e4] ss:$28 sps:$4 sm:$0xff]  }
 0x4bc   :  { %v14725_v40 = vld [vmem:[#allocation9 + $0x12a0] ss:$28 sps:$4 sm:$0xff]  }
 0x4bd   :  { %7212 = vmatpush2.bf16.msra.mxu1 %v14692_v28  ;;  %v14722_v28 = vld [vmem:[#allocation9 + $0x10e0] ss:$28 sps:$4 sm:$0xff]  }
 0x4be   :  { %7249 = vmatpush1.bf16.msra.mxu0 %v14695_v12  ;;  %7213 = vmatprep.subr.bf16.mxu1 %v14700_v48  ;;  %v14733_v12 = vld [vmem:[#allocation9 + $0x126c] ss:$28 sps:$4 sm:$0xff]  }
 0x4bf   :  { %7250 = vmatprep.subr.bf16.mxu0 %v14703_v15  ;;  %v14730_v48 = vld [vmem:[#allocation9 + $0x10ac] ss:$28 sps:$4 sm:$0xff]  }
 0x4c0   :  { %v14731_v15 = vld [vmem:[#allocation9 + $0x1268] ss:$28 sps:$4 sm:$0xff]  }
 0x4c1   :  { %7214 = vmatpush2.bf16.msra.mxu1 %v14698_v14  ;;  %v14728_v14 = vld [vmem:[#allocation9 + $0x10a8] ss:$28 sps:$4 sm:$0xff]  }
 0x4c2   :  { %7251 = vmatpush1.bf16.msra.mxu0 %v14701_v6  ;;  %7215 = vmatprep.subr.bf16.mxu1 %v14706_v4  ;;  %v14739_v6 = vld [vmem:[#allocation9 + $0x1234] ss:$28 sps:$4 sm:$0xff]  }
 0x4c3   :  { %7252 = vmatprep.subr.bf16.mxu0 %v14709_v18  ;;  %v14736_v4 = vld [vmem:[#allocation9 + $0x1074] ss:$28 sps:$4 sm:$0xff]  }
 0x4c4   :  { %v14737_v18 = vld [vmem:[#allocation9 + $0x1230] ss:$28 sps:$4 sm:$0xff]  }
 0x4c5   :  { %7216 = vmatpush2.bf16.msra.mxu1 %v14704_v26  ;;  %v14734_v26 = vld [vmem:[#allocation9 + $0x1070] ss:$28 sps:$4 sm:$0xff]  }
 0x4c6   :  { %7253 = vmatpush1.bf16.msra.mxu0 %v14707_v23  ;;  %7291 = vmatprep.subr.bf16.mxu1 %v14715_v13  ;;  %v14745_v23 = vld [vmem:[#allocation9 + $0x11fc] ss:$28 sps:$4 sm:$0xff]  }
 0x4c7   :  { %7254 = vmatprep.subr.bf16.mxu0 %v14712_v61  ;;  %v14742_v13 = vld [vmem:[#allocation9 + $0x103c] ss:$28 sps:$4 sm:$0xff]  }
 0x4c8   :  { %7218 = vmatmul.mubr.bf16.vlgmr.msra.gmra.mxu1 %v17872_v29  ;;  %v14743_v61 = vld [vmem:[#allocation9 + $0x11f8] ss:$28 sps:$4 sm:$0xff]  }
 0x4c9   :  { %7227 = vmatprep.mubr.bf16.mxu1 %v17883_v55  ;;  %7292 = vmatpush1.bf16.msra.mxu1 %v14713_v27  ;;  %v14740_v27 = vld [vmem:[#allocation9 + $0x1038] ss:$28 sps:$4 sm:$0xff]  }
 0x4ca   :  { %7255 = vmatpush2.bf16.msra.mxu0 %v14710_v56  ;;  %7293 = vmatprep.subr.bf16.mxu1 %v14721_v42  ;;  %v14751_v56 = vld [vmem:[#allocation9 + $0x11c4] ss:$28 sps:$4 sm:$0xff]  }
 0x4cb   :  { %7256 = vmatprep.subr.bf16.mxu0 %v14718_v54  ;;  %v14748_v42 = vld [vmem:[#allocation9 + $0x1004] ss:$28 sps:$4 sm:$0xff]  }
 0x4cc   :  { %v14749_v54 = vld [vmem:[#allocation9 + $0x11c0] ss:$28 sps:$4 sm:$0xff]  }
 0x4cd   :  { %7294 = vmatpush1.bf16.msra.mxu1 %v14719_v9  ;;  %v14746_v9 = vld [vmem:[#allocation9 + $0x1000] ss:$28 sps:$4 sm:$0xff]  }
 0x4ce   :  { %7257 = vmatpush2.bf16.msra.mxu0 %v14716_v47  ;;  %7295 = vmatprep.subr.bf16.mxu1 %v14727_v57  ;;  %v14757_v47 = vld [vmem:[#allocation9 + $0x118c] ss:$28 sps:$4 sm:$0xff]  }
 0x4cf   :  { %7258 = vmatprep.subr.bf16.mxu0 %v14724_v39  ;;  %v14754_v57 = vld [vmem:[#allocation9 + $0xfcc] ss:$28 sps:$4 sm:$0xff]  }
 0x4d0   :  { %7228 = vmatmul.mubr.bf16.gmra.mxu1 %v17892_v49  ;;  %v14755_v39 = vld [vmem:[#allocation9 + $0x1188] ss:$28 sps:$4 sm:$0xff]  }
 0x4d1   :  { %7296 = vmatpush1.bf16.msra.mxu1 %v14725_v40  ;;  %7323 = vmatprep.mubr.bf16.mxu1 %v17897_v3  ;;  %v14752_v40 = vld [vmem:[#allocation9 + $0xfc8] ss:$28 sps:$4 sm:$0xff]  }
 0x4d2   :  { %7259 = vmatpush2.bf16.msra.mxu0 %v14722_v28  ;;  %7297 = vmatprep.subr.bf16.mxu1 %v14733_v12  ;;  %v14760_v28 = vld [vmem:[#allocation9 + $0x14d4] ss:$28 sps:$4 sm:$0xff]  }
 0x4d3   :  { %7260 = vmatprep.subr.bf16.mxu0 %v14730_v48  ;;  %v14763_v12 = vld [vmem:[#allocation9 + $0x1694] ss:$28 sps:$4 sm:$0xff]   ;;  %v18010_v48 = vpop.f32.mrf.mxu1 }
 0x4d5   :  { %7298 = vmatpush1.bf16.msra.mxu1 %v14731_v15  ;;  %v14758_v15 = vld [vmem:[#allocation9 + $0x14d0] ss:$28 sps:$4 sm:$0xff]  }
 0x4d6   :  { %7261 = vmatpush2.bf16.msra.mxu0 %v14728_v14  ;;  %7299 = vmatprep.subr.bf16.mxu1 %v14739_v6  ;;  %v18012_v14 = vpop.f32.mrf.mxu0  ;;  %v14761_v6 = vld [vmem:[#allocation9 + $0x1690] ss:$28 sps:$4 sm:$0xff]  }
 0x4d7   :  { %7262 = vmatprep.subr.bf16.mxu0 %v14736_v4 }
 0x4d9   :  { %7300 = vmatpush1.bf16.msra.mxu1 %v14737_v18  ;;  %v14766_v18 = vld [vmem:[#allocation9 + $0x149c] ss:$28 sps:$4 sm:$0xff]  }
 0x4da   :  { %7263 = vmatpush2.bf16.msra.mxu0 %v14734_v26  ;;  %7301 = vmatprep.subr.bf16.mxu1 %v14745_v23  ;;  %v14769_v26 = vld [vmem:[#allocation9 + $0x165c] ss:$28 sps:$4 sm:$0xff]  }
 0x4db   :  { %7264 = vmatprep.subr.bf16.mxu0 %v14742_v13 }
 0x4dd   :  { %7302 = vmatpush1.bf16.msra.mxu1 %v14743_v61 }
 0x4de   :  { %7265 = vmatpush2.bf16.msra.mxu0 %v14740_v27  ;;  %7303 = vmatprep.subr.bf16.mxu1 %v14751_v56  ;;  %v14764_v27 = vld [vmem:[#allocation9 + $0x1498] ss:$28 sps:$4 sm:$0xff]  }
 0x4df   :  { %7266 = vmatprep.subr.bf16.mxu0 %v14748_v42 }
 0x4e1   :  { %7304 = vmatpush1.bf16.msra.mxu1 %v14749_v54 }
 0x4e2   :  { %7267 = vmatpush2.bf16.msra.mxu0 %v14746_v9  ;;  %7305 = vmatprep.subr.bf16.mxu1 %v14757_v47  ;;  %v14767_v9 = vld [vmem:[#allocation9 + $0x1658] ss:$28 sps:$4 sm:$0xff]   ;;  %v14772_v47 = vld [vmem:[#allocation9 + $0x1464] ss:$28 sps:$4 sm:$0xff]  }
 0x4e3   :  { %7268 = vmatprep.subr.bf16.mxu0 %v14754_v57 }
 0x4e5   :  { %7306 = vmatpush1.bf16.msra.mxu1 %v14755_v39 }
 0x4e6   :  { %7269 = vmatpush2.bf16.msra.mxu0 %v14752_v40  ;;  %7307 = vmatprep.subr.bf16.mxu1 %v14760_v28 }
 0x4e7   :  { %v6901_v4 = vpop.f32.mrf.mxu1  ;;  %7344 = vmatprep.subr.bf16.mxu0 %v14763_v12 }
 0x4e8   :  { %v6902_v23 = vadd.f32 %v6901_v4, %v17981_v8  ;;  %v6954_v13 = vpop.f32.mrf.mxu0  ;;  %v14775_v8 = vld [vmem:[#allocation9 + $0x1624] ss:$28 sps:$4 sm:$0xff]  }
 0x4e9   :  { %7271 = vmatmul.mubr.bf16.vlgmr.msra.gmra.mxu0 %v17924_v33  ;;  %7308 = vmatpush2.bf16.msra.mxu1 %v14758_v15  ;;  %v6903_v61 = vpop.f32.mrf.mxu1  ;;  %v14770_v15 = vld [vmem:[#allocation9 + $0x1460] ss:$28 sps:$4 sm:$0xff]  }
 0x4ea   :  { %v18016_v56 = vadd.f32 %v6954_v13, %v6902_v23  ;;  %7280 = vmatprep.mubr.bf16.mxu0 %v17928_v34  ;;  %7345 = vmatpush1.bf16.msra.mxu0 %v14761_v6  ;;  %v6904_v42 = vadd.f32 %v6903_v61, %v17986_v63  ;;  %v6956_v54 = vpop.f32.mrf.mxu0  ;;  %v14773_v6 = vld [vmem:[#allocation9 + $0x1620] ss:$28 sps:$4 sm:$0xff]   ;;  %v14778_v23 = vld [vmem:[#allocation9 + $0x142c] ss:$28 sps:$4 sm:$0xff]  }
 0x4eb   :  { %v6905_v57 = vpop.f32.mrf.mxu1  ;;  %7309 = vmatprep.subr.bf16.mxu1 %v14766_v18  ;;  %7346 = vmatprep.subr.bf16.mxu0 %v14769_v26  ;;  %v14781_v26 = vld [vmem:[#allocation9 + $0x15ec] ss:$28 sps:$4 sm:$0xff]  }
 0x4ec   :  { %v18020_v39 = vadd.f32 %v6956_v54, %v6904_v42  ;;  %v6906_v40 = vadd.f32 %v6905_v57, %v17991_v0  ;;  %v6958_v28 = vpop.f32.mrf.mxu0  ;;  %v14784_v57 = vld [vmem:[#allocation9 + $0x13f4] ss:$28 sps:$4 sm:$0xff]  }
 0x4ed   :  { %7310 = vmatpush2.bf16.msra.mxu1 %v14764_v27  ;;  %v18023_v12 = vpop.f32.mrf.mxu1  ;;  %v14776_v27 = vld [vmem:[#allocation9 + $0x1428] ss:$28 sps:$4 sm:$0xff]  }
 0x4ee   :  { %v18025_v4 = vadd.f32 %v6958_v28, %v6906_v40  ;;  %7347 = vmatpush1.bf16.msra.mxu0 %v14767_v9  ;;  %v18027_v63 = vpop.f32.mrf.mxu0  ;;  %7311 = vmatprep.subr.bf16.mxu1 %v14772_v47  ;;  %v14779_v47 = vld [vmem:[#allocation9 + $0x15e8] ss:$28 sps:$4 sm:$0xff]  }
 0x4ef   :  { %v6911_v18 = vpop.f32.mrf.mxu1  ;;  %7348 = vmatprep.subr.bf16.mxu0 %v14775_v8  ;;  %v14787_v8 = vld [vmem:[#allocation9 + $0x15b4] ss:$28 sps:$4 sm:$0xff]  }
 0x4f0   :  { %v6912_v13 = vadd.f32 %v6911_v18, %v17996_v1  ;;  %v6964_v61 = vpop.f32.mrf.mxu0  ;;  %v14782_v18 = vld [vmem:[#allocation9 + $0x13f0] ss:$28 sps:$4 sm:$0xff]  }
 0x4f1   :  { %7281 = vmatmul.mubr.bf16.gmra.mxu0 %v17934_v16  ;;  %7312 = vmatpush2.bf16.msra.mxu1 %v14770_v15  ;;  %v6913_v0 = vpop.f32.mrf.mxu1 }
 0x4f2   :  { %v18031_v42 = vadd.f32 %v6964_v61, %v6912_v13  ;;  %7349 = vmatpush1.bf16.msra.mxu0 %v14773_v6  ;;  %v6914_v54 = vadd.f32 %v6913_v0, %v18001_v19  ;;  %v6966_v9 = vpop.f32.mrf.mxu0  ;;  %7313 = vmatprep.subr.bf16.mxu1 %v14778_v23  ;;  %v14785_v19 = vld [vmem:[#allocation9 + $0x15b0] ss:$28 sps:$4 sm:$0xff]   ;;  %v14790_v6 = vld [vmem:[#allocation9 + $0x13bc] ss:$28 sps:$4 sm:$0xff]   ;;  %v14796_v0 = vld [vmem:[#allocation9 + $0x1384] ss:$28 sps:$4 sm:$0xff]  }
 0x4f3   :  { %v6915_v40 = vpop.f32.mrf.mxu1  ;;  %7350 = vmatprep.subr.bf16.mxu0 %v14781_v26  ;;  %7376 = vmatprep.mubr.bf16.mxu0 %v19147_v37  ;;  %v14793_v23 = vld [vmem:[#allocation9 + $0x157c] ss:$28 sps:$4 sm:$0xff]  }
 0x4f4   :  { %v18035_v1 = vadd.f32 %v6966_v9, %v6914_v54  ;;  %v6916_v28 = vadd.f32 %v6915_v40, %v18004_v51  ;;  %v6968_v15 = vpop.f32.mrf.mxu0  ;;  %v14788_v26 = vld [vmem:[#allocation9 + $0x13b8] ss:$28 sps:$4 sm:$0xff]   ;;  %v14799_v54 = vld [vmem:[#allocation9 + $0x1544] ss:$28 sps:$4 sm:$0xff]   ;;  %v6696_v51 = vadd.f32 %v17957_v24, %v17948_v30 }
 0x4f5   :  { %7314 = vmatpush2.bf16.msra.mxu1 %v14776_v27  ;;  %v14791_v61 = vld [vmem:[#allocation9 + $0x1578] ss:$28 sps:$4 sm:$0xff]   ;;  %v14794_v27 = vld [vmem:[#allocation9 + $0x1380] ss:$28 sps:$4 sm:$0xff]  }
 0x4f6   :  { %v18038_v13 = vadd.f32 %v6968_v15, %v6916_v28  ;;  %7351 = vmatpush1.bf16.msra.mxu0 %v14779_v47  ;;  %7315 = vmatprep.subr.bf16.mxu1 %v14784_v57  ;;  %v14797_v9 = vld [vmem:[#allocation9 + $0x1540] ss:$28 sps:$4 sm:$0xff]   ;;  %v14802_v47 = vld [vmem:[#allocation9 + $0x134c] ss:$28 sps:$4 sm:$0xff]   ;;  %v6749_v40 = vadd.f32 %v17961_v53, %v6696_v51 }
 0x4f7   :  { %7352 = vmatprep.subr.bf16.mxu0 %v14787_v8  ;;  %v14805_v57 = vld [vmem:[#allocation9 + $0x150c] ss:$28 sps:$4 sm:$0xff]   ;;  %v14808_v15 = vld [vmem:[#allocation9 + $0x19c] ss:$28 sps:$4 sm:$0xff]  }
 0x4f8   :  { %v14800_v8 = vld [vmem:[#allocation9 + $0x1348] ss:$28 sps:$4 sm:$0xff]   ;;  %v14811_v24 = vld [vmem:[#allocation9 + $0x51c] ss:$28 sps:$4 sm:$0xff]  }
 0x4f9   :  { %7316 = vmatpush2.bf16.msra.mxu1 %v14782_v18  ;;  %v14803_v28 = vld [vmem:[#allocation9 + $0x1508] ss:$28 sps:$4 sm:$0xff]   ;;  %v6802_v18 = vadd.f32 %v17989_v7, %v6749_v40 }
 0x4fa   :  { %7353 = vmatpush1.bf16.msra.mxu0 %v14785_v19  ;;  %7317 = vmatprep.subr.bf16.mxu1 %v14790_v6  ;;  %v6706_v19 = vadd.f32 %v17976_v44, %v17948_v30  ;;  %v6917_v6 = vpop.f32.mrf.mxu1 }
 0x4fb   :  { %7354 = vmatprep.subr.bf16.mxu0 %v14793_v23  ;;  %v14806_v23 = vld [vmem:[#allocation9 + $0x198] ss:$28 sps:$4 sm:$0xff]   ;;  %v6855_v53 = vadd.f32 %v17993_v31, %v6802_v18  ;;  %v14812_v31 = vld [vmem:[#allocation9 + $0x160] ss:$28 sps:$4 sm:$0xff]  }
 0x4fc   :  { %v6759_v7 = vadd.f32 %v17978_v21, %v6706_v19  ;;  %v14820_v21 = vld [vmem:[#allocation9 + $0x12c] ss:$28 sps:$4 sm:$0xff]  }
 0x4fd   :  { %7318 = vmatpush2.bf16.msra.mxu1 %v14788_v26  ;;  %v14809_v26 = vld [vmem:[#allocation9 + $0x518] ss:$28 sps:$4 sm:$0xff]   ;;  %v6908_v51 = vadd.f32 %v18023_v12, %v6855_v53  ;;  %v14823_v12 = vld [vmem:[#allocation9 + $0x4ac] ss:$28 sps:$4 sm:$0xff]  }
 0x4fe   :  { %7355 = vmatpush1.bf16.msra.mxu0 %v14791_v61  ;;  %7319 = vmatprep.subr.bf16.mxu1 %v14796_v0  ;;  %v14814_v61 = vld [vmem:[#allocation9 + $0x164] ss:$28 sps:$4 sm:$0xff]   ;;  %v14827_v53 = vld [vmem:[#allocation9 + $0x470] ss:$28 sps:$4 sm:$0xff]  }
 0x4ff   :  { %7356 = vmatprep.subr.bf16.mxu0 %v14799_v54  ;;  %v14817_v0 = vld [vmem:[#allocation9 + $0x4e4] ss:$28 sps:$4 sm:$0xff]  }
 0x501   :  { %7320 = vmatpush2.bf16.msra.mxu1 %v14794_v27  ;;  %v14815_v27 = vld [vmem:[#allocation9 + $0x4e0] ss:$28 sps:$4 sm:$0xff]  }
 0x502   :  { %7357 = vmatpush1.bf16.msra.mxu0 %v14797_v9  ;;  %7321 = vmatprep.subr.bf16.mxu1 %v14802_v47  ;;  %v6812_v9 = vadd.f32 %v18010_v48, %v6759_v7  ;;  %v14821_v48 = vld [vmem:[#allocation9 + $0x4a8] ss:$28 sps:$4 sm:$0xff]   ;;  %v6970_v7 = vpop.f32.mrf.mxu0 }
 0x503   :  { %7358 = vmatprep.subr.bf16.mxu0 %v14805_v57  ;;  %v6961_v57 = vadd.f32 %v18027_v63, %v6908_v51 }
 0x505   :  { %7322 = vmatpush2.bf16.msra.mxu1 %v14800_v8 }
 0x506   :  { %7359 = vmatpush1.bf16.msra.mxu0 %v14803_v28  ;;  %7397 = vmatprep.subr.bf16.mxu1 %v14808_v15  ;;  %v14818_v28 = vld [vmem:[#allocation9 + $0x128] ss:$28 sps:$4 sm:$0xff]  }
 0x507   :  { %7450 = vmatprep.subr.bf16.mxu0 %v14811_v24  ;;  %v14826_v24 = vld [vmem:[#allocation9 + $0xf4] ss:$28 sps:$4 sm:$0xff]  }
 0x508   :  { %v7007_v54 = vpop.f32.mrf.mxu1  ;;  %7324 = vmatmul.mubr.bf16.vlgmr.msra.gmra.mxu1 %v17926_v62 }
 0x509   :  { %v18051_v30 = vadd.f32 %v7007_v54, %v18016_v56  ;;  %7377 = vmatmul.mubr.bf16.vlgmr.msra.gmra.mxu0 %v17796_v20  ;;  %7333 = vmatprep.mubr.bf16.mxu1 %v17814_v60  ;;  %v14835_v54 = vld [vmem:[#allocation9 + $0x43c] ss:$28 sps:$4 sm:$0xff]  }
 0x50a   :  { %7398 = vmatpush1.bf16.msra.mxu1 %v14806_v23  ;;  %7451 = vmatpush1.bf16.msra.mxu0 %v14809_v26  ;;  %v7009_v44 = vpop.f32.mrf.mxu1  ;;  %v14824_v26 = vld [vmem:[#allocation9 + $0xf0] ss:$28 sps:$4 sm:$0xff]  }
 0x50b   :  { %v18057_v47 = vadd.f32 %v7009_v44, %v18020_v39  ;;  %7399 = vmatprep.subr.bf16.mxu1 %v14814_v61  ;;  %7452 = vmatprep.subr.bf16.mxu0 %v14817_v0  ;;  %v6865_v39 = vadd.f32 %v18012_v14, %v6812_v9 }
 0x50c   :  { %v7011_v56 = vpop.f32.mrf.mxu1  ;;  %7386 = vmatprep.mubr.bf16.mxu0 %v19147_v37 }
 0x50d   :  { %v18062_v40 = vadd.f32 %v7011_v56, %v18025_v4  ;;  %v14829_v4 = vld [vmem:[#allocation9 + $0x474] ss:$28 sps:$4 sm:$0xff]   ;;  %v6918_v63 = vadd.f32 %v6917_v6, %v6865_v39  ;;  %v14836_v39 = vld [vmem:[#allocation9 + $0x80] ss:$28 sps:$4 sm:$0xff]  }
 0x50e   :  { %7400 = vmatpush1.bf16.msra.mxu1 %v14812_v31  ;;  %7453 = vmatpush1.bf16.msra.mxu0 %v14815_v27  ;;  %v7013_v8 = vpop.f32.mrf.mxu1 }
 0x50f   :  { %v8111_v15 = vadd.f32 %v18062_v40, %v18051_v30  ;;  %v18067_v18 = vadd.f32 %v7013_v8, %v6961_v57  ;;  %7401 = vmatprep.subr.bf16.mxu1 %v14820_v21  ;;  %7454 = vmatprep.subr.bf16.mxu0 %v14823_v12  ;;  %v6971_v44 = vadd.f32 %v6970_v7, %v6918_v63  ;;  %v14830_v21 = vld [vmem:[#allocation9 + $0xb8] ss:$28 sps:$4 sm:$0xff]   ;;  %v14841_v8 = vld [vmem:[#allocation9 + $0x404] ss:$28 sps:$4 sm:$0xff]  }
 0x510   :  { %v7017_v19 = vpop.f32.mrf.mxu1  ;;  %7334 = vmatmul.mubr.bf16.gmra.mxu1 %v17936_v5  ;;  %v14833_v12 = vld [vmem:[#allocation9 + $0x438] ss:$28 sps:$4 sm:$0xff]  }
 0x511   :  { %v18071_v23 = vadd.f32 %v7017_v19, %v18031_v42  ;;  %7387 = vmatmul.mubr.bf16.gmra.mxu0 %v17820_v32  ;;  %7429 = vmatprep.mubr.bf16.mxu1 %v17695_v17  ;;  %v8120_v61 = vadd.f32 %v18067_v18, %v18057_v47  ;;  %v14832_v42 = vld [vmem:[#allocation9 + $0xbc] ss:$28 sps:$4 sm:$0xff]   ;;  %v14844_v19 = vld [vmem:[#allocation9 + $0x4c] ss:$28 sps:$4 sm:$0xff]  }
 0x512   :  { %7402 = vmatpush1.bf16.msra.mxu1 %v14818_v28  ;;  %7455 = vmatpush1.bf16.msra.mxu0 %v14821_v48  ;;  %v7019_v14 = vpop.f32.mrf.mxu1 }
 0x513   :  { %v8112_v0 = vadd.f32 %v8111_v15, %v18071_v23  ;;  %7482 = vmatprep.mubr.bf16.mxu0 %v17705_v2  ;;  %v18080_v6 = vadd.f32 %v7019_v14, %v18035_v1  ;;  %7403 = vmatprep.subr.bf16.mxu1 %v14826_v24  ;;  %v14838_v1 = vld [vmem:[#allocation9 + $0x84] ss:$28 sps:$4 sm:$0xff]  }
 0x514   :  { %v7021_v51 = vpop.f32.mrf.mxu1  ;;  %7456 = vmatprep.subr.bf16.mxu0 %v14829_v4  ;;  %v14839_v15 = vld [vmem:[#allocation9 + $0x400] ss:$28 sps:$4 sm:$0xff]   ;;  %v14847_v4 = vld [vmem:[#allocation9 + $0x3cc] ss:$28 sps:$4 sm:$0xff]  }
 0x515   :  { %v8121_v31 = vadd.f32 %v8120_v61, %v18080_v6  ;;  %v7022_v27 = vadd.f32 %v7021_v51, %v18038_v13 }
 0x516   :  { %7404 = vmatpush1.bf16.msra.mxu1 %v14824_v26  ;;  %7457 = vmatpush1.bf16.msra.mxu0 %v14827_v53  ;;  %v7023_v9 = vpop.f32.mrf.mxu1  ;;  %v14842_v26 = vld [vmem:[#allocation9 + $0x48] ss:$28 sps:$4 sm:$0xff]  }
 0x517   :  { %v8113_v56 = vadd.f32 %v8112_v0, %v7022_v27  ;;  %v18084_v57 = vadd.f32 %v7023_v9, %v6971_v44  ;;  %7405 = vmatprep.subr.bf16.mxu1 %v14832_v42  ;;  %7458 = vmatprep.subr.bf16.mxu0 %v14835_v54  ;;  %v14845_v53 = vld [vmem:[#allocation9 + $0x3c8] ss:$28 sps:$4 sm:$0xff]   ;;  %v14850_v42 = vld [vmem:[#allocation9 + $0x14] ss:$28 sps:$4 sm:$0xff]  }
 0x518   :  { %v14853_v54 = vld [vmem:[#allocation9 + $0x394] ss:$28 sps:$4 sm:$0xff]  }
 0x519   :  { %v8114_v28 = vrot.slane %v8113_v56, 4  ;;  %v8122_v48 = vadd.f32 %v8121_v31, %v18084_v57  ;;  %v14848_v44 = vld [vmem:[#allocation9 + $0x10] ss:$28 sps:$4 sm:$0xff]  }
 0x51a   :  { %7406 = vmatpush1.bf16.msra.mxu1 %v14830_v21  ;;  %7459 = vmatpush1.bf16.msra.mxu0 %v14833_v12  ;;  %v14851_v31 = vld [vmem:[#allocation9 + $0x390] ss:$28 sps:$4 sm:$0xff]   ;;  %v14856_v12 = vld [vmem:[#allocation9 + $0x35c] ss:$28 sps:$4 sm:$0xff]  }
 0x51b   :  { %v8115_v13 = vadd.f32 %v8114_v28, %v8113_v56  ;;  %v8123_v24 = vrot.slane %v8122_v48, 4  ;;  %7407 = vmatprep.subr.bf16.mxu1 %v14838_v1  ;;  %7460 = vmatprep.subr.bf16.mxu0 %v14841_v8  ;;  %v14859_v56 = vld [vmem:[#allocation9 + $0x6dc] ss:$28 sps:$4 sm:$0xff]  }
 0x51c   :  { %v14854_v28 = vld [vmem:[#allocation9 + $0x358] ss:$28 sps:$4 sm:$0xff]  }
 0x51d   :  { %v8116_v63 = vrot.slane %v8115_v13, 2  ;;  %v8124_v14 = vadd.f32 %v8123_v24, %v8122_v48  ;;  %v14857_v24 = vld [vmem:[#allocation9 + $0x6d8] ss:$28 sps:$4 sm:$0xff]  }
 0x51e   :  { %7408 = vmatpush1.bf16.msra.mxu1 %v14836_v39  ;;  %7461 = vmatpush1.bf16.msra.mxu0 %v14839_v15 }
 0x51f   :  { %v8117_v61 = vadd.f32 %v8116_v63, %v8115_v13  ;;  %v8125_v0 = vrot.slane %v8124_v14, 2  ;;  %7409 = vmatprep.subr.bf16.mxu1 %v14844_v19  ;;  %7462 = vmatprep.subr.bf16.mxu0 %v14847_v4  ;;  %v14862_v19 = vld [vmem:[#allocation9 + $0x324] ss:$28 sps:$4 sm:$0xff]  }
 0x520   :  { %v14865_v63 = vld [vmem:[#allocation9 + $0x6a4] ss:$28 sps:$4 sm:$0xff]  }
 0x521   :  { %v8118_v7 = vrot.slane %v8117_v61, 1  ;;  %v8126_v51 = vadd.f32 %v8125_v0, %v8124_v14  ;;  %v14863_v0 = vld [vmem:[#allocation9 + $0x6a0] ss:$28 sps:$4 sm:$0xff]  }
 0x522   :  { %7410 = vmatpush1.bf16.msra.mxu1 %v14842_v26  ;;  %7463 = vmatpush1.bf16.msra.mxu0 %v14845_v53  ;;  %v14860_v26 = vld [vmem:[#allocation9 + $0x320] ss:$28 sps:$4 sm:$0xff]  }
 0x523   :  { %v8119_v9 = vadd.f32 %v8118_v7, %v8117_v61  ;;  %v8127_v21 = vrot.slane %v8126_v51, 1  ;;  %7411 = vmatprep.subr.bf16.mxu1 %v14850_v42  ;;  %7464 = vmatprep.subr.bf16.mxu0 %v14853_v54  ;;  %v14868_v42 = vld [vmem:[#allocation9 + $0x2ec] ss:$28 sps:$4 sm:$0xff]  }
 0x525   :  { %v8174_v1 = vmul.f32 0.03125, %v8119_v9  ;;  %v8128_v8 = vadd.f32 %v8127_v21, %v8126_v51  ;;  %v14866_v9 = vld [vmem:[#allocation9 + $0x2e8] ss:$28 sps:$4 sm:$0xff]  }
 0x526   :  { %7412 = vmatpush1.bf16.msra.mxu1 %v14848_v44  ;;  %7465 = vmatpush1.bf16.msra.mxu0 %v14851_v31  ;;  %v14869_v21 = vld [vmem:[#allocation9 + $0x668] ss:$28 sps:$4 sm:$0xff]  }
 0x527   :  { %v18088_v48 = vsub.f32 %v18051_v30, %v8174_v1  ;;  %v18091_v39 = vsub.f32 %v18062_v40, %v8174_v1  ;;  %v18094_v15 = vsub.f32 %v18071_v23, %v8174_v1  ;;  %v18096_v13 = vsub.f32 %v7022_v27, %v8174_v1  ;;  %7413 = vmatprep.subr.bf16.mxu1 %v14856_v12  ;;  %v14874_v12 = vld [vmem:[#allocation9 + $0x2b4] ss:$28 sps:$4 sm:$0xff]  }
 0x528   :  { %v8175_v4 = vmul.f32 0.03125, %v8128_v8  ;;  %7466 = vmatprep.subr.bf16.mxu0 %v14859_v56  ;;  %v14877_v8 = vld [vmem:[#allocation9 + $0x634] ss:$28 sps:$4 sm:$0xff]  }
 0x529   :  { %19151 = vst [vmem:[#allocation127_spill] sm:$0xff] %v18088_v48  ;;  %19152 = vst [vmem:[#allocation118_spill] sm:$0xff] %v18091_v39  ;;  %v8209_v14 = vmul.f32 %v18088_v48, %v18088_v48  ;;  %v8216_v30 = vmul.f32 %v18091_v39, %v18091_v39  ;;  %v8223_v53 = vmul.f32 %v18094_v15, %v18094_v15  ;;  %v15063_v48 = vld [vmem:[#allocation9 + $0x146c] ss:$28 sps:$4 sm:$0xff]  }
 0x52a   :  { %19153 = vst [vmem:[#allocation119_spill] sm:$0xff] %v18094_v15  ;;  %19154 = vst [vmem:[#allocation124_spill] sm:$0xff] %v18096_v13  ;;  %v18103_v40 = vsub.f32 %v18057_v47, %v8175_v4  ;;  %v18106_v23 = vsub.f32 %v18067_v18, %v8175_v4  ;;  %v18109_v27 = vsub.f32 %v18080_v6, %v8175_v4  ;;  %7414 = vmatpush2.bf16.msra.mxu1 %v14854_v28  ;;  %v14871_v6 = vld [vmem:[#allocation9 + $0x66c] ss:$28 sps:$4 sm:$0xff]  }
 0x52b   :  { %v8237_v61 = vadd.f32 %v8216_v30, %v8209_v14  ;;  %7467 = vmatpush2.bf16.msra.mxu0 %v14857_v24  ;;  %7415 = vmatprep.subr.bf16.mxu1 %v14862_v19  ;;  %v18114_v54 = vsub.f32 %v18084_v57, %v8175_v4  ;;  %v8230_v7 = vmul.f32 %v18096_v13, %v18096_v13  ;;  %v14872_v19 = vld [vmem:[#allocation9 + $0x2b0] ss:$28 sps:$4 sm:$0xff]   ;;  %v14880_v14 = vld [vmem:[#allocation9 + $0x27c] ss:$28 sps:$4 sm:$0xff]  }
 0x52c   :  { %19155 = vst [vmem:[#allocation125_spill] sm:$0xff] %v18103_v40  ;;  %19156 = vst [vmem:[#allocation136_spill] sm:$0xff] %v18106_v23  ;;  %v8210_v47 = vmul.f32 %v18103_v40, %v18103_v40  ;;  %v8217_v18 = vmul.f32 %v18106_v23, %v18106_v23  ;;  %7468 = vmatprep.subr.bf16.mxu0 %v14865_v63  ;;  %v8224_v44 = vmul.f32 %v18109_v27, %v18109_v27  ;;  %v14875_v63 = vld [vmem:[#allocation9 + $0x630] ss:$28 sps:$4 sm:$0xff]   ;;  %v14926_v13 = vld [vmem:[#allocation9 + $0x7b8] ss:$28 sps:$4 sm:$0xff]  }
 0x52d   :  { %19157 = vst [vmem:[#allocation137_spill] sm:$0xff] %v18109_v27  ;;  %19158 = vst [vmem:[#allocation128_spill] sm:$0xff] %v18114_v54  ;;  %v8238_v51 = vadd.f32 %v8237_v61, %v8223_v53  ;;  %v8231_v56 = vmul.f32 %v18114_v54, %v18114_v54  ;;  %v15028_v27 = vld [vmem:[#allocation9 + $0xe80] ss:$28 sps:$4 sm:$0xff]   ;;  %v15094_v40 = vld [vmem:[#allocation9 + $0x1698] ss:$28 sps:$4 sm:$0xff]  }
 0x52e   :  { %v8246_v31 = vadd.f32 %v8217_v18, %v8210_v47  ;;  %7416 = vmatpush2.bf16.msra.mxu1 %v14860_v26  ;;  %v14883_v26 = vld [vmem:[#allocation9 + $0x5fc] ss:$28 sps:$4 sm:$0xff]   ;;  %v14886_v18 = vld [vmem:[#allocation9 + $0x244] ss:$28 sps:$4 sm:$0xff]  }
 0x52f   :  { %v8239_v57 = vadd.f32 %v8238_v51, %v8230_v7  ;;  %7469 = vmatpush2.bf16.msra.mxu0 %v14863_v0  ;;  %7417 = vmatprep.subr.bf16.mxu1 %v14868_v42  ;;  %v14878_v0 = vld [vmem:[#allocation9 + $0x278] ss:$28 sps:$4 sm:$0xff]   ;;  %v7060_v7 = vpop.f32.mrf.mxu0  ;;  %v14889_v51 = vld [vmem:[#allocation9 + $0x5c4] ss:$28 sps:$4 sm:$0xff]  }
 0x530   :  { %v8247_v1 = vadd.f32 %v8246_v31, %v8224_v44  ;;  %7470 = vmatprep.subr.bf16.mxu0 %v14871_v6  ;;  %v14881_v47 = vld [vmem:[#allocation9 + $0x5f8] ss:$28 sps:$4 sm:$0xff]  }
 0x531   :  { %v8240_v28 = vrot.slane %v8239_v57, 4  ;;  %v15075_v23 = vld [vmem:[#allocation9 + $0x13fc] ss:$28 sps:$4 sm:$0xff]  }
 0x532   :  { %v8248_v24 = vadd.f32 %v8247_v1, %v8231_v56  ;;  %7418 = vmatpush2.bf16.msra.mxu1 %v14866_v9  ;;  %v14884_v9 = vld [vmem:[#allocation9 + $0x240] ss:$28 sps:$4 sm:$0xff]   ;;  %v7062_v1 = vpop.f32.mrf.mxu0 }
 0x533   :  { %v8241_v4 = vadd.f32 %v8240_v28, %v8239_v57  ;;  %7471 = vmatpush2.bf16.msra.mxu0 %v14869_v21  ;;  %7419 = vmatprep.subr.bf16.mxu1 %v14874_v12  ;;  %v14887_v21 = vld [vmem:[#allocation9 + $0x5c0] ss:$28 sps:$4 sm:$0xff]   ;;  %v14892_v12 = vld [vmem:[#allocation9 + $0x20c] ss:$28 sps:$4 sm:$0xff]  }
 0x534   :  { %v8249_v30 = vrot.slane %v8248_v24, 4  ;;  %7472 = vmatprep.subr.bf16.mxu0 %v14877_v8  ;;  %v14895_v8 = vld [vmem:[#allocation9 + $0x58c] ss:$28 sps:$4 sm:$0xff]  }
 0x535   :  { %v8242_v53 = vrot.slane %v8241_v4, 2 }
 0x536   :  { %v8250_v61 = vadd.f32 %v8249_v30, %v8248_v24  ;;  %7420 = vmatpush2.bf16.msra.mxu1 %v14872_v19  ;;  %v14890_v19 = vld [vmem:[#allocation9 + $0x208] ss:$28 sps:$4 sm:$0xff]  }
 0x537   :  { %v8243_v42 = vadd.f32 %v8242_v53, %v8241_v4  ;;  %7473 = vmatpush2.bf16.msra.mxu0 %v14875_v63  ;;  %7421 = vmatprep.subr.bf16.mxu1 %v14880_v14  ;;  %v14893_v63 = vld [vmem:[#allocation9 + $0x588] ss:$28 sps:$4 sm:$0xff]   ;;  %v14898_v14 = vld [vmem:[#allocation9 + $0x1d4] ss:$28 sps:$4 sm:$0xff]  }
 0x538   :  { %v8251_v6 = vrot.slane %v8250_v61, 2  ;;  %7474 = vmatprep.subr.bf16.mxu0 %v14883_v26  ;;  %v7064_v26 = vpop.f32.mrf.mxu0  ;;  %v14901_v53 = vld [vmem:[#allocation9 + $0x554] ss:$28 sps:$4 sm:$0xff]  }
 0x539   :  { %v8244_v44 = vrot.slane %v8243_v42, 1 }
 0x53a   :  { %v8252_v31 = vadd.f32 %v8251_v6, %v8250_v61  ;;  %7422 = vmatpush2.bf16.msra.mxu1 %v14878_v0  ;;  %v14896_v0 = vld [vmem:[#allocation9 + $0x1d0] ss:$28 sps:$4 sm:$0xff]   ;;  %v14904_v6 = vld [vmem:[#allocation9 + $0x89c] ss:$28 sps:$4 sm:$0xff]  }
 0x53b   :  { %v8245_v57 = vadd.f32 %v8244_v44, %v8243_v42  ;;  %7475 = vmatpush2.bf16.msra.mxu0 %v14881_v47  ;;  %7423 = vmatprep.subr.bf16.mxu1 %v14886_v18  ;;  %v15782_v42 = vld [vmem:[#allocation10] sm:$0xff]  ;;  %v14899_v18 = vld [vmem:[#allocation9 + $0x550] ss:$28 sps:$4 sm:$0xff]   ;;  %v14907_v44 = vld [vmem:[#allocation9 + $0xc1c] ss:$28 sps:$4 sm:$0xff]  }
 0x53c   :  { %v8253_v56 = vrot.slane %v8252_v31, 1  ;;  %7476 = vmatprep.subr.bf16.mxu0 %v14889_v51  ;;  %v2887_v47 = vrot.slane %v15782_v42, %v17118_v10  ;;  %v18127_v51 = vpop.f32.mrf.mxu0 }
 0x53d   :  { %v8300_v28 = vmul.f32 0.03125, %v8245_v57 }
 0x53e   :  { %v8254_v24 = vadd.f32 %v8253_v56, %v8252_v31  ;;  %7424 = vmatpush2.bf16.msra.mxu1 %v14884_v9  ;;  %v19159_v31 = vld [vmem:[#allocation113_spill] sm:$0xff]  ;;  %v7061_v57 = vadd.f32 %v7060_v7, %v2887_v47 }
 0x53f   :  { %v8307_v4 = vadd.f32 1e-05, %v8300_v28  ;;  %7477 = vmatpush2.bf16.msra.mxu0 %v14887_v21  ;;  %7425 = vmatprep.subr.bf16.mxu1 %v14892_v12  ;;  %v18130_v9 = vrot.slane %v15782_v42, %v19159_v31  ;;  %v14902_v21 = vld [vmem:[#allocation9 + $0x898] ss:$28 sps:$4 sm:$0xff]   ;;  %v7070_v12 = vpop.f32.mrf.mxu0  ;;  %v14910_v28 = vld [vmem:[#allocation9 + $0x864] ss:$28 sps:$4 sm:$0xff]  }
 0x540   :  { %v8301_v30 = vmul.f32 0.03125, %v8254_v24  ;;  %7478 = vmatprep.subr.bf16.mxu0 %v14895_v8  ;;  %v14905_v8 = vld [vmem:[#allocation9 + $0xc18] ss:$28 sps:$4 sm:$0xff]  }
 0x541   :  { %15744 = vrsqrt.f32 %v8307_v4  ;;  %v7063_v24 = vadd.f32 %v7062_v1, %v18130_v9  ;;  %v14913_v4 = vld [vmem:[#allocation9 + $0xbe4] ss:$28 sps:$4 sm:$0xff]  }
 0x542   :  { %v8308_v61 = vadd.f32 1e-05, %v8301_v30  ;;  %7426 = vmatpush2.bf16.msra.mxu1 %v14890_v19  ;;  %v14908_v30 = vld [vmem:[#allocation9 + $0x860] ss:$28 sps:$4 sm:$0xff]  }
 0x543   :  { %7479 = vmatpush2.bf16.msra.mxu0 %v14893_v63  ;;  %7427 = vmatprep.subr.bf16.mxu1 %v14898_v14  ;;  %v7065_v63 = vadd.f32 %v7064_v26, %v2887_v47  ;;  %v14914_v26 = vld [vmem:[#allocation9 + $0x828] ss:$28 sps:$4 sm:$0xff]  }
 0x544   :  { %15746 = vrsqrt.f32 %v8308_v61  ;;  %7480 = vmatprep.subr.bf16.mxu0 %v14901_v53  ;;  %v7072_v53 = vpop.f32.mrf.mxu0  ;;  %v14911_v61 = vld [vmem:[#allocation9 + $0xbe0] ss:$28 sps:$4 sm:$0xff]  }
 0x546   :  { %7428 = vmatpush2.bf16.msra.mxu1 %v14896_v0  ;;  %v14916_v0 = vld [vmem:[#allocation9 + $0x82c] ss:$28 sps:$4 sm:$0xff]  }
 0x547   :  { %7481 = vmatpush2.bf16.msra.mxu0 %v14899_v18  ;;  %7503 = vmatprep.subr.bf16.mxu1 %v14904_v6  ;;  %v14919_v18 = vld [vmem:[#allocation9 + $0xbac] ss:$28 sps:$4 sm:$0xff]  }
 0x548   :  { %v7113_v56 = vpop.f32.mrf.mxu1  ;;  %7556 = vmatprep.subr.bf16.mxu0 %v14907_v44  ;;  %v7071_v44 = vadd.f32 %v7070_v12, %v2887_v47  ;;  %v14925_v12 = vld [vmem:[#allocation9 + $0xb74] ss:$28 sps:$4 sm:$0xff]  }
 0x549   :  { %v18133_v19 = vadd.f32 %v7113_v56, %v7061_v57  ;;  %7430 = vmatmul.mubr.bf16.vlgmr.msra.gmra.mxu1 %v17723_v45 }
 0x54a   :  { %7483 = vmatmul.mubr.bf16.vlgmr.msra.gmra.mxu0 %v17731_v50  ;;  %7439 = vmatprep.mubr.bf16.mxu1 %v17740_v41  ;;  %v7115_v7 = vpop.f32.mrf.mxu1 }
 0x54b   :  { %7492 = vmatprep.mubr.bf16.mxu0 %v19148_v25  ;;  %7504 = vmatpush1.bf16.msra.mxu1 %v14902_v21  ;;  %v18139_v14 = vadd.f32 %v7115_v7, %v7063_v24  ;;  %v7074_v21 = vpop.f32.mrf.mxu0  ;;  %v14922_v24 = vld [vmem:[#allocation9 + $0x7f4] ss:$28 sps:$4 sm:$0xff]   ;;  %v7073_v7 = vadd.f32 %v7072_v53, %v18130_v9 }
 0x54c   :  { %7557 = vmatpush1.bf16.msra.mxu0 %v14905_v8  ;;  %v7117_v1 = vpop.f32.mrf.mxu1  ;;  %7505 = vmatprep.subr.bf16.mxu1 %v14910_v28  ;;  %v14917_v8 = vld [vmem:[#allocation9 + $0xba8] ss:$28 sps:$4 sm:$0xff]   ;;  %v14920_v53 = vld [vmem:[#allocation9 + $0x7f0] ss:$28 sps:$4 sm:$0xff]  }
 0x54d   :  { %v18141_v42 = vadd.f32 %v7117_v1, %v7065_v63  ;;  %7558 = vmatprep.subr.bf16.mxu0 %v14913_v4  ;;  %v7075_v1 = vadd.f32 %v7074_v21, %v2887_v47  ;;  %v14931_v4 = vld [vmem:[#allocation9 + $0xb3c] ss:$28 sps:$4 sm:$0xff]   ;;  %v14937_v21 = vld [vmem:[#allocation9 + $0xb04] ss:$28 sps:$4 sm:$0xff]  }
 0x54e   :  { %v18143_v6 = vpop.f32.mrf.mxu1  ;;  %v18145_v57 = vpop.eup %15744  ;;  %v14929_v47 = vld [vmem:[#allocation9 + $0xb38] ss:$28 sps:$4 sm:$0xff]  }
 0x54f   :  { %7506 = vmatpush1.bf16.msra.mxu1 %v14908_v30 }
 0x550   :  { %7559 = vmatpush1.bf16.msra.mxu0 %v14911_v61  ;;  %v7123_v56 = vpop.f32.mrf.mxu1  ;;  %7507 = vmatprep.subr.bf16.mxu1 %v14916_v0 }
 0x551   :  { %v18147_v28 = vpop.eup %15746  ;;  %v18150_v63 = vadd.f32 %v7123_v56, %v7071_v44  ;;  %7440 = vmatmul.mubr.bf16.gmra.mxu1 %v17763_v36  ;;  %7560 = vmatprep.subr.bf16.mxu0 %v14919_v18  ;;  %v14923_v18 = vld [vmem:[#allocation9 + $0xb70] ss:$28 sps:$4 sm:$0xff]   ;;  %v14928_v44 = vld [vmem:[#allocation9 + $0x7bc] ss:$28 sps:$4 sm:$0xff]  }
 0x552   :  { %7493 = vmatmul.mubr.bf16.gmra.mxu0 %v19149_v58  ;;  %7535 = vmatprep.mubr.bf16.mxu1 %v17777_v59  ;;  %v7125_v30 = vpop.f32.mrf.mxu1 }
 0x553   :  { %7508 = vmatpush1.bf16.msra.mxu1 %v14914_v26  ;;  %7588 = vmatprep.mubr.bf16.mxu0 %v19150_v52  ;;  %v18158_v61 = vadd.f32 %v7125_v30, %v7073_v7  ;;  %v14934_v26 = vld [vmem:[#allocation9 + $0x784] ss:$28 sps:$4 sm:$0xff]   ;;  %v14943_v30 = vld [vmem:[#allocation9 + $0xacc] ss:$28 sps:$4 sm:$0xff]  }
 0x554   :  { %7561 = vmatpush1.bf16.msra.mxu0 %v14917_v8  ;;  %v7127_v0 = vpop.f32.mrf.mxu1  ;;  %7509 = vmatprep.subr.bf16.mxu1 %v14922_v24  ;;  %v14932_v7 = vld [vmem:[#allocation9 + $0x780] ss:$28 sps:$4 sm:$0xff]   ;;  %v14940_v24 = vld [vmem:[#allocation9 + $0x74c] ss:$28 sps:$4 sm:$0xff]  }
 0x555   :  { %v18160_v56 = vadd.f32 %v7127_v0, %v7075_v1  ;;  %7562 = vmatprep.subr.bf16.mxu0 %v14925_v12  ;;  %v14935_v8 = vld [vmem:[#allocation9 + $0xb00] ss:$28 sps:$4 sm:$0xff]   ;;  %v14938_v1 = vld [vmem:[#allocation9 + $0x748] ss:$28 sps:$4 sm:$0xff]   ;;  %v14949_v0 = vld [vmem:[#allocation9 + $0xa94] ss:$28 sps:$4 sm:$0xff]  }
 0x556   :  { %v14941_v12 = vld [vmem:[#allocation9 + $0xac8] ss:$28 sps:$4 sm:$0xff]  }
 0x557   :  { %7510 = vmatpush1.bf16.msra.mxu1 %v14920_v53  ;;  %v14946_v53 = vld [vmem:[#allocation9 + $0x714] ss:$28 sps:$4 sm:$0xff]  }
 0x558   :  { %7563 = vmatpush1.bf16.msra.mxu0 %v14923_v18  ;;  %7511 = vmatprep.subr.bf16.mxu1 %v14928_v44  ;;  %v14944_v18 = vld [vmem:[#allocation9 + $0x710] ss:$28 sps:$4 sm:$0xff]   ;;  %v14955_v44 = vld [vmem:[#allocation9 + $0xddc] ss:$28 sps:$4 sm:$0xff]  }
 0x559   :  { %7564 = vmatprep.subr.bf16.mxu0 %v14931_v4  ;;  %v14952_v4 = vld [vmem:[#allocation9 + $0xa5c] ss:$28 sps:$4 sm:$0xff]  }
 0x55b   :  { %7512 = vmatpush1.bf16.msra.mxu1 %v14926_v13  ;;  %v14947_v13 = vld [vmem:[#allocation9 + $0xa90] ss:$28 sps:$4 sm:$0xff]  }
 0x55c   :  { %7565 = vmatpush1.bf16.msra.mxu0 %v14929_v47  ;;  %7513 = vmatprep.subr.bf16.mxu1 %v14934_v26  ;;  %v18162_v47 = vpop.f32.mrf.mxu0  ;;  %v14950_v26 = vld [vmem:[#allocation9 + $0xa58] ss:$28 sps:$4 sm:$0xff]  }
 0x55d   :  { %7566 = vmatprep.subr.bf16.mxu0 %v14937_v21  ;;  %v14953_v21 = vld [vmem:[#allocation9 + $0xdd8] ss:$28 sps:$4 sm:$0xff]  }
 0x55f   :  { %7514 = vmatpush1.bf16.msra.mxu1 %v14932_v7  ;;  %v14958_v7 = vld [vmem:[#allocation9 + $0xa24] ss:$28 sps:$4 sm:$0xff]  }
 0x560   :  { %7567 = vmatpush1.bf16.msra.mxu0 %v14935_v8  ;;  %7515 = vmatprep.subr.bf16.mxu1 %v14940_v24  ;;  %v14961_v24 = vld [vmem:[#allocation9 + $0xda4] ss:$28 sps:$4 sm:$0xff]  }
 0x561   :  { %7568 = vmatprep.subr.bf16.mxu0 %v14943_v30 }
 0x563   :  { %7516 = vmatpush1.bf16.msra.mxu1 %v14938_v1 }
 0x564   :  { %7569 = vmatpush1.bf16.msra.mxu0 %v14941_v12  ;;  %7517 = vmatprep.subr.bf16.mxu1 %v14946_v53  ;;  %v14956_v12 = vld [vmem:[#allocation9 + $0xa20] ss:$28 sps:$4 sm:$0xff]  }
 0x565   :  { %7570 = vmatprep.subr.bf16.mxu0 %v14949_v0  ;;  %v14959_v0 = vld [vmem:[#allocation9 + $0xda0] ss:$28 sps:$4 sm:$0xff]  }
 0x567   :  { %7518 = vmatpush1.bf16.msra.mxu1 %v14944_v18  ;;  %v14964_v18 = vld [vmem:[#allocation9 + $0x9ec] ss:$28 sps:$4 sm:$0xff]  }
 0x568   :  { %7571 = vmatpush1.bf16.msra.mxu0 %v14947_v13  ;;  %7519 = vmatprep.subr.bf16.mxu1 %v14952_v4  ;;  %v14967_v4 = vld [vmem:[#allocation9 + $0xd6c] ss:$28 sps:$4 sm:$0xff]  }
 0x569   :  { %v7166_v8 = vpop.f32.mrf.mxu0  ;;  %7572 = vmatprep.subr.bf16.mxu0 %v14955_v44 }
 0x56a   :  { %v18165_v30 = vadd.f32 %v7166_v8, %v18133_v19  ;;  %v14962_v19 = vld [vmem:[#allocation9 + $0x9e8] ss:$28 sps:$4 sm:$0xff]  }
 0x56b   :  { %7520 = vmatpush2.bf16.msra.mxu1 %v14950_v26  ;;  %v7168_v1 = vpop.f32.mrf.mxu0  ;;  %v14965_v26 = vld [vmem:[#allocation9 + $0xd68] ss:$28 sps:$4 sm:$0xff]  }
 0x56c   :  { %7573 = vmatpush2.bf16.msra.mxu0 %v14953_v21  ;;  %v18168_v53 = vadd.f32 %v7168_v1, %v18139_v14  ;;  %7521 = vmatprep.subr.bf16.mxu1 %v14958_v7  ;;  %v14970_v21 = vld [vmem:[#allocation9 + $0x9b4] ss:$28 sps:$4 sm:$0xff]  }
 0x56d   :  { %v7170_v13 = vpop.f32.mrf.mxu0  ;;  %7574 = vmatprep.subr.bf16.mxu0 %v14961_v24  ;;  %v14973_v14 = vld [vmem:[#allocation9 + $0xd34] ss:$28 sps:$4 sm:$0xff]  }
 0x56e   :  { %v18171_v15 = vadd.f32 %v7170_v13, %v18141_v42  ;;  %v14968_v1 = vld [vmem:[#allocation9 + $0x9b0] ss:$28 sps:$4 sm:$0xff]   ;;  %v14976_v13 = vld [vmem:[#allocation9 + $0x97c] ss:$28 sps:$4 sm:$0xff]  }
 0x56f   :  { %7522 = vmatpush2.bf16.msra.mxu1 %v14956_v12  ;;  %v18173_v44 = vpop.f32.mrf.mxu0  ;;  %v14971_v12 = vld [vmem:[#allocation9 + $0xd30] ss:$28 sps:$4 sm:$0xff]  }
 0x570   :  { %7575 = vmatpush2.bf16.msra.mxu0 %v14959_v0  ;;  %7523 = vmatprep.subr.bf16.mxu1 %v14964_v18  ;;  %v14979_v18 = vld [vmem:[#allocation9 + $0xcfc] ss:$28 sps:$4 sm:$0xff]  }
 0x571   :  { %v7176_v8 = vpop.f32.mrf.mxu0  ;;  %7576 = vmatprep.subr.bf16.mxu0 %v14967_v4  ;;  %v14974_v4 = vld [vmem:[#allocation9 + $0x978] ss:$28 sps:$4 sm:$0xff]  }
 0x572   :  { %v18176_v7 = vadd.f32 %v7176_v8, %v18150_v63  ;;  %v14977_v63 = vld [vmem:[#allocation9 + $0xcf8] ss:$28 sps:$4 sm:$0xff]   ;;  %v14988_v8 = vld [vmem:[#allocation9 + $0x90c] ss:$28 sps:$4 sm:$0xff]  }
 0x573   :  { %7524 = vmatpush2.bf16.msra.mxu1 %v14962_v19  ;;  %v7178_v24 = vpop.f32.mrf.mxu0  ;;  %v14982_v19 = vld [vmem:[#allocation9 + $0x944] ss:$28 sps:$4 sm:$0xff]  }
 0x574   :  { %7577 = vmatpush2.bf16.msra.mxu0 %v14965_v26  ;;  %v18179_v42 = vadd.f32 %v7178_v24, %v18158_v61  ;;  %7525 = vmatprep.subr.bf16.mxu1 %v14970_v21  ;;  %v14985_v26 = vld [vmem:[#allocation9 + $0xcc4] ss:$28 sps:$4 sm:$0xff]  }
 0x575   :  { %v7180_v0 = vpop.f32.mrf.mxu0  ;;  %7578 = vmatprep.subr.bf16.mxu0 %v14973_v14  ;;  %v14980_v61 = vld [vmem:[#allocation9 + $0x940] ss:$28 sps:$4 sm:$0xff]   ;;  %v14991_v14 = vld [vmem:[#allocation9 + $0xc8c] ss:$28 sps:$4 sm:$0xff]  }
 0x576   :  { %v18182_v54 = vadd.f32 %v7180_v0, %v18160_v56  ;;  %v14983_v21 = vld [vmem:[#allocation9 + $0xcc0] ss:$28 sps:$4 sm:$0xff]   ;;  %v14986_v24 = vld [vmem:[#allocation9 + $0x908] ss:$28 sps:$4 sm:$0xff]   ;;  %v14995_v0 = vld [vmem:[#allocation9 + $0xc50] ss:$28 sps:$4 sm:$0xff]  }
 0x577   :  { %7526 = vmatpush2.bf16.msra.mxu1 %v14968_v1  ;;  %v14989_v56 = vld [vmem:[#allocation9 + $0xc88] ss:$28 sps:$4 sm:$0xff]   ;;  %v14994_v1 = vld [vmem:[#allocation9 + $0x8d4] ss:$28 sps:$4 sm:$0xff]  }
 0x578   :  { %7579 = vmatpush2.bf16.msra.mxu0 %v14971_v12  ;;  %7527 = vmatprep.subr.bf16.mxu1 %v14976_v13  ;;  %v14997_v12 = vld [vmem:[#allocation9 + $0xc54] ss:$28 sps:$4 sm:$0xff]  }
 0x579   :  { %7580 = vmatprep.subr.bf16.mxu0 %v14979_v18  ;;  %v14992_v13 = vld [vmem:[#allocation9 + $0x8d0] ss:$28 sps:$4 sm:$0xff]   ;;  %v15000_v18 = vld [vmem:[#allocation9 + $0xf9c] ss:$28 sps:$4 sm:$0xff]  }
 0x57b   :  { %7528 = vmatpush2.bf16.msra.mxu1 %v14974_v4  ;;  %v15003_v4 = vld [vmem:[#allocation9 + $0x131c] ss:$28 sps:$4 sm:$0xff]  }
 0x57c   :  { %7581 = vmatpush2.bf16.msra.mxu0 %v14977_v63  ;;  %7529 = vmatprep.subr.bf16.mxu1 %v14982_v19  ;;  %v18184_v63 = vpop.f32.mrf.mxu1 }
 0x57d   :  { %7582 = vmatprep.subr.bf16.mxu0 %v14985_v26  ;;  %v14998_v26 = vld [vmem:[#allocation9 + $0xf98] ss:$28 sps:$4 sm:$0xff]  }
 0x57f   :  { %7530 = vmatpush2.bf16.msra.mxu1 %v14980_v61 }
 0x580   :  { %7583 = vmatpush2.bf16.msra.mxu0 %v14983_v21  ;;  %7531 = vmatprep.subr.bf16.mxu1 %v14988_v8  ;;  %v15001_v21 = vld [vmem:[#allocation9 + $0x1318] ss:$28 sps:$4 sm:$0xff]   ;;  %v15006_v8 = vld [vmem:[#allocation9 + $0xf64] ss:$28 sps:$4 sm:$0xff]  }
 0x581   :  { %7584 = vmatprep.subr.bf16.mxu0 %v14991_v14 }
 0x583   :  { %7532 = vmatpush2.bf16.msra.mxu1 %v14986_v24  ;;  %v15009_v24 = vld [vmem:[#allocation9 + $0x12e4] ss:$28 sps:$4 sm:$0xff]  }
 0x584   :  { %7585 = vmatpush2.bf16.msra.mxu0 %v14989_v56  ;;  %7533 = vmatprep.subr.bf16.mxu1 %v14994_v1 }
 0x585   :  { %7586 = vmatprep.subr.bf16.mxu0 %v14997_v12 }
 0x587   :  { %7534 = vmatpush2.bf16.msra.mxu1 %v14992_v13  ;;  %v15007_v13 = vld [vmem:[#allocation9 + $0x12e0] ss:$28 sps:$4 sm:$0xff]  }
 0x588   :  { %7587 = vmatpush2.bf16.msra.mxu0 %v14995_v0  ;;  %v7219_v19 = vpop.f32.mrf.mxu1  ;;  %7609 = vmatprep.subr.bf16.mxu1 %v15000_v18  ;;  %v15012_v0 = vld [vmem:[#allocation9 + $0xf2c] ss:$28 sps:$4 sm:$0xff]  }
 0x589   :  { %v18187_v61 = vadd.f32 %v7219_v19, %v18165_v30  ;;  %7662 = vmatprep.subr.bf16.mxu0 %v15003_v4  ;;  %v15004_v30 = vld [vmem:[#allocation9 + $0xf60] ss:$28 sps:$4 sm:$0xff]   ;;  %v15015_v4 = vld [vmem:[#allocation9 + $0x12ac] ss:$28 sps:$4 sm:$0xff]  }
 0x58a   :  { %7536 = vmatmul.mubr.bf16.vlgmr.msra.gmra.mxu1 %v17870_v46  ;;  %v7221_v14 = vpop.f32.mrf.mxu1 }
 0x58b   :  { %7589 = vmatmul.mubr.bf16.vlgmr.msra.gmra.mxu0 %v17872_v29  ;;  %7545 = vmatprep.mubr.bf16.mxu1 %v17874_v22  ;;  %v18193_v56 = vadd.f32 %v7221_v14, %v18168_v53  ;;  %v15010_v53 = vld [vmem:[#allocation9 + $0xf28] ss:$28 sps:$4 sm:$0xff]  }
 0x58c   :  { %7598 = vmatprep.mubr.bf16.mxu0 %v17883_v55  ;;  %7610 = vmatpush1.bf16.msra.mxu1 %v14998_v26  ;;  %v7223_v1 = vpop.f32.mrf.mxu1  ;;  %v15013_v26 = vld [vmem:[#allocation9 + $0x12a8] ss:$28 sps:$4 sm:$0xff]  }
 0x58d   :  { %7663 = vmatpush1.bf16.msra.mxu0 %v15001_v21  ;;  %v18197_v12 = vadd.f32 %v7223_v1, %v18171_v15  ;;  %7611 = vmatprep.subr.bf16.mxu1 %v15006_v8  ;;  %v15018_v21 = vld [vmem:[#allocation9 + $0xef4] ss:$28 sps:$4 sm:$0xff]  }
 0x58e   :  { %7664 = vmatprep.subr.bf16.mxu0 %v15009_v24  ;;  %v18199_v18 = vpop.f32.mrf.mxu1  ;;  %v15021_v8 = vld [vmem:[#allocation9 + $0x1274] ss:$28 sps:$4 sm:$0xff]  }
 0x58f   :  { %v15016_v1 = vld [vmem:[#allocation9 + $0xef0] ss:$28 sps:$4 sm:$0xff]  }
 0x590   :  { %7612 = vmatpush1.bf16.msra.mxu1 %v15004_v30  ;;  %v7229_v19 = vpop.f32.mrf.mxu1 }
 0x591   :  { %7665 = vmatpush1.bf16.msra.mxu0 %v15007_v13  ;;  %v18202_v14 = vadd.f32 %v7229_v19, %v18176_v7  ;;  %7613 = vmatprep.subr.bf16.mxu1 %v15012_v0  ;;  %v15019_v13 = vld [vmem:[#allocation9 + $0x1270] ss:$28 sps:$4 sm:$0xff]   ;;  %v15024_v0 = vld [vmem:[#allocation9 + $0xebc] ss:$28 sps:$4 sm:$0xff]  }
 0x592   :  { %7546 = vmatmul.mubr.bf16.gmra.mxu1 %v17890_v11  ;;  %7666 = vmatprep.subr.bf16.mxu0 %v15015_v4  ;;  %v7231_v15 = vpop.f32.mrf.mxu1  ;;  %v15027_v4 = vld [vmem:[#allocation9 + $0x123c] ss:$28 sps:$4 sm:$0xff]  }
 0x593   :  { %7599 = vmatmul.mubr.bf16.gmra.mxu0 %v17892_v49  ;;  %7641 = vmatprep.mubr.bf16.mxu1 %v17894_v43  ;;  %v18208_v24 = vadd.f32 %v7231_v15, %v18179_v42  ;;  %v15022_v19 = vld [vmem:[#allocation9 + $0xeb8] ss:$28 sps:$4 sm:$0xff]   ;;  %v15030_v15 = vld [vmem:[#allocation9 + $0xe84] ss:$28 sps:$4 sm:$0xff]  }
 0x594   :  { %7614 = vmatpush1.bf16.msra.mxu1 %v15010_v53  ;;  %7694 = vmatprep.mubr.bf16.mxu0 %v17897_v3  ;;  %v7233_v7 = vpop.f32.mrf.mxu1  ;;  %v15025_v42 = vld [vmem:[#allocation9 + $0x1238] ss:$28 sps:$4 sm:$0xff]   ;;  %v15033_v53 = vld [vmem:[#allocation9 + $0x1204] ss:$28 sps:$4 sm:$0xff]  }
 0x595   :  { %7667 = vmatpush1.bf16.msra.mxu0 %v15013_v26  ;;  %v18212_v30 = vadd.f32 %v7233_v7, %v18182_v54  ;;  %7615 = vmatprep.subr.bf16.mxu1 %v15018_v21  ;;  %v15031_v26 = vld [vmem:[#allocation9 + $0x1200] ss:$28 sps:$4 sm:$0xff]   ;;  %v15036_v54 = vld [vmem:[#allocation9 + $0xe4c] ss:$28 sps:$4 sm:$0xff]  }
 0x596   :  { %7668 = vmatprep.subr.bf16.mxu0 %v15021_v8  ;;  %v15039_v21 = vld [vmem:[#allocation9 + $0x11cc] ss:$28 sps:$4 sm:$0xff]  }
 0x597   :  { %v15034_v7 = vld [vmem:[#allocation9 + $0xe48] ss:$28 sps:$4 sm:$0xff]  }
 0x598   :  { %7616 = vmatpush1.bf16.msra.mxu1 %v15016_v1  ;;  %v15037_v8 = vld [vmem:[#allocation9 + $0x11c8] ss:$28 sps:$4 sm:$0xff]   ;;  %v15042_v1 = vld [vmem:[#allocation9 + $0xe14] ss:$28 sps:$4 sm:$0xff]  }
 0x599   :  { %7669 = vmatpush1.bf16.msra.mxu0 %v15019_v13  ;;  %7617 = vmatprep.subr.bf16.mxu1 %v15024_v0  ;;  %v15045_v13 = vld [vmem:[#allocation9 + $0x1194] ss:$28 sps:$4 sm:$0xff]  }
 0x59a   :  { %7670 = vmatprep.subr.bf16.mxu0 %v15027_v4  ;;  %v15040_v0 = vld [vmem:[#allocation9 + $0xe10] ss:$28 sps:$4 sm:$0xff]  }
 0x59b   :  { %v15043_v4 = vld [vmem:[#allocation9 + $0x1190] ss:$28 sps:$4 sm:$0xff]  }
 0x59c   :  { %7618 = vmatpush1.bf16.msra.mxu1 %v15022_v19  ;;  %v15048_v19 = vld [vmem:[#allocation9 + $0x115c] ss:$28 sps:$4 sm:$0xff]  }
 0x59d   :  { %7671 = vmatpush1.bf16.msra.mxu0 %v15025_v42  ;;  %7619 = vmatprep.subr.bf16.mxu1 %v15030_v15  ;;  %v15051_v42 = vld [vmem:[#allocation9 + $0x14dc] ss:$28 sps:$4 sm:$0xff]   ;;  %v18214_v15 = vpop.f32.mrf.mxu0 }
 0x59e   :  { %7672 = vmatprep.subr.bf16.mxu0 %v15033_v53  ;;  %v15046_v53 = vld [vmem:[#allocation9 + $0x1158] ss:$28 sps:$4 sm:$0xff]  }
 0x5a0   :  { %7620 = vmatpush1.bf16.msra.mxu1 %v15028_v27 }
 0x5a1   :  { %7673 = vmatpush1.bf16.msra.mxu0 %v15031_v26  ;;  %7621 = vmatprep.subr.bf16.mxu1 %v15036_v54  ;;  %v15049_v26 = vld [vmem:[#allocation9 + $0x14d8] ss:$28 sps:$4 sm:$0xff]   ;;  %v15054_v54 = vld [vmem:[#allocation9 + $0x1124] ss:$28 sps:$4 sm:$0xff]  }
 0x5a2   :  { %7674 = vmatprep.subr.bf16.mxu0 %v15039_v21 }
 0x5a4   :  { %7622 = vmatpush1.bf16.msra.mxu1 %v15034_v7  ;;  %v15057_v7 = vld [vmem:[#allocation9 + $0x14a4] ss:$28 sps:$4 sm:$0xff]  }
 0x5a5   :  { %7675 = vmatpush1.bf16.msra.mxu0 %v15037_v8  ;;  %7623 = vmatprep.subr.bf16.mxu1 %v15042_v1 }
 0x5a6   :  { %7676 = vmatprep.subr.bf16.mxu0 %v15045_v13  ;;  %v15052_v13 = vld [vmem:[#allocation9 + $0x1120] ss:$28 sps:$4 sm:$0xff]  }
 0x5a8   :  { %7624 = vmatpush1.bf16.msra.mxu1 %v15040_v0  ;;  %v15055_v0 = vld [vmem:[#allocation9 + $0x14a0] ss:$28 sps:$4 sm:$0xff]  }
 0x5a9   :  { %7677 = vmatpush1.bf16.msra.mxu0 %v15043_v4  ;;  %v7272_v27 = vpop.f32.mrf.mxu0  ;;  %7625 = vmatprep.subr.bf16.mxu1 %v15048_v19  ;;  %v15060_v4 = vld [vmem:[#allocation9 + $0x10ec] ss:$28 sps:$4 sm:$0xff]  }
 0x5aa   :  { %v18217_v21 = vadd.f32 %v7272_v27, %v18187_v61  ;;  %7678 = vmatprep.subr.bf16.mxu0 %v15051_v42  ;;  %v15058_v42 = vld [vmem:[#allocation9 + $0x10e8] ss:$28 sps:$4 sm:$0xff]   ;;  %v15066_v27 = vld [vmem:[#allocation9 + $0x10b4] ss:$28 sps:$4 sm:$0xff]  }
 0x5ab   :  { %v7274_v8 = vpop.f32.mrf.mxu0 }
 0x5ac   :  { %7626 = vmatpush2.bf16.msra.mxu1 %v15046_v53  ;;  %v18220_v1 = vadd.f32 %v7274_v8, %v18193_v56  ;;  %v15061_v56 = vld [vmem:[#allocation9 + $0x1468] ss:$28 sps:$4 sm:$0xff]  }
 0x5ad   :  { %7679 = vmatpush2.bf16.msra.mxu0 %v15049_v26  ;;  %v7276_v39 = vpop.f32.mrf.mxu0  ;;  %7627 = vmatprep.subr.bf16.mxu1 %v15054_v54  ;;  %v15069_v54 = vld [vmem:[#allocation9 + $0x1434] ss:$28 sps:$4 sm:$0xff]  }
 0x5ae   :  { %v18223_v19 = vadd.f32 %v7276_v39, %v18197_v12  ;;  %7680 = vmatprep.subr.bf16.mxu0 %v15057_v7  ;;  %v15064_v12 = vld [vmem:[#allocation9 + $0x10b0] ss:$28 sps:$4 sm:$0xff]  }
 0x5af   :  { %v18225_v61 = vpop.f32.mrf.mxu0 }
 0x5b0   :  { %7628 = vmatpush2.bf16.msra.mxu1 %v15052_v13  ;;  %v15067_v13 = vld [vmem:[#allocation9 + $0x1430] ss:$28 sps:$4 sm:$0xff]  }
 0x5b1   :  { %7681 = vmatpush2.bf16.msra.mxu0 %v15055_v0  ;;  %v7282_v53 = vpop.f32.mrf.mxu0  ;;  %7629 = vmatprep.subr.bf16.mxu1 %v15060_v4  ;;  %v15072_v0 = vld [vmem:[#allocation9 + $0x107c] ss:$28 sps:$4 sm:$0xff]  }
 0x5b2   :  { %v18228_v26 = vadd.f32 %v7282_v53, %v18202_v14  ;;  %7682 = vmatprep.subr.bf16.mxu0 %v15063_v48  ;;  %v15070_v14 = vld [vmem:[#allocation9 + $0x1078] ss:$28 sps:$4 sm:$0xff]   ;;  %v15076_v53 = vld [vmem:[#allocation9 + $0x1040] ss:$28 sps:$4 sm:$0xff]  }
 0x5b3   :  { %v7284_v8 = vpop.f32.mrf.mxu0  ;;  %v15073_v48 = vld [vmem:[#allocation9 + $0x13f8] ss:$28 sps:$4 sm:$0xff]  }
 0x5b4   :  { %7630 = vmatpush2.bf16.msra.mxu1 %v15058_v42  ;;  %v18231_v39 = vadd.f32 %v7284_v8, %v18208_v24  ;;  %v15078_v42 = vld [vmem:[#allocation9 + $0x1044] ss:$28 sps:$4 sm:$0xff]   ;;  %v15087_v8 = vld [vmem:[#allocation9 + $0x138c] ss:$28 sps:$4 sm:$0xff]  }
 0x5b5   :  { %7683 = vmatpush2.bf16.msra.mxu0 %v15061_v56  ;;  %v7286_v7 = vpop.f32.mrf.mxu0  ;;  %7631 = vmatprep.subr.bf16.mxu1 %v15066_v27  ;;  %v15081_v24 = vld [vmem:[#allocation9 + $0x13c4] ss:$28 sps:$4 sm:$0xff]   ;;  %v15084_v27 = vld [vmem:[#allocation9 + $0x100c] ss:$28 sps:$4 sm:$0xff]  }
 0x5b6   :  { %v18234_v4 = vadd.f32 %v7286_v7, %v18212_v30  ;;  %7684 = vmatprep.subr.bf16.mxu0 %v15069_v54  ;;  %v15079_v56 = vld [vmem:[#allocation9 + $0x13c0] ss:$28 sps:$4 sm:$0xff]   ;;  %v15082_v30 = vld [vmem:[#allocation9 + $0x1008] ss:$28 sps:$4 sm:$0xff]   ;;  %v15093_v7 = vld [vmem:[#allocation9 + $0x1354] ss:$28 sps:$4 sm:$0xff]  }
 0x5b7   :  { %v15085_v54 = vld [vmem:[#allocation9 + $0x1388] ss:$28 sps:$4 sm:$0xff]  }
 0x5b8   :  { %7632 = vmatpush2.bf16.msra.mxu1 %v15064_v12  ;;  %v15090_v12 = vld [vmem:[#allocation9 + $0xfd4] ss:$28 sps:$4 sm:$0xff]  }
 0x5b9   :  { %7685 = vmatpush2.bf16.msra.mxu0 %v15067_v13  ;;  %7633 = vmatprep.subr.bf16.mxu1 %v15072_v0  ;;  %v15088_v13 = vld [vmem:[#allocation9 + $0xfd0] ss:$28 sps:$4 sm:$0xff]  }
 0x5ba   :  { %7686 = vmatprep.subr.bf16.mxu0 %v15075_v23  ;;  %v7067_v23 = vadd.f32 %v18127_v51, %v18130_v9  ;;  %v15091_v0 = vld [vmem:[#allocation9 + $0x1350] ss:$28 sps:$4 sm:$0xff]   ;;  %v15098_v51 = vld [vmem:[#allocation9 + $0x1a0] ss:$28 sps:$4 sm:$0xff]  }
 0x5bc   :  { %7634 = vmatpush2.bf16.msra.mxu1 %v15070_v14  ;;  %v15096_v14 = vld [vmem:[#allocation9 + $0x169c] ss:$28 sps:$4 sm:$0xff]  }
 0x5bd   :  { %7687 = vmatpush2.bf16.msra.mxu0 %v15073_v48  ;;  %7635 = vmatprep.subr.bf16.mxu1 %v15078_v42  ;;  %v7235_v48 = vpop.f32.mrf.mxu1  ;;  %v15097_v42 = vld [vmem:[#allocation9 + $0x360] ss:$28 sps:$4 sm:$0xff]  }
 0x5be   :  { %7688 = vmatprep.subr.bf16.mxu0 %v15081_v24  ;;  %v7120_v24 = vadd.f32 %v18143_v6, %v7067_v23 }
 0x5c0   :  { %7636 = vmatpush2.bf16.msra.mxu1 %v15076_v53  ;;  %v7288_v53 = vpop.f32.mrf.mxu0 }
 0x5c1   :  { %7689 = vmatpush2.bf16.msra.mxu0 %v15079_v56  ;;  %7637 = vmatprep.subr.bf16.mxu1 %v15084_v27  ;;  %v7173_v27 = vadd.f32 %v18173_v44, %v7120_v24  ;;  %v15102_v44 = vld [vmem:[#allocation9 + $0x328] ss:$28 sps:$4 sm:$0xff]  }
 0x5c2   :  { %7690 = vmatprep.subr.bf16.mxu0 %v15087_v8 }
 0x5c4   :  { %7638 = vmatpush2.bf16.msra.mxu1 %v15082_v30 }
 0x5c5   :  { %7691 = vmatpush2.bf16.msra.mxu0 %v15085_v54  ;;  %7639 = vmatprep.subr.bf16.mxu1 %v15090_v12  ;;  %v15101_v12 = vld [vmem:[#allocation9 + $0x1664] ss:$28 sps:$4 sm:$0xff]  }
 0x5c6   :  { %7692 = vmatprep.subr.bf16.mxu0 %v15093_v7  ;;  %v7226_v7 = vadd.f32 %v18199_v18, %v7173_v27 }
 0x5c8   :  { %7640 = vmatpush2.bf16.msra.mxu1 %v15088_v13  ;;  %v7325_v56 = vpop.f32.mrf.mxu1 }
 0x5c9   :  { %7693 = vmatpush2.bf16.msra.mxu0 %v15091_v0  ;;  %v7326_v8 = vadd.f32 %v7325_v56, %v18217_v21  ;;  %v7378_v30 = vpop.f32.mrf.mxu0  ;;  %7715 = vmatprep.subr.bf16.mxu1 %v15096_v14  ;;  %v7077_v21 = vadd.f32 %v18162_v47, %v18130_v9  ;;  %v7279_v0 = vadd.f32 %v18225_v61, %v7226_v7  ;;  %v15103_v9 = vld [vmem:[#allocation9 + $0x168] ss:$28 sps:$4 sm:$0xff]  }
 0x5ca   :  { %13669 = vmatprep.subr.bf16.mxu0 %v15097_v42  ;;  %v7327_v54 = vpop.f32.mrf.mxu1  ;;  %v15099_v42 = vld [vmem:[#allocation9 + $0x1660] ss:$28 sps:$4 sm:$0xff]   ;;  %v15106_v56 = vld [vmem:[#allocation9 + $0x162c] ss:$28 sps:$4 sm:$0xff]  }
 0x5cb   :  { %v18242_v10 = vadd.f32 %v7378_v30, %v7326_v8  ;;  %7642 = vmatmul.mubr.bf16.vlgmr.msra.gmra.mxu1 %v17924_v33  ;;  %v7328_v6 = vadd.f32 %v7327_v54, %v18220_v1  ;;  %v7380_v13 = vpop.f32.mrf.mxu0  ;;  %v7130_v24 = vadd.f32 %v18184_v63, %v7077_v21  ;;  %v15107_v30 = vld [vmem:[#allocation9 + $0x2f0] ss:$28 sps:$4 sm:$0xff]  }
 0x5cc   :  { %7695 = vmatmul.mubr.bf16.vlgmr.msra.gmra.mxu0 %v17926_v62  ;;  %7651 = vmatprep.mubr.bf16.mxu1 %v17928_v34  ;;  %v7329_v23 = vpop.f32.mrf.mxu1  ;;  %v15111_v21 = vld [vmem:[#allocation9 + $0x15f4] ss:$28 sps:$4 sm:$0xff]  }
 0x5cd   :  { %7704 = vmatprep.mubr.bf16.mxu0 %v17814_v60  ;;  %7716 = vmatpush1.bf16.msra.mxu1 %v15094_v40  ;;  %v18252_v18 = vadd.f32 %v7380_v13, %v7328_v6  ;;  %v7330_v14 = vadd.f32 %v7329_v23, %v18223_v19  ;;  %v7382_v1 = vpop.f32.mrf.mxu0  ;;  %v7183_v40 = vadd.f32 %v18214_v15, %v7130_v24  ;;  %v15108_v13 = vld [vmem:[#allocation9 + $0x130] ss:$28 sps:$4 sm:$0xff]  }
 0x5ce   :  { %13670 = vmatpush3.bf16.msra.mxu0 %v15098_v51  ;;  %7717 = vmatprep.subr.bf16.mxu1 %v15101_v12  ;;  %v7331_v47 = vpop.f32.mrf.mxu1  ;;  %v15104_v12 = vld [vmem:[#allocation9 + $0x1628] ss:$28 sps:$4 sm:$0xff]  }
 0x5cf   :  { %v18256_v27 = vadd.f32 %v7382_v1, %v7330_v14  ;;  %13671 = vmatprep.subr.bf16.mxu0 %v15102_v44  ;;  %v7332_v61 = vadd.f32 %v7331_v47, %v7279_v0  ;;  %v7384_v8 = vpop.f32.mrf.mxu0  ;;  %v7236_v6 = vadd.f32 %v7235_v48, %v7183_v40 }
 0x5d0   :  { %v7335_v54 = vpop.f32.mrf.mxu1 }
 0x5d1   :  { %v8129_v19 = vadd.f32 %v18256_v27, %v18242_v10  ;;  %7718 = vmatpush1.bf16.msra.mxu1 %v15099_v42  ;;  %v18261_v7 = vadd.f32 %v7384_v8, %v7332_v61  ;;  %v7336_v63 = vadd.f32 %v7335_v54, %v18228_v26  ;;  %v7388_v51 = vpop.f32.mrf.mxu0  ;;  %v15112_v26 = vld [vmem:[#allocation9 + $0x2b8] ss:$28 sps:$4 sm:$0xff]   ;;  %v7289_v1 = vadd.f32 %v7288_v53, %v7236_v6  ;;  %v15117_v54 = vld [vmem:[#allocation9 + $0x280] ss:$28 sps:$4 sm:$0xff]  }
 0x5d2   :  { %13672 = vmatpush3.bf16.msra.mxu0 %v15103_v9  ;;  %7719 = vmatprep.subr.bf16.mxu1 %v15106_v56  ;;  %v7337_v44 = vpop.f32.mrf.mxu1  ;;  %v15109_v56 = vld [vmem:[#allocation9 + $0x15f0] ss:$28 sps:$4 sm:$0xff]   ;;  %v15116_v61 = vld [vmem:[#allocation9 + $0x15bc] ss:$28 sps:$4 sm:$0xff]  }
 0x5d3   :  { %v8138_v15 = vadd.f32 %v18261_v7, %v18252_v18  ;;  %v18266_v23 = vadd.f32 %v7388_v51, %v7336_v63  ;;  %7652 = vmatmul.mubr.bf16.gmra.mxu1 %v17934_v16  ;;  %13673 = vmatprep.subr.bf16.mxu0 %v15107_v30  ;;  %v7338_v0 = vadd.f32 %v7337_v44, %v18231_v39  ;;  %v7390_v14 = vpop.f32.mrf.mxu0  ;;  %v15113_v39 = vld [vmem:[#allocation9 + $0xf8] ss:$28 sps:$4 sm:$0xff]   ;;  %v15122_v44 = vld [vmem:[#allocation9 + $0x248] ss:$28 sps:$4 sm:$0xff]  }
 0x5d4   :  { %7705 = vmatmul.mubr.bf16.gmra.mxu0 %v17936_v5  ;;  %v7339_v48 = vpop.f32.mrf.mxu1  ;;  %7747 = vmatprep.mubr.bf16.mxu1 %v19147_v37  ;;  %v15114_v51 = vld [vmem:[#allocation9 + $0x15b8] ss:$28 sps:$4 sm:$0xff]  }
 0x5d5   :  { %v8130_v42 = vadd.f32 %v8129_v19, %v18266_v23  ;;  %7720 = vmatpush1.bf16.msra.mxu1 %v15104_v12  ;;  %7800 = vmatprep.mubr.bf16.mxu0 %v17695_v17  ;;  %v18274_v24 = vadd.f32 %v7390_v14, %v7338_v0  ;;  %v7340_v9 = vadd.f32 %v7339_v48, %v18234_v4  ;;  %v7392_v47 = vpop.f32.mrf.mxu0  ;;  %v15118_v4 = vld [vmem:[#allocation9 + $0xc0] ss:$28 sps:$4 sm:$0xff]   ;;  %v15123_v14 = vld [vmem:[#allocation9 + $0x88] ss:$28 sps:$4 sm:$0xff]  }
 0x5d6   :  { %13674 = vmatpush3.bf16.msra.mxu0 %v15108_v13  ;;  %7721 = vmatprep.subr.bf16.mxu1 %v15111_v21  ;;  %v7341_v53 = vpop.f32.mrf.mxu1  ;;  %v15121_v12 = vld [vmem:[#allocation9 + $0x1584] ss:$28 sps:$4 sm:$0xff]  }
 0x5d7   :  { %v8139_v8 = vadd.f32 %v8138_v15, %v18274_v24  ;;  %v7393_v30 = vadd.f32 %v7392_v47, %v7340_v9  ;;  %13675 = vmatprep.subr.bf16.mxu0 %v15112_v26  ;;  %v7342_v40 = vadd.f32 %v7341_v53, %v7289_v1  ;;  %v7394_v19 = vpop.f32.mrf.mxu0  ;;  %v15119_v0 = vld [vmem:[#allocation9 + $0x1580] ss:$28 sps:$4 sm:$0xff]   ;;  %v15126_v26 = vld [vmem:[#allocation9 + $0x154c] ss:$28 sps:$4 sm:$0xff]   ;;  %v15131_v53 = vld [vmem:[#allocation9 + $0x1514] ss:$28 sps:$4 sm:$0xff]  }
 0x5d9   :  { %v8131_v63 = vadd.f32 %v8130_v42, %v7393_v30  ;;  %7722 = vmatpush1.bf16.msra.mxu1 %v15109_v56  ;;  %v18278_v17 = vadd.f32 %v7394_v19, %v7342_v40  ;;  %v15127_v42 = vld [vmem:[#allocation9 + $0x210] ss:$28 sps:$4 sm:$0xff]   ;;  %v15124_v56 = vld [vmem:[#allocation9 + $0x1548] ss:$28 sps:$4 sm:$0xff]   ;;  %v15132_v40 = vld [vmem:[#allocation9 + $0x1d8] ss:$28 sps:$4 sm:$0xff]  }
 0x5da   :  { %13676 = vmatpush3.bf16.msra.mxu0 %v15113_v39  ;;  %7723 = vmatprep.subr.bf16.mxu1 %v15116_v61  ;;  %v15128_v39 = vld [vmem:[#allocation9 + $0x50] ss:$28 sps:$4 sm:$0xff]  }
 0x5db   :  { %v8132_v6 = vrot.slane %v8131_v63, 4  ;;  %v8140_v13 = vadd.f32 %v8139_v8, %v18278_v17  ;;  %13677 = vmatprep.subr.bf16.mxu0 %v15117_v54 }
 0x5dd   :  { %v8133_v21 = vadd.f32 %v8132_v6, %v8131_v63  ;;  %v8141_v15 = vrot.slane %v8140_v13, 4  ;;  %7724 = vmatpush1.bf16.msra.mxu1 %v15114_v51  ;;  %v15129_v63 = vld [vmem:[#allocation9 + $0x1510] ss:$28 sps:$4 sm:$0xff]   ;;  %v15133_v51 = vld [vmem:[#allocation9 + $0x18] ss:$28 sps:$4 sm:$0xff]  }
 0x5de   :  { %13678 = vmatpush3.bf16.msra.mxu0 %v15118_v4  ;;  %7725 = vmatprep.subr.bf16.mxu1 %v15121_v12  ;;  %v15134_v4 = vld [vmem:[#allocation9 + $0x6e0] ss:$28 sps:$4 sm:$0xff]  }
 0x5df   :  { %v8134_v1 = vrot.slane %v8133_v21, 2  ;;  %v8142_v48 = vadd.f32 %v8141_v15, %v8140_v13  ;;  %13679 = vmatprep.subr.bf16.mxu0 %v15122_v44  ;;  %v15135_v13 = vld [vmem:[#allocation9 + $0xa60] ss:$28 sps:$4 sm:$0xff]  }
 0x5e1   :  { %v8135_v9 = vadd.f32 %v8134_v1, %v8133_v21  ;;  %v8143_v47 = vrot.slane %v8142_v48, 2  ;;  %7726 = vmatpush1.bf16.msra.mxu1 %v15119_v0 }
 0x5e2   :  { %13680 = vmatpush3.bf16.msra.mxu0 %v15123_v14  ;;  %7727 = vmatprep.subr.bf16.mxu1 %v15126_v26  ;;  %v15136_v14 = vld [vmem:[#allocation9 + $0x520] ss:$28 sps:$4 sm:$0xff]  }
 0x5e3   :  { %v8136_v61 = vrot.slane %v8135_v9, 1  ;;  %v8144_v8 = vadd.f32 %v8143_v47, %v8142_v48  ;;  %13681 = vmatprep.subr.bf16.mxu0 %v15127_v42  ;;  %v15137_v48 = vld [vmem:[#allocation9 + $0x8a0] ss:$28 sps:$4 sm:$0xff]   ;;  %v15139_v47 = vld [vmem:[#allocation9 + $0xa28] ss:$28 sps:$4 sm:$0xff]  }
 0x5e5   :  { %v8137_v54 = vadd.f32 %v8136_v61, %v8135_v9  ;;  %v8145_v19 = vrot.slane %v8144_v8, 1  ;;  %7728 = vmatpush1.bf16.msra.mxu1 %v15124_v56 }
 0x5e6   :  { %13682 = vmatpush3.bf16.msra.mxu0 %v15128_v39  ;;  %7729 = vmatprep.subr.bf16.mxu1 %v15131_v53 }
 0x5e7   :  { %v8176_v12 = vmul.f32 0.03125, %v8137_v54  ;;  %v8146_v6 = vadd.f32 %v8145_v19, %v8144_v8  ;;  %13683 = vmatprep.subr.bf16.mxu0 %v15132_v40  ;;  %v15141_v8 = vld [vmem:[#allocation9 + $0x868] ss:$28 sps:$4 sm:$0xff]   ;;  %v15143_v54 = vld [vmem:[#allocation9 + $0x9f0] ss:$28 sps:$4 sm:$0xff]  }
 0x5e9   :  { %v18282_v44 = vsub.f32 %v18242_v10, %v8176_v12  ;;  %v18285_v21 = vsub.f32 %v18256_v27, %v8176_v12  ;;  %v18288_v15 = vsub.f32 %v18266_v23, %v8176_v12  ;;  %v18290_v0 = vsub.f32 %v7393_v30, %v8176_v12  ;;  %7730 = vmatpush1.bf16.msra.mxu1 %v15129_v63  ;;  %v15138_v27 = vld [vmem:[#allocation9 + $0x6a8] ss:$28 sps:$4 sm:$0xff]   ;;  %v15144_v63 = vld [vmem:[#allocation9 + $0x4b0] ss:$28 sps:$4 sm:$0xff]  }
 0x5ea   :  { %v8177_v26 = vmul.f32 0.03125, %v8146_v6  ;;  %13684 = vmatpush3.bf16.msra.mxu0 %v15133_v51  ;;  %13697 = vmatprep.subr.bf16.mxu1 %v15134_v4  ;;  %v15145_v12 = vld [vmem:[#allocation9 + $0x830] ss:$28 sps:$4 sm:$0xff]   ;;  %v15146_v6 = vld [vmem:[#allocation9 + $0x638] ss:$28 sps:$4 sm:$0xff]  }
 0x5eb   :  { %19160 = vst [vmem:[#allocation129_spill] sm:$0xff] %v18282_v44  ;;  %19161 = vst [vmem:[#allocation132_spill] sm:$0xff] %v18285_v21  ;;  %v8211_v1 = vmul.f32 %v18282_v44, %v18282_v44  ;;  %v8218_v10 = vmul.f32 %v18285_v21, %v18285_v21  ;;  %13725 = vmatprep.subr.bf16.mxu0 %v15135_v13  ;;  %v8225_v56 = vmul.f32 %v18288_v15, %v18288_v15 }
 0x5ec   :  { %19162 = vst [vmem:[#allocation133_spill] sm:$0xff] %v18288_v15  ;;  %19163 = vst [vmem:[#allocation121_spill] sm:$0xff] %v18290_v0  ;;  %v18297_v42 = vsub.f32 %v18252_v18, %v8177_v26  ;;  %v18300_v23 = vsub.f32 %v18261_v7, %v8177_v26  ;;  %v18303_v30 = vsub.f32 %v18274_v24, %v8177_v26  ;;  %7748 = vmatmul.mubr.bf16.vlgmr.msra.gmra.mxu1 %v17796_v20  ;;  %v15140_v18 = vld [vmem:[#allocation9 + $0x4e8] ss:$28 sps:$4 sm:$0xff]   ;;  %v15317_v15 = vld [vmem:[#allocation15 + $0x304] ss:$16 sps:$4 sm:$0xff]  }
 0x5ed   :  { %v18306_v9 = vsub.f32 %v18278_v17, %v8177_v26  ;;  %v8255_v39 = vadd.f32 %v8218_v10, %v8211_v1  ;;  %7801 = vmatmul.mubr.bf16.vlgmr.msra.gmra.mxu0 %v17723_v45  ;;  %13698 = vmatpush3.bf16.msra.mxu1 %v15136_v14  ;;  %v15142_v17 = vld [vmem:[#allocation9 + $0x670] ss:$28 sps:$4 sm:$0xff]   ;;  %v8232_v53 = vmul.f32 %v18290_v0, %v18290_v0  ;;  %v15147_v14 = vld [vmem:[#allocation9 + $0x9b8] ss:$28 sps:$4 sm:$0xff]  }
 0x5ee   :  { %19164 = vst [vmem:[#allocation122_spill] sm:$0xff] %v18297_v42  ;;  %19165 = vst [vmem:[#allocation139_spill] sm:$0xff] %v18300_v23  ;;  %v8212_v7 = vmul.f32 %v18297_v42, %v18297_v42  ;;  %v8219_v24 = vmul.f32 %v18300_v23, %v18300_v23  ;;  %7808 = vmatprep.mubr.bf16.mxu0 %v17740_v41  ;;  %13726 = vmatpush3.bf16.msra.mxu0 %v15137_v48  ;;  %v15148_v1 = vld [vmem:[#allocation9 + $0x478] ss:$28 sps:$4 sm:$0xff]   ;;  %v15150_v48 = vld [vmem:[#allocation9 + $0x600] ss:$28 sps:$4 sm:$0xff]  }
 0x5ef   :  { %19166 = vst [vmem:[#allocation138_spill] sm:$0xff] %v18303_v30  ;;  %19167 = vst [vmem:[#allocation130_spill] sm:$0xff] %v18306_v9  ;;  %v8256_v61 = vadd.f32 %v8255_v39, %v8225_v56  ;;  %13699 = vmatprep.subr.bf16.mxu1 %v15138_v27  ;;  %v8226_v45 = vmul.f32 %v18303_v30, %v18303_v30  ;;  %13727 = vmatprep.subr.bf16.mxu0 %v15139_v47  ;;  %v15149_v47 = vld [vmem:[#allocation9 + $0x7f8] ss:$28 sps:$4 sm:$0xff]   ;;  %v15151_v39 = vld [vmem:[#allocation9 + $0x980] ss:$28 sps:$4 sm:$0xff]  }
 0x5f0   :  { %v8264_v40 = vadd.f32 %v8219_v24, %v8212_v7  ;;  %7757 = vmatprep.mubr.bf16.mxu1 %v19147_v37  ;;  %v8233_v41 = vmul.f32 %v18306_v9, %v18306_v9  ;;  %v15152_v7 = vld [vmem:[#allocation9 + $0x440] ss:$28 sps:$4 sm:$0xff]   ;;  %v15306_v0 = vld [vmem:[#allocation15 + $0x120] ss:$16 sps:$4 sm:$0xff]  }
 0x5f1   :  { %v8257_v19 = vadd.f32 %v8256_v61, %v8232_v53  ;;  %13700 = vmatpush3.bf16.msra.mxu1 %v15140_v18  ;;  %v15153_v53 = vld [vmem:[#allocation9 + $0x7c0] ss:$28 sps:$4 sm:$0xff]   ;;  %v15312_v9 = vld [vmem:[#allocation15 + $0x100] ss:$16 sps:$4 sm:$0xff]  }
 0x5f2   :  { %v8265_v51 = vadd.f32 %v8264_v40, %v8226_v45  ;;  %13701 = vmatprep.subr.bf16.mxu1 %v15142_v17  ;;  %13728 = vmatpush3.bf16.msra.mxu0 %v15141_v8  ;;  %v15156_v8 = vld [vmem:[#allocation9 + $0x408] ss:$28 sps:$4 sm:$0xff]   ;;  %v15158_v40 = vld [vmem:[#allocation9 + $0x590] ss:$28 sps:$4 sm:$0xff]  }
 0x5f3   :  { %v8258_v4 = vrot.slane %v8257_v19, 4  ;;  %13729 = vmatprep.subr.bf16.mxu0 %v15143_v54 }
 0x5f4   :  { %v8266_v13 = vadd.f32 %v8265_v51, %v8233_v41  ;;  %7758 = vmatmul.mubr.bf16.gmra.mxu1 %v17820_v32  ;;  %v15159_v41 = vld [vmem:[#allocation9 + $0x910] ss:$28 sps:$4 sm:$0xff]  }
 0x5f5   :  { %v8259_v26 = vadd.f32 %v8258_v4, %v8257_v19  ;;  %7809 = vmatmul.mubr.bf16.gmra.mxu0 %v17763_v36  ;;  %13702 = vmatpush3.bf16.msra.mxu1 %v15144_v63  ;;  %v15154_v36 = vld [vmem:[#allocation9 + $0x5c8] ss:$28 sps:$4 sm:$0xff]   ;;  %v15160_v4 = vld [vmem:[#allocation9 + $0x3d0] ss:$28 sps:$4 sm:$0xff]  }
 0x5f6   :  { %v8267_v10 = vrot.slane %v8266_v13, 4  ;;  %7849 = vmatprep.mubr.bf16.mxu1 %v17705_v2  ;;  %7898 = vmatprep.mubr.bf16.mxu0 %v17777_v59  ;;  %v15155_v59 = vld [vmem:[#allocation9 + $0x948] ss:$28 sps:$4 sm:$0xff]  }
 0x5f7   :  { %v8260_v27 = vrot.slane %v8259_v26, 2  ;;  %13730 = vmatpush3.bf16.msra.mxu0 %v15145_v12  ;;  %13703 = vmatprep.subr.bf16.mxu1 %v15146_v6  ;;  %v15157_v19 = vld [vmem:[#allocation9 + $0x788] ss:$28 sps:$4 sm:$0xff]   ;;  %v15162_v6 = vld [vmem:[#allocation9 + $0x558] ss:$28 sps:$4 sm:$0xff]  }
 0x5f8   :  { %v8268_v56 = vadd.f32 %v8267_v10, %v8266_v13  ;;  %13731 = vmatprep.subr.bf16.mxu0 %v15147_v14  ;;  %v15161_v13 = vld [vmem:[#allocation9 + $0x750] ss:$28 sps:$4 sm:$0xff]   ;;  %v18328_v10 = vld [vmem:[#allocation10] sm:$0xff] }
 0x5f9   :  { %v8261_v18 = vadd.f32 %v8260_v27, %v8259_v26  ;;  %13704 = vmatpush3.bf16.msra.mxu1 %v15148_v1  ;;  %v15163_v26 = vld [vmem:[#allocation9 + $0x8d8] ss:$28 sps:$4 sm:$0xff]  }
 0x5fa   :  { %v8269_v24 = vrot.slane %v8268_v56, 2  ;;  %13705 = vmatprep.subr.bf16.mxu1 %v15150_v48  ;;  %v15164_v1 = vld [vmem:[#allocation9 + $0x398] ss:$28 sps:$4 sm:$0xff]   ;;  %v19168_v48 = vld [vmem:[#allocation114_spill] sm:$0xff] }
 0x5fb   :  { %v8262_v17 = vrot.slane %v8261_v18, 1  ;;  %13732 = vmatpush3.bf16.msra.mxu0 %v15149_v47  ;;  %v18332_v27 = vrot.slane %v18328_v10, %v19168_v48  ;;  %v15166_v47 = vld [vmem:[#allocation9 + $0xde0] ss:$28 sps:$4 sm:$0xff]  }
 0x5fc   :  { %v8270_v2 = vadd.f32 %v8269_v24, %v8268_v56  ;;  %13733 = vmatprep.subr.bf16.mxu0 %v15151_v39  ;;  %v15165_v56 = vld [vmem:[#allocation9 + $0x718] ss:$28 sps:$4 sm:$0xff]   ;;  %v15167_v39 = vld [vmem:[#allocation9 + $0x1160] ss:$28 sps:$4 sm:$0xff]  }
 0x5fd   :  { %v8263_v61 = vadd.f32 %v8262_v17, %v8261_v18  ;;  %13706 = vmatpush3.bf16.msra.mxu1 %v15152_v7  ;;  %v19169_v18 = vld [vmem:[#allocation115_spill] sm:$0xff] }
 0x5fe   :  { %v8271_v45 = vrot.slane %v8270_v2, 1  ;;  %13707 = vmatprep.subr.bf16.mxu1 %v15154_v36  ;;  %v18336_v7 = vrot.slane %v18328_v10, %v19169_v18  ;;  %v15168_v36 = vld [vmem:[#allocation9 + $0xc20] ss:$28 sps:$4 sm:$0xff]  }
 0x5ff   :  { %v8302_v54 = vmul.f32 0.03125, %v8263_v61  ;;  %13734 = vmatpush3.bf16.msra.mxu0 %v15153_v53 }
 0x600   :  { %v8272_v63 = vadd.f32 %v8271_v45, %v8270_v2  ;;  %13735 = vmatprep.subr.bf16.mxu0 %v15155_v59  ;;  %v15170_v2 = vld [vmem:[#allocation9 + $0xda8] ss:$28 sps:$4 sm:$0xff]   ;;  %v15169_v59 = vld [vmem:[#allocation9 + $0xfa0] ss:$28 sps:$4 sm:$0xff]  }
 0x601   :  { %v8309_v51 = vadd.f32 1e-05, %v8302_v54  ;;  %13708 = vmatpush3.bf16.msra.mxu1 %v15156_v8  ;;  %v15171_v54 = vld [vmem:[#allocation9 + $0x1128] ss:$28 sps:$4 sm:$0xff]  }
 0x602   :  { %v8303_v12 = vmul.f32 0.03125, %v8272_v63  ;;  %13709 = vmatprep.subr.bf16.mxu1 %v15158_v40  ;;  %v15172_v63 = vld [vmem:[#allocation9 + $0xbe8] ss:$28 sps:$4 sm:$0xff]  }
 0x603   :  { %13736 = vmatpush3.bf16.msra.mxu0 %v15157_v19  ;;  %15748 = vrsqrt.f32 %v8309_v51 }
 0x604   :  { %v8310_v14 = vadd.f32 1e-05, %v8303_v12  ;;  %13737 = vmatprep.subr.bf16.mxu0 %v15159_v41  ;;  %v15174_v12 = vld [vmem:[#allocation9 + $0xd70] ss:$28 sps:$4 sm:$0xff]  }
 0x605   :  { %13710 = vmatpush3.bf16.msra.mxu1 %v15160_v4 }
 0x606   :  { %15750 = vrsqrt.f32 %v8310_v14  ;;  %13711 = vmatprep.subr.bf16.mxu1 %v15162_v6  ;;  %v15175_v14 = vld [vmem:[#allocation9 + $0x10f0] ss:$28 sps:$4 sm:$0xff]  }
 0x607   :  { %13738 = vmatpush3.bf16.msra.mxu0 %v15161_v13 }
 0x608   :  { %13739 = vmatprep.subr.bf16.mxu0 %v15163_v26  ;;  %v15176_v26 = vld [vmem:[#allocation9 + $0xbb0] ss:$28 sps:$4 sm:$0xff]  }
 0x609   :  { %13712 = vmatpush3.bf16.msra.mxu1 %v15164_v1  ;;  %v7431_v24 = vpop.f32.mrf.mxu1 }
 0x60a   :  { %v7432_v17 = vadd.f32 %v7431_v24, %v18332_v27  ;;  %v7484_v53 = vpop.f32.mrf.mxu0  ;;  %13753 = vmatprep.subr.bf16.mxu1 %v15166_v47  ;;  %v15177_v24 = vld [vmem:[#allocation9 + $0xf30] ss:$28 sps:$4 sm:$0xff]  }
 0x60b   :  { %13740 = vmatpush3.bf16.msra.mxu0 %v15165_v56  ;;  %v7433_v61 = vpop.f32.mrf.mxu1 }
 0x60c   :  { %v18339_v8 = vadd.f32 %v7484_v53, %v7432_v17  ;;  %7850 = vmatmul.mubr.bf16.vlgmr.msra.gmra.mxu1 %v17731_v50  ;;  %13781 = vmatprep.subr.bf16.mxu0 %v15167_v39  ;;  %v7434_v45 = vadd.f32 %v7433_v61, %v18336_v7  ;;  %v7486_v40 = vpop.f32.mrf.mxu0  ;;  %v15173_v50 = vld [vmem:[#allocation9 + $0xf68] ss:$28 sps:$4 sm:$0xff]   ;;  %v15178_v39 = vld [vmem:[#allocation9 + $0xd38] ss:$28 sps:$4 sm:$0xff]  }
 0x60d   :  { %7857 = vmatprep.mubr.bf16.mxu1 %v19148_v25  ;;  %13754 = vmatpush3.bf16.msra.mxu1 %v15168_v36  ;;  %v7435_v19 = vpop.f32.mrf.mxu1  ;;  %v15179_v61 = vld [vmem:[#allocation9 + $0x10b8] ss:$28 sps:$4 sm:$0xff]  }
 0x60e   :  { %7899 = vmatmul.mubr.bf16.vlgmr.msra.gmra.mxu0 %v17870_v46  ;;  %v18345_v41 = vadd.f32 %v7486_v40, %v7434_v45  ;;  %v7436_v51 = vadd.f32 %v7435_v19, %v18332_v27  ;;  %v7488_v4 = vpop.f32.mrf.mxu0  ;;  %13755 = vmatprep.subr.bf16.mxu1 %v15170_v2  ;;  %v19170_v45 = vld [vmem:[#allocation143_spill] sm:$0xff]  ;;  %v19171_v40 = vcombine.low %v18145_v57, %v18147_v28 }
 0x60f   :  { %7906 = vmatprep.mubr.bf16.mxu0 %v17874_v22  ;;  %13782 = vmatpush3.bf16.msra.mxu0 %v15169_v59  ;;  %v18349_v6 = vpop.f32.mrf.mxu1  ;;  %v15181_v57 = vld [vmem:[#allocation9 + $0xef8] ss:$28 sps:$4 sm:$0xff]  }
 0x610   :  { %v18351_v13 = vadd.f32 %v7488_v4, %v7436_v51  ;;  %13783 = vmatprep.subr.bf16.mxu0 %v15171_v54  ;;  %v18353_v25 = vpop.f32.mrf.mxu0  ;;  %v15749_v1 = vpop.eup %15748  ;;  %v18364_v54 = vrot.slane %v19171_v40, %v19170_v45  ;;  %v15196_v40 = vld [vmem:[#allocation9 + $0xa98] ss:$28 sps:$4 sm:$0xff]  }
 0x611   :  { %13756 = vmatpush3.bf16.msra.mxu1 %v15172_v63  ;;  %v7441_v46 = vpop.f32.mrf.mxu1  ;;  %v15180_v63 = vld [vmem:[#allocation9 + $0xb78] ss:$28 sps:$4 sm:$0xff]  }
 0x612   :  { %v7442_v47 = vadd.f32 %v7441_v46, %v18332_v27  ;;  %v7494_v56 = vpop.f32.mrf.mxu0  ;;  %13757 = vmatprep.subr.bf16.mxu1 %v15174_v12  ;;  %v15183_v46 = vld [vmem:[#allocation9 + $0x1080] ss:$28 sps:$4 sm:$0xff]  }
 0x613   :  { %v15751_v22 = vpop.eup %15750  ;;  %13784 = vmatpush3.bf16.msra.mxu0 %v15173_v50  ;;  %v7443_v36 = vpop.f32.mrf.mxu1  ;;  %v15182_v50 = vld [vmem:[#allocation9 + $0xd00] ss:$28 sps:$4 sm:$0xff]  }
 0x614   :  { %v8329_v17 = vcombine.low %v15749_v1, %v15751_v22  ;;  %v18356_v53 = vadd.f32 %v7494_v56, %v7442_v47  ;;  %7858 = vmatmul.mubr.bf16.gmra.mxu1 %v19149_v58  ;;  %13785 = vmatprep.subr.bf16.mxu0 %v15175_v14  ;;  %v7444_v2 = vadd.f32 %v7443_v36, %v18336_v7  ;;  %v7496_v59 = vpop.f32.mrf.mxu0  ;;  %v15186_v47 = vld [vmem:[#allocation9 + $0xcc8] ss:$28 sps:$4 sm:$0xff]   ;;  %v15190_v22 = vld [vmem:[#allocation9 + $0xc90] ss:$28 sps:$4 sm:$0xff]  }
 0x615   :  { %13758 = vmatpush3.bf16.msra.mxu1 %v15176_v26  ;;  %7947 = vmatprep.mubr.bf16.mxu1 %v19150_v52  ;;  %v7445_v19 = vpop.f32.mrf.mxu1  ;;  %v15187_v56 = vld [vmem:[#allocation9 + $0x1048] ss:$28 sps:$4 sm:$0xff]   ;;  %v15191_v36 = vld [vmem:[#allocation9 + $0x1010] ss:$28 sps:$4 sm:$0xff]  }
 0x616   :  { %v18368_v51 = vrot.slane %v8329_v17, %v19170_v45  ;;  %7907 = vmatmul.mubr.bf16.gmra.mxu0 %v17890_v11  ;;  %v18371_v58 = vadd.f32 %v7496_v59, %v7444_v2  ;;  %v7446_v4 = vadd.f32 %v7445_v19, %v18332_v27  ;;  %v7498_v12 = vpop.f32.mrf.mxu0  ;;  %13759 = vmatprep.subr.bf16.mxu1 %v15178_v39  ;;  %v15184_v27 = vld [vmem:[#allocation9 + $0xb40] ss:$28 sps:$4 sm:$0xff]   ;;  %v15188_v39 = vld [vmem:[#allocation9 + $0xb08] ss:$28 sps:$4 sm:$0xff]   ;;  %v15192_v17 = vld [vmem:[#allocation9 + $0xad0] ss:$28 sps:$4 sm:$0xff]  }
 0x617   :  { %13786 = vmatpush3.bf16.msra.mxu0 %v15177_v24  ;;  %7996 = vmatprep.mubr.bf16.mxu0 %v17894_v43  ;;  %v7447_v28 = vpop.f32.mrf.mxu1  ;;  %v15185_v43 = vld [vmem:[#allocation9 + $0xec0] ss:$28 sps:$4 sm:$0xff]   ;;  %v15189_v24 = vld [vmem:[#allocation9 + $0xe88] ss:$28 sps:$4 sm:$0xff]   ;;  %v15194_v2 = vld [vmem:[#allocation9 + $0xc58] ss:$28 sps:$4 sm:$0xff]  }
 0x618   :  { %v18377_v14 = vadd.f32 %v7498_v12, %v7446_v4  ;;  %13787 = vmatprep.subr.bf16.mxu0 %v15179_v61  ;;  %v7448_v11 = vadd.f32 %v7447_v28, %v18336_v7  ;;  %v7500_v26 = vpop.f32.mrf.mxu0  ;;  %v15193_v59 = vld [vmem:[#allocation9 + $0xe50] ss:$28 sps:$4 sm:$0xff]   ;;  %v15195_v61 = vld [vmem:[#allocation9 + $0xfd8] ss:$28 sps:$4 sm:$0xff]   ;;  %v15198_v19 = vld [vmem:[#allocation9 + $0x14e0] ss:$28 sps:$4 sm:$0xff]  }
 0x619   :  { %13760 = vmatpush3.bf16.msra.mxu1 %v15180_v63  ;;  %v15197_v63 = vld [vmem:[#allocation9 + $0xe18] ss:$28 sps:$4 sm:$0xff]   ;;  %v15199_v4 = vld [vmem:[#allocation9 + $0x16a0] ss:$28 sps:$4 sm:$0xff]   ;;  %v15203_v28 = vld [vmem:[#allocation9 + $0x12e8] ss:$28 sps:$4 sm:$0xff]  }
 0x61a   :  { %v18380_v1 = vadd.f32 %v7500_v26, %v7448_v11  ;;  %13761 = vmatprep.subr.bf16.mxu1 %v15182_v50  ;;  %v15200_v12 = vld [vmem:[#allocation9 + $0x1320] ss:$28 sps:$4 sm:$0xff]   ;;  %v15201_v50 = vld [vmem:[#allocation9 + $0x14a8] ss:$28 sps:$4 sm:$0xff]   ;;  %v15204_v11 = vld [vmem:[#allocation9 + $0x1470] ss:$28 sps:$4 sm:$0xff]  }
 0x61b   :  { %13788 = vmatpush3.bf16.msra.mxu0 %v15181_v57  ;;  %v15202_v57 = vld [vmem:[#allocation9 + $0x1668] ss:$28 sps:$4 sm:$0xff]   ;;  %v15206_v26 = vld [vmem:[#allocation9 + $0x12b0] ss:$28 sps:$4 sm:$0xff]  }
 0x61c   :  { %13789 = vmatprep.subr.bf16.mxu0 %v15183_v46  ;;  %v15205_v46 = vld [vmem:[#allocation9 + $0x1630] ss:$28 sps:$4 sm:$0xff]  }
 0x61d   :  { %13762 = vmatpush3.bf16.msra.mxu1 %v15184_v27  ;;  %v15207_v27 = vld [vmem:[#allocation9 + $0x1438] ss:$28 sps:$4 sm:$0xff]   ;;  %v15305_v52 = vld [vmem:[#allocation15 + $0x344] ss:$16 sps:$4 sm:$0xff]  }
 0x61e   :  { %13763 = vmatprep.subr.bf16.mxu1 %v15186_v47  ;;  %v15212_v47 = vld [vmem:[#allocation9 + $0x1240] ss:$28 sps:$4 sm:$0xff]  }
 0x61f   :  { %13790 = vmatpush3.bf16.msra.mxu0 %v15185_v43  ;;  %v15213_v43 = vld [vmem:[#allocation9 + $0x13c8] ss:$28 sps:$4 sm:$0xff]  }
 0x620   :  { %13791 = vmatprep.subr.bf16.mxu0 %v15187_v56  ;;  %v15215_v56 = vld [vmem:[#allocation9 + $0x1208] ss:$28 sps:$4 sm:$0xff]  }
 0x621   :  { %13764 = vmatpush3.bf16.msra.mxu1 %v15188_v39  ;;  %v15218_v39 = vld [vmem:[#allocation9 + $0x11d0] ss:$28 sps:$4 sm:$0xff]  }
 0x622   :  { %13765 = vmatprep.subr.bf16.mxu1 %v15190_v22  ;;  %v15220_v22 = vld [vmem:[#allocation9 + $0x1518] ss:$28 sps:$4 sm:$0xff]  }
 0x623   :  { %13792 = vmatpush3.bf16.msra.mxu0 %v15189_v24  ;;  %v15221_v24 = vld [vmem:[#allocation9 + $0x1198] ss:$28 sps:$4 sm:$0xff]  }
 0x624   :  { %13793 = vmatprep.subr.bf16.mxu0 %v15191_v36 }
 0x625   :  { %13766 = vmatpush3.bf16.msra.mxu1 %v15192_v17  ;;  %v7438_v17 = vadd.f32 %v18349_v6, %v18336_v7 }
 0x626   :  { %13767 = vmatprep.subr.bf16.mxu1 %v15194_v2 }
 0x627   :  { %13794 = vmatpush3.bf16.msra.mxu0 %v15193_v59 }
 0x628   :  { %13795 = vmatprep.subr.bf16.mxu0 %v15195_v61 }
 0x629   :  { %13768 = vmatpush3.bf16.msra.mxu1 %v15196_v40 }
 0x62a   :  { %13809 = vmatprep.subr.bf16.mxu1 %v15198_v19 }
 0x62b   :  { %13796 = vmatpush3.bf16.msra.mxu0 %v15197_v63 }
 0x62c   :  { %7948 = vmatmul.mubr.bf16.vlgmr.msra.gmra.mxu1 %v17872_v29  ;;  %13941 = vmatprep.subr.bf16.mxu0 %v15199_v4  ;;  %v15208_v29 = vld [vmem:[#allocation9 + $0x15f8] ss:$28 sps:$4 sm:$0xff]  }
 0x62d   :  { %7955 = vmatprep.mubr.bf16.mxu1 %v17883_v55  ;;  %13810 = vmatpush3.bf16.msra.mxu1 %v15200_v12  ;;  %v15209_v55 = vld [vmem:[#allocation9 + $0x1278] ss:$28 sps:$4 sm:$0xff]   ;;  %v7491_v12 = vadd.f32 %v18353_v25, %v7438_v17 }
 0x62e   :  { %7997 = vmatmul.mubr.bf16.vlgmr.msra.gmra.mxu0 %v17924_v33  ;;  %13811 = vmatprep.subr.bf16.mxu1 %v15201_v50  ;;  %v15210_v33 = vld [vmem:[#allocation9 + $0x1400] ss:$28 sps:$4 sm:$0xff]  }
 0x62f   :  { %8004 = vmatprep.mubr.bf16.mxu0 %v17928_v34  ;;  %13942 = vmatpush3.bf16.msra.mxu0 %v15199_v4  ;;  %v15211_v34 = vld [vmem:[#allocation9 + $0x15c0] ss:$28 sps:$4 sm:$0xff]  }
 0x630   :  { %13943 = vmatprep.subr.bf16.mxu0 %v15202_v57 }
 0x631   :  { %13812 = vmatpush3.bf16.msra.mxu1 %v15203_v28 }
 0x632   :  { %13813 = vmatprep.subr.bf16.mxu1 %v15204_v11 }
 0x633   :  { %13944 = vmatpush3.bf16.msra.mxu0 %v15202_v57 }
 0x634   :  { %7956 = vmatmul.mubr.bf16.gmra.mxu1 %v17892_v49  ;;  %13945 = vmatprep.subr.bf16.mxu0 %v15205_v46  ;;  %v15214_v49 = vld [vmem:[#allocation9 + $0x1588] ss:$28 sps:$4 sm:$0xff]  }
 0x635   :  { %13814 = vmatpush3.bf16.msra.mxu1 %v15206_v26  ;;  %8045 = vmatprep.mubr.bf16.mxu1 %v17897_v3  ;;  %v15216_v3 = vld [vmem:[#allocation9 + $0x1390] ss:$28 sps:$4 sm:$0xff]  }
 0x636   :  { %8005 = vmatmul.mubr.bf16.gmra.mxu0 %v17934_v16  ;;  %13815 = vmatprep.subr.bf16.mxu1 %v15207_v27  ;;  %v15217_v16 = vld [vmem:[#allocation9 + $0x1550] ss:$28 sps:$4 sm:$0xff]  }
 0x637   :  { %13946 = vmatpush3.bf16.msra.mxu0 %v15205_v46  ;;  %13957 = vmatprep.mubr.bf16.mxu0 %v17796_v20  ;;  %v15219_v20 = vld [vmem:[#allocation9 + $0x1358] ss:$28 sps:$4 sm:$0xff]  }
 0x638   :  { %13947 = vmatprep.subr.bf16.mxu0 %v15208_v29 }
 0x639   :  { %13816 = vmatpush3.bf16.msra.mxu1 %v15209_v55 }
 0x63a   :  { %13817 = vmatprep.subr.bf16.mxu1 %v15210_v33 }
 0x63b   :  { %13948 = vmatpush3.bf16.msra.mxu0 %v15208_v29 }
 0x63c   :  { %13949 = vmatprep.subr.bf16.mxu0 %v15211_v34 }
 0x63d   :  { %13818 = vmatpush3.bf16.msra.mxu1 %v15212_v47 }
 0x63e   :  { %13819 = vmatprep.subr.bf16.mxu1 %v15213_v43 }
 0x63f   :  { %13950 = vmatpush3.bf16.msra.mxu0 %v15211_v34 }
 0x640   :  { %13951 = vmatprep.subr.bf16.mxu0 %v15214_v49 }
 0x641   :  { %13820 = vmatpush3.bf16.msra.mxu1 %v15215_v56 }
 0x642   :  { %13821 = vmatprep.subr.bf16.mxu1 %v15216_v3 }
 0x643   :  { %13952 = vmatpush3.bf16.msra.mxu0 %v15214_v49 }
 0x644   :  { %13953 = vmatprep.subr.bf16.mxu0 %v15217_v16 }
 0x645   :  { %13822 = vmatpush3.bf16.msra.mxu1 %v15218_v39 }
 0x646   :  { %13823 = vmatprep.subr.bf16.mxu1 %v15219_v20 }
 0x647   :  { %13954 = vmatpush3.bf16.msra.mxu0 %v15217_v16 }
 0x648   :  { %13955 = vmatprep.subr.bf16.mxu0 %v15220_v22 }
 0x649   :  { %13824 = vmatpush3.bf16.msra.mxu1 %v15221_v24 }
 0x64a   :  { %v7537_v36 = vpop.f32.mrf.mxu1 }
 0x64b   :  { %13956 = vmatpush3.bf16.msra.mxu0 %v15220_v22  ;;  %v7538_v2 = vadd.f32 %v7537_v36, %v18339_v8  ;;  %v7590_v59 = vpop.f32.mrf.mxu0 }
 0x64c   :  { %8046 = vmatmul.mubr.bf16.vlgmr.msra.gmra.mxu1 %v17926_v62  ;;  %v7539_v61 = vpop.f32.mrf.mxu1 }
 0x64d   :  { %v7591_v40 = vadd.f32 %v7590_v59, %v7538_v2  ;;  %8053 = vmatprep.mubr.bf16.mxu1 %v17814_v60  ;;  %v7540_v19 = vadd.f32 %v7539_v61, %v18345_v41  ;;  %v7592_v63 = vpop.f32.mrf.mxu0 }
 0x64e   :  { %13958 = vmatmul.mubr.bf16.vlgmr.msra.gmra.mxu0 %v17820_v32  ;;  %v7541_v4 = vpop.f32.mrf.mxu1 }
 0x64f   :  { %v7593_v50 = vadd.f32 %v7592_v63, %v7540_v19  ;;  %v7542_v7 = vadd.f32 %v7541_v4, %v18351_v13  ;;  %v7594_v6 = vpop.f32.mrf.mxu0 }
 0x650   :  { %v7543_v8 = vpop.f32.mrf.mxu1 }
 0x651   :  { %v7595_v57 = vadd.f32 %v7594_v6, %v7542_v7  ;;  %v7544_v28 = vadd.f32 %v7543_v8, %v7491_v12  ;;  %v7596_v62 = vpop.f32.mrf.mxu0 }
 0x652   :  { %v7547_v11 = vpop.f32.mrf.mxu1 }
 0x653   :  { %v7597_v46 = vadd.f32 %v7596_v62, %v7544_v28  ;;  %v7548_v60 = vadd.f32 %v7547_v11, %v18356_v53  ;;  %v7600_v26 = vpop.f32.mrf.mxu0 }
 0x654   :  { %8054 = vmatmul.mubr.bf16.gmra.mxu1 %v17936_v5  ;;  %v7549_v41 = vpop.f32.mrf.mxu1 }
 0x655   :  { %v7601_v32 = vadd.f32 %v7600_v26, %v7548_v60  ;;  %v7550_v27 = vadd.f32 %v7549_v41, %v18371_v58  ;;  %v7602_v25 = vpop.f32.mrf.mxu0 }
 0x656   :  { %v7551_v29 = vpop.f32.mrf.mxu1 }
 0x657   :  { %v7603_v55 = vadd.f32 %v7602_v25, %v7550_v27  ;;  %v7552_v13 = vadd.f32 %v7551_v29, %v18377_v14  ;;  %v7604_v33 = vpop.f32.mrf.mxu0 }
 0x658   :  { %v7553_v34 = vpop.f32.mrf.mxu1 }
 0x659   :  { %v7605_v47 = vadd.f32 %v7604_v33, %v7552_v13  ;;  %v7554_v43 = vadd.f32 %v7553_v34, %v18380_v1  ;;  %v7606_v49 = vpop.f32.mrf.mxu0 }
 0x65b   :  { %v7607_v56 = vadd.f32 %v7606_v49, %v7554_v43 }
 0x68b   :  { %v7643_v53 = vpop.f32.mrf.mxu1 }
 0x68c   :  { %v7644_v3 = vadd.f32 %v7643_v53, %v7591_v40  ;;  %v7696_v16 = vpop.f32.mrf.mxu0 }
 0x68d   :  { %v7645_v5 = vpop.f32.mrf.mxu1 }
 0x68e   :  { %v7697_v39 = vadd.f32 %v7696_v16, %v7644_v3  ;;  %v7646_v20 = vadd.f32 %v7645_v5, %v7593_v50  ;;  %v7698_v22 = vpop.f32.mrf.mxu0 }
 0x68f   :  { %v7647_v58 = vpop.f32.mrf.mxu1 }
 0x690   :  { %v7699_v24 = vadd.f32 %v7698_v22, %v7646_v20  ;;  %v7648_v36 = vadd.f32 %v7647_v58, %v7595_v57  ;;  %v7700_v4 = vpop.f32.mrf.mxu0 }
 0x691   :  { %v7649_v17 = vpop.f32.mrf.mxu1 }
 0x692   :  { %v7650_v2 = vadd.f32 %v7649_v17, %v7597_v46  ;;  %v7702_v12 = vpop.f32.mrf.mxu0  ;;  %v7701_v62 = vadd.f32 %v7700_v4, %v7648_v36 }
 0x693   :  { %v7653_v14 = vpop.f32.mrf.mxu1 }
 0x694   :  { %v7654_v59 = vadd.f32 %v7653_v14, %v7601_v32  ;;  %v7706_v7 = vpop.f32.mrf.mxu0  ;;  %v7703_v60 = vadd.f32 %v7702_v12, %v7650_v2 }
 0x695   :  { %v7655_v61 = vpop.f32.mrf.mxu1 }
 0x696   :  { %v7656_v19 = vadd.f32 %v7655_v61, %v7603_v55  ;;  %v7708_v40 = vpop.f32.mrf.mxu0  ;;  %v7707_v32 = vadd.f32 %v7706_v7, %v7654_v59  ;;  %v15222_v7 = vld [vmem:[#allocation15 + $0xe0] ss:$16 sps:$4 sm:$0xff]  }
 0x697   :  { %v7657_v63 = vpop.f32.mrf.mxu1 }
 0x698   :  { %v7658_v1 = vadd.f32 %v7657_v63, %v7605_v47  ;;  %v7710_v28 = vpop.f32.mrf.mxu0  ;;  %v7709_v33 = vadd.f32 %v7708_v40, %v7656_v19  ;;  %v15224_v63 = vld [vmem:[#allocation15 + $0xe4] ss:$16 sps:$4 sm:$0xff]   ;;  %v15225_v40 = vld [vmem:[#allocation15 + $0x2e0] ss:$16 sps:$4 sm:$0xff]  }
 0x699   :  { %v7659_v6 = vpop.f32.mrf.mxu1  ;;  %9916 = vmatprep.subr.bf16.mxu1 %v15224_v63  ;;  %v15243_v63 = vld [vmem:[#allocation15 + $0x280] ss:$16 sps:$4 sm:$0xff]  }
 0x69a   :  { %v7712_v26 = vpop.f32.mrf.mxu0  ;;  %v7660_v34 = vadd.f32 %v7659_v6, %v7607_v56  ;;  %v7711_v53 = vadd.f32 %v7710_v28, %v7658_v1  ;;  %v15227_v1 = vld [vmem:[#allocation15 + $0x2e4] ss:$16 sps:$4 sm:$0xff]   ;;  %9917 = vmatpush1.bf16.msra.mxu1 %v15222_v7 }
 0x69b   :  { %9969 = vmatprep.subr.bf16.mxu0 %v15227_v1  ;;  %v15251_v7 = vld [vmem:[#allocation15 + $0x264] ss:$16 sps:$4 sm:$0xff]  }
 0x69c   :  { %v7713_v20 = vadd.f32 %v7712_v26, %v7660_v34  ;;  %9970 = vmatpush1.bf16.msra.mxu0 %v15225_v40  ;;  %v15228_v26 = vld [vmem:[#allocation15 + $0xc0] ss:$16 sps:$4 sm:$0xff]   ;;  %v15239_v34 = vld [vmem:[#allocation15 + $0x2a4] ss:$16 sps:$4 sm:$0xff]  }
 0x69d   :  { %v15249_v40 = vld [vmem:[#allocation15 + $0x260] ss:$16 sps:$4 sm:$0xff]  }
 0x6ac   :  { %v7749_v8 = vpop.f32.mrf.mxu1 }
 0x6ad   :  { %v18404_v57 = vadd.f32 %v7749_v8, %v7697_v39  ;;  %v18414_v55 = vpop.f32.mrf.mxu0 }
 0x6ae   :  { %v7751_v50 = vpop.f32.mrf.mxu1 }
 0x6af   :  { %v18408_v27 = vadd.f32 %v7751_v50, %v7699_v24  ;;  %v18420_v5 = vpop.f32.mrf.mxu0  ;;  %v15230_v50 = vld [vmem:[#allocation15 + $0xc4] ss:$16 sps:$4 sm:$0xff]  }
 0x6b0   :  { %v7753_v11 = vpop.f32.mrf.mxu1  ;;  %9918 = vmatprep.subr.bf16.mxu1 %v15230_v50  ;;  %v15254_v50 = vld [vmem:[#allocation15 + $0x44] ss:$16 sps:$4 sm:$0xff]  }
 0x6b1   :  { %v18406_v46 = vadd.f32 %v7753_v11, %v7701_v62  ;;  %v18423_v56 = vpop.f32.mrf.mxu0  ;;  %v15233_v62 = vld [vmem:[#allocation15 + $0x2c4] ss:$16 sps:$4 sm:$0xff]   ;;  %9919 = vmatpush1.bf16.msra.mxu1 %v15228_v26 }
 0x6b2   :  { %v7755_v41 = vpop.f32.mrf.mxu1  ;;  %9971 = vmatprep.subr.bf16.mxu0 %v15233_v62  ;;  %v15257_v62 = vld [vmem:[#allocation15 + $0x244] ss:$16 sps:$4 sm:$0xff]  }
 0x6b3   :  { %v8147_v25 = vadd.f32 %v18406_v46, %v18404_v57  ;;  %v18412_v29 = vadd.f32 %v7755_v41, %v7703_v60  ;;  %v18425_v19 = vpop.f32.mrf.mxu0  ;;  %v15231_v41 = vld [vmem:[#allocation15 + $0x2c0] ss:$16 sps:$4 sm:$0xff]  }
 0x6b4   :  { %v7759_v13 = vpop.f32.mrf.mxu1  ;;  %9972 = vmatpush1.bf16.msra.mxu0 %v15231_v41 }
 0x6b5   :  { %v8156_v47 = vadd.f32 %v18412_v29, %v18408_v27  ;;  %v7760_v43 = vadd.f32 %v7759_v13, %v7707_v32  ;;  %v18427_v28 = vpop.f32.mrf.mxu0  ;;  %9973 = vmatprep.subr.bf16.mxu0 %v15239_v34  ;;  %v15261_v34 = vld [vmem:[#allocation15 + $0x220] ss:$16 sps:$4 sm:$0xff]  }
 0x6b6   :  { %v7761_v49 = vpop.f32.mrf.mxu1 }
 0x6b7   :  { %v8148_v3 = vadd.f32 %v8147_v25, %v7760_v43  ;;  %v18418_v16 = vadd.f32 %v7761_v49, %v7709_v33  ;;  %v18429_v13 = vpop.f32.mrf.mxu0  ;;  %v15236_v33 = vld [vmem:[#allocation15 + $0xa4] ss:$16 sps:$4 sm:$0xff]  }
 0x6b8   :  { %v7763_v39 = vpop.f32.mrf.mxu1  ;;  %9920 = vmatprep.subr.bf16.mxu1 %v15236_v33  ;;  %v15258_v33 = vld [vmem:[#allocation15 + $0x20] ss:$16 sps:$4 sm:$0xff]  }
 0x6b9   :  { %v8157_v22 = vadd.f32 %v8156_v47, %v18418_v16  ;;  %v7764_v58 = vadd.f32 %v7763_v39, %v7711_v53  ;;  %v15234_v53 = vld [vmem:[#allocation15 + $0xa0] ss:$16 sps:$4 sm:$0xff]  }
 0x6ba   :  { %v7765_v24 = vpop.f32.mrf.mxu1  ;;  %9921 = vmatpush1.bf16.msra.mxu1 %v15234_v53  ;;  %v15266_v53 = vld [vmem:[#allocation15 + $0x4] ss:$16 sps:$4 sm:$0xff]  }
 0x6bb   :  { %v8149_v36 = vadd.f32 %v8148_v3, %v7764_v58  ;;  %v7766_v17 = vadd.f32 %v7765_v24, %v7713_v20  ;;  %v15237_v3 = vld [vmem:[#allocation15 + $0x2a0] ss:$16 sps:$4 sm:$0xff]  }
 0x6bc   :  { %9974 = vmatpush1.bf16.msra.mxu0 %v15237_v3  ;;  %v15269_v3 = vld [vmem:[#allocation15 + $0x204] ss:$16 sps:$4 sm:$0xff]  }
 0x6bd   :  { %v8150_v2 = vrot.slane %v8149_v36, 4  ;;  %v8158_v14 = vadd.f32 %v8157_v22, %v7766_v17 }
 0x6bf   :  { %v8151_v59 = vadd.f32 %v8150_v2, %v8149_v36  ;;  %v8159_v61 = vrot.slane %v8158_v14, 4  ;;  %v18441_v36 = vpop.f32.mrf.mxu0 }
 0x6c1   :  { %v8152_v4 = vrot.slane %v8151_v59, 2  ;;  %v8160_v12 = vadd.f32 %v8159_v61, %v8158_v14  ;;  %v15242_v14 = vld [vmem:[#allocation15 + $0x84] ss:$16 sps:$4 sm:$0xff]   ;;  %v15240_v61 = vld [vmem:[#allocation15 + $0x80] ss:$16 sps:$4 sm:$0xff]  }
 0x6c2   :  { %9922 = vmatprep.subr.bf16.mxu1 %v15242_v14  ;;  %v15267_v14 = vld [vmem:[#allocation15 + $0x200] ss:$16 sps:$4 sm:$0xff]  }
 0x6c3   :  { %v8153_v6 = vadd.f32 %v8152_v4, %v8151_v59  ;;  %v8161_v8 = vrot.slane %v8160_v12, 2  ;;  %v15245_v59 = vld [vmem:[#allocation15 + $0x284] ss:$16 sps:$4 sm:$0xff]   ;;  %9923 = vmatpush1.bf16.msra.mxu1 %v15240_v61 }
 0x6c4   :  { %9975 = vmatprep.subr.bf16.mxu0 %v15245_v59 }
 0x6c5   :  { %v8154_v11 = vrot.slane %v8153_v6, 1  ;;  %v8162_v60 = vadd.f32 %v8161_v8, %v8160_v12  ;;  %v18458_v12 = vpop.f32.mrf.mxu0  ;;  %9976 = vmatpush1.bf16.msra.mxu0 %v15243_v63  ;;  %v15272_v63 = vld [vmem:[#allocation15 + $0x1e4] ss:$16 sps:$4 sm:$0xff]  }
 0x6c6   :  { %9977 = vmatprep.subr.bf16.mxu0 %v15251_v7 }
 0x6c7   :  { %v8155_v32 = vadd.f32 %v8154_v11, %v8153_v6  ;;  %v8163_v25 = vrot.slane %v8162_v60, 1  ;;  %v15252_v11 = vld [vmem:[#allocation15 + $0x40] ss:$16 sps:$4 sm:$0xff]  }
 0x6c9   :  { %v8178_v47 = vmul.f32 0.03125, %v8155_v32  ;;  %v8164_v49 = vadd.f32 %v8163_v25, %v8162_v60  ;;  %9978 = vmatpush1.bf16.msra.mxu0 %v15249_v40  ;;  %v15255_v60 = vld [vmem:[#allocation15 + $0x240] ss:$16 sps:$4 sm:$0xff]   ;;  %v15260_v32 = vld [vmem:[#allocation15 + $0x24] ss:$16 sps:$4 sm:$0xff]  }
 0x6ca   :  { %9979 = vmatprep.subr.bf16.mxu0 %v15257_v62  ;;  %v15263_v25 = vld [vmem:[#allocation15 + $0x224] ss:$16 sps:$4 sm:$0xff]   ;;  %v15276_v62 = vld [vmem:[#allocation15 + $0x1c0] ss:$16 sps:$4 sm:$0xff]  }
 0x6cb   :  { %v18432_v39 = vsub.f32 %v18404_v57, %v8178_v47  ;;  %v18435_v20 = vsub.f32 %v18406_v46, %v8178_v47  ;;  %v18437_v22 = vsub.f32 %v7760_v43, %v8178_v47  ;;  %v18439_v24 = vsub.f32 %v7764_v58, %v8178_v47  ;;  %v15278_v40 = vld [vmem:[#allocation15 + $0x1c4] ss:$16 sps:$4 sm:$0xff]  }
 0x6cc   :  { %v8179_v2 = vmul.f32 0.03125, %v8164_v49 }
 0x6cd   :  { %9980 = vmatpush1.bf16.msra.mxu0 %v15255_v60 }
 0x6ce   :  { %v18444_v1 = vsub.f32 %v18408_v27, %v8179_v2  ;;  %v18447_v57 = vsub.f32 %v18412_v29, %v8179_v2  ;;  %v18450_v46 = vsub.f32 %v18418_v16, %v8179_v2  ;;  %v18452_v43 = vsub.f32 %v7766_v17, %v8179_v2  ;;  %v18460_v27 = vpop.f32.mrf.mxu1  ;;  %v15248_v29 = vld [vmem:[#allocation15 + $0x64] ss:$16 sps:$4 sm:$0xff]   ;;  %v15246_v16 = vld [vmem:[#allocation15 + $0x60] ss:$16 sps:$4 sm:$0xff]   ;;  %v18464_v6 = vpop.f32.mrf.mxu0  ;;  %9981 = vmatprep.subr.bf16.mxu0 %v15263_v25 }
 0x6cf   :  { %9924 = vmatprep.subr.bf16.mxu1 %v15248_v29  ;;  %v15264_v2 = vld [vmem:[#allocation15] ss:$16 sps:$4 sm:$0xff]  }
 0x6d0   :  { %19172 = vst [vmem:[#allocation131_spill] sm:$0xff] %v18444_v1  ;;  %19173 = vst [vmem:[#allocation134_spill] sm:$0xff] %v18447_v57  ;;  %v8214_v58 = vmul.f32 %v18444_v1, %v18444_v1  ;;  %v8221_v4 = vmul.f32 %v18447_v57, %v18447_v57  ;;  %9925 = vmatpush1.bf16.msra.mxu1 %v15246_v16  ;;  %v18466_v8 = vpop.f32.mrf.mxu1  ;;  %v18468_v26 = vpop.f32.mrf.mxu0  ;;  %v15273_v29 = vld [vmem:[#allocation15 + $0x3e0] ss:$16 sps:$4 sm:$0xff]   ;;  %v15308_v57 = vld [vmem:[#allocation15 + $0x124] ss:$16 sps:$4 sm:$0xff]  }
 0x6d1   :  { %9926 = vmatprep.subr.bf16.mxu1 %v15254_v50  ;;  %9982 = vmatpush1.bf16.msra.mxu0 %v15261_v34  ;;  %v15281_v50 = vld [vmem:[#allocation15 + $0x3c4] ss:$16 sps:$4 sm:$0xff]   ;;  %v15282_v25 = vld [vmem:[#allocation15 + $0x1a0] ss:$16 sps:$4 sm:$0xff]  }
 0x6d2   :  { %v18462_v17 = vadd.f32 %v8221_v4, %v8214_v58  ;;  %v18470_v41 = vpop.f32.mrf.mxu1  ;;  %v18472_v47 = vpop.f32.mrf.mxu0  ;;  %9983 = vmatprep.subr.bf16.mxu0 %v15269_v3  ;;  %v15275_v58 = vld [vmem:[#allocation15 + $0x3e4] ss:$16 sps:$4 sm:$0xff]   ;;  %v15270_v4 = vld [vmem:[#allocation15 + $0x1e0] ss:$16 sps:$4 sm:$0xff]  }
 0x6d3   :  { %v15290_v3 = vld [vmem:[#allocation15 + $0x184] ss:$16 sps:$4 sm:$0xff]  }
 0x6d4   :  { %9927 = vmatpush1.bf16.msra.mxu1 %v15252_v11  ;;  %v18474_v49 = vpop.f32.mrf.mxu1  ;;  %v18476_v59 = vpop.f32.mrf.mxu0  ;;  %v15279_v11 = vld [vmem:[#allocation15 + $0x3c0] ss:$16 sps:$4 sm:$0xff]  }
 0x6d5   :  { %9928 = vmatprep.subr.bf16.mxu1 %v15260_v32  ;;  %9984 = vmatpush1.bf16.msra.mxu0 %v15267_v14  ;;  %v15284_v32 = vld [vmem:[#allocation15 + $0x1a4] ss:$16 sps:$4 sm:$0xff]  }
 0x6d6   :  { %v18478_v61 = vpop.f32.mrf.mxu1  ;;  %v18480_v7 = vpop.f32.mrf.mxu0  ;;  %9985 = vmatprep.subr.bf16.mxu0 %v15275_v58 }
 0x6d8   :  { %9929 = vmatpush1.bf16.msra.mxu1 %v15258_v33  ;;  %v18482_v16 = vpop.f32.mrf.mxu1  ;;  %v18484_v60 = vpop.f32.mrf.mxu0  ;;  %v15287_v33 = vld [vmem:[#allocation15 + $0x3a4] ss:$16 sps:$4 sm:$0xff]  }
 0x6d9   :  { %9930 = vmatprep.subr.bf16.mxu1 %v15266_v53  ;;  %9986 = vmatpush2.bf16.msra.mxu0 %v15273_v29  ;;  %v15285_v53 = vld [vmem:[#allocation15 + $0x3a0] ss:$16 sps:$4 sm:$0xff]   ;;  %v15296_v29 = vld [vmem:[#allocation15 + $0x164] ss:$16 sps:$4 sm:$0xff]  }
 0x6da   :  { %9987 = vmatprep.subr.bf16.mxu0 %v15281_v50  ;;  %v18486_v34 = vpop.f32.mrf.mxu1  ;;  %v18488_v14 = vpop.f32.mrf.mxu0 }
 0x6dc   :  { %9931 = vmatpush1.bf16.msra.mxu1 %v15264_v2  ;;  %v15293_v2 = vld [vmem:[#allocation15 + $0x384] ss:$16 sps:$4 sm:$0xff]   ;;  %v18490_v58 = vpop.f32.mrf.mxu1  ;;  %v18492_v50 = vpop.f32.mrf.mxu0 }
 0x6dd   :  { %9932 = vmatprep.subr.bf16.mxu1 %v15272_v63  ;;  %9988 = vmatpush2.bf16.msra.mxu0 %v15279_v11  ;;  %v15288_v63 = vld [vmem:[#allocation15 + $0x180] ss:$16 sps:$4 sm:$0xff]  }
 0x6de   :  { %9989 = vmatprep.subr.bf16.mxu0 %v15287_v33  ;;  %v15294_v11 = vld [vmem:[#allocation15 + $0x160] ss:$16 sps:$4 sm:$0xff]   ;;  %v15302_v33 = vld [vmem:[#allocation15 + $0x144] ss:$16 sps:$4 sm:$0xff]  }
 0x6e0   :  { %9933 = vmatpush2.bf16.msra.mxu1 %v15270_v4  ;;  %v15291_v4 = vld [vmem:[#allocation15 + $0x380] ss:$16 sps:$4 sm:$0xff]  }
 0x6e1   :  { %9934 = vmatprep.subr.bf16.mxu1 %v15278_v40  ;;  %9990 = vmatpush2.bf16.msra.mxu0 %v15285_v53  ;;  %v15299_v40 = vld [vmem:[#allocation15 + $0x364] ss:$16 sps:$4 sm:$0xff]  }
 0x6e2   :  { %9991 = vmatprep.subr.bf16.mxu0 %v15293_v2  ;;  %v15303_v2 = vld [vmem:[#allocation15 + $0x340] ss:$16 sps:$4 sm:$0xff]  }
 0x6e4   :  { %9935 = vmatpush2.bf16.msra.mxu1 %v15276_v62 }
 0x6e5   :  { %9936 = vmatprep.subr.bf16.mxu1 %v15284_v32  ;;  %9992 = vmatpush2.bf16.msra.mxu0 %v15291_v4 }
 0x6e6   :  { %9993 = vmatprep.subr.bf16.mxu0 %v15299_v40  ;;  %v15314_v40 = vld [vmem:[#allocation15 + $0x104] ss:$16 sps:$4 sm:$0xff]  }
 0x6e8   :  { %9937 = vmatpush2.bf16.msra.mxu1 %v15282_v25  ;;  %v15297_v25 = vld [vmem:[#allocation15 + $0x360] ss:$16 sps:$4 sm:$0xff]  }
 0x6e9   :  { %9938 = vmatprep.subr.bf16.mxu1 %v15290_v3  ;;  %v15300_v3 = vld [vmem:[#allocation15 + $0x140] ss:$16 sps:$4 sm:$0xff]   ;;  %9994 = vmatpush2.bf16.msra.mxu0 %v15297_v25 }
 0x6ea   :  { %9995 = vmatprep.subr.bf16.mxu0 %v15305_v52  ;;  %v15315_v25 = vld [vmem:[#allocation15 + $0x300] ss:$16 sps:$4 sm:$0xff]   ;;  %v15323_v52 = vld [vmem:[#allocation15 + $0x6e4] ss:$16 sps:$4 sm:$0xff]  }
 0x6ec   :  { %v18494_v62 = vpop.f32.mrf.mxu1  ;;  %9939 = vmatpush2.bf16.msra.mxu1 %v15288_v63  ;;  %v15311_v63 = vld [vmem:[#allocation15 + $0x324] ss:$16 sps:$4 sm:$0xff]  }
 0x6ed   :  { %9940 = vmatprep.subr.bf16.mxu1 %v15296_v29  ;;  %9996 = vmatpush2.bf16.msra.mxu0 %v15303_v2  ;;  %v15309_v29 = vld [vmem:[#allocation15 + $0x320] ss:$16 sps:$4 sm:$0xff]  }
 0x6ee   :  { %v18496_v32 = vpop.f32.mrf.mxu0  ;;  %v13770_v53 = vpop.f32.mrf.mxu1  ;;  %9997 = vmatprep.subr.bf16.mxu0 %v15311_v63  ;;  %v19174_v63 = vld [vmem:[#allocation111_spill] sm:$0xff] }
 0x6f0   :  { %9941 = vmatpush2.bf16.msra.mxu1 %v15294_v11  ;;  %v18498_v37 = vpop.f32.mrf.mxu0  ;;  %v13772_v1 = vpop.f32.mrf.mxu1 }
 0x6f1   :  { %9942 = vmatprep.subr.bf16.mxu1 %v15302_v33  ;;  %9998 = vmatpush2.bf16.msra.mxu0 %v15309_v29  ;;  %v15320_v33 = vld [vmem:[#allocation15 + $0x4e4] ss:$16 sps:$4 sm:$0xff]   ;;  %v13718_v29 = vadd.f32 %v18474_v49, %v18470_v41  ;;  %v13746_v41 = vadd.f32 %v18476_v59, %v18472_v47 }
 0x6f2   :  { %v13800_v4 = vpop.f32.mrf.mxu0  ;;  %v13773_v11 = vpop.f32.mrf.mxu1  ;;  %9999 = vmatprep.subr.bf16.mxu0 %v15317_v15  ;;  %v13687_v15 = vadd.f32 %v18420_v5, %v18414_v55  ;;  %v13696_v5 = vadd.f32 %v18458_v12, %v18441_v36  ;;  %v13749_v36 = vadd.f32 %v18484_v60, %v18480_v7 }
 0x6f3   :  { %v13774_v49 = vadd.f32 %v13773_v11, %v13772_v1 }
 0x6f4   :  { %9943 = vmatpush2.bf16.msra.mxu1 %v15300_v3  ;;  %v13801_v30 = vpop.f32.mrf.mxu0  ;;  %v13775_v21 = vpop.f32.mrf.mxu1 }
 0x6f5   :  { %9944 = vmatprep.subr.bf16.mxu1 %v15308_v57  ;;  %10000 = vmatpush2.bf16.msra.mxu0 %v15315_v25  ;;  %v13690_v57 = vadd.f32 %v18425_v19, %v18423_v56  ;;  %v13693_v25 = vadd.f32 %v18429_v13, %v18427_v28 }
 0x6f6   :  { %v13803_v3 = vpop.f32.mrf.mxu0  ;;  %10075 = vmatprep.subr.bf16.mxu0 %v15323_v52  ;;  %v13776_v2 = vpop.f32.mrf.mxu1 }
 0x6f7   :  { %v13777_v12 = vadd.f32 %v13776_v2, %v13775_v21 }
 0x6f8   :  { %9945 = vmatpush2.bf16.msra.mxu1 %v15306_v0  ;;  %v2903_v0 = vrot.slane %v18328_v10, %v19174_v63  ;;  %v13721_v10 = vadd.f32 %v18482_v16, %v18478_v61  ;;  %v13771_v61 = vadd.f32 %v13770_v53, %v18494_v62 }
 0x6f9   :  { %9946 = vmatprep.subr.bf16.mxu1 %v15314_v40  ;;  %v13804_v40 = vpop.f32.mrf.mxu0 }
 0x6fa   :  { %v7806_v44 = vadd.f32 %v13690_v57, %v2903_v0  ;;  %v7803_v52 = vadd.f32 %v13687_v15, %v2903_v0  ;;  %v7811_v55 = vadd.f32 %v13693_v25, %v2903_v0  ;;  %v7814_v16 = vadd.f32 %v13696_v5, %v2903_v0 }
 0x6fb   :  { %v13806_v19 = vpop.f32.mrf.mxu0 }
 0x6fc   :  { %9947 = vmatpush2.bf16.msra.mxu1 %v15312_v9  ;;  %v13778_v9 = vpop.f32.mrf.mxu1  ;;  %v7855_v56 = vadd.f32 %v13718_v29, %v7806_v44  ;;  %v13743_v44 = vadd.f32 %v18468_v26, %v18464_v6  ;;  %v13802_v29 = vadd.f32 %v13801_v30, %v13800_v4  ;;  %v13805_v4 = vadd.f32 %v13804_v40, %v13803_v3 }
 0x6fd   :  { %10022 = vmatprep.subr.bf16.mxu1 %v15320_v33  ;;  %v13715_v33 = vadd.f32 %v18466_v8, %v18460_v27  ;;  %v13807_v13 = vpop.f32.mrf.mxu0  ;;  %v7860_v27 = vadd.f32 %v13721_v10, %v7811_v55  ;;  %v13724_v8 = vadd.f32 %v18490_v58, %v18486_v34  ;;  %v13752_v34 = vadd.f32 %v18492_v50, %v18488_v14 }
 0x6fe   :  { %v13779_v23 = vpop.f32.mrf.mxu1  ;;  %v7904_v28 = vadd.f32 %v13746_v41, %v7855_v56  ;;  %v13799_v58 = vadd.f32 %v18498_v37, %v18496_v32  ;;  %v8213_v41 = vmul.f32 %v18432_v39, %v18432_v39  ;;  %v8220_v14 = vmul.f32 %v18435_v20, %v18435_v20 }
 0x6ff   :  { %v7852_v57 = vadd.f32 %v13715_v33, %v7803_v52  ;;  %v7909_v33 = vadd.f32 %v13749_v36, %v7860_v27  ;;  %v7863_v6 = vadd.f32 %v13724_v8, %v7814_v16  ;;  %v13780_v56 = vadd.f32 %v13779_v23, %v13778_v9 }
 0x700   :  { %v7953_v47 = vadd.f32 %v13774_v49, %v7904_v28  ;;  %v13808_v9 = vadd.f32 %v13807_v13, %v13806_v19  ;;  %v8273_v28 = vadd.f32 %v8220_v14, %v8213_v41  ;;  %v8228_v3 = vmul.f32 %v18450_v46, %v18450_v46 }
 0x701   :  { %v7901_v11 = vadd.f32 %v13743_v44, %v7852_v57  ;;  %v7958_v0 = vadd.f32 %v13777_v12, %v7909_v33  ;;  %v7912_v30 = vadd.f32 %v13752_v34, %v7863_v6  ;;  %v8235_v19 = vmul.f32 %v18452_v43, %v18452_v43 }
 0x702   :  { %v8002_v62 = vadd.f32 %v13802_v29, %v7953_v47  ;;  %v8227_v47 = vmul.f32 %v18437_v22, %v18437_v22  ;;  %v8234_v29 = vmul.f32 %v18439_v24, %v18439_v24 }
 0x703   :  { %v7950_v26 = vadd.f32 %v13771_v61, %v7901_v11  ;;  %v8007_v37 = vadd.f32 %v13805_v4, %v7958_v0  ;;  %v7961_v32 = vadd.f32 %v13780_v56, %v7912_v30 }
 0x704   :  { %v8274_v36 = vadd.f32 %v8273_v28, %v8227_v47 }
 0x705   :  { %v7999_v60 = vadd.f32 %v13799_v58, %v7950_v26  ;;  %v8010_v44 = vadd.f32 %v13808_v9, %v7961_v32 }
 0x70c   :  { %v13825_v42 = vpop.f32.mrf.mxu1 }
 0x70e   :  { %v13959_v1 = vpop.f32.mrf.mxu0  ;;  %v13826_v59 = vpop.f32.mrf.mxu1 }
 0x70f   :  { %v13827_v52 = vadd.f32 %v13826_v59, %v13825_v42  ;;  %v8283_v59 = vadd.f32 %v18462_v17, %v8228_v3 }
 0x710   :  { %v8096_v15 = vpop.f32.mrf.mxu0  ;;  %v13828_v25 = vpop.f32.mrf.mxu1 }
 0x711   :  { %v8048_v49 = vadd.f32 %v13827_v52, %v7999_v60 }
 0x712   :  { %v13829_v53 = vpop.f32.mrf.mxu1  ;;  %v13960_v7 = vpop.f32.mrf.mxu0 }
 0x713   :  { %v13830_v10 = vadd.f32 %v13829_v53, %v13828_v25  ;;  %v8097_v27 = vadd.f32 %v8096_v15, %v8048_v49  ;;  %v8284_v25 = vadd.f32 %v8283_v59, %v8235_v19 }
 0x714   :  { %v13831_v21 = vpop.f32.mrf.mxu1  ;;  %v8099_v23 = vpop.f32.mrf.mxu0 }
 0x715   :  { %v8051_v2 = vadd.f32 %v13830_v10, %v8002_v62  ;;  %v8285_v6 = vrot.slane %v8284_v25, 4 }
 0x716   :  { %v13832_v50 = vpop.f32.mrf.mxu1 }
 0x717   :  { %v13833_v55 = vadd.f32 %v13832_v50, %v13831_v21  ;;  %v8100_v5 = vadd.f32 %v8099_v23, %v8051_v2  ;;  %v8286_v17 = vadd.f32 %v8285_v6, %v8284_v25 }
 0x718   :  { %v13834_v42 = vpop.f32.mrf.mxu1 }
 0x719   :  { %v8056_v57 = vadd.f32 %v13833_v55, %v8007_v37  ;;  %v8165_v16 = vadd.f32 %v8100_v5, %v8097_v27  ;;  %v8287_v56 = vrot.slane %v8286_v17, 2 }
 0x71a   :  { %v13835_v40 = vpop.f32.mrf.mxu1 }
 0x71b   :  { %v8105_v8 = vadd.f32 %v13959_v1, %v8056_v57  ;;  %v13836_v61 = vadd.f32 %v13835_v40, %v13834_v42  ;;  %v8275_v1 = vadd.f32 %v8274_v36, %v8234_v29 }
 0x71d   :  { %v8059_v11 = vadd.f32 %v13836_v61, %v8010_v44  ;;  %v8166_v13 = vadd.f32 %v8165_v16, %v8105_v8  ;;  %v8276_v34 = vrot.slane %v8275_v1, 4 }
 0x71f   :  { %v8108_v12 = vadd.f32 %v13960_v7, %v8059_v11  ;;  %v8277_v53 = vadd.f32 %v8276_v34, %v8275_v1  ;;  %v8288_v7 = vadd.f32 %v8287_v56, %v8286_v17  ;;  %v2847_v34 = vld [vmem:[#allocation12] sm:$0xff] }
 0x721   :  { %v8167_v15 = vadd.f32 %v8166_v13, %v8108_v12  ;;  %v8278_v10 = vrot.slane %v8277_v53, 2  ;;  %v8289_v37 = vrot.slane %v8288_v7, 1 }
 0x723   :  { %v8168_v33 = vrot.slane %v8167_v15, 4  ;;  %v8279_v2 = vadd.f32 %v8278_v10, %v8277_v53  ;;  %v8290_v9 = vadd.f32 %v8289_v37, %v8288_v7 }
 0x725   :  { %v8169_v26 = vadd.f32 %v8168_v33, %v8167_v15  ;;  %v8280_v55 = vrot.slane %v8279_v2, 1  ;;  %v8305_v40 = vmul.f32 0.03125, %v8290_v9  ;;  %v19175_v33 = vcombine.low %v18364_v54, %v18368_v51 }
 0x727   :  { %v8170_v58 = vrot.slane %v8169_v26, 2  ;;  %v8281_v28 = vadd.f32 %v8280_v55, %v8279_v2  ;;  %v8367_v6 = vrot.slane %v19175_v33, %v19170_v45 }
 0x729   :  { %v8171_v62 = vadd.f32 %v8170_v58, %v8169_v26  ;;  %v8304_v44 = vmul.f32 0.03125, %v8281_v28  ;;  %v2848_v58 = vld [vmem:[#allocation13] sm:$0xff]  ;;  %v19179_v28 = vld [vmem:[#allocation122_spill] sm:$0xff] }
 0x72a   :  { %v8450_v53 = vrot.slane %v2848_v58, %v17081_v38  ;;  %v18556_v56 = vrot.slane %v2848_v58, %v17076_v35  ;;  %v18565_v54 = vrot.slane %v2848_v58, %v19174_v63 }
 0x72b   :  { %v8172_v0 = vrot.slane %v8171_v62, 1  ;;  %v8311_v47 = vadd.f32 1e-05, %v8304_v44  ;;  %v19181_v44 = vld [vmem:[#allocation127_spill] sm:$0xff] }
 0x72d   :  { %v8173_v52 = vadd.f32 %v8172_v0, %v8171_v62  ;;  %v8458_v0 = vrot.slane %v2848_v58, %v19159_v31 }
 0x72f   :  { %v8180_v21 = vmul.f32 0.03125, %v8173_v52  ;;  %v19176_v52 = vld [vmem:[#allocation112_spill] sm:$0xff] }
 0x730   :  { %v18559_v10 = vrot.slane %v2848_v58, %v19176_v52 }
 0x731   :  { %v8187_v30 = vsub.f32 %v8097_v27, %v8180_v21  ;;  %v8194_v60 = vsub.f32 %v8100_v5, %v8180_v21  ;;  %v18542_v4 = vsub.f32 %v8105_v8, %v8180_v21  ;;  %v8208_v41 = vsub.f32 %v8108_v12, %v8180_v21 }
 0x732   :  { %v8312_v8 = vadd.f32 1e-05, %v8305_v40  ;;  %v18562_v21 = vrot.slane %v2848_v58, %v19169_v18  ;;  %v19180_v40 = vld [vmem:[#allocation139_spill] sm:$0xff] }
 0x733   :  { %v8215_v14 = vmul.f32 %v8187_v30, %v8187_v30  ;;  %v8222_v50 = vmul.f32 %v8194_v60, %v8194_v60  ;;  %v8229_v32 = vmul.f32 %v18542_v4, %v18542_v4  ;;  %v8236_v23 = vmul.f32 %v8208_v41, %v8208_v41 }
 0x734   :  { %15752 = vrsqrt.f32 %v8312_v8  ;;  %v19182_v8 = vld [vmem:[#allocation118_spill] sm:$0xff] }
 0x735   :  { %v8291_v49 = vadd.f32 %v8222_v50, %v8215_v14  ;;  %15754 = vrsqrt.f32 %v8311_v47 }
 0x737   :  { %v8292_v42 = vadd.f32 %v8291_v49, %v8229_v32  ;;  %v18581_v49 = vrot.slane %v2848_v58, %v19168_v48  ;;  %v19185_v58 = vld [vmem:[#allocation137_spill] sm:$0xff] }
 0x739   :  { %v8293_v57 = vadd.f32 %v8292_v42, %v8236_v23  ;;  %v19177_v42 = vld [vmem:[#allocation125_spill] sm:$0xff] }
 0x73b   :  { %v8294_v3 = vrot.slane %v8293_v57, 4 }
 0x73d   :  { %v8295_v5 = vadd.f32 %v8294_v3, %v8293_v57  ;;  %v19178_v57 = vld [vmem:[#allocation136_spill] sm:$0xff] }
 0x73f   :  { %v8296_v27 = vrot.slane %v8295_v5, 2 }
 0x741   :  { %v8297_v61 = vadd.f32 %v8296_v27, %v8295_v5  ;;  %v15753_v19 = vpop.eup %15752 }
 0x742   :  { %v15755_v13 = vpop.eup %15754 }
 0x743   :  { %v8298_v59 = vrot.slane %v8297_v61, 1  ;;  %v8330_v12 = vcombine.low %v15755_v13, %v15753_v19 }
 0x745   :  { %v8299_v16 = vadd.f32 %v8298_v59, %v8297_v61  ;;  %v8351_v25 = vrot.slane %v8330_v12, %v19170_v45  ;;  %v19183_v61 = vld [vmem:[#allocation129_spill] sm:$0xff] }
 0x747   :  { %v8306_v11 = vmul.f32 0.03125, %v8299_v16 }
 0x749   :  { %v8313_v36 = vadd.f32 1e-05, %v8306_v11 }
 0x74b   :  { %15756 = vrsqrt.f32 %v8313_v36 }
 0x758   :  { %v15757_v29 = vpop.eup %15756 }
 0x759   :  { %v8358_v15 = vrot.slane %v15757_v29, %v19170_v45 }
 0x75b   :  { %v8360_v1 = vcombine.low %v8351_v25, %v8358_v15 }
 0x75d   :  { %v8374_v26 = vrot.slane %v8360_v1, %v19170_v45 }
 0x75f   :  { %v8375_v17 = vcombine.low %v8367_v6, %v8374_v26 }
 0x761   :  { %v8377_v62 = vmul.f32 %v8375_v17, %v2847_v34 }
 0x763   :  { %v18568_v51 = vrot.slane %v8377_v62, %v19174_v63  ;;  %v8386_v7 = vrot.slane %v8377_v62, %v17081_v38  ;;  %v8394_v2 = vrot.slane %v8377_v62, %v19159_v31  ;;  %v8382_v14 = vrot.slane %v8377_v62, %v17076_v35 }
 0x764   :  { %v8390_v50 = vrot.slane %v8377_v62, %v19176_v52  ;;  %v18575_v37 = vrot.slane %v8377_v62, %v19169_v18  ;;  %v18578_v32 = vrot.slane %v8377_v62, %v19168_v48 }
 0x765   :  { %v18584_v63 = vmul.f32 %v18568_v51, %v8187_v30  ;;  %v18587_v55 = vmul.f32 %v18568_v51, %v8194_v60  ;;  %v18590_v23 = vmul.f32 %v18568_v51, %v8208_v41  ;;  %v8415_v9 = vmul.f32 %v8386_v7, %v19177_v42  ;;  %v19184_v60 = vld [vmem:[#allocation132_spill] sm:$0xff] }
 0x766   :  { %v8422_v18 = vmul.f32 %v8386_v7, %v19178_v57  ;;  %v8417_v3 = vmul.f32 %v8394_v2, %v19179_v28  ;;  %v8424_v5 = vmul.f32 %v8394_v2, %v19180_v40  ;;  %v8414_v48 = vmul.f32 %v8382_v14, %v19181_v44  ;;  %v15321_v57 = vld [vmem:[#allocation15 + $0x6e0] ss:$16 sps:$4 sm:$0xff]  }
 0x767   :  { %v8479_v27 = vadd.f32 %v8450_v53, %v8415_v9  ;;  %v8421_v30 = vmul.f32 %v8382_v14, %v19182_v8  ;;  %v8416_v47 = vmul.f32 %v8390_v50, %v19183_v61  ;;  %v8423_v59 = vmul.f32 %v8390_v50, %v19184_v60  ;;  %v15318_v9 = vld [vmem:[#allocation15 + $0x4e0] ss:$16 sps:$4 sm:$0xff]   ;;  %v15329_v61 = vld [vmem:[#allocation15 + $0x6c4] ss:$16 sps:$4 sm:$0xff]  }
 0x768   :  { %v8486_v16 = vadd.f32 %v8450_v53, %v8422_v18  ;;  %v8481_v41 = vadd.f32 %v8458_v0, %v8417_v3  ;;  %v8488_v11 = vadd.f32 %v8458_v0, %v8424_v5  ;;  %v8478_v36 = vadd.f32 %v18556_v56, %v8414_v48  ;;  %v19186_v18 = vld [vmem:[#allocation128_spill] sm:$0xff]  ;;  %v19187_v3 = vld [vmem:[#allocation138_spill] sm:$0xff] }
 0x769   :  { %v8507_v19 = vmax.f32 %v8479_v27, 0.0  ;;  %v8485_v13 = vadd.f32 %v18556_v56, %v8421_v30  ;;  %v8480_v12 = vadd.f32 %v18559_v10, %v8416_v47  ;;  %v8487_v29 = vadd.f32 %v18559_v10, %v8423_v59  ;;  %v19188_v27 = vld [vmem:[#allocation130_spill] sm:$0xff]  ;;  %v19189_v59 = vld [vmem:[#allocation119_spill] sm:$0xff] }
 0x76a   :  { %v8514_v25 = vmax.f32 %v8486_v16, 0.0  ;;  %v8509_v15 = vmax.f32 %v8481_v41, 0.0  ;;  %v8516_v1 = vmax.f32 %v8488_v11, 0.0  ;;  %v8506_v33 = vmax.f32 %v8478_v36, 0.0  ;;  %v15326_v30 = vld [vmem:[#allocation15 + $0x4c4] ss:$16 sps:$4 sm:$0xff]  }
 0x76b   :  { %v8513_v6 = vmax.f32 %v8485_v13, 0.0  ;;  %v8508_v26 = vmax.f32 %v8480_v12, 0.0  ;;  %v8515_v34 = vmax.f32 %v8487_v29, 0.0  ;;  %v8429_v17 = vmul.f32 %v8386_v7, %v19185_v58  ;;  %v19190_v11 = vld [vmem:[#allocation124_spill] sm:$0xff] }
 0x76c   :  { %v18605_v62 = vpack.c.bf16 %v8514_v25, %v8507_v19  ;;  %v18607_v42 = vpack.c.bf16 %v8516_v1, %v8509_v15  ;;  %v8436_v28 = vmul.f32 %v8386_v7, %v19186_v18  ;;  %v8431_v40 = vmul.f32 %v8394_v2, %v19187_v3  ;;  %v19191_v19 = vld [vmem:[#allocation133_spill] sm:$0xff]  ;;  %v15324_v29 = vld [vmem:[#allocation15 + $0x4c0] ss:$16 sps:$4 sm:$0xff]   ;;  %v15332_v58 = vld [vmem:[#allocation15 + $0x4a4] ss:$16 sps:$4 sm:$0xff]  }
 0x76d   :  { %v18611_v5 = vpack.c.bf16 %v8513_v6, %v8506_v33  ;;  %v18613_v44 = vpack.c.bf16 %v8515_v34, %v8508_v26  ;;  %v8493_v48 = vadd.f32 %v8450_v53, %v8429_v17  ;;  %v8438_v8 = vmul.f32 %v8394_v2, %v19188_v27  ;;  %v19192_v25 = vld [vmem:[#allocation121_spill] sm:$0xff]  ;;  %v15327_v33 = vld [vmem:[#allocation15 + $0x6c0] ss:$16 sps:$4 sm:$0xff]   ;;  %v15335_v17 = vld [vmem:[#allocation15 + $0x6a4] ss:$16 sps:$4 sm:$0xff]  }
 0x76e   :  { %9948 = vmatprep.mubr.bf16.mxu1 %v18605_v62  ;;  %10001 = vmatprep.mubr.bf16.mxu0 %v18607_v42  ;;  %v8500_v47 = vadd.f32 %v8450_v53, %v8436_v28  ;;  %v8495_v60 = vadd.f32 %v8458_v0, %v8431_v40  ;;  %v8428_v16 = vmul.f32 %v8382_v14, %v19189_v59  ;;  %v19194_v18 = vld [vmem:[#allocation134_spill] sm:$0xff] }
 0x76f   :  { %9949 = vmatmul.mubr.bf16.vlgmr.msra.gmra.mxu1 %v18611_v5  ;;  %10002 = vmatmul.mubr.bf16.vlgmr.msra.gmra.mxu0 %v18613_v44  ;;  %v8521_v7 = vmax.f32 %v8493_v48, 0.0  ;;  %v8502_v41 = vadd.f32 %v8458_v0, %v8438_v8  ;;  %v8435_v36 = vmul.f32 %v8382_v14, %v19190_v11  ;;  %v8430_v2 = vmul.f32 %v8390_v50, %v19191_v19  ;;  %v19193_v14 = vld [vmem:[#allocation131_spill] sm:$0xff]  ;;  %v15330_v48 = vld [vmem:[#allocation15 + $0x4a0] ss:$16 sps:$4 sm:$0xff]   ;;  %v15338_v59 = vld [vmem:[#allocation15 + $0x484] ss:$16 sps:$4 sm:$0xff]  }
 0x770   :  { %10023 = vmatpush1.bf16.msra.mxu1 %v15318_v9  ;;  %10076 = vmatpush1.bf16.msra.mxu0 %v15321_v57  ;;  %v8528_v13 = vmax.f32 %v8500_v47, 0.0  ;;  %v8523_v12 = vmax.f32 %v8495_v60, 0.0  ;;  %v8492_v53 = vadd.f32 %v18556_v56, %v8428_v16  ;;  %v8437_v15 = vmul.f32 %v8390_v50, %v19192_v25 }
 0x771   :  { %v8530_v1 = vmax.f32 %v8502_v41, 0.0  ;;  %10024 = vmatprep.subr.bf16.mxu1 %v15326_v30  ;;  %10077 = vmatprep.subr.bf16.mxu0 %v15329_v61  ;;  %v8499_v6 = vadd.f32 %v18556_v56, %v8435_v36  ;;  %v8494_v0 = vadd.f32 %v18559_v10, %v8430_v2  ;;  %v8419_v26 = vmul.f32 %v18575_v37, %v19193_v14  ;;  %v15333_v61 = vld [vmem:[#allocation15 + $0x6a0] ss:$16 sps:$4 sm:$0xff]  }
 0x772   :  { %v18629_v34 = vpack.c.bf16 %v8528_v13, %v8521_v7  ;;  %v8520_v9 = vmax.f32 %v8492_v53, 0.0  ;;  %v8501_v57 = vadd.f32 %v18559_v10, %v8437_v15  ;;  %v8426_v50 = vmul.f32 %v18575_v37, %v19194_v18  ;;  %v15344_v53 = vld [vmem:[#allocation15 + $0x464] ss:$16 sps:$4 sm:$0xff]  }
 0x773   :  { %v18634_v28 = vpack.c.bf16 %v8530_v1, %v8523_v12  ;;  %v8527_v3 = vmax.f32 %v8499_v6, 0.0  ;;  %v8522_v40 = vmax.f32 %v8494_v0, 0.0  ;;  %v8483_v56 = vadd.f32 %v18562_v21, %v8419_v26  ;;  %v15342_v26 = vld [vmem:[#allocation15 + $0x460] ss:$16 sps:$4 sm:$0xff]  }
 0x774   :  { %9958 = vmatprep.mubr.bf16.mxu1 %v18629_v34  ;;  %10025 = vmatpush1.bf16.msra.mxu1 %v15324_v29  ;;  %v8529_v27 = vmax.f32 %v8501_v57, 0.0  ;;  %v8490_v8 = vadd.f32 %v18562_v21, %v8426_v50  ;;  %v8484_v30 = vadd.f32 %v18565_v54, %v18584_v63  ;;  %v8491_v10 = vadd.f32 %v18565_v54, %v18587_v55  ;;  %v15341_v55 = vld [vmem:[#allocation15 + $0x684] ss:$16 sps:$4 sm:$0xff]   ;;  %v15339_v29 = vld [vmem:[#allocation15 + $0x680] ss:$16 sps:$4 sm:$0xff]  }
 0x775   :  { %10011 = vmatprep.mubr.bf16.mxu0 %v18634_v28  ;;  %10078 = vmatpush1.bf16.msra.mxu0 %v15327_v33  ;;  %v18644_v47 = vpack.c.bf16 %v8527_v3, %v8520_v9  ;;  %v8511_v60 = vmax.f32 %v8483_v56, 0.0  ;;  %v8434_v16 = vmul.f32 %v18568_v51, %v18542_v4  ;;  %v8505_v7 = vadd.f32 %v18565_v54, %v18590_v23  ;;  %v15336_v23 = vld [vmem:[#allocation15 + $0x480] ss:$16 sps:$4 sm:$0xff]   ;;  %v15350_v57 = vld [vmem:[#allocation15 + $0x444] ss:$16 sps:$4 sm:$0xff]  }
 0x776   :  { %10026 = vmatprep.subr.bf16.mxu1 %v15332_v58  ;;  %10079 = vmatprep.subr.bf16.mxu0 %v15335_v17  ;;  %v18650_v63 = vpack.c.bf16 %v8529_v27, %v8522_v40  ;;  %v8518_v41 = vmax.f32 %v8490_v8, 0.0  ;;  %v8512_v11 = vmax.f32 %v8484_v30, 0.0  ;;  %v8519_v36 = vmax.f32 %v8491_v10, 0.0  ;;  %v15345_v9 = vld [vmem:[#allocation15 + $0x660] ss:$16 sps:$4 sm:$0xff]  }
 0x777   :  { %9959 = vmatmul.mubr.bf16.gmra.mxu1 %v18644_v47  ;;  %v8498_v19 = vadd.f32 %v18565_v54, %v8434_v16  ;;  %v8533_v2 = vmax.f32 %v8505_v7, 0.0  ;;  %v8418_v13 = vmul.f32 %v18578_v32, %v18432_v39  ;;  %v8425_v4 = vmul.f32 %v18578_v32, %v18435_v20  ;;  %v15347_v20 = vld [vmem:[#allocation15 + $0x664] ss:$16 sps:$4 sm:$0xff]   ;;  %v15348_v50 = vld [vmem:[#allocation15 + $0x440] ss:$16 sps:$4 sm:$0xff]  }
 0x778   :  { %10012 = vmatmul.mubr.bf16.gmra.mxu0 %v18650_v63  ;;  %10027 = vmatpush1.bf16.msra.mxu1 %v15330_v48  ;;  %v18659_v51 = vpack.c.bf16 %v8518_v41, %v8511_v60  ;;  %v18661_v12 = vpack.c.bf16 %v8519_v36, %v8512_v11  ;;  %v8432_v15 = vmul.f32 %v18578_v32, %v18437_v22  ;;  %v19195_v33 = vmov 0   ;;  %v15351_v40 = vld [vmem:[#allocation15 + $0x640] ss:$16 sps:$4 sm:$0xff]   ;;  %v15356_v56 = vld [vmem:[#allocation15 + $0x424] ss:$16 sps:$4 sm:$0xff]  }
 0x779   :  { %10080 = vmatpush1.bf16.msra.mxu0 %v15333_v61  ;;  %10028 = vmatprep.subr.bf16.mxu1 %v15338_v59  ;;  %v8526_v54 = vmax.f32 %v8498_v19, 0.0  ;;  %v8482_v25 = vadd.f32 %v18581_v49, %v8418_v13  ;;  %v8489_v39 = vadd.f32 %v18581_v49, %v8425_v4  ;;  %v8439_v1 = vmul.f32 %v18578_v32, %v18439_v24  ;;  %v15353_v24 = vld [vmem:[#allocation15 + $0x644] ss:$16 sps:$4 sm:$0xff]   ;;  %v15354_v48 = vld [vmem:[#allocation15 + $0x420] ss:$16 sps:$4 sm:$0xff]  }
 0x77a   :  { %10054 = vmatprep.mubr.bf16.mxu1 %v18659_v51  ;;  %10081 = vmatprep.subr.bf16.mxu0 %v15341_v55  ;;  %v8496_v58 = vadd.f32 %v18581_v49, %v8432_v15  ;;  %v15357_v27 = vld [vmem:[#allocation15 + $0x620] ss:$16 sps:$4 sm:$0xff]   ;;  %v15362_v8 = vld [vmem:[#allocation15 + $0x404] ss:$16 sps:$4 sm:$0xff]   ;;  %v15371_v59 = vld [vmem:[#allocation15 + $0xec] ss:$16 sps:$4 sm:$0xff]  }
 0x77b   :  { %10107 = vmatprep.mubr.bf16.mxu0 %v19195_v33  ;;  %v18671_v6 = vpack.c.bf16 %v8533_v2, %v8526_v54  ;;  %v8510_v0 = vmax.f32 %v8482_v25, 0.0  ;;  %v8517_v14 = vmax.f32 %v8489_v39, 0.0  ;;  %v8503_v17 = vadd.f32 %v18581_v49, %v8439_v1  ;;  %v15359_v49 = vld [vmem:[#allocation15 + $0x624] ss:$16 sps:$4 sm:$0xff]   ;;  %v15360_v10 = vld [vmem:[#allocation15 + $0x400] ss:$16 sps:$4 sm:$0xff]  }
 0x77c   :  { %10029 = vmatpush1.bf16.msra.mxu1 %v15336_v23  ;;  %v8524_v32 = vmax.f32 %v8496_v58, 0.0  ;;  %v15365_v30 = vld [vmem:[#allocation15 + $0x604] ss:$16 sps:$4 sm:$0xff]   ;;  %v15363_v61 = vld [vmem:[#allocation15 + $0x600] ss:$16 sps:$4 sm:$0xff]  }
 0x77d   :  { %10082 = vmatpush1.bf16.msra.mxu0 %v15339_v29  ;;  %10030 = vmatprep.subr.bf16.mxu1 %v15344_v53  ;;  %v18675_v22 = vpack.c.bf16 %v8517_v14, %v8510_v0  ;;  %v8531_v18 = vmax.f32 %v8503_v17, 0.0  ;;  %v15368_v60 = vld [vmem:[#allocation15 + $0x5e4] ss:$16 sps:$4 sm:$0xff]   ;;  %v15366_v16 = vld [vmem:[#allocation15 + $0x5e0] ss:$16 sps:$4 sm:$0xff]   ;;  %v8433_v17 = vmul.f32 %v18575_v37, %v18450_v46 }
 0x77e   :  { %10083 = vmatprep.subr.bf16.mxu0 %v15347_v20  ;;  %v15369_v7 = vld [vmem:[#allocation15 + $0xe8] ss:$16 sps:$4 sm:$0xff]   ;;  %v15374_v41 = vld [vmem:[#allocation15 + $0x5c4] ss:$16 sps:$4 sm:$0xff]   ;;  %v15377_v55 = vld [vmem:[#allocation15 + $0xcc] ss:$16 sps:$4 sm:$0xff]  }
 0x77f   :  { %v18677_v3 = vpack.c.bf16 %v8531_v18, %v8524_v32  ;;  %v15372_v11 = vld [vmem:[#allocation15 + $0x5c0] ss:$16 sps:$4 sm:$0xff]   ;;  %v15375_v36 = vld [vmem:[#allocation15 + $0xc8] ss:$16 sps:$4 sm:$0xff]   ;;  %v15380_v19 = vld [vmem:[#allocation15 + $0x5a4] ss:$16 sps:$4 sm:$0xff]  }
 0x780   :  { %10031 = vmatpush1.bf16.msra.mxu1 %v15342_v26  ;;  %v15383_v2 = vld [vmem:[#allocation15 + $0xac] ss:$16 sps:$4 sm:$0xff]   ;;  %v15378_v13 = vld [vmem:[#allocation15 + $0x5a0] ss:$16 sps:$4 sm:$0xff]   ;;  %v15381_v4 = vld [vmem:[#allocation15 + $0xa8] ss:$16 sps:$4 sm:$0xff]  }
 0x781   :  { %10084 = vmatpush1.bf16.msra.mxu0 %v15345_v9  ;;  %10032 = vmatprep.subr.bf16.mxu1 %v15350_v57  ;;  %v15386_v23 = vld [vmem:[#allocation15 + $0x584] ss:$16 sps:$4 sm:$0xff]   ;;  %v15389_v29 = vld [vmem:[#allocation15 + $0x8c] ss:$16 sps:$4 sm:$0xff]   ;;  %v15384_v53 = vld [vmem:[#allocation15 + $0x580] ss:$16 sps:$4 sm:$0xff]   ;;  %v8440_v9 = vmul.f32 %v18575_v37, %v18452_v43 }
 0x782   :  { %10085 = vmatprep.subr.bf16.mxu0 %v15353_v24  ;;  %v15387_v54 = vld [vmem:[#allocation15 + $0x88] ss:$16 sps:$4 sm:$0xff]   ;;  %v15392_v25 = vld [vmem:[#allocation15 + $0x564] ss:$16 sps:$4 sm:$0xff]   ;;  %v15395_v39 = vld [vmem:[#allocation15 + $0x6c] ss:$16 sps:$4 sm:$0xff]  }
 0x783   :  { %v15390_v20 = vld [vmem:[#allocation15 + $0x560] ss:$16 sps:$4 sm:$0xff]   ;;  %v15393_v15 = vld [vmem:[#allocation15 + $0x68] ss:$16 sps:$4 sm:$0xff]   ;;  %v15398_v1 = vld [vmem:[#allocation15 + $0x544] ss:$16 sps:$4 sm:$0xff]  }
 0x784   :  { %10033 = vmatpush1.bf16.msra.mxu1 %v15348_v50  ;;  %v15401_v0 = vld [vmem:[#allocation15 + $0x4c] ss:$16 sps:$4 sm:$0xff]   ;;  %v15396_v14 = vld [vmem:[#allocation15 + $0x540] ss:$16 sps:$4 sm:$0xff]   ;;  %v15399_v26 = vld [vmem:[#allocation15 + $0x48] ss:$16 sps:$4 sm:$0xff]   ;;  %v8497_v50 = vadd.f32 %v18562_v21, %v8433_v17 }
 0x785   :  { %10086 = vmatpush1.bf16.msra.mxu0 %v15351_v40  ;;  %10034 = vmatprep.subr.bf16.mxu1 %v15356_v56  ;;  %v15404_v58 = vld [vmem:[#allocation15 + $0x524] ss:$16 sps:$4 sm:$0xff]   ;;  %v15402_v57 = vld [vmem:[#allocation15 + $0x520] ss:$16 sps:$4 sm:$0xff]   ;;  %v15405_v24 = vld [vmem:[#allocation15 + $0x28] ss:$16 sps:$4 sm:$0xff]   ;;  %v8504_v40 = vadd.f32 %v18562_v21, %v8440_v9 }
 0x786   :  { %10087 = vmatprep.subr.bf16.mxu0 %v15359_v49  ;;  %v15410_v32 = vld [vmem:[#allocation15 + $0x504] ss:$16 sps:$4 sm:$0xff]   ;;  %v15413_v18 = vld [vmem:[#allocation15 + $0xc] ss:$16 sps:$4 sm:$0xff]   ;;  %v15408_v56 = vld [vmem:[#allocation15 + $0x500] ss:$16 sps:$4 sm:$0xff]  }
 0x787   :  { %v15411_v46 = vld [vmem:[#allocation15 + $0x8] ss:$16 sps:$4 sm:$0xff]   ;;  %v15419_v49 = vld [vmem:[#allocation15 + $0x2ec] ss:$16 sps:$4 sm:$0xff]   ;;  %v8525_v37 = vmax.f32 %v8497_v50, 0.0 }
 0x788   :  { %10035 = vmatpush1.bf16.msra.mxu1 %v15354_v48  ;;  %v15416_v43 = vld [vmem:[#allocation15 + $0x1ec] ss:$16 sps:$4 sm:$0xff]   ;;  %v8532_v48 = vmax.f32 %v8504_v40, 0.0  ;;  %v15462_v17 = vld [vmem:[#allocation15 + $0x3e8] ss:$16 sps:$4 sm:$0xff]  }
 0x789   :  { %10088 = vmatpush1.bf16.msra.mxu0 %v15357_v27  ;;  %10036 = vmatprep.subr.bf16.mxu1 %v15362_v8  ;;  %v15417_v27 = vld [vmem:[#allocation15 + $0x2e8] ss:$16 sps:$4 sm:$0xff]   ;;  %v15422_v21 = vld [vmem:[#allocation15 + $0x1cc] ss:$16 sps:$4 sm:$0xff]  }
 0x78a   :  { %10089 = vmatprep.subr.bf16.mxu0 %v15365_v30  ;;  %v15414_v8 = vld [vmem:[#allocation15 + $0x1e8] ss:$16 sps:$4 sm:$0xff]   ;;  %v15425_v30 = vld [vmem:[#allocation15 + $0x2cc] ss:$16 sps:$4 sm:$0xff]  }
 0x78b   :  { %v15465_v9 = vld [vmem:[#allocation15 + $0x4e8] ss:$16 sps:$4 sm:$0xff]   ;;  %v15476_v50 = vld [vmem:[#allocation15 + $0x3ac] ss:$16 sps:$4 sm:$0xff]  }
 0x78c   :  { %10037 = vmatpush1.bf16.msra.mxu1 %v15360_v10  ;;  %v18689_v10 = vpack.c.bf16 %v8532_v48, %v8525_v37  ;;  %v15479_v40 = vld [vmem:[#allocation15 + $0x4ac] ss:$16 sps:$4 sm:$0xff]  }
 0x78d   :  { %10090 = vmatpush1.bf16.msra.mxu0 %v15363_v61  ;;  %10038 = vmatprep.subr.bf16.mxu1 %v15368_v60  ;;  %v15423_v61 = vld [vmem:[#allocation15 + $0x2c8] ss:$16 sps:$4 sm:$0xff]   ;;  %v15488_v37 = vld [vmem:[#allocation15 + $0x36c] ss:$16 sps:$4 sm:$0xff]  }
 0x78e   :  { %10128 = vmatprep.subr.bf16.mxu0 %v15371_v59  ;;  %v15420_v60 = vld [vmem:[#allocation15 + $0x1c8] ss:$16 sps:$4 sm:$0xff]   ;;  %v15431_v59 = vld [vmem:[#allocation15 + $0x2ac] ss:$16 sps:$4 sm:$0xff]  }
 0x78f   :  { %v15491_v48 = vld [vmem:[#allocation15 + $0x46c] ss:$16 sps:$4 sm:$0xff]  }
 0x790   :  { %10108 = vmatmul.mubr.bf16.vlgmr.msra.gmra.mxu0 %v18661_v12  ;;  %10039 = vmatpush2.bf16.msra.mxu1 %v15366_v16  ;;  %v15428_v16 = vld [vmem:[#allocation15 + $0x1ac] ss:$16 sps:$4 sm:$0xff]  }
 0x791   :  { %10129 = vmatpush1.bf16.msra.mxu0 %v15369_v7  ;;  %10040 = vmatprep.subr.bf16.mxu1 %v15374_v41  ;;  %v15429_v7 = vld [vmem:[#allocation15 + $0x2a8] ss:$16 sps:$4 sm:$0xff]  }
 0x792   :  { %10130 = vmatprep.subr.bf16.mxu0 %v15377_v55  ;;  %10117 = vmatprep.mubr.bf16.mxu0 %v19195_v33  ;;  %v15426_v41 = vld [vmem:[#allocation15 + $0x1a8] ss:$16 sps:$4 sm:$0xff]   ;;  %v15437_v55 = vld [vmem:[#allocation15 + $0x28c] ss:$16 sps:$4 sm:$0xff]  }
 0x794   :  { %10041 = vmatpush2.bf16.msra.mxu1 %v15372_v11  ;;  %v15434_v11 = vld [vmem:[#allocation15 + $0x18c] ss:$16 sps:$4 sm:$0xff]  }
 0x795   :  { %10131 = vmatpush1.bf16.msra.mxu0 %v15375_v36  ;;  %10042 = vmatprep.subr.bf16.mxu1 %v15380_v19  ;;  %v15435_v36 = vld [vmem:[#allocation15 + $0x288] ss:$16 sps:$4 sm:$0xff]  }
 0x796   :  { %10132 = vmatprep.subr.bf16.mxu0 %v15383_v2  ;;  %v15432_v19 = vld [vmem:[#allocation15 + $0x188] ss:$16 sps:$4 sm:$0xff]   ;;  %v15443_v2 = vld [vmem:[#allocation15 + $0x26c] ss:$16 sps:$4 sm:$0xff]  }
 0x798   :  { %10118 = vmatmul.mubr.bf16.gmra.mxu0 %v18671_v6  ;;  %10043 = vmatpush2.bf16.msra.mxu1 %v15378_v13  ;;  %v15440_v13 = vld [vmem:[#allocation15 + $0x16c] ss:$16 sps:$4 sm:$0xff]  }
 0x799   :  { %10133 = vmatpush1.bf16.msra.mxu0 %v15381_v4  ;;  %10160 = vmatprep.mubr.bf16.mxu0 %v18605_v62  ;;  %v15407_v62 = vld [vmem:[#allocation15 + $0x2c] ss:$16 sps:$4 sm:$0xff]   ;;  %v15441_v4 = vld [vmem:[#allocation15 + $0x268] ss:$16 sps:$4 sm:$0xff]  }
 0x79a   :  { %10044 = vmatprep.subr.bf16.mxu1 %v15386_v23  ;;  %10134 = vmatprep.subr.bf16.mxu0 %v15389_v29  ;;  %v15438_v23 = vld [vmem:[#allocation15 + $0x168] ss:$16 sps:$4 sm:$0xff]   ;;  %v15449_v29 = vld [vmem:[#allocation15 + $0x24c] ss:$16 sps:$4 sm:$0xff]  }
 0x79c   :  { %10045 = vmatpush2.bf16.msra.mxu1 %v15384_v53  ;;  %v15446_v53 = vld [vmem:[#allocation15 + $0x14c] ss:$16 sps:$4 sm:$0xff]  }
 0x79d   :  { %10135 = vmatpush1.bf16.msra.mxu0 %v15387_v54  ;;  %10046 = vmatprep.subr.bf16.mxu1 %v15392_v25  ;;  %v15447_v54 = vld [vmem:[#allocation15 + $0x248] ss:$16 sps:$4 sm:$0xff]  }
 0x79e   :  { %10136 = vmatprep.subr.bf16.mxu0 %v15395_v39  ;;  %v15444_v25 = vld [vmem:[#allocation15 + $0x148] ss:$16 sps:$4 sm:$0xff]   ;;  %v15452_v39 = vld [vmem:[#allocation15 + $0x12c] ss:$16 sps:$4 sm:$0xff]  }
 0x7a0   :  { %10047 = vmatpush2.bf16.msra.mxu1 %v15390_v20  ;;  %v15453_v20 = vld [vmem:[#allocation15 + $0x228] ss:$16 sps:$4 sm:$0xff]  }
 0x7a1   :  { %10137 = vmatpush1.bf16.msra.mxu0 %v15393_v15  ;;  %10048 = vmatprep.subr.bf16.mxu1 %v15398_v1  ;;  %v15450_v15 = vld [vmem:[#allocation15 + $0x128] ss:$16 sps:$4 sm:$0xff]   ;;  %v15461_v1 = vld [vmem:[#allocation15 + $0x20c] ss:$16 sps:$4 sm:$0xff]  }
 0x7a2   :  { %10138 = vmatprep.subr.bf16.mxu0 %v15401_v0  ;;  %v15458_v0 = vld [vmem:[#allocation15 + $0x10c] ss:$16 sps:$4 sm:$0xff]  }
 0x7a4   :  { %10049 = vmatpush2.bf16.msra.mxu1 %v15396_v14  ;;  %v15459_v14 = vld [vmem:[#allocation15 + $0x208] ss:$16 sps:$4 sm:$0xff]  }
 0x7a5   :  { %10139 = vmatpush1.bf16.msra.mxu0 %v15399_v26  ;;  %10050 = vmatprep.subr.bf16.mxu1 %v15404_v58  ;;  %v15456_v26 = vld [vmem:[#allocation15 + $0x108] ss:$16 sps:$4 sm:$0xff]   ;;  %v15464_v58 = vld [vmem:[#allocation15 + $0x3ec] ss:$16 sps:$4 sm:$0xff]  }
 0x7a6   :  { %10140 = vmatprep.subr.bf16.mxu0 %v15407_v62  ;;  %v15467_v62 = vld [vmem:[#allocation15 + $0x4ec] ss:$16 sps:$4 sm:$0xff]  }
 0x7a8   :  { %10051 = vmatpush2.bf16.msra.mxu1 %v15402_v57  ;;  %v15470_v57 = vld [vmem:[#allocation15 + $0x3cc] ss:$16 sps:$4 sm:$0xff]  }
 0x7a9   :  { %10141 = vmatpush1.bf16.msra.mxu0 %v15405_v24  ;;  %10052 = vmatprep.subr.bf16.mxu1 %v15410_v32  ;;  %v15473_v24 = vld [vmem:[#allocation15 + $0x4cc] ss:$16 sps:$4 sm:$0xff]   ;;  %v15468_v32 = vld [vmem:[#allocation15 + $0x3c8] ss:$16 sps:$4 sm:$0xff]  }
 0x7aa   :  { %10142 = vmatprep.subr.bf16.mxu0 %v15413_v18  ;;  %v15471_v18 = vld [vmem:[#allocation15 + $0x4c8] ss:$16 sps:$4 sm:$0xff]  }
 0x7ac   :  { %10053 = vmatpush2.bf16.msra.mxu1 %v15408_v56  ;;  %v15474_v56 = vld [vmem:[#allocation15 + $0x3a8] ss:$16 sps:$4 sm:$0xff]  }
 0x7ad   :  { %10143 = vmatpush1.bf16.msra.mxu0 %v15411_v46  ;;  %10181 = vmatprep.subr.bf16.mxu1 %v15419_v49  ;;  %v15477_v46 = vld [vmem:[#allocation15 + $0x4a8] ss:$16 sps:$4 sm:$0xff]   ;;  %v15482_v49 = vld [vmem:[#allocation15 + $0x38c] ss:$16 sps:$4 sm:$0xff]  }
 0x7ae   :  { %10144 = vmatprep.subr.bf16.mxu0 %v15416_v43  ;;  %v15485_v43 = vld [vmem:[#allocation15 + $0x48c] ss:$16 sps:$4 sm:$0xff]  }
 0x7af   :  { %10055 = vmatmul.mubr.bf16.vlgmr.msra.gmra.mxu1 %v18675_v22 }
 0x7b0   :  { %10064 = vmatprep.mubr.bf16.mxu1 %v18689_v10  ;;  %10182 = vmatpush1.bf16.msra.mxu1 %v15417_v27  ;;  %v15486_v27 = vld [vmem:[#allocation15 + $0x368] ss:$16 sps:$4 sm:$0xff]  }
 0x7b1   :  { %10145 = vmatpush2.bf16.msra.mxu0 %v15414_v8  ;;  %10183 = vmatprep.subr.bf16.mxu1 %v15425_v30  ;;  %v15489_v8 = vld [vmem:[#allocation15 + $0x468] ss:$16 sps:$4 sm:$0xff]   ;;  %v15494_v30 = vld [vmem:[#allocation15 + $0x34c] ss:$16 sps:$4 sm:$0xff]  }
 0x7b2   :  { %10146 = vmatprep.subr.bf16.mxu0 %v15422_v21  ;;  %v15497_v21 = vld [vmem:[#allocation15 + $0x44c] ss:$16 sps:$4 sm:$0xff]  }
 0x7b4   :  { %10184 = vmatpush1.bf16.msra.mxu1 %v15423_v61  ;;  %v15495_v61 = vld [vmem:[#allocation15 + $0x448] ss:$16 sps:$4 sm:$0xff]  }
 0x7b5   :  { %10147 = vmatpush2.bf16.msra.mxu0 %v15420_v60  ;;  %10185 = vmatprep.subr.bf16.mxu1 %v15431_v59  ;;  %v15500_v60 = vld [vmem:[#allocation15 + $0x32c] ss:$16 sps:$4 sm:$0xff]   ;;  %v15498_v59 = vld [vmem:[#allocation15 + $0x328] ss:$16 sps:$4 sm:$0xff]  }
 0x7b6   :  { %10148 = vmatprep.subr.bf16.mxu0 %v15428_v16  ;;  %v15501_v16 = vld [vmem:[#allocation15 + $0x428] ss:$16 sps:$4 sm:$0xff]  }
 0x7b7   :  { %10065 = vmatmul.mubr.bf16.gmra.mxu1 %v18677_v3 }
 0x7b8   :  { %10186 = vmatpush1.bf16.msra.mxu1 %v15429_v7  ;;  %10213 = vmatprep.mubr.bf16.mxu1 %v18607_v42  ;;  %v15455_v42 = vld [vmem:[#allocation15 + $0x22c] ss:$16 sps:$4 sm:$0xff]  }
 0x7b9   :  { %10149 = vmatpush2.bf16.msra.mxu0 %v15426_v41  ;;  %10187 = vmatprep.subr.bf16.mxu1 %v15437_v55  ;;  %v15506_v7 = vld [vmem:[#allocation15 + $0x30c] ss:$16 sps:$4 sm:$0xff]   ;;  %v15504_v55 = vld [vmem:[#allocation15 + $0x308] ss:$16 sps:$4 sm:$0xff]  }
 0x7ba   :  { %10150 = vmatprep.subr.bf16.mxu0 %v15434_v11  ;;  %v15509_v41 = vld [vmem:[#allocation15 + $0x40c] ss:$16 sps:$4 sm:$0xff]   ;;  %v15507_v11 = vld [vmem:[#allocation15 + $0x408] ss:$16 sps:$4 sm:$0xff]  }
 0x7bc   :  { %10188 = vmatpush1.bf16.msra.mxu1 %v15435_v36  ;;  %v15515_v36 = vld [vmem:[#allocation15 + $0x6ec] ss:$16 sps:$4 sm:$0xff]  }
 0x7bd   :  { %10151 = vmatpush2.bf16.msra.mxu0 %v15432_v19  ;;  %10189 = vmatprep.subr.bf16.mxu1 %v15443_v2  ;;  %v15512_v19 = vld [vmem:[#allocation15 + $0x5ec] ss:$16 sps:$4 sm:$0xff]   ;;  %v15513_v2 = vld [vmem:[#allocation15 + $0x6e8] ss:$16 sps:$4 sm:$0xff]  }
 0x7be   :  { %10152 = vmatprep.subr.bf16.mxu0 %v15440_v13  ;;  %v15510_v13 = vld [vmem:[#allocation15 + $0x5e8] ss:$16 sps:$4 sm:$0xff]  }
 0x7c0   :  { %10190 = vmatpush1.bf16.msra.mxu1 %v15441_v4  ;;  %v15521_v4 = vld [vmem:[#allocation15 + $0x6cc] ss:$16 sps:$4 sm:$0xff]  }
 0x7c1   :  { %10153 = vmatpush2.bf16.msra.mxu0 %v15438_v23  ;;  %10191 = vmatprep.subr.bf16.mxu1 %v15449_v29  ;;  %v15518_v23 = vld [vmem:[#allocation15 + $0x5cc] ss:$16 sps:$4 sm:$0xff]   ;;  %v15519_v29 = vld [vmem:[#allocation15 + $0x6c8] ss:$16 sps:$4 sm:$0xff]  }
 0x7c2   :  { %10154 = vmatprep.subr.bf16.mxu0 %v15446_v53  ;;  %v15516_v53 = vld [vmem:[#allocation15 + $0x5c8] ss:$16 sps:$4 sm:$0xff]  }
 0x7c4   :  { %10192 = vmatpush1.bf16.msra.mxu1 %v15447_v54  ;;  %v15527_v54 = vld [vmem:[#allocation15 + $0x6ac] ss:$16 sps:$4 sm:$0xff]  }
 0x7c5   :  { %10155 = vmatpush2.bf16.msra.mxu0 %v15444_v25  ;;  %10193 = vmatprep.subr.bf16.mxu1 %v15455_v42  ;;  %v15524_v25 = vld [vmem:[#allocation15 + $0x5ac] ss:$16 sps:$4 sm:$0xff]   ;;  %v15525_v42 = vld [vmem:[#allocation15 + $0x6a8] ss:$16 sps:$4 sm:$0xff]  }
 0x7c6   :  { %10156 = vmatprep.subr.bf16.mxu0 %v15452_v39  ;;  %v15522_v39 = vld [vmem:[#allocation15 + $0x5a8] ss:$16 sps:$4 sm:$0xff]  }
 0x7c8   :  { %10194 = vmatpush1.bf16.msra.mxu1 %v15453_v20  ;;  %v15533_v20 = vld [vmem:[#allocation15 + $0x68c] ss:$16 sps:$4 sm:$0xff]  }
 0x7c9   :  { %10157 = vmatpush2.bf16.msra.mxu0 %v15450_v15  ;;  %10195 = vmatprep.subr.bf16.mxu1 %v15461_v1  ;;  %v15530_v15 = vld [vmem:[#allocation15 + $0x58c] ss:$16 sps:$4 sm:$0xff]  }
 0x7ca   :  { %10158 = vmatprep.subr.bf16.mxu0 %v15458_v0  ;;  %v15539_v1 = vld [vmem:[#allocation15 + $0x66c] ss:$16 sps:$4 sm:$0xff]  }
 0x7cb   :  { %v15536_v0 = vld [vmem:[#allocation15 + $0x56c] ss:$16 sps:$4 sm:$0xff]  }
 0x7cc   :  { %10196 = vmatpush1.bf16.msra.mxu1 %v15459_v14  ;;  %v15537_v14 = vld [vmem:[#allocation15 + $0x668] ss:$16 sps:$4 sm:$0xff]  }
 0x7cd   :  { %10159 = vmatpush2.bf16.msra.mxu0 %v15456_v26  ;;  %10197 = vmatprep.subr.bf16.mxu1 %v15464_v58  ;;  %v15534_v26 = vld [vmem:[#allocation15 + $0x568] ss:$16 sps:$4 sm:$0xff]   ;;  %v15545_v58 = vld [vmem:[#allocation15 + $0x64c] ss:$16 sps:$4 sm:$0xff]  }
 0x7ce   :  { %10234 = vmatprep.subr.bf16.mxu0 %v15467_v62  ;;  %v15542_v62 = vld [vmem:[#allocation15 + $0x54c] ss:$16 sps:$4 sm:$0xff]  }
 0x7d0   :  { %10161 = vmatmul.mubr.bf16.vlgmr.msra.gmra.mxu0 %v18611_v5  ;;  %10198 = vmatpush2.bf16.msra.mxu1 %v15462_v17  ;;  %v15480_v5 = vld [vmem:[#allocation15 + $0x388] ss:$16 sps:$4 sm:$0xff]  }
 0x7d1   :  { %10170 = vmatprep.mubr.bf16.mxu0 %v18629_v34  ;;  %10235 = vmatpush1.bf16.msra.mxu0 %v15465_v9  ;;  %v15483_v34 = vld [vmem:[#allocation15 + $0x488] ss:$16 sps:$4 sm:$0xff]   ;;  %v15551_v9 = vld [vmem:[#allocation15 + $0x62c] ss:$16 sps:$4 sm:$0xff]  }
 0x7d2   :  { %10199 = vmatprep.subr.bf16.mxu1 %v15470_v57  ;;  %10236 = vmatprep.subr.bf16.mxu0 %v15473_v24  ;;  %v15540_v17 = vld [vmem:[#allocation15 + $0x548] ss:$16 sps:$4 sm:$0xff]   ;;  %v15548_v57 = vld [vmem:[#allocation15 + $0x52c] ss:$16 sps:$4 sm:$0xff]  }
 0x7d3   :  { %v15549_v24 = vld [vmem:[#allocation15 + $0x628] ss:$16 sps:$4 sm:$0xff]  }
 0x7d4   :  { %10200 = vmatpush2.bf16.msra.mxu1 %v15468_v32  ;;  %v15546_v32 = vld [vmem:[#allocation15 + $0x528] ss:$16 sps:$4 sm:$0xff]  }
 0x7d5   :  { %10237 = vmatpush1.bf16.msra.mxu0 %v15471_v18  ;;  %10201 = vmatprep.subr.bf16.mxu1 %v15476_v50  ;;  %v15557_v18 = vld [vmem:[#allocation15 + $0x60c] ss:$16 sps:$4 sm:$0xff]  }
 0x7d6   :  { %10238 = vmatprep.subr.bf16.mxu0 %v15479_v40  ;;  %v15554_v50 = vld [vmem:[#allocation15 + $0x50c] ss:$16 sps:$4 sm:$0xff]   ;;  %v15555_v40 = vld [vmem:[#allocation15 + $0x608] ss:$16 sps:$4 sm:$0xff]  }
 0x7d8   :  { %10171 = vmatmul.mubr.bf16.gmra.mxu0 %v18644_v47  ;;  %10202 = vmatpush2.bf16.msra.mxu1 %v15474_v56  ;;  %v15492_v47 = vld [vmem:[#allocation15 + $0x348] ss:$16 sps:$4 sm:$0xff]  }
 0x7d9   :  { %10239 = vmatpush1.bf16.msra.mxu0 %v15477_v46  ;;  %10266 = vmatprep.mubr.bf16.mxu0 %v18659_v51  ;;  %v15503_v51 = vld [vmem:[#allocation15 + $0x42c] ss:$16 sps:$4 sm:$0xff]   ;;  %v15552_v56 = vld [vmem:[#allocation15 + $0x508] ss:$16 sps:$4 sm:$0xff]  }
 0x7da   :  { %10203 = vmatprep.subr.bf16.mxu1 %v15482_v49  ;;  %10240 = vmatprep.subr.bf16.mxu0 %v15485_v43 }
 0x7dc   :  { %10204 = vmatpush2.bf16.msra.mxu1 %v15480_v5 }
 0x7dd   :  { %10241 = vmatpush1.bf16.msra.mxu0 %v15483_v34  ;;  %10205 = vmatprep.subr.bf16.mxu1 %v15488_v37 }
 0x7de   :  { %10242 = vmatprep.subr.bf16.mxu0 %v15491_v48 }
 0x7e0   :  { %10206 = vmatpush2.bf16.msra.mxu1 %v15486_v27  ;;  %v15566_v27 = vld [vmem:[#allocation21 + $0x64] ss:$8 sps:$4 sm:$0xff]  }
 0x7e1   :  { %10243 = vmatpush1.bf16.msra.mxu0 %v15489_v8  ;;  %10207 = vmatprep.subr.bf16.mxu1 %v15494_v30  ;;  %v15569_v8 = vld [vmem:[#allocation21 + $0x164] ss:$8 sps:$4 sm:$0xff]  }
 0x7e2   :  { %10244 = vmatprep.subr.bf16.mxu0 %v15497_v21  ;;  %v15564_v21 = vld [vmem:[#allocation21 + $0x60] ss:$8 sps:$4 sm:$0xff]  }
 0x7e4   :  { %10208 = vmatpush2.bf16.msra.mxu1 %v15492_v47  ;;  %v15567_v47 = vld [vmem:[#allocation21 + $0x160] ss:$8 sps:$4 sm:$0xff]  }
 0x7e5   :  { %10245 = vmatpush1.bf16.msra.mxu0 %v15495_v61  ;;  %10209 = vmatprep.subr.bf16.mxu1 %v15500_v60  ;;  %v15572_v60 = vld [vmem:[#allocation21 + $0x54] ss:$8 sps:$4 sm:$0xff]  }
 0x7e6   :  { %10246 = vmatprep.subr.bf16.mxu0 %v15503_v51  ;;  %v15575_v51 = vld [vmem:[#allocation21 + $0x154] ss:$8 sps:$4 sm:$0xff]  }
 0x7e8   :  { %10210 = vmatpush2.bf16.msra.mxu1 %v15498_v59 }
 0x7e9   :  { %10247 = vmatpush1.bf16.msra.mxu0 %v15501_v16  ;;  %10211 = vmatprep.subr.bf16.mxu1 %v15506_v7  ;;  %v15570_v16 = vld [vmem:[#allocation21 + $0x50] ss:$8 sps:$4 sm:$0xff]  }
 0x7ea   :  { %10248 = vmatprep.subr.bf16.mxu0 %v15509_v41  ;;  %v15573_v7 = vld [vmem:[#allocation21 + $0x150] ss:$8 sps:$4 sm:$0xff]  }
 0x7ec   :  { %10212 = vmatpush2.bf16.msra.mxu1 %v15504_v55  ;;  %v15578_v55 = vld [vmem:[#allocation21 + $0x44] ss:$8 sps:$4 sm:$0xff]  }
 0x7ed   :  { %10249 = vmatpush1.bf16.msra.mxu0 %v15507_v11  ;;  %10287 = vmatprep.subr.bf16.mxu1 %v15515_v36  ;;  %v15581_v11 = vld [vmem:[#allocation21 + $0x144] ss:$8 sps:$4 sm:$0xff]  }
 0x7ee   :  { %10250 = vmatprep.subr.bf16.mxu0 %v15512_v19  ;;  %v15576_v19 = vld [vmem:[#allocation21 + $0x40] ss:$8 sps:$4 sm:$0xff]  }
 0x7ef   :  { %10214 = vmatmul.mubr.bf16.vlgmr.msra.gmra.mxu1 %v18613_v44  ;;  %v15531_v44 = vld [vmem:[#allocation15 + $0x688] ss:$16 sps:$4 sm:$0xff]  }
 0x7f0   :  { %10223 = vmatprep.mubr.bf16.mxu1 %v18634_v28  ;;  %10288 = vmatpush1.bf16.msra.mxu1 %v15513_v2  ;;  %v15528_v28 = vld [vmem:[#allocation15 + $0x588] ss:$16 sps:$4 sm:$0xff]   ;;  %v15579_v2 = vld [vmem:[#allocation21 + $0x140] ss:$8 sps:$4 sm:$0xff]  }
 0x7f1   :  { %10251 = vmatpush2.bf16.msra.mxu0 %v15510_v13  ;;  %10289 = vmatprep.subr.bf16.mxu1 %v15521_v4 }
 0x7f2   :  { %10252 = vmatprep.subr.bf16.mxu0 %v15518_v23  ;;  %v15584_v23 = vld [vmem:[#allocation21 + $0x34] ss:$8 sps:$4 sm:$0xff]  }
 0x7f4   :  { %10290 = vmatpush1.bf16.msra.mxu1 %v15519_v29  ;;  %v15587_v29 = vld [vmem:[#allocation21 + $0x134] ss:$8 sps:$4 sm:$0xff]  }
 0x7f5   :  { %10253 = vmatpush2.bf16.msra.mxu0 %v15516_v53  ;;  %10291 = vmatprep.subr.bf16.mxu1 %v15527_v54  ;;  %v15582_v53 = vld [vmem:[#allocation21 + $0x30] ss:$8 sps:$4 sm:$0xff]  }
 0x7f6   :  { %10254 = vmatprep.subr.bf16.mxu0 %v15524_v25  ;;  %v15585_v54 = vld [vmem:[#allocation21 + $0x130] ss:$8 sps:$4 sm:$0xff]  }
 0x7f7   :  { %10224 = vmatmul.mubr.bf16.gmra.mxu1 %v18650_v63  ;;  %v15543_v63 = vld [vmem:[#allocation15 + $0x648] ss:$16 sps:$4 sm:$0xff]  }
 0x7f8   :  { %10292 = vmatpush1.bf16.msra.mxu1 %v15525_v42  ;;  %10319 = vmatprep.mubr.bf16.mxu1 %v19195_v33 }
 0x7f9   :  { %10255 = vmatpush2.bf16.msra.mxu0 %v15522_v39  ;;  %10293 = vmatprep.subr.bf16.mxu1 %v15533_v20  ;;  %v15590_v20 = vld [vmem:[#allocation21 + $0x24] ss:$8 sps:$4 sm:$0xff]  }
 0x7fa   :  { %10256 = vmatprep.subr.bf16.mxu0 %v15530_v15  ;;  %v15593_v15 = vld [vmem:[#allocation21 + $0x124] ss:$8 sps:$4 sm:$0xff]  }
 0x7fc   :  { %10294 = vmatpush1.bf16.msra.mxu1 %v15531_v44  ;;  %v15588_v44 = vld [vmem:[#allocation21 + $0x20] ss:$8 sps:$4 sm:$0xff]  }
 0x7fd   :  { %10257 = vmatpush2.bf16.msra.mxu0 %v15528_v28  ;;  %10295 = vmatprep.subr.bf16.mxu1 %v15539_v1  ;;  %v15591_v28 = vld [vmem:[#allocation21 + $0x120] ss:$8 sps:$4 sm:$0xff]  }
 0x7fe   :  { %10258 = vmatprep.subr.bf16.mxu0 %v15536_v0 }
 0x800   :  { %10296 = vmatpush1.bf16.msra.mxu1 %v15537_v14  ;;  %v15596_v14 = vld [vmem:[#allocation21 + $0x14] ss:$8 sps:$4 sm:$0xff]  }
 0x801   :  { %10259 = vmatpush2.bf16.msra.mxu0 %v15534_v26  ;;  %10297 = vmatprep.subr.bf16.mxu1 %v15545_v58  ;;  %v15599_v26 = vld [vmem:[#allocation21 + $0x114] ss:$8 sps:$4 sm:$0xff]   ;;  %v15594_v58 = vld [vmem:[#allocation21 + $0x10] ss:$8 sps:$4 sm:$0xff]  }
 0x802   :  { %10260 = vmatprep.subr.bf16.mxu0 %v15542_v62  ;;  %v15597_v62 = vld [vmem:[#allocation21 + $0x110] ss:$8 sps:$4 sm:$0xff]  }
 0x804   :  { %10298 = vmatpush1.bf16.msra.mxu1 %v15543_v63 }
 0x805   :  { %10261 = vmatpush2.bf16.msra.mxu0 %v15540_v17  ;;  %10299 = vmatprep.subr.bf16.mxu1 %v15551_v9  ;;  %v15602_v9 = vld [vmem:[#allocation21 + $0x4] ss:$8 sps:$4 sm:$0xff]  }
 0x806   :  { %10262 = vmatprep.subr.bf16.mxu0 %v15548_v57  ;;  %v15605_v57 = vld [vmem:[#allocation21 + $0x104] ss:$8 sps:$4 sm:$0xff]  }
 0x808   :  { %10300 = vmatpush1.bf16.msra.mxu1 %v15549_v24  ;;  %v15600_v24 = vld [vmem:[#allocation21] ss:$8 sps:$4 sm:$0xff]  }
 0x809   :  { %10263 = vmatpush2.bf16.msra.mxu0 %v15546_v32  ;;  %10301 = vmatprep.subr.bf16.mxu1 %v15557_v18  ;;  %v15603_v32 = vld [vmem:[#allocation21 + $0x100] ss:$8 sps:$4 sm:$0xff]  }
 0x80a   :  { %10264 = vmatprep.subr.bf16.mxu0 %v15554_v50  ;;  %v18755_v50 = vld [vmem:[#allocation16] sm:$0xf] }
 0x80c   :  { %10302 = vmatpush1.bf16.msra.mxu1 %v15555_v40 }
 0x80d   :  { %10265 = vmatpush2.bf16.msra.mxu0 %v15552_v56  ;;  %v15608_v56 = vld [vmem:[#allocation21 + $0xf4] ss:$8 sps:$4 sm:$0xff]  }
 0x80f   :  { %10320 = vmatmul.mubr.bf16.vlgmr.msra.gmra.mxu1 %v18661_v12 }
 0x810   :  { %10267 = vmatmul.mubr.bf16.vlgmr.msra.gmra.mxu0 %v18675_v22  ;;  %10329 = vmatprep.mubr.bf16.mxu1 %v19195_v33  ;;  %v15560_v33 = vld [vmem:[#allocation21 + $0x74] ss:$8 sps:$4 sm:$0xff]  }
 0x811   :  { %10276 = vmatprep.mubr.bf16.mxu0 %v18689_v10  ;;  %v15563_v10 = vld [vmem:[#allocation21 + $0x174] ss:$8 sps:$4 sm:$0xff]   ;;  %10986 = vmatprep.subr.bf16.mxu1 %v15560_v33 }
 0x812   :  { %11039 = vmatprep.subr.bf16.mxu0 %v15563_v10  ;;  %v15611_v33 = vld [vmem:[#allocation21 + $0x1f4] ss:$8 sps:$4 sm:$0xff]   ;;  %v8783_v10 = vrot.slane %v18755_v50, %v17081_v38 }
 0x817   :  { %10330 = vmatmul.mubr.bf16.gmra.mxu1 %v18671_v6  ;;  %v15558_v6 = vld [vmem:[#allocation21 + $0x70] ss:$8 sps:$4 sm:$0xff]  }
 0x818   :  { %10277 = vmatmul.mubr.bf16.gmra.mxu0 %v18677_v3  ;;  %v15561_v3 = vld [vmem:[#allocation21 + $0x170] ss:$8 sps:$4 sm:$0xff]   ;;  %10987 = vmatpush1.bf16.msra.mxu1 %v15558_v6 }
 0x819   :  { %11040 = vmatpush1.bf16.msra.mxu0 %v15561_v3  ;;  %10988 = vmatprep.subr.bf16.mxu1 %v15566_v27  ;;  %v15606_v6 = vld [vmem:[#allocation21 + $0xf0] ss:$8 sps:$4 sm:$0xff]   ;;  %v8779_v27 = vrot.slane %v18755_v50, %v17076_v35 }
 0x81a   :  { %11041 = vmatprep.subr.bf16.mxu0 %v15569_v8  ;;  %v15609_v3 = vld [vmem:[#allocation21 + $0x1f0] ss:$8 sps:$4 sm:$0xff]  }
 0x81c   :  { %10989 = vmatpush1.bf16.msra.mxu1 %v15564_v21 }
 0x81d   :  { %11042 = vmatpush1.bf16.msra.mxu0 %v15567_v47  ;;  %10990 = vmatprep.subr.bf16.mxu1 %v15572_v60  ;;  %v15614_v60 = vld [vmem:[#allocation21 + $0xe4] ss:$8 sps:$4 sm:$0xff]  }
 0x81e   :  { %11043 = vmatprep.subr.bf16.mxu0 %v15575_v51  ;;  %v15617_v51 = vld [vmem:[#allocation21 + $0x1e4] ss:$8 sps:$4 sm:$0xff]  }
 0x820   :  { %10991 = vmatpush1.bf16.msra.mxu1 %v15570_v16 }
 0x821   :  { %11044 = vmatpush1.bf16.msra.mxu0 %v15573_v7  ;;  %10992 = vmatprep.subr.bf16.mxu1 %v15578_v55  ;;  %v15612_v7 = vld [vmem:[#allocation21 + $0xe0] ss:$8 sps:$4 sm:$0xff]  }
 0x822   :  { %11045 = vmatprep.subr.bf16.mxu0 %v15581_v11  ;;  %v15615_v55 = vld [vmem:[#allocation21 + $0x1e0] ss:$8 sps:$4 sm:$0xff]  }
 0x824   :  { %10993 = vmatpush1.bf16.msra.mxu1 %v15576_v19 }
 0x825   :  { %11046 = vmatpush1.bf16.msra.mxu0 %v15579_v2  ;;  %10994 = vmatprep.subr.bf16.mxu1 %v15584_v23 }
 0x826   :  { %11047 = vmatprep.subr.bf16.mxu0 %v15587_v29 }
 0x828   :  { %10995 = vmatpush1.bf16.msra.mxu1 %v15582_v53 }
 0x829   :  { %11048 = vmatpush1.bf16.msra.mxu0 %v15585_v54  ;;  %10996 = vmatprep.subr.bf16.mxu1 %v15590_v20  ;;  %v15620_v20 = vld [vmem:[#allocation21 + $0xd4] ss:$8 sps:$4 sm:$0xff]  }
 0x82a   :  { %11049 = vmatprep.subr.bf16.mxu0 %v15593_v15  ;;  %v15621_v15 = vld [vmem:[#allocation21 + $0x1d0] ss:$8 sps:$4 sm:$0xff]  }
 0x82c   :  { %10997 = vmatpush1.bf16.msra.mxu1 %v15588_v44  ;;  %v15623_v44 = vld [vmem:[#allocation21 + $0x1d4] ss:$8 sps:$4 sm:$0xff]  }
 0x82d   :  { %11050 = vmatpush1.bf16.msra.mxu0 %v15591_v28  ;;  %10998 = vmatprep.subr.bf16.mxu1 %v15596_v14 }
 0x82e   :  { %11051 = vmatprep.subr.bf16.mxu0 %v15599_v26 }
 0x82f   :  { %v18709_v46 = vpop.f32.mrf.mxu1  ;;  %v18713_v43 = vpop.f32.mrf.mxu0 }
 0x830   :  { %10999 = vmatpush1.bf16.msra.mxu1 %v15594_v58  ;;  %v9951_v2 = vadd.f32 %v18709_v46, %v8779_v27 }
 0x831   :  { %v18711_v49 = vpop.f32.mrf.mxu1  ;;  %v18717_v34 = vpop.f32.mrf.mxu0  ;;  %11052 = vmatpush1.bf16.msra.mxu0 %v15597_v62  ;;  %11000 = vmatprep.subr.bf16.mxu1 %v15602_v9 }
 0x832   :  { %11053 = vmatprep.subr.bf16.mxu0 %v15605_v57  ;;  %v9953_v16 = vadd.f32 %v18711_v49, %v8783_v10  ;;  %v15618_v49 = vld [vmem:[#allocation21 + $0xd0] ss:$8 sps:$4 sm:$0xff]  }
 0x833   :  { %v18715_v5 = vpop.f32.mrf.mxu1  ;;  %v18721_v22 = vpop.f32.mrf.mxu0 }
 0x834   :  { %11001 = vmatpush1.bf16.msra.mxu1 %v15600_v24  ;;  %v9955_v11 = vadd.f32 %v18715_v5, %v8779_v27  ;;  %v10006_v5 = vadd.f32 %v18717_v34, %v9953_v16  ;;  %v15629_v34 = vld [vmem:[#allocation21 + $0x1c4] ss:$8 sps:$4 sm:$0xff]  }
 0x835   :  { %v18719_v12 = vpop.f32.mrf.mxu1  ;;  %v18725_v48 = vpop.f32.mrf.mxu0  ;;  %11054 = vmatpush1.bf16.msra.mxu0 %v15603_v32  ;;  %11002 = vmatprep.subr.bf16.mxu1 %v15608_v56 }
 0x836   :  { %11055 = vmatprep.subr.bf16.mxu0 %v15611_v33  ;;  %v9957_v21 = vadd.f32 %v18719_v12, %v8783_v10  ;;  %v10008_v46 = vadd.f32 %v18721_v22, %v9955_v11  ;;  %v15647_v11 = vld [vmem:[#allocation21 + $0x194] ss:$8 sps:$4 sm:$0xff]  }
 0x837   :  { %v18723_v37 = vpop.f32.mrf.mxu1 }
 0x838   :  { %v18729_v61 = vpop.f32.mrf.mxu0  ;;  %11003 = vmatpush2.bf16.msra.mxu1 %v15606_v6  ;;  %v9961_v12 = vadd.f32 %v18723_v37, %v8779_v27  ;;  %v10010_v29 = vadd.f32 %v18725_v48, %v9957_v21  ;;  %v15626_v48 = vld [vmem:[#allocation21 + $0xc4] ss:$8 sps:$4 sm:$0xff]   ;;  %v15630_v6 = vld [vmem:[#allocation21 + $0xb0] ss:$8 sps:$4 sm:$0xff]  }
 0x839   :  { %v18727_v30 = vpop.f32.mrf.mxu1  ;;  %11056 = vmatpush2.bf16.msra.mxu0 %v15609_v3  ;;  %11004 = vmatprep.subr.bf16.mxu1 %v15614_v60 }
 0x83a   :  { %v18733_v41 = vpop.f32.mrf.mxu0  ;;  %v9963_v19 = vadd.f32 %v18727_v30, %v8783_v10  ;;  %11057 = vmatprep.subr.bf16.mxu0 %v15617_v51  ;;  %v10014_v14 = vadd.f32 %v18729_v61, %v9961_v12  ;;  %v15635_v61 = vld [vmem:[#allocation21 + $0x1b4] ss:$8 sps:$4 sm:$0xff]  }
 0x83b   :  { %v18731_v59 = vpop.f32.mrf.mxu1 }
 0x83c   :  { %v18737_v13 = vpop.f32.mrf.mxu0  ;;  %11005 = vmatpush2.bf16.msra.mxu1 %v15612_v7  ;;  %v9965_v30 = vadd.f32 %v18731_v59, %v8779_v27  ;;  %v10016_v37 = vadd.f32 %v18733_v41, %v9963_v19  ;;  %v15624_v41 = vld [vmem:[#allocation21 + $0xc0] ss:$8 sps:$4 sm:$0xff]  }
 0x83d   :  { %v18735_v36 = vpop.f32.mrf.mxu1  ;;  %11058 = vmatpush2.bf16.msra.mxu0 %v15615_v55  ;;  %11006 = vmatprep.subr.bf16.mxu1 %v15620_v20  ;;  %v15639_v7 = vld [vmem:[#allocation21 + $0x1a0] ss:$8 sps:$4 sm:$0xff]   ;;  %v15653_v20 = vld [vmem:[#allocation21 + $0x184] ss:$8 sps:$4 sm:$0xff]  }
 0x83e   :  { %v18741_v25 = vpop.f32.mrf.mxu0  ;;  %v9967_v53 = vadd.f32 %v18735_v36, %v8783_v10  ;;  %v10004_v36 = vadd.f32 %v18713_v43, %v9951_v2  ;;  %11059 = vmatprep.subr.bf16.mxu0 %v15623_v44  ;;  %v10018_v57 = vadd.f32 %v18737_v13, %v9965_v30  ;;  %v15632_v43 = vld [vmem:[#allocation21 + $0xb4] ss:$8 sps:$4 sm:$0xff]   ;;  %v15648_v44 = vld [vmem:[#allocation21 + $0x80] ss:$8 sps:$4 sm:$0xff]  }
 0x840   :  { %v10020_v59 = vadd.f32 %v18741_v25, %v9967_v53  ;;  %11007 = vmatpush2.bf16.msra.mxu1 %v15618_v49  ;;  %v15645_v53 = vld [vmem:[#allocation21 + $0x190] ss:$8 sps:$4 sm:$0xff]   ;;  %v15650_v49 = vld [vmem:[#allocation21 + $0x84] ss:$8 sps:$4 sm:$0xff]  }
 0x841   :  { %11060 = vmatpush2.bf16.msra.mxu0 %v15621_v15  ;;  %11008 = vmatprep.subr.bf16.mxu1 %v15626_v48 }
 0x842   :  { %11061 = vmatprep.subr.bf16.mxu0 %v15629_v34 }
 0x844   :  { %11009 = vmatpush2.bf16.msra.mxu1 %v15624_v41 }
 0x845   :  { %11010 = vmatprep.subr.bf16.mxu1 %v15632_v43 }
 0x848   :  { %11011 = vmatpush2.bf16.msra.mxu1 %v15630_v6  ;;  %v8791_v6 = vrot.slane %v18755_v50, %v19159_v31 }
 0x850   :  { %v18745_v39 = vpop.f32.mrf.mxu0 }
 0x852   :  { %v18749_v0 = vpop.f32.mrf.mxu0 }
 0x854   :  { %v18751_v17 = vpop.f32.mrf.mxu0 }
 0x856   :  { %v18757_v40 = vpop.f32.mrf.mxu0 }
 0x858   :  { %v18764_v47 = vpop.f32.mrf.mxu0 }
 0x85a   :  { %v10121_v54 = vpop.f32.mrf.mxu0 }
 0x85c   :  { %v10123_v62 = vpop.f32.mrf.mxu0 }
 0x85e   :  { %v10125_v56 = vpop.f32.mrf.mxu0 }
 0x86f   :  { %v18739_v4 = vpop.f32.mrf.mxu1 }
 0x871   :  { %v18743_v42 = vpop.f32.mrf.mxu1 }
 0x872   :  { %v10059_v26 = vadd.f32 %v18743_v42, %v10006_v5  ;;  %v10057_v42 = vadd.f32 %v18739_v4, %v10004_v36  ;;  %v15633_v4 = vld [vmem:[#allocation21 + $0x1b0] ss:$8 sps:$4 sm:$0xff]  }
 0x873   :  { %v18747_v1 = vpop.f32.mrf.mxu1 }
 0x874   :  { %v10061_v9 = vadd.f32 %v18747_v1, %v10008_v46  ;;  %v18789_v1 = vadd.f32 %v18749_v0, %v10059_v26  ;;  %v18799_v0 = vadd.f32 %v18745_v39, %v10057_v42  ;;  %v15636_v39 = vld [vmem:[#allocation21 + $0xa0] ss:$8 sps:$4 sm:$0xff]  }
 0x875   :  { %v10062_v63 = vpop.f32.mrf.mxu1  ;;  %v15651_v46 = vld [vmem:[#allocation21 + $0x180] ss:$8 sps:$4 sm:$0xff]  }
 0x876   :  { %v10063_v28 = vadd.f32 %v10062_v63, %v10010_v29  ;;  %v15627_v63 = vld [vmem:[#allocation21 + $0x1c0] ss:$8 sps:$4 sm:$0xff]   ;;  %v18792_v33 = vadd.f32 %v18751_v17, %v10061_v9  ;;  %v15642_v29 = vld [vmem:[#allocation21 + $0x90] ss:$8 sps:$4 sm:$0xff]  }
 0x877   :  { %v18753_v18 = vpop.f32.mrf.mxu1  ;;  %11062 = vmatpush2.bf16.msra.mxu0 %v15627_v63 }
 0x878   :  { %v18785_v24 = vadd.f32 %v18757_v40, %v10063_v28  ;;  %v10067_v25 = vadd.f32 %v18753_v18, %v10014_v14  ;;  %11063 = vmatprep.subr.bf16.mxu0 %v15635_v61  ;;  %v15638_v18 = vld [vmem:[#allocation21 + $0xa4] ss:$8 sps:$4 sm:$0xff]   ;;  %v10340_v60 = vadd.f32 %v18792_v33, %v18799_v0 }
 0x879   :  { %v10068_v8 = vpop.f32.mrf.mxu1  ;;  %v15641_v40 = vld [vmem:[#allocation21 + $0x1a4] ss:$8 sps:$4 sm:$0xff]   ;;  %11012 = vmatprep.subr.bf16.mxu1 %v15638_v18 }
 0x87a   :  { %v10069_v22 = vadd.f32 %v10068_v8, %v10016_v37  ;;  %v10349_v17 = vadd.f32 %v18785_v24, %v18789_v1  ;;  %v18804_v27 = vadd.f32 %v18764_v47, %v10067_v25  ;;  %v15644_v47 = vld [vmem:[#allocation21 + $0x94] ss:$8 sps:$4 sm:$0xff]   ;;  %11013 = vmatpush2.bf16.msra.mxu1 %v15636_v39 }
 0x87b   :  { %v10070_v23 = vpop.f32.mrf.mxu1  ;;  %11064 = vmatpush2.bf16.msra.mxu0 %v15633_v4  ;;  %11014 = vmatprep.subr.bf16.mxu1 %v15644_v47 }
 0x87c   :  { %v18794_v13 = vadd.f32 %v10121_v54, %v10069_v22  ;;  %v10071_v10 = vadd.f32 %v10070_v23, %v10018_v57  ;;  %11065 = vmatprep.subr.bf16.mxu0 %v15641_v40  ;;  %v10341_v19 = vadd.f32 %v10340_v60, %v18804_v27 }
 0x87d   :  { %v10072_v58 = vpop.f32.mrf.mxu1 }
 0x87e   :  { %v10073_v32 = vadd.f32 %v10072_v58, %v10020_v59  ;;  %v10350_v51 = vadd.f32 %v10349_v17, %v18794_v13  ;;  %v18813_v16 = vadd.f32 %v10123_v62, %v10071_v10  ;;  %11015 = vmatpush2.bf16.msra.mxu1 %v15642_v29 }
 0x87f   :  { %11066 = vmatpush2.bf16.msra.mxu0 %v15639_v7  ;;  %11016 = vmatprep.subr.bf16.mxu1 %v15650_v49 }
 0x880   :  { %v18806_v8 = vadd.f32 %v10125_v56, %v10073_v32  ;;  %v10342_v23 = vadd.f32 %v10341_v19, %v18813_v16  ;;  %11067 = vmatprep.subr.bf16.mxu0 %v15647_v11  ;;  %v8787_v32 = vrot.slane %v18755_v50, %v19176_v52 }
 0x882   :  { %v10351_v2 = vadd.f32 %v10350_v51, %v18806_v8  ;;  %v10343_v15 = vrot.slane %v10342_v23, 4  ;;  %11017 = vmatpush2.bf16.msra.mxu1 %v15648_v44 }
 0x883   :  { %11068 = vmatpush2.bf16.msra.mxu0 %v15645_v53 }
 0x884   :  { %v10352_v5 = vrot.slane %v10351_v2, 4  ;;  %11069 = vmatprep.subr.bf16.mxu0 %v15653_v20  ;;  %v10344_v36 = vadd.f32 %v10343_v15, %v10342_v23 }
 0x886   :  { %v10353_v28 = vadd.f32 %v10352_v5, %v10351_v2  ;;  %v10345_v34 = vrot.slane %v10344_v36, 2 }
 0x887   :  { %11070 = vmatpush2.bf16.msra.mxu0 %v15651_v46 }
 0x888   :  { %v10354_v26 = vrot.slane %v10353_v28, 2  ;;  %v10346_v22 = vadd.f32 %v10345_v34, %v10344_v36 }
 0x88a   :  { %v10355_v62 = vadd.f32 %v10354_v26, %v10353_v28  ;;  %v10347_v43 = vrot.slane %v10346_v22, 1 }
 0x88c   :  { %v10356_v63 = vrot.slane %v10355_v62, 1  ;;  %v10348_v10 = vadd.f32 %v10347_v43, %v10346_v22 }
 0x88e   :  { %v10357_v42 = vadd.f32 %v10356_v63, %v10355_v62  ;;  %v10376_v11 = vmul.f32 0.03125, %v10348_v10 }
 0x890   :  { %v18808_v21 = vpop.f32.mrf.mxu0  ;;  %v10377_v17 = vmul.f32 0.03125, %v10357_v42  ;;  %v18834_v28 = vsub.f32 %v18799_v0, %v10376_v11 }
 0x891   :  { %v10163_v51 = vadd.f32 %v18808_v21, %v8787_v32 }
 0x892   :  { %v10164_v12 = vpop.f32.mrf.mxu0  ;;  %v18827_v50 = vsub.f32 %v18789_v1, %v10377_v17  ;;  %v18830_v5 = vsub.f32 %v18785_v24, %v10377_v17  ;;  %v18852_v43 = vsub.f32 %v18794_v13, %v10377_v17 }
 0x893   :  { %v10165_v19 = vadd.f32 %v10164_v12, %v8791_v6 }
 0x894   :  { %v10166_v30 = vpop.f32.mrf.mxu0 }
 0x895   :  { %v10167_v18 = vadd.f32 %v10166_v30, %v8787_v32 }
 0x896   :  { %v10168_v48 = vpop.f32.mrf.mxu0 }
 0x897   :  { %v10169_v39 = vadd.f32 %v10168_v48, %v8791_v6 }
 0x898   :  { %v10172_v58 = vpop.f32.mrf.mxu0 }
 0x899   :  { %v10173_v23 = vadd.f32 %v10172_v58, %v8787_v32 }
 0x89a   :  { %v10174_v9 = vpop.f32.mrf.mxu0 }
 0x89b   :  { %v10175_v30 = vadd.f32 %v10174_v9, %v8791_v6 }
 0x89c   :  { %v10176_v57 = vpop.f32.mrf.mxu0 }
 0x89e   :  { %v10178_v25 = vpop.f32.mrf.mxu0 }
 0x89f   :  { %v10179_v34 = vadd.f32 %v10178_v25, %v8791_v6 }
 0x8af   :  { %v18796_v3 = vpop.f32.mrf.mxu1 }
 0x8b0   :  { %v10216_v29 = vadd.f32 %v18796_v3, %v10163_v51  ;;  %v18837_v3 = vsub.f32 %v18792_v33, %v10376_v11 }
 0x8b1   :  { %v18815_v55 = vpop.f32.mrf.mxu1 }
 0x8b3   :  { %v10219_v54 = vpop.f32.mrf.mxu1 }
 0x8b4   :  { %v10220_v7 = vadd.f32 %v10219_v54, %v10167_v18  ;;  %v10218_v54 = vadd.f32 %v18815_v55, %v10165_v19  ;;  %v10397_v55 = vmul.f32 %v18827_v50, %v18827_v50 }
 0x8b5   :  { %v10221_v37 = vpop.f32.mrf.mxu1 }
 0x8b6   :  { %v10222_v53 = vadd.f32 %v10221_v37, %v10169_v39  ;;  %v10177_v37 = vadd.f32 %v10176_v57, %v8787_v32  ;;  %v10400_v57 = vmul.f32 %v18837_v3, %v18837_v3 }
 0x8b7   :  { %v10225_v14 = vpop.f32.mrf.mxu1 }
 0x8b8   :  { %v10226_v15 = vadd.f32 %v10225_v14, %v10173_v23  ;;  %v10401_v14 = vmul.f32 %v18830_v5, %v18830_v5 }
 0x8b9   :  { %v10227_v59 = vpop.f32.mrf.mxu1 }
 0x8ba   :  { %v10228_v48 = vadd.f32 %v10227_v59, %v10175_v30  ;;  %v10396_v59 = vmul.f32 %v18834_v28, %v18834_v28  ;;  %v10421_v18 = vadd.f32 %v10401_v14, %v10397_v55 }
 0x8bb   :  { %v10229_v41 = vpop.f32.mrf.mxu1 }
 0x8bc   :  { %v10230_v0 = vadd.f32 %v10229_v41, %v10177_v37  ;;  %v10412_v13 = vadd.f32 %v10400_v57, %v10396_v59 }
 0x8bd   :  { %v10231_v61 = vpop.f32.mrf.mxu1 }
 0x8be   :  { %v10232_v42 = vadd.f32 %v10231_v61, %v10179_v34  ;;  %v18860_v61 = vsub.f32 %v18806_v8, %v10377_v17 }
 0x8c0   :  { %v10409_v8 = vmul.f32 %v18860_v61, %v18860_v61 }
 0x8cf   :  { %v10321_v56 = vpop.f32.mrf.mxu1 }
 0x8d0   :  { %v10268_v4 = vpop.f32.mrf.mxu0 }
 0x8d1   :  { %v10323_v40 = vpop.f32.mrf.mxu1  ;;  %v10269_v44 = vadd.f32 %v10268_v4, %v10216_v29  ;;  %v18856_v4 = vsub.f32 %v18804_v27, %v10376_v11  ;;  %v18865_v27 = vsub.f32 %v18813_v16, %v10376_v11 }
 0x8d2   :  { %v10270_v60 = vpop.f32.mrf.mxu0 }
 0x8d3   :  { %v10325_v47 = vpop.f32.mrf.mxu1  ;;  %v10271_v36 = vadd.f32 %v10270_v60, %v10218_v54  ;;  %v10322_v9 = vadd.f32 %v10321_v56, %v10269_v44 }
 0x8d4   :  { %v10272_v2 = vpop.f32.mrf.mxu0 }
 0x8d5   :  { %v10273_v49 = vadd.f32 %v10272_v2, %v10220_v7  ;;  %v10327_v20 = vpop.f32.mrf.mxu1  ;;  %v10324_v25 = vadd.f32 %v10323_v40, %v10271_v36  ;;  %v10405_v40 = vmul.f32 %v18852_v43, %v18852_v43 }
 0x8d6   :  { %v10274_v21 = vpop.f32.mrf.mxu0 }
 0x8d7   :  { %v10275_v12 = vadd.f32 %v10274_v21, %v10222_v53  ;;  %v10331_v46 = vpop.f32.mrf.mxu1  ;;  %v18839_v24 = vadd.f32 %v10325_v47, %v10273_v49  ;;  %v10404_v53 = vmul.f32 %v18856_v4, %v18856_v4  ;;  %v10422_v49 = vadd.f32 %v10421_v18, %v10405_v40 }
 0x8d8   :  { %v10278_v1 = vpop.f32.mrf.mxu0 }
 0x8d9   :  { %v10279_v26 = vadd.f32 %v10278_v1, %v10226_v15  ;;  %v10333_v58 = vpop.f32.mrf.mxu1  ;;  %v18845_v33 = vadd.f32 %v10327_v20, %v10275_v12  ;;  %v10358_v41 = vadd.f32 %v18839_v24, %v10322_v9  ;;  %v10413_v21 = vadd.f32 %v10412_v13, %v10404_v53 }
 0x8da   :  { %v10280_v62 = vpop.f32.mrf.mxu0  ;;  %v10408_v15 = vmul.f32 %v18865_v27, %v18865_v27  ;;  %v10423_v44 = vadd.f32 %v10422_v49, %v10409_v8 }
 0x8db   :  { %v10332_v22 = vadd.f32 %v10331_v46, %v10279_v26  ;;  %v10281_v63 = vadd.f32 %v10280_v62, %v10228_v48  ;;  %v10335_v10 = vpop.f32.mrf.mxu1  ;;  %v10367_v51 = vadd.f32 %v18845_v33, %v10324_v25 }
 0x8dc   :  { %v10282_v32 = vpop.f32.mrf.mxu0  ;;  %v10414_v16 = vadd.f32 %v10413_v21, %v10408_v15  ;;  %v10424_v1 = vrot.slane %v10423_v44, 4 }
 0x8dd   :  { %v10334_v56 = vadd.f32 %v10333_v58, %v10281_v63  ;;  %v10283_v6 = vadd.f32 %v10282_v32, %v10230_v0  ;;  %v10359_v39 = vadd.f32 %v10358_v41, %v10332_v22  ;;  %v10337_v19 = vpop.f32.mrf.mxu1 }
 0x8de   :  { %v10284_v60 = vpop.f32.mrf.mxu0  ;;  %v10415_v26 = vrot.slane %v10414_v16, 4  ;;  %v10425_v14 = vadd.f32 %v10424_v1, %v10423_v44 }
 0x8df   :  { %v10336_v7 = vadd.f32 %v10335_v10, %v10283_v6  ;;  %v10285_v47 = vadd.f32 %v10284_v60, %v10232_v42  ;;  %v10368_v2 = vadd.f32 %v10367_v51, %v10334_v56 }
 0x8e0   :  { %v10416_v62 = vadd.f32 %v10415_v26, %v10414_v16  ;;  %v10426_v42 = vrot.slane %v10425_v14, 2 }
 0x8e1   :  { %v10360_v23 = vadd.f32 %v10359_v39, %v10336_v7  ;;  %v10338_v29 = vadd.f32 %v10337_v19, %v10285_v47 }
 0x8e2   :  { %v10417_v18 = vrot.slane %v10416_v62, 2  ;;  %v10427_v39 = vadd.f32 %v10426_v42, %v10425_v14 }
 0x8e3   :  { %v10361_v20 = vrot.slane %v10360_v23, 4  ;;  %v10369_v30 = vadd.f32 %v10368_v2, %v10338_v29 }
 0x8e5   :  { %v10362_v17 = vadd.f32 %v10361_v20, %v10360_v23  ;;  %v10370_v54 = vrot.slane %v10369_v30, 4  ;;  %v10428_v23 = vrot.slane %v10427_v39, 1 }
 0x8e7   :  { %v10363_v12 = vrot.slane %v10362_v17, 2  ;;  %v10371_v46 = vadd.f32 %v10370_v54, %v10369_v30  ;;  %v10429_v8 = vadd.f32 %v10428_v23, %v10427_v39 }
 0x8e9   :  { %v10364_v11 = vadd.f32 %v10363_v12, %v10362_v17  ;;  %v10372_v37 = vrot.slane %v10371_v46, 2 }
 0x8eb   :  { %v10365_v48 = vrot.slane %v10364_v11, 1  ;;  %v10373_v36 = vadd.f32 %v10372_v37, %v10371_v46  ;;  %v10449_v46 = vmul.f32 0.03125, %v10429_v8 }
 0x8ed   :  { %v10366_v58 = vadd.f32 %v10365_v48, %v10364_v11  ;;  %v10374_v55 = vrot.slane %v10373_v36, 1 }
 0x8ef   :  { %v10378_v34 = vmul.f32 0.03125, %v10366_v58  ;;  %v10375_v0 = vadd.f32 %v10374_v55, %v10373_v36  ;;  %v10453_v36 = vadd.f32 1e-05, %v10449_v46 }
 0x8f1   :  { %v18873_v63 = vsub.f32 %v10322_v9, %v10378_v34  ;;  %v18876_v59 = vsub.f32 %v18839_v24, %v10378_v34  ;;  %v18878_v57 = vsub.f32 %v10332_v22, %v10378_v34  ;;  %v10379_v32 = vmul.f32 0.03125, %v10375_v0 }
 0x8f2   :  { %v18880_v10 = vsub.f32 %v10336_v7, %v10378_v34  ;;  %15758 = vrsqrt.f32 %v10453_v36 }
 0x8f3   :  { %v10398_v41 = vmul.f32 %v18873_v63, %v18873_v63  ;;  %v10402_v6 = vmul.f32 %v18876_v59, %v18876_v59  ;;  %v18886_v60 = vsub.f32 %v10324_v25, %v10379_v32  ;;  %v18889_v9 = vsub.f32 %v18845_v33, %v10379_v32 }
 0x8f4   :  { %v18891_v24 = vsub.f32 %v10334_v56, %v10379_v32  ;;  %v10406_v22 = vmul.f32 %v18878_v57, %v18878_v57  ;;  %v10395_v7 = vsub.f32 %v10338_v29, %v10379_v32  ;;  %v10410_v25 = vmul.f32 %v18880_v10, %v18880_v10 }
 0x8f5   :  { %v10430_v51 = vadd.f32 %v10402_v6, %v10398_v41  ;;  %v10399_v47 = vmul.f32 %v18886_v60, %v18886_v60  ;;  %v10403_v13 = vmul.f32 %v18889_v9, %v18889_v9  ;;  %v10418_v33 = vadd.f32 %v10417_v18, %v10416_v62 }
 0x8f6   :  { %v10407_v56 = vmul.f32 %v18891_v24, %v18891_v24  ;;  %v10411_v53 = vmul.f32 %v10395_v7, %v10395_v7 }
 0x8f7   :  { %v10431_v40 = vadd.f32 %v10430_v51, %v10406_v22  ;;  %v10439_v19 = vadd.f32 %v10403_v13, %v10399_v47  ;;  %v10419_v20 = vrot.slane %v10418_v33, 1  ;;  %v8759_v13 = vld [vmem:[#allocation18] sm:$0xf] }
 0x8f9   :  { %v10432_v2 = vadd.f32 %v10431_v40, %v10410_v25  ;;  %v10440_v49 = vadd.f32 %v10439_v19, %v10407_v56  ;;  %v10420_v15 = vadd.f32 %v10419_v20, %v10418_v33  ;;  %v8760_v40 = vld [vmem:[#allocation19] sm:$0xf] }
 0x8fa   :  { %v10535_v56 = vrot.slane %v8760_v40, %v17081_v38  ;;  %v10543_v19 = vrot.slane %v8760_v40, %v19159_v31  ;;  %v10539_v20 = vrot.slane %v8760_v40, %v19176_v52 }
 0x8fb   :  { %v10433_v29 = vrot.slane %v10432_v2, 4  ;;  %v10441_v30 = vadd.f32 %v10440_v49, %v10411_v53  ;;  %v10448_v37 = vmul.f32 0.03125, %v10420_v15 }
 0x8fd   :  { %v10434_v21 = vadd.f32 %v10433_v29, %v10432_v2  ;;  %v10442_v17 = vrot.slane %v10441_v30, 4  ;;  %v10452_v55 = vadd.f32 1e-05, %v10448_v37  ;;  %v10531_v29 = vrot.slane %v8760_v40, %v17076_v35 }
 0x8ff   :  { %v10435_v54 = vrot.slane %v10434_v21, 2  ;;  %v10443_v44 = vadd.f32 %v10442_v17, %v10441_v30  ;;  %15760 = vrsqrt.f32 %v10452_v55  ;;  %v15759_v42 = vpop.eup %15758 }
 0x901   :  { %v10436_v12 = vadd.f32 %v10435_v54, %v10434_v21  ;;  %v10444_v16 = vrot.slane %v10443_v44, 2 }
 0x903   :  { %v10437_v11 = vrot.slane %v10436_v12, 1  ;;  %v10445_v1 = vadd.f32 %v10444_v16, %v10443_v44 }
 0x905   :  { %v10438_v48 = vadd.f32 %v10437_v11, %v10436_v12  ;;  %v10446_v26 = vrot.slane %v10445_v1, 1 }
 0x907   :  { %v10450_v58 = vmul.f32 0.03125, %v10438_v48  ;;  %v10447_v14 = vadd.f32 %v10446_v26, %v10445_v1 }
 0x909   :  { %v10454_v34 = vadd.f32 1e-05, %v10450_v58  ;;  %v10451_v0 = vmul.f32 0.03125, %v10447_v14 }
 0x90b   :  { %v10455_v62 = vadd.f32 1e-05, %v10451_v0  ;;  %15762 = vrsqrt.f32 %v10454_v34 }
 0x90c   :  { %v15761_v32 = vpop.eup %15760 }
 0x90d   :  { %15764 = vrsqrt.f32 %v10455_v62  ;;  %v10464_v6 = vcombine.low %v15761_v32, %v15759_v42 }
 0x90f   :  { %v10472_v51 = vrot.slane %v10464_v6, %v19170_v45 }
 0x918   :  { %v15763_v41 = vpop.eup %15762 }
 0x91a   :  { %v15765_v18 = vpop.eup %15764 }
 0x91b   :  { %v10465_v22 = vcombine.low %v15763_v41, %v15765_v18 }
 0x91d   :  { %v10479_v39 = vrot.slane %v10465_v22, %v19170_v45 }
 0x91f   :  { %v10480_v47 = vcombine.low %v10472_v51, %v10479_v39 }
 0x921   :  { %v10487_v25 = vrot.slane %v10480_v47, %v19170_v45 }
 0x923   :  { %v10489_v33 = vmul.f32 %v10487_v25, %v8759_v13 }
 0x925   :  { %v10494_v2 = vrot.slane %v10489_v33, %v17076_v35  ;;  %v10502_v23 = vrot.slane %v10489_v33, %v19176_v52  ;;  %v10506_v53 = vrot.slane %v10489_v33, %v19159_v31  ;;  %v10498_v49 = vrot.slane %v10489_v33, %v17081_v38 }
 0x927   :  { %v10526_v30 = vmul.f32 %v10506_v53, %v10395_v7  ;;  %v10512_v21 = vmul.f32 %v10498_v49, %v18827_v50  ;;  %v10516_v8 = vmul.f32 %v10498_v49, %v18830_v5  ;;  %v10514_v17 = vmul.f32 %v10506_v53, %v18886_v60 }
 0x928   :  { %v10518_v54 = vmul.f32 %v10506_v53, %v18889_v9  ;;  %v10511_v15 = vmul.f32 %v10494_v2, %v18834_v28  ;;  %v10515_v44 = vmul.f32 %v10494_v2, %v18837_v3  ;;  %v10513_v31 = vmul.f32 %v10502_v23, %v18873_v63 }
 0x929   :  { %v10549_v12 = vadd.f32 %v10535_v56, %v10512_v21  ;;  %v10553_v46 = vadd.f32 %v10535_v56, %v10516_v8  ;;  %v10551_v16 = vadd.f32 %v10543_v19, %v10514_v17  ;;  %v10517_v52 = vmul.f32 %v10502_v23, %v18876_v59  ;;  %v15660_v21 = vld [vmem:[#allocation27 + $0x60] sm:$0xff]   ;;  %v15662_v17 = vld [vmem:[#allocation27 + $0x58] sm:$0xff]  }
 0x92a   :  { %v10555_v7 = vadd.f32 %v10543_v19, %v10518_v54  ;;  %v10548_v11 = vadd.f32 %v10531_v29, %v10511_v15  ;;  %v10552_v50 = vadd.f32 %v10531_v29, %v10515_v44  ;;  %v10550_v37 = vadd.f32 %v10539_v20, %v10513_v31  ;;  %v15661_v8 = vld [vmem:[#allocation27 + $0x20] sm:$0xff]   ;;  %v15663_v54 = vld [vmem:[#allocation27 + $0x18] sm:$0xff]   ;;  %v15664_v15 = vld [vmem:[#allocation27 + $0x50] sm:$0xff]  }
 0x92b   :  { %v10565_v5 = vmax.f32 %v10549_v12, 0.0  ;;  %v10569_v1 = vmax.f32 %v10553_v46, 0.0  ;;  %v10567_v60 = vmax.f32 %v10551_v16, 0.0  ;;  %v10554_v48 = vadd.f32 %v10539_v20, %v10517_v52  ;;  %v15665_v44 = vld [vmem:[#allocation27 + $0x10] sm:$0xff]   ;;  %v15666_v31 = vld [vmem:[#allocation27 + $0x48] sm:$0xff]   ;;  %v15668_v46 = vld [vmem:[#allocation27 + $0x40] sm:$0xff]  }
 0x92c   :  { %v10571_v9 = vmax.f32 %v10555_v7, 0.0  ;;  %v10564_v36 = vmax.f32 %v10548_v11, 0.0  ;;  %v10568_v28 = vmax.f32 %v10552_v50, 0.0  ;;  %v10566_v26 = vmax.f32 %v10550_v37, 0.0  ;;  %v15667_v12 = vld [vmem:[#allocation27 + $0x8] sm:$0xff]   ;;  %v15669_v16 = vld [vmem:[#allocation27] sm:$0xff]  }
 0x92d   :  { %v10648_v3 = vpack.c.bf16 %v10569_v1, %v10565_v5  ;;  %v10570_v58 = vmax.f32 %v10554_v48, 0.0  ;;  %v10520_v63 = vmul.f32 %v10498_v49, %v18852_v43  ;;  %v10524_v55 = vmul.f32 %v10498_v49, %v18860_v61  ;;  %v10644_v52 = vld [vmem:[#allocation22] sm:$0x3] }
 0x92e   :  { %v10650_v14 = vpack.c.bf16 %v10571_v9, %v10567_v60  ;;  %v10647_v59 = vpack.c.bf16 %v10568_v28, %v10564_v36  ;;  %v10522_v34 = vmul.f32 %v10506_v53, %v18891_v24  ;;  %v10563_v0 = vadd.f32 %v10543_v19, %v10526_v30  ;;  %v15655_v30 = vld [vmem:[#allocation27 + $0x38] sm:$0xff]  }
 0x92f   :  { %11018 = vmatprep.mubr.bf16.mxu1 %v10648_v3  ;;  %v10649_v62 = vpack.c.bf16 %v10570_v58, %v10566_v26  ;;  %v10557_v42 = vadd.f32 %v10535_v56, %v10520_v63  ;;  %v10561_v32 = vadd.f32 %v10535_v56, %v10524_v55  ;;  %v10519_v41 = vmul.f32 %v10494_v2, %v18856_v4 }
 0x930   :  { %11071 = vmatprep.mubr.bf16.mxu0 %v10650_v14  ;;  %11019 = vmatmul.mubr.bf16.vlgmr.msra.gmra.mxu1 %v10647_v59  ;;  %v10559_v6 = vadd.f32 %v10543_v19, %v10522_v34  ;;  %v10579_v18 = vmax.f32 %v10563_v0, 0.0  ;;  %v10523_v22 = vmul.f32 %v10494_v2, %v18865_v27  ;;  %v10521_v43 = vmul.f32 %v10502_v23, %v18878_v57  ;;  %v15654_v2 = vld [vmem:[#allocation27 + $0x78] sm:$0xff]  }
 0x931   :  { %11072 = vmatmul.mubr.bf16.vlgmr.msra.gmra.mxu0 %v10649_v62  ;;  %v10573_v61 = vmax.f32 %v10557_v42, 0.0  ;;  %v10577_v51 = vmax.f32 %v10561_v32, 0.0  ;;  %v10556_v39 = vadd.f32 %v10531_v29, %v10519_v41  ;;  %v10525_v24 = vmul.f32 %v10502_v23, %v18880_v10  ;;  %13847 = vmatprep.subr.bf16.mxu1 %v15654_v2  ;;  %v15656_v10 = vld [vmem:[#allocation27 + $0x70] sm:$0xff]  }
 0x932   :  { %v10575_v47 = vmax.f32 %v10559_v6, 0.0  ;;  %v10560_v13 = vadd.f32 %v10531_v29, %v10523_v22  ;;  %v10558_v25 = vadd.f32 %v10539_v20, %v10521_v43  ;;  %13848 = vmatpush3.bf16.msra.mxu1 %v15655_v30  ;;  %v15657_v23 = vld [vmem:[#allocation27 + $0x30] sm:$0xff]   ;;  %v15658_v29 = vld [vmem:[#allocation27 + $0x68] sm:$0xff]   ;;  %v10659_v37 = vrot.slane %v10644_v52, %v17076_v35 }
 0x933   :  { %v10652_v40 = vpack.c.bf16 %v10577_v51, %v10573_v61  ;;  %v10572_v33 = vmax.f32 %v10556_v39, 0.0  ;;  %v10562_v4 = vadd.f32 %v10539_v20, %v10525_v24  ;;  %13849 = vmatprep.subr.bf16.mxu1 %v15656_v10  ;;  %v15659_v20 = vld [vmem:[#allocation27 + $0x28] sm:$0xff]   ;;  %v10663_v60 = vrot.slane %v10644_v52, %v17081_v38 }
 0x934   :  { %v10654_v56 = vpack.c.bf16 %v10579_v18, %v10575_v47  ;;  %v10576_v53 = vmax.f32 %v10560_v13, 0.0  ;;  %v10574_v19 = vmax.f32 %v10558_v25, 0.0 }
 0x935   :  { %11028 = vmatprep.mubr.bf16.mxu1 %v10652_v40  ;;  %v10578_v49 = vmax.f32 %v10562_v4, 0.0 }
 0x936   :  { %11081 = vmatprep.mubr.bf16.mxu0 %v10654_v56  ;;  %v10651_v27 = vpack.c.bf16 %v10576_v53, %v10572_v33  ;;  %13850 = vmatpush3.bf16.msra.mxu1 %v15657_v23 }
 0x937   :  { %v10653_v57 = vpack.c.bf16 %v10578_v49, %v10574_v19  ;;  %13851 = vmatprep.subr.bf16.mxu1 %v15658_v29 }
 0x938   :  { %11029 = vmatmul.mubr.bf16.gmra.mxu1 %v10651_v27 }
 0x939   :  { %11082 = vmatmul.mubr.bf16.gmra.mxu0 %v10653_v57 }
 0x93a   :  { %13852 = vmatpush3.bf16.msra.mxu1 %v15659_v20 }
 0x93b   :  { %13853 = vmatprep.subr.bf16.mxu1 %v15660_v21 }
 0x93e   :  { %13854 = vmatpush3.bf16.msra.mxu1 %v15661_v8 }
 0x93f   :  { %13855 = vmatprep.subr.bf16.mxu1 %v15662_v17 }
 0x942   :  { %13856 = vmatpush3.bf16.msra.mxu1 %v15663_v54 }
 0x943   :  { %13857 = vmatprep.subr.bf16.mxu1 %v15664_v15 }
 0x946   :  { %13858 = vmatpush3.bf16.msra.mxu1 %v15665_v44 }
 0x947   :  { %13859 = vmatprep.subr.bf16.mxu1 %v15666_v31 }
 0x94a   :  { %13860 = vmatpush3.bf16.msra.mxu1 %v15667_v12 }
 0x94b   :  { %13861 = vmatprep.subr.bf16.mxu1 %v15668_v46 }
 0x94e   :  { %13862 = vmatpush3.bf16.msra.mxu1 %v15669_v16 }
 0x9f0   :  { %v11020_v7 = vpop.f32.mrf.mxu1 }
 0x9f1   :  { %v11073_v11 = vpop.f32.mrf.mxu0  ;;  %v11021_v28 = vadd.f32 %v11020_v7, %v10659_v37 }
 0x9f2   :  { %v11022_v50 = vpop.f32.mrf.mxu1 }
 0x9f3   :  { %v11075_v5 = vpop.f32.mrf.mxu0  ;;  %v11023_v63 = vadd.f32 %v11022_v50, %v10663_v60  ;;  %v11074_v0 = vadd.f32 %v11073_v11, %v11021_v28 }
 0x9f4   :  { %v11024_v1 = vpop.f32.mrf.mxu1 }
 0x9f5   :  { %v11025_v48 = vadd.f32 %v11024_v1, %v10659_v37  ;;  %v11077_v9 = vpop.f32.mrf.mxu0  ;;  %v11076_v18 = vadd.f32 %v11075_v5, %v11023_v63 }
 0x9f6   :  { %v11026_v36 = vpop.f32.mrf.mxu1 }
 0x9f7   :  { %v11027_v26 = vadd.f32 %v11026_v36, %v10663_v60  ;;  %v11079_v3 = vpop.f32.mrf.mxu0  ;;  %v11078_v55 = vadd.f32 %v11077_v9, %v11025_v48 }
 0x9f8   :  { %v11030_v58 = vpop.f32.mrf.mxu1 }
 0x9f9   :  { %v11031_v14 = vadd.f32 %v11030_v58, %v10659_v37  ;;  %v11083_v59 = vpop.f32.mrf.mxu0  ;;  %v11080_v62 = vadd.f32 %v11079_v3, %v11027_v26  ;;  %v11092_v22 = vadd.f32 %v11078_v55, %v11074_v0 }
 0x9fa   :  { %v11032_v34 = vpop.f32.mrf.mxu1 }
 0x9fb   :  { %v11084_v42 = vadd.f32 %v11083_v59, %v11031_v14  ;;  %v11033_v32 = vadd.f32 %v11032_v34, %v10663_v60  ;;  %v11085_v41 = vpop.f32.mrf.mxu0  ;;  %v11101_v24 = vadd.f32 %v11080_v62, %v11076_v18 }
 0x9fc   :  { %v11034_v6 = vpop.f32.mrf.mxu1 }
 0x9fd   :  { %v11086_v43 = vadd.f32 %v11085_v41, %v11033_v32  ;;  %v11035_v61 = vadd.f32 %v11034_v6, %v10659_v37  ;;  %v11087_v51 = vpop.f32.mrf.mxu0  ;;  %v11093_v47 = vadd.f32 %v11092_v22, %v11084_v42 }
 0x9fe   :  { %v11036_v39 = vpop.f32.mrf.mxu1 }
 0x9ff   :  { %v11088_v13 = vadd.f32 %v11087_v51, %v11035_v61  ;;  %v11037_v25 = vadd.f32 %v11036_v39, %v10663_v60  ;;  %v11089_v40 = vpop.f32.mrf.mxu0  ;;  %v11102_v33 = vadd.f32 %v11101_v24, %v11086_v43 }
 0xa01   :  { %v11094_v4 = vadd.f32 %v11093_v47, %v11088_v13  ;;  %v11090_v56 = vadd.f32 %v11089_v40, %v11037_v25  ;;  %v10645_v40 = vld [vmem:[#allocation24] sm:$0x3] }
 0xa03   :  { %v11095_v53 = vrot.slane %v11094_v4, 4  ;;  %v11103_v19 = vadd.f32 %v11102_v33, %v11090_v56 }
 0xa05   :  { %v11096_v49 = vadd.f32 %v11095_v53, %v11094_v4  ;;  %v11104_v27 = vrot.slane %v11103_v19, 4  ;;  %v10646_v4 = vld [vmem:[#allocation25] sm:$0x3] }
 0xa07   :  { %v11097_v57 = vrot.slane %v11096_v49, 2  ;;  %v11105_v2 = vadd.f32 %v11104_v27, %v11103_v19  ;;  %v11198_v27 = vrot.slane %v10646_v4, %v17081_v38 }
 0xa09   :  { %v11098_v30 = vadd.f32 %v11097_v57, %v11096_v49  ;;  %v11106_v10 = vrot.slane %v11105_v2, 2  ;;  %v11194_v49 = vrot.slane %v10646_v4, %v17076_v35 }
 0xa0b   :  { %v11099_v23 = vrot.slane %v11098_v30, 1  ;;  %v11107_v29 = vadd.f32 %v11106_v10, %v11105_v2 }
 0xa0d   :  { %v11100_v20 = vadd.f32 %v11099_v23, %v11098_v30  ;;  %v11108_v21 = vrot.slane %v11107_v29, 1 }
 0xa0f   :  { %v11110_v8 = vmul.f32 0.03125, %v11100_v20  ;;  %v11109_v17 = vadd.f32 %v11108_v21, %v11107_v29 }
 0xa11   :  { %v11112_v54 = vsub.f32 %v11074_v0, %v11110_v8  ;;  %v11114_v15 = vsub.f32 %v11078_v55, %v11110_v8  ;;  %v18931_v44 = vsub.f32 %v11084_v42, %v11110_v8  ;;  %v11111_v31 = vmul.f32 0.03125, %v11109_v17 }
 0xa12   :  { %v11118_v12 = vsub.f32 %v11088_v13, %v11110_v8 }
 0xa13   :  { %v11120_v46 = vmul.f32 %v11112_v54, %v11112_v54  ;;  %v11122_v16 = vmul.f32 %v11114_v15, %v11114_v15  ;;  %v11113_v52 = vsub.f32 %v11076_v18, %v11111_v31  ;;  %v11115_v7 = vsub.f32 %v11080_v62, %v11111_v31 }
 0xa14   :  { %v11117_v11 = vsub.f32 %v11086_v43, %v11111_v31  ;;  %v11124_v50 = vmul.f32 %v18931_v44, %v18931_v44  ;;  %v11119_v5 = vsub.f32 %v11090_v56, %v11111_v31  ;;  %v11126_v48 = vmul.f32 %v11118_v12, %v11118_v12 }
 0xa15   :  { %v11128_v37 = vadd.f32 %v11122_v16, %v11120_v46  ;;  %v11121_v1 = vmul.f32 %v11113_v52, %v11113_v52  ;;  %v11123_v60 = vmul.f32 %v11115_v7, %v11115_v7 }
 0xa16   :  { %v11125_v36 = vmul.f32 %v11117_v11, %v11117_v11  ;;  %v11127_v3 = vmul.f32 %v11119_v5, %v11119_v5 }
 0xa17   :  { %v11129_v9 = vadd.f32 %v11128_v37, %v11124_v50  ;;  %v11137_v28 = vadd.f32 %v11123_v60, %v11121_v1 }
 0xa19   :  { %v11130_v26 = vadd.f32 %v11129_v9, %v11126_v48  ;;  %v11138_v58 = vadd.f32 %v11137_v28, %v11125_v36  ;;  %v15672_v28 = vld [vmem:[#allocation33 + $0x28] sm:$0xff]  }
 0xa1b   :  { %v11131_v63 = vrot.slane %v11130_v26, 4  ;;  %v11139_v55 = vadd.f32 %v11138_v58, %v11127_v3  ;;  %v15674_v3 = vld [vmem:[#allocation33 + $0x18] sm:$0xff]   ;;  %v15675_v58 = vld [vmem:[#allocation33 + $0x10] sm:$0xff]  }
 0xa1d   :  { %v11132_v14 = vadd.f32 %v11131_v63, %v11130_v26  ;;  %v11140_v59 = vrot.slane %v11139_v55, 4  ;;  %v15673_v26 = vld [vmem:[#allocation33 + $0x20] sm:$0xff]   ;;  %v15676_v63 = vld [vmem:[#allocation33 + $0x8] sm:$0xff]  }
 0xa1f   :  { %v11133_v34 = vrot.slane %v11132_v14, 2  ;;  %v11141_v0 = vadd.f32 %v11140_v59, %v11139_v55  ;;  %v15677_v55 = vld [vmem:[#allocation33] sm:$0xff]  }
 0xa21   :  { %v11134_v62 = vadd.f32 %v11133_v34, %v11132_v14  ;;  %v11142_v42 = vrot.slane %v11141_v0, 2 }
 0xa23   :  { %v11135_v32 = vrot.slane %v11134_v62, 1  ;;  %v11143_v41 = vadd.f32 %v11142_v42, %v11141_v0 }
 0xa25   :  { %v11136_v6 = vadd.f32 %v11135_v32, %v11134_v62  ;;  %v11144_v18 = vrot.slane %v11143_v41, 1 }
 0xa27   :  { %v11146_v22 = vmul.f32 0.03125, %v11136_v6  ;;  %v11145_v43 = vadd.f32 %v11144_v18, %v11143_v41  ;;  %v13589_v41 = vld [vmem:[#allocation28] ss:$0 sm:$0xff] }
 0xa29   :  { %v11148_v61 = vadd.f32 1e-05, %v11146_v22  ;;  %v11147_v51 = vmul.f32 0.03125, %v11145_v43 }
 0xa2b   :  { %v11149_v39 = vadd.f32 1e-05, %v11147_v51  ;;  %15766 = vrsqrt.f32 %v11148_v61 }
 0xa2d   :  { %15768 = vrsqrt.f32 %v11149_v39 }
 0xa38   :  { %v15767_v24 = vpop.eup %15766 }
 0xa3a   :  { %v15769_v47 = vpop.eup %15768 }
 0xa3b   :  { %v11154_v13 = vcombine.low %v15767_v24, %v15769_v47 }
 0xa3d   :  { %v11161_v25 = vrot.slane %v11154_v13, %v19170_v45 }
 0xa3f   :  { %v11168_v33 = vrot.slane %v11161_v25, %v19170_v45 }
 0xa41   :  { %v11170_v56 = vmul.f32 %v11168_v33, %v10645_v40 }
 0xa43   :  { %v11175_v53 = vrot.slane %v11170_v56, %v17076_v35  ;;  %v11179_v19 = vrot.slane %v11170_v56, %v17081_v38 }
 0xa45   :  { %v11189_v57 = vmul.f32 %v11179_v19, %v11119_v5  ;;  %v11183_v2 = vmul.f32 %v11179_v19, %v11113_v52  ;;  %v11185_v30 = vmul.f32 %v11179_v19, %v11115_v7  ;;  %v11182_v10 = vmul.f32 %v11175_v53, %v11112_v54 }
 0xa46   :  { %v11184_v23 = vmul.f32 %v11175_v53, %v11114_v15  ;;  %v11187_v29 = vmul.f32 %v11179_v19, %v11117_v11  ;;  %v11186_v46 = vmul.f32 %v11175_v53, %v18931_v44  ;;  %v11188_v16 = vmul.f32 %v11175_v53, %v11118_v12  ;;  %v15670_v44 = vld [vmem:[#allocation33 + $0x38] sm:$0xff]   ;;  %v15671_v12 = vld [vmem:[#allocation33 + $0x30] sm:$0xff]  }
 0xa47   :  { %v11202_v20 = vadd.f32 %v11198_v27, %v11183_v2  ;;  %v11204_v21 = vadd.f32 %v11198_v27, %v11185_v30  ;;  %v11201_v8 = vadd.f32 %v11194_v49, %v11182_v10  ;;  %v11208_v45 = vadd.f32 %v11198_v27, %v11189_v57  ;;  %13961 = vmatprep.subr.bf16.mxu0 %v15670_v44 }
 0xa48   :  { %v11203_v17 = vadd.f32 %v11194_v49, %v11184_v23  ;;  %v11206_v31 = vadd.f32 %v11198_v27, %v11187_v29  ;;  %v11205_v54 = vadd.f32 %v11194_v49, %v11186_v46  ;;  %v11207_v15 = vadd.f32 %v11194_v49, %v11188_v16  ;;  %13962 = vmatpush3.bf16.msra.mxu0 %v15670_v44 }
 0xa49   :  { %v11210_v50 = vmax.f32 %v11202_v20, 0.0  ;;  %v11212_v37 = vmax.f32 %v11204_v21, 0.0  ;;  %v11209_v1 = vmax.f32 %v11201_v8, 0.0  ;;  %v11216_v60 = vmax.f32 %v11208_v45, 0.0  ;;  %13963 = vmatprep.subr.bf16.mxu0 %v15671_v12 }
 0xa4a   :  { %v11211_v38 = vmax.f32 %v11203_v17, 0.0  ;;  %v11214_v5 = vmax.f32 %v11206_v31, 0.0  ;;  %v11213_v48 = vmax.f32 %v11205_v54, 0.0  ;;  %v11215_v9 = vmax.f32 %v11207_v15, 0.0  ;;  %v13606_v15 = vld [vmem:[#allocation31] ss:$0 sm:$0xff] }
 0xa4b   :  { %v11253_v52 = vpack.c.bf16 %v11212_v37, %v11210_v50 }
 0xa4c   :  { %v11252_v7 = vpack.c.bf16 %v11211_v38, %v11209_v1  ;;  %v11255_v11 = vpack.c.bf16 %v11216_v60, %v11214_v5  ;;  %v11254_v36 = vpack.c.bf16 %v11215_v9, %v11213_v48  ;;  %13964 = vmatpush3.bf16.msra.mxu0 %v15671_v12  ;;  %v11250_v5 = vld [vmem:[#allocation30] sm:$0x1] }
 0xa4d   :  { %11390 = vmatprep.mubr.bf16.mxu1 %v11253_v52  ;;  %13965 = vmatprep.subr.bf16.mxu0 %v15672_v28 }
 0xa4e   :  { %11391 = vmatmul.mubr.bf16.vlgmr.msra.gmra.mxu1 %v11252_v7 }
 0xa4f   :  { %11398 = vmatprep.mubr.bf16.mxu1 %v11255_v11 }
 0xa50   :  { %13966 = vmatpush3.bf16.msra.mxu0 %v15672_v28 }
 0xa51   :  { %13967 = vmatprep.subr.bf16.mxu0 %v15673_v26 }
 0xa54   :  { %13968 = vmatpush3.bf16.msra.mxu0 %v15673_v26 }
 0xa55   :  { %13969 = vmatprep.subr.bf16.mxu0 %v15674_v3 }
 0xa56   :  { %11399 = vmatmul.mubr.bf16.gmra.mxu1 %v11254_v36 }
 0xa58   :  { %13970 = vmatpush3.bf16.msra.mxu0 %v15674_v3 }
 0xa59   :  { %13971 = vmatprep.subr.bf16.mxu0 %v15675_v58 }
 0xa5c   :  { %13972 = vmatpush3.bf16.msra.mxu0 %v15675_v58 }
 0xa5d   :  { %13973 = vmatprep.subr.bf16.mxu0 %v15676_v63 }
 0xa60   :  { %13974 = vmatpush3.bf16.msra.mxu0 %v15676_v63 }
 0xa61   :  { %13975 = vmatprep.subr.bf16.mxu0 %v15677_v55 }
 0xa64   :  { %13976 = vmatpush3.bf16.msra.mxu0 %v15677_v55 }
 0xb0e   :  { %v13863_v14 = vpop.f32.mrf.mxu1 }
 0xb10   :  { %v13864_v59 = vpop.f32.mrf.mxu1 }
 0xb11   :  { %v13865_v32 = vadd.f32 %v13864_v59, %v13863_v14 }
 0xb12   :  { %v13866_v34 = vpop.f32.mrf.mxu1 }
 0xb13   :  { %v11393_v61 = vadd.f32 %v13865_v32, %v13589_v41  ;;  %v15682_v32 = vld [vmem:[#allocation39 + $0x18] sm:$0xff]  }
 0xb14   :  { %v13867_v0 = vpop.f32.mrf.mxu1 }
 0xb15   :  { %v13868_v62 = vadd.f32 %v13867_v0, %v13866_v34  ;;  %v15678_v34 = vld [vmem:[#allocation39 + $0x38] sm:$0xff]   ;;  %v15679_v0 = vld [vmem:[#allocation39 + $0x30] sm:$0xff]  }
 0xb16   :  { %v13869_v42 = vpop.f32.mrf.mxu1  ;;  %13981 = vmatprep.subr.bf16.mxu1 %v15678_v34 }
 0xb17   :  { %v11396_v18 = vadd.f32 %v13868_v62, %v13589_v41  ;;  %13982 = vmatpush3.bf16.msra.mxu1 %v15678_v34  ;;  %v15680_v62 = vld [vmem:[#allocation39 + $0x28] sm:$0xff]  }
 0xb18   :  { %v13870_v6 = vpop.f32.mrf.mxu1  ;;  %13983 = vmatprep.subr.bf16.mxu1 %v15679_v0 }
 0xb19   :  { %v13871_v22 = vadd.f32 %v13870_v6, %v13869_v42  ;;  %v11407_v24 = vadd.f32 %v11396_v18, %v11393_v61  ;;  %v15681_v42 = vld [vmem:[#allocation39 + $0x20] sm:$0xff]   ;;  %v15684_v6 = vld [vmem:[#allocation39 + $0x8] sm:$0xff]  }
 0xb1a   :  { %v13872_v43 = vpop.f32.mrf.mxu1 }
 0xb1b   :  { %v11401_v51 = vadd.f32 %v13871_v22, %v13589_v41  ;;  %13984 = vmatpush3.bf16.msra.mxu1 %v15679_v0 }
 0xb1c   :  { %v13873_v39 = vpop.f32.mrf.mxu1  ;;  %13985 = vmatprep.subr.bf16.mxu1 %v15680_v62 }
 0xb1d   :  { %v13874_v47 = vadd.f32 %v13873_v39, %v13872_v43  ;;  %v11408_v13 = vadd.f32 %v11407_v24, %v11401_v51 }
 0xb1f   :  { %v11404_v25 = vadd.f32 %v13874_v47, %v13589_v41  ;;  %13986 = vmatpush3.bf16.msra.mxu1 %v15680_v62  ;;  %v15683_v41 = vld [vmem:[#allocation39 + $0x10] sm:$0xff]   ;;  %v15686_v62 = vld [vmem:[#allocation45 + $0x38] sm:$0xff]  }
 0xb20   :  { %13987 = vmatprep.subr.bf16.mxu1 %v15681_v42  ;;  %14001 = vmatprep.subr.bf16.mxu0 %v15686_v62 }
 0xb21   :  { %v11409_v40 = vadd.f32 %v11408_v13, %v11404_v25 }
 0xb23   :  { %v11410_v33 = vrot.slane %v11409_v40, 4  ;;  %13988 = vmatpush3.bf16.msra.mxu1 %v15681_v42  ;;  %v15687_v42 = vld [vmem:[#allocation45 + $0x30] sm:$0xff]  }
 0xb24   :  { %13989 = vmatprep.subr.bf16.mxu1 %v15682_v32 }
 0xb25   :  { %v11411_v4 = vadd.f32 %v11410_v33, %v11409_v40 }
 0xb27   :  { %v11412_v56 = vrot.slane %v11411_v4, 2  ;;  %13990 = vmatpush3.bf16.msra.mxu1 %v15682_v32  ;;  %v15688_v32 = vld [vmem:[#allocation45 + $0x28] sm:$0xff]  }
 0xb28   :  { %13991 = vmatprep.subr.bf16.mxu1 %v15683_v41 }
 0xb29   :  { %v11413_v53 = vadd.f32 %v11412_v56, %v11411_v4 }
 0xb2b   :  { %v11414_v19 = vrot.slane %v11413_v53, 1  ;;  %13992 = vmatpush3.bf16.msra.mxu1 %v15683_v41  ;;  %v15689_v41 = vld [vmem:[#allocation45 + $0x20] sm:$0xff]  }
 0xb2c   :  { %13993 = vmatprep.subr.bf16.mxu1 %v15684_v6 }
 0xb2d   :  { %v11415_v49 = vadd.f32 %v11414_v19, %v11413_v53 }
 0xb2f   :  { %v11416_v27 = vmul.f32 0.03125, %v11415_v49  ;;  %13994 = vmatpush3.bf16.msra.mxu1 %v15684_v6  ;;  %v15690_v6 = vld [vmem:[#allocation45 + $0x18] sm:$0xff]  }
 0xb31   :  { %v11417_v57 = vsub.f32 %v11393_v61, %v11416_v27  ;;  %v11418_v2 = vsub.f32 %v11396_v18, %v11416_v27  ;;  %v11419_v30 = vsub.f32 %v11401_v51, %v11416_v27  ;;  %v11420_v10 = vsub.f32 %v11404_v25, %v11416_v27  ;;  %v15685_v18 = vld [vmem:[#allocation39] sm:$0xff]   ;;  %v13607_v51 = vld [vmem:[#allocation34] ss:$0 sm:$0xff] }
 0xb32   :  { %13995 = vmatprep.subr.bf16.mxu1 %v15685_v18 }
 0xb33   :  { %v11421_v23 = vmul.f32 %v11417_v57, %v11417_v57  ;;  %v11422_v29 = vmul.f32 %v11418_v2, %v11418_v2  ;;  %v11423_v20 = vmul.f32 %v11419_v30, %v11419_v30  ;;  %v11424_v8 = vmul.f32 %v11420_v10, %v11420_v10  ;;  %13996 = vmatpush3.bf16.msra.mxu1 %v15685_v18  ;;  %v15691_v18 = vld [vmem:[#allocation45 + $0x10] sm:$0xff]  }
 0xb35   :  { %v11425_v21 = vadd.f32 %v11422_v29, %v11421_v23 }
 0xb37   :  { %v11426_v45 = vadd.f32 %v11425_v21, %v11423_v20 }
 0xb39   :  { %v11427_v17 = vadd.f32 %v11426_v45, %v11424_v8 }
 0xb3b   :  { %v11428_v31 = vrot.slane %v11427_v17, 4 }
 0xb3d   :  { %v11429_v46 = vadd.f32 %v11428_v31, %v11427_v17 }
 0xb3f   :  { %v11430_v16 = vrot.slane %v11429_v46, 2 }
 0xb41   :  { %v11431_v50 = vadd.f32 %v11430_v16, %v11429_v46 }
 0xb43   :  { %v11432_v37 = vrot.slane %v11431_v50, 1 }
 0xb45   :  { %v11433_v1 = vadd.f32 %v11432_v37, %v11431_v50 }
 0xb47   :  { %v11434_v60 = vmul.f32 0.03125, %v11433_v1 }
 0xb49   :  { %v11435_v38 = vadd.f32 1e-05, %v11434_v60 }
 0xb4b   :  { %15770 = vrsqrt.f32 %v11435_v38 }
 0xb58   :  { %v15771_v52 = vpop.eup %15770 }
 0xb59   :  { %v11437_v7 = vmul.f32 %v15771_v52, %v11250_v5 }
 0xb5b   :  { %v11442_v54 = vrot.slane %v11437_v7, %v17076_v35  ;;  %v11479_v7 = vld [vmem:[#allocation36] sm:$0x1] }
 0xb5d   :  { %v11446_v11 = vmul.f32 %v11442_v54, %v11419_v30  ;;  %v11447_v48 = vmul.f32 %v11442_v54, %v11420_v10  ;;  %v11444_v9 = vmul.f32 %v11442_v54, %v11417_v57  ;;  %v11445_v36 = vmul.f32 %v11442_v54, %v11418_v2 }
 0xb5f   :  { %v11456_v44 = vadd.f32 %v13606_v15, %v11446_v11  ;;  %v11457_v12 = vadd.f32 %v13606_v15, %v11447_v48  ;;  %v11454_v28 = vadd.f32 %v13606_v15, %v11444_v9  ;;  %v11455_v26 = vadd.f32 %v13606_v15, %v11445_v36  ;;  %v13616_v48 = vld [vmem:[#allocation37] ss:$0 sm:$0xff] }
 0xb61   :  { %v11460_v3 = vmax.f32 %v11456_v44, 0.0  ;;  %v11461_v58 = vmax.f32 %v11457_v12, 0.0  ;;  %v11458_v63 = vmax.f32 %v11454_v28, 0.0  ;;  %v11459_v55 = vmax.f32 %v11455_v26, 0.0 }
 0xb63   :  { %v11482_v14 = vpack.c.bf16 %v11461_v58, %v11460_v3  ;;  %v11481_v59 = vpack.c.bf16 %v11459_v55, %v11458_v63 }
 0xb65   :  { %13977 = vmatprep.mubr.bf16.mxu0 %v11481_v59 }
 0xb66   :  { %13978 = vmatmul.mubr.bf16.vlgmr.msra.gmra.mxu0 %v11482_v14 }
 0xb67   :  { %14002 = vmatpush3.bf16.msra.mxu0 %v15686_v62 }
 0xb68   :  { %14003 = vmatprep.subr.bf16.mxu0 %v15687_v42 }
 0xb6b   :  { %14004 = vmatpush3.bf16.msra.mxu0 %v15687_v42 }
 0xb6c   :  { %14005 = vmatprep.subr.bf16.mxu0 %v15688_v32 }
 0xb6f   :  { %14006 = vmatpush3.bf16.msra.mxu0 %v15688_v32  ;;  %v15694_v32 = vld [vmem:[#allocation51 + $0x38] sm:$0xff]  }
 0xb70   :  { %14007 = vmatprep.subr.bf16.mxu0 %v15689_v41  ;;  %14021 = vmatprep.subr.bf16.mxu1 %v15694_v32 }
 0xb73   :  { %14008 = vmatpush3.bf16.msra.mxu0 %v15689_v41  ;;  %v15695_v41 = vld [vmem:[#allocation51 + $0x30] sm:$0xff]  }
 0xb74   :  { %14009 = vmatprep.subr.bf16.mxu0 %v15690_v6 }
 0xb77   :  { %14010 = vmatpush3.bf16.msra.mxu0 %v15690_v6  ;;  %v15696_v6 = vld [vmem:[#allocation51 + $0x28] sm:$0xff]  }
 0xb78   :  { %14011 = vmatprep.subr.bf16.mxu0 %v15691_v18 }
 0xb7b   :  { %14012 = vmatpush3.bf16.msra.mxu0 %v15691_v18  ;;  %v15697_v18 = vld [vmem:[#allocation51 + $0x20] sm:$0xff]  }
 0xc26   :  { %v13979_v22 = vpop.f32.mrf.mxu0 }
 0xc27   :  { %v11580_v13 = vadd.f32 %v13979_v22, %v13607_v51  ;;  %v15692_v22 = vld [vmem:[#allocation45 + $0x8] sm:$0xff]  }
 0xc28   :  { %v11571_v43 = vpop.f32.mrf.mxu0  ;;  %14013 = vmatprep.subr.bf16.mxu0 %v15692_v22 }
 0xc29   :  { %v11572_v24 = vadd.f32 %v13607_v51, %v11571_v43  ;;  %v15693_v43 = vld [vmem:[#allocation45] sm:$0xff]   ;;  %14014 = vmatpush3.bf16.msra.mxu0 %v15692_v22 }
 0xc2a   :  { %v13980_v61 = vpop.f32.mrf.mxu0  ;;  %14015 = vmatprep.subr.bf16.mxu0 %v15693_v43  ;;  %v15698_v22 = vld [vmem:[#allocation51 + $0x18] sm:$0xff]  }
 0xc2b   :  { %v11583_v40 = vadd.f32 %v13980_v61, %v13607_v51 }
 0xc2c   :  { %v11574_v39 = vpop.f32.mrf.mxu0 }
 0xc2d   :  { %v11575_v47 = vadd.f32 %v13607_v51, %v11574_v39  ;;  %14016 = vmatpush3.bf16.msra.mxu0 %v15693_v43  ;;  %v15699_v43 = vld [vmem:[#allocation51 + $0x10] sm:$0xff]  }
 0xc2f   :  { %v11586_v25 = vadd.f32 %v11575_v47, %v11572_v24 }
 0xc31   :  { %v11587_v33 = vadd.f32 %v11586_v25, %v11580_v13 }
 0xc33   :  { %v11588_v4 = vadd.f32 %v11587_v33, %v11583_v40 }
 0xc35   :  { %v11589_v56 = vrot.slane %v11588_v4, 4 }
 0xc37   :  { %v11590_v53 = vadd.f32 %v11589_v56, %v11588_v4 }
 0xc39   :  { %v11591_v19 = vrot.slane %v11590_v53, 2 }
 0xc3b   :  { %v11592_v49 = vadd.f32 %v11591_v19, %v11590_v53 }
 0xc3d   :  { %v11593_v27 = vrot.slane %v11592_v49, 1 }
 0xc3f   :  { %v11594_v57 = vadd.f32 %v11593_v27, %v11592_v49 }
 0xc41   :  { %v11595_v2 = vmul.f32 0.03125, %v11594_v57 }
 0xc43   :  { %v11596_v30 = vsub.f32 %v11572_v24, %v11595_v2  ;;  %v11597_v10 = vsub.f32 %v11575_v47, %v11595_v2  ;;  %v11598_v23 = vsub.f32 %v11580_v13, %v11595_v2  ;;  %v11599_v29 = vsub.f32 %v11583_v40, %v11595_v2  ;;  %v13617_v24 = vld [vmem:[#allocation40] ss:$0 sm:$0xff] }
 0xc45   :  { %v11600_v20 = vmul.f32 %v11596_v30, %v11596_v30  ;;  %v11601_v21 = vmul.f32 %v11597_v10, %v11597_v10  ;;  %v11602_v8 = vmul.f32 %v11598_v23, %v11598_v23  ;;  %v11603_v17 = vmul.f32 %v11599_v29, %v11599_v29 }
 0xc47   :  { %v11604_v45 = vadd.f32 %v11601_v21, %v11600_v20 }
 0xc49   :  { %v11605_v31 = vadd.f32 %v11604_v45, %v11602_v8 }
 0xc4b   :  { %v11606_v46 = vadd.f32 %v11605_v31, %v11603_v17 }
 0xc4d   :  { %v11607_v16 = vrot.slane %v11606_v46, 4 }
 0xc4f   :  { %v11608_v50 = vadd.f32 %v11607_v16, %v11606_v46 }
 0xc51   :  { %v11609_v37 = vrot.slane %v11608_v50, 2 }
 0xc53   :  { %v11610_v1 = vadd.f32 %v11609_v37, %v11608_v50 }
 0xc55   :  { %v11611_v60 = vrot.slane %v11610_v1, 1 }
 0xc57   :  { %v11612_v38 = vadd.f32 %v11611_v60, %v11610_v1 }
 0xc59   :  { %v11613_v5 = vmul.f32 0.03125, %v11612_v38 }
 0xc5b   :  { %v11614_v52 = vadd.f32 1e-05, %v11613_v5 }
 0xc5d   :  { %15772 = vrsqrt.f32 %v11614_v52 }
 0xc6a   :  { %v15773_v54 = vpop.eup %15772 }
 0xc6b   :  { %v11616_v15 = vmul.f32 %v15773_v54, %v11479_v7 }
 0xc6d   :  { %v11621_v11 = vrot.slane %v11616_v15, %v17076_v35  ;;  %v11658_v15 = vld [vmem:[#allocation42] sm:$0x1] }
 0xc6f   :  { %v11624_v9 = vmul.f32 %v11621_v11, %v11597_v10  ;;  %v11625_v36 = vmul.f32 %v11621_v11, %v11598_v23  ;;  %v11623_v44 = vmul.f32 %v11621_v11, %v11596_v30  ;;  %v11626_v12 = vmul.f32 %v11621_v11, %v11599_v29 }
 0xc71   :  { %v11633_v28 = vadd.f32 %v13616_v48, %v11623_v44  ;;  %v11634_v26 = vadd.f32 %v13616_v48, %v11624_v9  ;;  %v11635_v3 = vadd.f32 %v13616_v48, %v11625_v36  ;;  %v11636_v58 = vadd.f32 %v13616_v48, %v11626_v12  ;;  %v13626_v36 = vld [vmem:[#allocation43] ss:$0 sm:$0xff] }
 0xc73   :  { %v11637_v63 = vmax.f32 %v11633_v28, 0.0  ;;  %v11638_v55 = vmax.f32 %v11634_v26, 0.0  ;;  %v11639_v14 = vmax.f32 %v11635_v3, 0.0  ;;  %v11640_v59 = vmax.f32 %v11636_v58, 0.0 }
 0xc75   :  { %v11660_v34 = vpack.c.bf16 %v11638_v55, %v11637_v63  ;;  %v11661_v0 = vpack.c.bf16 %v11640_v59, %v11639_v14 }
 0xc77   :  { %13997 = vmatprep.mubr.bf16.mxu1 %v11660_v34 }
 0xc78   :  { %13998 = vmatmul.mubr.bf16.vlgmr.msra.gmra.mxu1 %v11661_v0 }
 0xc79   :  { %14022 = vmatpush3.bf16.msra.mxu1 %v15694_v32 }
 0xc7a   :  { %14023 = vmatprep.subr.bf16.mxu1 %v15695_v41 }
 0xc7d   :  { %14024 = vmatpush3.bf16.msra.mxu1 %v15695_v41 }
 0xc7e   :  { %14025 = vmatprep.subr.bf16.mxu1 %v15696_v6 }
 0xc81   :  { %14026 = vmatpush3.bf16.msra.mxu1 %v15696_v6  ;;  %v15702_v6 = vld [vmem:[#allocation57 + $0x38] sm:$0xff]  }
 0xc82   :  { %14027 = vmatprep.subr.bf16.mxu1 %v15697_v18  ;;  %14041 = vmatprep.subr.bf16.mxu0 %v15702_v6 }
 0xc85   :  { %14028 = vmatpush3.bf16.msra.mxu1 %v15697_v18  ;;  %v15703_v18 = vld [vmem:[#allocation57 + $0x30] sm:$0xff]  }
 0xc86   :  { %14029 = vmatprep.subr.bf16.mxu1 %v15698_v22 }
 0xc89   :  { %14030 = vmatpush3.bf16.msra.mxu1 %v15698_v22  ;;  %v15704_v22 = vld [vmem:[#allocation57 + $0x28] sm:$0xff]  }
 0xc8a   :  { %14031 = vmatprep.subr.bf16.mxu1 %v15699_v43 }
 0xc8d   :  { %14032 = vmatpush3.bf16.msra.mxu1 %v15699_v43  ;;  %v15705_v43 = vld [vmem:[#allocation57 + $0x20] sm:$0xff]  }
 0xd38   :  { %v13999_v61 = vpop.f32.mrf.mxu1 }
 0xd39   :  { %v11759_v40 = vadd.f32 %v13999_v61, %v13617_v24  ;;  %v15700_v61 = vld [vmem:[#allocation51 + $0x8] sm:$0xff]  }
 0xd3a   :  { %v11750_v51 = vpop.f32.mrf.mxu1  ;;  %14033 = vmatprep.subr.bf16.mxu1 %v15700_v61 }
 0xd3b   :  { %v11751_v13 = vadd.f32 %v13617_v24, %v11750_v51  ;;  %v15701_v51 = vld [vmem:[#allocation51] sm:$0xff]   ;;  %14034 = vmatpush3.bf16.msra.mxu1 %v15700_v61 }
 0xd3c   :  { %v14000_v39 = vpop.f32.mrf.mxu1  ;;  %14035 = vmatprep.subr.bf16.mxu1 %v15701_v51  ;;  %v15706_v61 = vld [vmem:[#allocation57 + $0x18] sm:$0xff]  }
 0xd3d   :  { %v11762_v4 = vadd.f32 %v14000_v39, %v13617_v24 }
 0xd3e   :  { %v11753_v47 = vpop.f32.mrf.mxu1 }
 0xd3f   :  { %v11754_v25 = vadd.f32 %v13617_v24, %v11753_v47  ;;  %14036 = vmatpush3.bf16.msra.mxu1 %v15701_v51  ;;  %v15707_v51 = vld [vmem:[#allocation57 + $0x10] sm:$0xff]  }
 0xd41   :  { %v11765_v33 = vadd.f32 %v11754_v25, %v11751_v13 }
 0xd43   :  { %v11766_v56 = vadd.f32 %v11765_v33, %v11759_v40 }
 0xd45   :  { %v11767_v53 = vadd.f32 %v11766_v56, %v11762_v4 }
 0xd47   :  { %v11768_v19 = vrot.slane %v11767_v53, 4 }
 0xd49   :  { %v11769_v49 = vadd.f32 %v11768_v19, %v11767_v53 }
 0xd4b   :  { %v11770_v27 = vrot.slane %v11769_v49, 2 }
 0xd4d   :  { %v11771_v57 = vadd.f32 %v11770_v27, %v11769_v49 }
 0xd4f   :  { %v11772_v2 = vrot.slane %v11771_v57, 1 }
 0xd51   :  { %v11773_v30 = vadd.f32 %v11772_v2, %v11771_v57 }
 0xd53   :  { %v11774_v10 = vmul.f32 0.03125, %v11773_v30 }
 0xd55   :  { %v11775_v23 = vsub.f32 %v11751_v13, %v11774_v10  ;;  %v11776_v29 = vsub.f32 %v11754_v25, %v11774_v10  ;;  %v11777_v20 = vsub.f32 %v11759_v40, %v11774_v10  ;;  %v11778_v21 = vsub.f32 %v11762_v4, %v11774_v10  ;;  %v13627_v13 = vld [vmem:[#allocation46] ss:$0 sm:$0xff] }
 0xd57   :  { %v11779_v8 = vmul.f32 %v11775_v23, %v11775_v23  ;;  %v11780_v45 = vmul.f32 %v11776_v29, %v11776_v29  ;;  %v11781_v17 = vmul.f32 %v11777_v20, %v11777_v20  ;;  %v11782_v46 = vmul.f32 %v11778_v21, %v11778_v21 }
 0xd59   :  { %v11783_v31 = vadd.f32 %v11780_v45, %v11779_v8 }
 0xd5b   :  { %v11784_v16 = vadd.f32 %v11783_v31, %v11781_v17 }
 0xd5d   :  { %v11785_v50 = vadd.f32 %v11784_v16, %v11782_v46 }
 0xd5f   :  { %v11786_v37 = vrot.slane %v11785_v50, 4 }
 0xd61   :  { %v11787_v1 = vadd.f32 %v11786_v37, %v11785_v50 }
 0xd63   :  { %v11788_v60 = vrot.slane %v11787_v1, 2 }
 0xd65   :  { %v11789_v38 = vadd.f32 %v11788_v60, %v11787_v1 }
 0xd67   :  { %v11790_v5 = vrot.slane %v11789_v38, 1 }
 0xd69   :  { %v11791_v52 = vadd.f32 %v11790_v5, %v11789_v38 }
 0xd6b   :  { %v11792_v7 = vmul.f32 0.03125, %v11791_v52 }
 0xd6d   :  { %v11793_v54 = vadd.f32 1e-05, %v11792_v7 }
 0xd6f   :  { %15774 = vrsqrt.f32 %v11793_v54 }
 0xd7c   :  { %v15775_v11 = vpop.eup %15774 }
 0xd7d   :  { %v11795_v48 = vmul.f32 %v15775_v11, %v11658_v15 }
 0xd7f   :  { %v11800_v9 = vrot.slane %v11795_v48, %v17076_v35  ;;  %v11837_v48 = vld [vmem:[#allocation48] sm:$0x1] }
 0xd81   :  { %v11803_v44 = vmul.f32 %v11800_v9, %v11776_v29  ;;  %v11804_v12 = vmul.f32 %v11800_v9, %v11777_v20  ;;  %v11802_v28 = vmul.f32 %v11800_v9, %v11775_v23  ;;  %v11805_v26 = vmul.f32 %v11800_v9, %v11778_v21 }
 0xd83   :  { %v11812_v3 = vadd.f32 %v13626_v36, %v11802_v28  ;;  %v11813_v58 = vadd.f32 %v13626_v36, %v11803_v44  ;;  %v11814_v63 = vadd.f32 %v13626_v36, %v11804_v12  ;;  %v11815_v55 = vadd.f32 %v13626_v36, %v11805_v26  ;;  %v13636_v12 = vld [vmem:[#allocation49] ss:$0 sm:$0xff] }
 0xd85   :  { %v11816_v14 = vmax.f32 %v11812_v3, 0.0  ;;  %v11817_v59 = vmax.f32 %v11813_v58, 0.0  ;;  %v11818_v34 = vmax.f32 %v11814_v63, 0.0  ;;  %v11819_v0 = vmax.f32 %v11815_v55, 0.0 }
 0xd87   :  { %v11839_v62 = vpack.c.bf16 %v11817_v59, %v11816_v14  ;;  %v11840_v42 = vpack.c.bf16 %v11819_v0, %v11818_v34 }
 0xd89   :  { %14017 = vmatprep.mubr.bf16.mxu0 %v11839_v62 }
 0xd8a   :  { %14018 = vmatmul.mubr.bf16.vlgmr.msra.gmra.mxu0 %v11840_v42 }
 0xd8b   :  { %14042 = vmatpush3.bf16.msra.mxu0 %v15702_v6 }
 0xd8c   :  { %14043 = vmatprep.subr.bf16.mxu0 %v15703_v18 }
 0xd8f   :  { %14044 = vmatpush3.bf16.msra.mxu0 %v15703_v18 }
 0xd90   :  { %14045 = vmatprep.subr.bf16.mxu0 %v15704_v22 }
 0xd93   :  { %14046 = vmatpush3.bf16.msra.mxu0 %v15704_v22  ;;  %v15710_v22 = vld [vmem:[%s16954_s4 + $0x38] sm:$0xff]  }
 0xd94   :  { %14047 = vmatprep.subr.bf16.mxu0 %v15705_v43  ;;  %14061 = vmatprep.subr.bf16.mxu1 %v15710_v22 }
 0xd97   :  { %14048 = vmatpush3.bf16.msra.mxu0 %v15705_v43  ;;  %v15711_v43 = vld [vmem:[%s16954_s4 + $0x30] sm:$0xff]  }
 0xd98   :  { %14049 = vmatprep.subr.bf16.mxu0 %v15706_v61 }
 0xd9b   :  { %14050 = vmatpush3.bf16.msra.mxu0 %v15706_v61  ;;  %v15712_v61 = vld [vmem:[%s16954_s4 + $0x28] sm:$0xff]  }
 0xd9c   :  { %14051 = vmatprep.subr.bf16.mxu0 %v15707_v51 }
 0xd9f   :  { %14052 = vmatpush3.bf16.msra.mxu0 %v15707_v51  ;;  %v15713_v51 = vld [vmem:[%s16954_s4 + $0x20] sm:$0xff]  }
 0xe4a   :  { %v14019_v39 = vpop.f32.mrf.mxu0 }
 0xe4b   :  { %v11938_v4 = vadd.f32 %v14019_v39, %v13627_v13  ;;  %v15708_v39 = vld [vmem:[#allocation57 + $0x8] sm:$0xff]  }
 0xe4c   :  { %v11929_v24 = vpop.f32.mrf.mxu0  ;;  %14053 = vmatprep.subr.bf16.mxu0 %v15708_v39 }
 0xe4d   :  { %v11930_v40 = vadd.f32 %v13627_v13, %v11929_v24  ;;  %v15709_v24 = vld [vmem:[#allocation57] sm:$0xff]   ;;  %14054 = vmatpush3.bf16.msra.mxu0 %v15708_v39  ;;  %v15714_v39 = vld [vmem:[%s16954_s4 + $0x18] sm:$0xff]  }
 0xe4e   :  { %v14020_v47 = vpop.f32.mrf.mxu0  ;;  %14055 = vmatprep.subr.bf16.mxu0 %v15709_v24 }
 0xe4f   :  { %v11941_v53 = vadd.f32 %v14020_v47, %v13627_v13 }
 0xe50   :  { %v11932_v25 = vpop.f32.mrf.mxu0 }
 0xe51   :  { %v11933_v33 = vadd.f32 %v13627_v13, %v11932_v25  ;;  %14056 = vmatpush3.bf16.msra.mxu0 %v15709_v24  ;;  %v15715_v24 = vld [vmem:[%s16954_s4 + $0x10] sm:$0xff]  }
 0xe53   :  { %v11944_v56 = vadd.f32 %v11933_v33, %v11930_v40 }
 0xe55   :  { %v11945_v19 = vadd.f32 %v11944_v56, %v11938_v4 }
 0xe57   :  { %v11946_v49 = vadd.f32 %v11945_v19, %v11941_v53 }
 0xe59   :  { %v11947_v27 = vrot.slane %v11946_v49, 4 }
 0xe5b   :  { %v11948_v57 = vadd.f32 %v11947_v27, %v11946_v49 }
 0xe5d   :  { %v11949_v2 = vrot.slane %v11948_v57, 2 }
 0xe5f   :  { %v11950_v30 = vadd.f32 %v11949_v2, %v11948_v57 }
 0xe61   :  { %v11951_v10 = vrot.slane %v11950_v30, 1 }
 0xe63   :  { %v11952_v23 = vadd.f32 %v11951_v10, %v11950_v30 }
 0xe65   :  { %v11953_v29 = vmul.f32 0.03125, %v11952_v23 }
 0xe67   :  { %v11954_v20 = vsub.f32 %v11930_v40, %v11953_v29  ;;  %v11955_v21 = vsub.f32 %v11933_v33, %v11953_v29  ;;  %v11956_v8 = vsub.f32 %v11938_v4, %v11953_v29  ;;  %v11957_v45 = vsub.f32 %v11941_v53, %v11953_v29  ;;  %v13637_v40 = vld [vmem:[#allocation52] ss:$0 sm:$0xff] }
 0xe69   :  { %v11958_v17 = vmul.f32 %v11954_v20, %v11954_v20  ;;  %v11959_v31 = vmul.f32 %v11955_v21, %v11955_v21  ;;  %v11960_v46 = vmul.f32 %v11956_v8, %v11956_v8  ;;  %v11961_v50 = vmul.f32 %v11957_v45, %v11957_v45 }
 0xe6b   :  { %v11962_v16 = vadd.f32 %v11959_v31, %v11958_v17 }
 0xe6d   :  { %v11963_v37 = vadd.f32 %v11962_v16, %v11960_v46 }
 0xe6f   :  { %v11964_v1 = vadd.f32 %v11963_v37, %v11961_v50 }
 0xe71   :  { %v11965_v60 = vrot.slane %v11964_v1, 4 }
 0xe73   :  { %v11966_v38 = vadd.f32 %v11965_v60, %v11964_v1 }
 0xe75   :  { %v11967_v5 = vrot.slane %v11966_v38, 2 }
 0xe77   :  { %v11968_v52 = vadd.f32 %v11967_v5, %v11966_v38 }
 0xe79   :  { %v11969_v7 = vrot.slane %v11968_v52, 1 }
 0xe7b   :  { %v11970_v54 = vadd.f32 %v11969_v7, %v11968_v52 }
 0xe7d   :  { %v11971_v15 = vmul.f32 0.03125, %v11970_v54 }
 0xe7f   :  { %v11972_v11 = vadd.f32 1e-05, %v11971_v15 }
 0xe81   :  { %15776 = vrsqrt.f32 %v11972_v11 }
 0xe8e   :  { %v15777_v9 = vpop.eup %15776 }
 0xe8f   :  { %v11974_v36 = vmul.f32 %v15777_v9, %v11837_v48 }
 0xe91   :  { %v11979_v44 = vrot.slane %v11974_v36, %v17076_v35  ;;  %v12016_v36 = vld [vmem:[#allocation54] sm:$0x1] }
 0xe93   :  { %v11982_v28 = vmul.f32 %v11979_v44, %v11955_v21  ;;  %v11983_v26 = vmul.f32 %v11979_v44, %v11956_v8  ;;  %v11981_v3 = vmul.f32 %v11979_v44, %v11954_v20  ;;  %v11984_v58 = vmul.f32 %v11979_v44, %v11957_v45 }
 0xe95   :  { %v11991_v63 = vadd.f32 %v13636_v12, %v11981_v3  ;;  %v11992_v55 = vadd.f32 %v13636_v12, %v11982_v28  ;;  %v11993_v14 = vadd.f32 %v13636_v12, %v11983_v26  ;;  %v11994_v59 = vadd.f32 %v13636_v12, %v11984_v58  ;;  %v13646_v26 = vld [vmem:[#allocation55] ss:$0 sm:$0xff] }
 0xe97   :  { %v11995_v34 = vmax.f32 %v11991_v63, 0.0  ;;  %v11996_v0 = vmax.f32 %v11992_v55, 0.0  ;;  %v11997_v62 = vmax.f32 %v11993_v14, 0.0  ;;  %v11998_v42 = vmax.f32 %v11994_v59, 0.0 }
 0xe99   :  { %v12018_v32 = vpack.c.bf16 %v11996_v0, %v11995_v34  ;;  %v12019_v41 = vpack.c.bf16 %v11998_v42, %v11997_v62 }
 0xe9b   :  { %14037 = vmatprep.mubr.bf16.mxu1 %v12018_v32 }
 0xe9c   :  { %14038 = vmatmul.mubr.bf16.vlgmr.msra.gmra.mxu1 %v12019_v41 }
 0xe9d   :  { %14062 = vmatpush3.bf16.msra.mxu1 %v15710_v22 }
 0xe9e   :  { %14063 = vmatprep.subr.bf16.mxu1 %v15711_v43 }
 0xea1   :  { %14064 = vmatpush3.bf16.msra.mxu1 %v15711_v43 }
 0xea2   :  { %14065 = vmatprep.subr.bf16.mxu1 %v15712_v61 }
 0xea5   :  { %14066 = vmatpush3.bf16.msra.mxu1 %v15712_v61 }
 0xea6   :  { %14067 = vmatprep.subr.bf16.mxu1 %v15713_v51 }
 0xea9   :  { %14068 = vmatpush3.bf16.msra.mxu1 %v15713_v51 }
 0xeaa   :  { %14069 = vmatprep.subr.bf16.mxu1 %v15714_v39 }
 0xead   :  { %14070 = vmatpush3.bf16.msra.mxu1 %v15714_v39 }
 0xeae   :  { %14071 = vmatprep.subr.bf16.mxu1 %v15715_v24 }
 0xeb1   :  { %14072 = vmatpush3.bf16.msra.mxu1 %v15715_v24 }
 0xf5c   :  { %v14039_v47 = vpop.f32.mrf.mxu1 }
 0xf5d   :  { %v12117_v53 = vadd.f32 %v14039_v47, %v13637_v40  ;;  %v15716_v47 = vld [vmem:[%s16954_s4 + $0x8] sm:$0xff]  }
 0xf5e   :  { %v12108_v13 = vpop.f32.mrf.mxu1  ;;  %14073 = vmatprep.subr.bf16.mxu1 %v15716_v47 }
 0xf5f   :  { %v12109_v4 = vadd.f32 %v13637_v40, %v12108_v13  ;;  %v15717_v13 = vld [vmem:[%s16954_s4] sm:$0xff]   ;;  %14074 = vmatpush3.bf16.msra.mxu1 %v15716_v47 }
 0xf60   :  { %v14040_v25 = vpop.f32.mrf.mxu1  ;;  %14075 = vmatprep.subr.bf16.mxu1 %v15717_v13 }
 0xf61   :  { %v12120_v49 = vadd.f32 %v14040_v25, %v13637_v40 }
 0xf62   :  { %v12111_v33 = vpop.f32.mrf.mxu1 }
 0xf63   :  { %v12112_v56 = vadd.f32 %v13637_v40, %v12111_v33  ;;  %14076 = vmatpush3.bf16.msra.mxu1 %v15717_v13 }
 0xf65   :  { %v12123_v19 = vadd.f32 %v12112_v56, %v12109_v4 }
 0xf67   :  { %v12124_v27 = vadd.f32 %v12123_v19, %v12117_v53 }
 0xf69   :  { %v12125_v57 = vadd.f32 %v12124_v27, %v12120_v49 }
 0xf6b   :  { %v12126_v2 = vrot.slane %v12125_v57, 4 }
 0xf6d   :  { %v12127_v30 = vadd.f32 %v12126_v2, %v12125_v57 }
 0xf6f   :  { %v12128_v10 = vrot.slane %v12127_v30, 2 }
 0xf71   :  { %v12129_v23 = vadd.f32 %v12128_v10, %v12127_v30 }
 0xf73   :  { %v12130_v29 = vrot.slane %v12129_v23, 1 }
 0xf75   :  { %v12131_v20 = vadd.f32 %v12130_v29, %v12129_v23 }
 0xf77   :  { %v12132_v21 = vmul.f32 0.03125, %v12131_v20 }
 0xf79   :  { %v12133_v8 = vsub.f32 %v12109_v4, %v12132_v21  ;;  %v12134_v45 = vsub.f32 %v12112_v56, %v12132_v21  ;;  %v12135_v17 = vsub.f32 %v12117_v53, %v12132_v21  ;;  %v12136_v31 = vsub.f32 %v12120_v49, %v12132_v21  ;;  %v13647_v4 = vld [vmem:[#allocation58] ss:$0 sm:$0xff] }
 0xf7b   :  { %v12137_v46 = vmul.f32 %v12133_v8, %v12133_v8  ;;  %v12138_v16 = vmul.f32 %v12134_v45, %v12134_v45  ;;  %v12139_v50 = vmul.f32 %v12135_v17, %v12135_v17  ;;  %v12140_v1 = vmul.f32 %v12136_v31, %v12136_v31 }
 0xf7d   :  { %v12141_v37 = vadd.f32 %v12138_v16, %v12137_v46 }
 0xf7f   :  { %v12142_v60 = vadd.f32 %v12141_v37, %v12139_v50 }
 0xf81   :  { %v12143_v38 = vadd.f32 %v12142_v60, %v12140_v1 }
 0xf83   :  { %v12144_v5 = vrot.slane %v12143_v38, 4 }
 0xf85   :  { %v12145_v52 = vadd.f32 %v12144_v5, %v12143_v38 }
 0xf87   :  { %v12146_v7 = vrot.slane %v12145_v52, 2 }
 0xf89   :  { %v12147_v54 = vadd.f32 %v12146_v7, %v12145_v52 }
 0xf8b   :  { %v12148_v15 = vrot.slane %v12147_v54, 1 }
 0xf8d   :  { %v12149_v11 = vadd.f32 %v12148_v15, %v12147_v54 }
 0xf8f   :  { %v12150_v48 = vmul.f32 0.03125, %v12149_v11 }
 0xf91   :  { %v12151_v9 = vadd.f32 1e-05, %v12150_v48 }
 0xf93   :  { %15778 = vrsqrt.f32 %v12151_v9 }
 0xfa0   :  { %v15779_v44 = vpop.eup %15778 }
 0xfa1   :  { %v12153_v12 = vmul.f32 %v15779_v44, %v12016_v36 }
 0xfa3   :  { %v12158_v28 = vrot.slane %v12153_v12, %v17076_v35  ;;  %v12195_v12 = vld [vmem:[#allocation60] sm:$0x1] }
 0xfa5   :  { %v12161_v3 = vmul.f32 %v12158_v28, %v12134_v45  ;;  %v12162_v58 = vmul.f32 %v12158_v28, %v12135_v17  ;;  %v12160_v63 = vmul.f32 %v12158_v28, %v12133_v8  ;;  %v12163_v55 = vmul.f32 %v12158_v28, %v12136_v31 }
 0xfa7   :  { %v12170_v14 = vadd.f32 %v13646_v26, %v12160_v63  ;;  %v12171_v59 = vadd.f32 %v13646_v26, %v12161_v3  ;;  %v12172_v34 = vadd.f32 %v13646_v26, %v12162_v58  ;;  %v12173_v0 = vadd.f32 %v13646_v26, %v12163_v55  ;;  %v13656_v58 = vld [vmem:[#allocation61] ss:$0 sm:$0xff] }
 0xfa9   :  { %v12174_v62 = vmax.f32 %v12170_v14, 0.0  ;;  %v12175_v42 = vmax.f32 %v12171_v59, 0.0  ;;  %v12176_v32 = vmax.f32 %v12172_v34, 0.0  ;;  %v12177_v41 = vmax.f32 %v12173_v0, 0.0 }
 0xfab   :  { %v12197_v6 = vpack.c.bf16 %v12175_v42, %v12174_v62  ;;  %v12198_v18 = vpack.c.bf16 %v12177_v41, %v12176_v32 }
 0xfad   :  { %14057 = vmatprep.mubr.bf16.mxu0 %v12197_v6 }
 0xfae   :  { %14058 = vmatmul.mubr.bf16.vlgmr.msra.gmra.mxu0 %v12198_v18 }
0x106e   :  { %v14059_v25 = vpop.f32.mrf.mxu0 }
0x106f   :  { %v12296_v49 = vadd.f32 %v14059_v25, %v13647_v4 }
0x1070   :  { %v12287_v40 = vpop.f32.mrf.mxu0 }
0x1071   :  { %v12288_v53 = vadd.f32 %v13647_v4, %v12287_v40 }
0x1072   :  { %v14060_v33 = vpop.f32.mrf.mxu0 }
0x1073   :  { %v12299_v57 = vadd.f32 %v14060_v33, %v13647_v4 }
0x1074   :  { %v12290_v56 = vpop.f32.mrf.mxu0 }
0x1075   :  { %v12291_v19 = vadd.f32 %v13647_v4, %v12290_v56 }
0x1077   :  { %v12302_v27 = vadd.f32 %v12291_v19, %v12288_v53 }
0x1079   :  { %v12303_v2 = vadd.f32 %v12302_v27, %v12296_v49 }
0x107b   :  { %v12304_v30 = vadd.f32 %v12303_v2, %v12299_v57 }
0x107d   :  { %v12305_v10 = vrot.slane %v12304_v30, 4 }
0x107f   :  { %v12306_v23 = vadd.f32 %v12305_v10, %v12304_v30 }
0x1081   :  { %v12307_v29 = vrot.slane %v12306_v23, 2 }
0x1083   :  { %v12308_v20 = vadd.f32 %v12307_v29, %v12306_v23 }
0x1085   :  { %v12309_v21 = vrot.slane %v12308_v20, 1 }
0x1087   :  { %v12310_v8 = vadd.f32 %v12309_v21, %v12308_v20 }
0x1089   :  { %v12311_v45 = vmul.f32 0.03125, %v12310_v8 }
0x108b   :  { %v12312_v17 = vsub.f32 %v12288_v53, %v12311_v45  ;;  %v12313_v31 = vsub.f32 %v12291_v19, %v12311_v45  ;;  %v12314_v46 = vsub.f32 %v12296_v49, %v12311_v45  ;;  %v12315_v16 = vsub.f32 %v12299_v57, %v12311_v45 }
0x108d   :  { %v12316_v50 = vmul.f32 %v12312_v17, %v12312_v17  ;;  %v12317_v37 = vmul.f32 %v12313_v31, %v12313_v31  ;;  %v12318_v1 = vmul.f32 %v12314_v46, %v12314_v46  ;;  %v12319_v38 = vmul.f32 %v12315_v16, %v12315_v16 }
0x108f   :  { %v12320_v60 = vadd.f32 %v12317_v37, %v12316_v50 }
0x1091   :  { %v12321_v5 = vadd.f32 %v12320_v60, %v12318_v1 }
0x1093   :  { %v12322_v52 = vadd.f32 %v12321_v5, %v12319_v38 }
0x1095   :  { %v12323_v7 = vrot.slane %v12322_v52, 4 }
0x1097   :  { %v12324_v54 = vadd.f32 %v12323_v7, %v12322_v52 }
0x1099   :  { %v12325_v15 = vrot.slane %v12324_v54, 2 }
0x109b   :  { %v12326_v11 = vadd.f32 %v12325_v15, %v12324_v54 }
0x109d   :  { %v12327_v48 = vrot.slane %v12326_v11, 1 }
0x109f   :  { %v12328_v9 = vadd.f32 %v12327_v48, %v12326_v11 }
0x10a1   :  { %v12329_v36 = vmul.f32 0.03125, %v12328_v9 }
0x10a3   :  { %v12330_v44 = vadd.f32 1e-05, %v12329_v36 }
0x10a5   :  { %15780 = vrsqrt.f32 %v12330_v44 }
0x10b2   :  { %v15781_v28 = vpop.eup %15780 }
0x10b3   :  { %v12332_v26 = vmul.f32 %v15781_v28, %v12195_v12 }
0x10b5   :  { %v12337_v3 = vrot.slane %v12332_v26, %v17076_v35  ;;  %v13657_v35 = vld [vmem:[#allocation63] ss:$0 sm:$0xff] }
0x10b7   :  { %v12340_v63 = vmul.f32 %v12337_v3, %v12313_v31  ;;  %v12341_v55 = vmul.f32 %v12337_v3, %v12314_v46  ;;  %v12339_v14 = vmul.f32 %v12337_v3, %v12312_v17  ;;  %v12342_v59 = vmul.f32 %v12337_v3, %v12315_v16 }
0x10b9   :  { %v12349_v34 = vadd.f32 %v13656_v58, %v12339_v14  ;;  %v12350_v0 = vadd.f32 %v13656_v58, %v12340_v63  ;;  %v12351_v62 = vadd.f32 %v13656_v58, %v12341_v55  ;;  %v12352_v42 = vadd.f32 %v13656_v58, %v12342_v59 }
0x10bb   :  { %v12353_v32 = vmax.f32 %v12349_v34, 0.0  ;;  %v12354_v41 = vmax.f32 %v12350_v0, 0.0  ;;  %v12355_v6 = vmax.f32 %v12351_v62, 0.0  ;;  %v12356_v18 = vmax.f32 %v12352_v42, 0.0 }
0x10bd   :  { %v12374_v22 = vpack.c.bf16 %v12354_v41, %v12353_v32  ;;  %v12375_v43 = vpack.c.bf16 %v12356_v18, %v12355_v6 }
0x10bf   :  { %14077 = vmatprep.mubr.bf16.mxu1 %v12374_v22 }
0x10c0   :  { %14078 = vmatmul.mubr.bf16.vlgmr.msra.gmra.mxu1 %v12375_v43 }
0x1180   :  { %v14079_v61 = vpop.f32.mrf.mxu1 }
0x1181   :  { %v12473_v51 = vadd.f32 %v14079_v61, %v13657_v35 }
0x1182   :  { %v12464_v39 = vpop.f32.mrf.mxu1 }
0x1183   :  { %12482 = vst.msk [vmem:[%s16964_s20 + $0x10] sm:$0xff] %vm12479_vm2, %v12473_v51  ;;  %v12465_v24 = vadd.f32 %v13657_v35, %v12464_v39 }
0x1184   :  { %v14080_v47 = vpop.f32.mrf.mxu1 }
0x1185   :  { %12480 = vst.msk [vmem:[%s16964_s20] sm:$0xff] %vm12479_vm2, %v12465_v24  ;;  %v12476_v13 = vadd.f32 %v14080_v47, %v13657_v35 }
0x1186   :  { %v12467_v25 = vpop.f32.mrf.mxu1 }
0x1187   :  { %12483 = vst.msk [vmem:[%s16964_s20 + $0x18] sm:$0xff] %vm12479_vm2, %v12476_v13  ;;  %v12468_v40 = vadd.f32 %v13657_v35, %v12467_v25 }
0x1189   :  { %12481 = vst.msk [vmem:[%s16964_s20 + $0x8] sm:$0xff] %vm12479_vm2, %v12468_v40 }
0x118a   :  { %12488 = vsyncpa [#allocation3], 1 }
0x118b   :  { %12489 = vsyncpa [#allocation5], 1 }
0x118c   :  { %12490 = vsyncpa [#allocation8], 1 }
0x118d   :  { %12491 = vsyncpa [#allocation11], 1 }
0x118e   :  { %12492 = vsyncpa [#allocation14], 1 }
0x118f   :  { %12493 = vsyncpa [#allocation17], 1 }
0x1190   :  { %12494 = vsyncpa [#allocation20], 1 }
0x1191   :  { %12495 = vsyncpa [#allocation23], 1 }
0x1192   :  { %12496 = vsyncpa [#allocation26], 1 }
0x1193   :  { %12497 = vsyncpa [#allocation29], 1 }
0x1194   :  { %12498 = vsyncpa [#allocation32], 1 }
0x1195   :  { %12499 = vsyncpa [#allocation35], 1 }
0x1196   :  { %12500 = vsyncpa [#allocation38], 1 }
0x1197   :  { %12501 = vsyncpa [#allocation41], 1 }
0x1198   :  { %12502 = vsyncpa [#allocation44], 1 }
0x1199   :  { %12503 = vsyncpa [#allocation47], 1 }
0x119a   :  { %12504 = vsyncpa [#allocation50], 1 }
0x119b   :  { %12505 = vsyncpa [#allocation53], 1 }
0x119c   :  { %12506 = vsyncpa [#allocation56], 1 }
0x119d   :  { %12507 = vsyncpa [#allocation59], 1 }
0x119e   :  { %12508 = vsyncpa [#allocation62], 1 }

</bundles_post_ra>
